<compile_context>
chip_gen: v7x
topology: tpu7x:2x2x1
jax: 0.10.0
libtpu: 0.0.40
codegen_flags: <defaults>
</compile_context>

<pallas_src>
import jax
import jax.numpy as jnp
import numpy as np
from jax.experimental import pallas as pl
from jax.experimental.pallas import tpu as pltpu

BN_EPS = 1e-5
CIN_PAD = 8  # pad the single input channel to 8 lanes


# ------------------------------- fused kernel --------------------------------
def medium_cnn_kernel(
    x_ref,
    w1a_ref, b1a_ref, w1b_ref, b1b_ref,
    w2a_ref, b2a_ref, w2b_ref, b2b_ref,
    w3a_ref, b3a_ref, w3b_ref, b3b_ref,
    fc1w_ref, fc1b_ref, fc2w_ref, fc2b_ref,
    out_ref,
):
    B, L, _ = x_ref.shape  # (B, 160, CIN_PAD)

    def shift_down(x3, d):  # y[:, r, :] = x[:, r - d, :]   (zeros shifted in)
        Bx, Lx, C = x3.shape
        pad = jnp.zeros((Bx, d, C), jnp.float32)
        return jnp.concatenate([pad, x3[:, :Lx - d, :]], axis=1)

    def shift_up(x3, d):    # y[:, r, :] = x[:, r + d, :]   (zeros shifted in)
        Bx, Lx, C = x3.shape
        pad = jnp.zeros((Bx, d, C), jnp.float32)
        return jnp.concatenate([x3[:, d:, :], pad], axis=1)

    def conv_bn_relu(x3, w_ref, b_ref, d):
        """Conv1d(k=3, 'same') + folded BN + ReLU with valid rows spaced d apart.

        The conv only mixes rows of equal residue mod d, so rows that are not
        multiples of d carry harmless garbage and never contaminate valid rows.
        """
        Bx, Lx, Cin = x3.shape
        Cout = b_ref.shape[-1]

        def tap(a3, k):
            return jnp.dot(a3.reshape(Bx * Lx, Cin), w_ref[k],
                           preferred_element_type=jnp.float32)

        y = tap(shift_down(x3, d), 0) + tap(x3, 1) + tap(shift_up(x3, d), 2)
        y = jnp.maximum(y + b_ref[...], 0.0)
        return y.reshape(Bx, Lx, Cout)

    def max_pool2(x3, d):
        # MaxPool1d(kernel=2, stride=2) over rows spaced d apart: pooled value for
        # logical position p lands on row 2*p*d; no compaction / strided gather.
        return jnp.maximum(x3, shift_up(x3, d))

    x = x_ref[...].astype(jnp.float32)            # (B, 160, 8)
    # Block 1: channels 1(->8 padded) -> 8 -> 8, valid row spacing 1 -> 2
    x = conv_bn_relu(x, w1a_ref, b1a_ref, 1)
    x = conv_bn_relu(x, w1b_ref, b1b_ref, 1)
    x = max_pool2(x, 1)
    # Block 2: channels 8 -> 16 -> 16, spacing 2 -> 4
    x = conv_bn_relu(x, w2a_ref, b2a_ref, 2)
    x = conv_bn_relu(x, w2b_ref, b2b_ref, 2)
    x = max_pool2(x, 2)
    # Block 3: channels 16 -> 32 -> 32, spacing 4 -> 8
    x = conv_bn_relu(x, w3a_ref, b3a_ref, 4)
    x = conv_bn_relu(x, w3b_ref, b3b_ref, 4)
    x = max_pool2(x, 4)

    C3 = x.shape[-1]                              # 32
    y2 = x.reshape(B * L, C3)                     # valid rows: b*L + 8*n, n = 0..L//8-1

    # fc1: flatten(32 x 20) @ (640, 64), expressed as 20 per-position (B,32)@(32,64)
    # matmuls so the PyTorch channel-major flatten never needs a lane/sublane reshape.
    n_pos = L // 8                                # 20
    acc = jnp.zeros((B, fc1b_ref.shape[-1]), jnp.float32)
    for n in range(n_pos):
        rows = [y2[b * L + 8 * n: b * L + 8 * n + 1, :] for b in range(B)]
        x_n = jnp.concatenate(rows, axis=0) if B > 1 else rows[0]       # (B, 32)
        acc = acc + jnp.dot(x_n, fc1w_ref[n], preferred_element_type=jnp.float32)
    h = jnp.maximum(acc + fc1b_ref[...], 0.0)                           # (B, 64)
    # Dropout1d(p=0.2): identity at inference time.

    out = jnp.dot(h, fc2w_ref[...], preferred_element_type=jnp.float32) + fc2b_ref[...]
    out_ref[...] = jnp.maximum(out, 0.0).astype(out_ref.dtype)          # (B, 8)


# --------------------------------- wrapper ------------------------------------
def medium_cnn_forward(x_ncl, kp):
    """x_ncl: (B, 1, L) like the PyTorch module (batch, channels, length)."""
    B, _, L = x_ncl.shape
    # Channels-last; Cin == 1 so this reshape is a pure relabeling, then zero-pad to
    # CIN_PAD lanes (matching the zero-padded first-conv weight).
    x_k = jnp.pad(x_ncl.reshape(B, L, 1), ((0, 0), (0, 0), (0, CIN_PAD - 1)))

    args = (
        x_k,
        kp["w1a"], kp["b1a"], kp["w1b"], kp["b1b"],
        kp["w2a"], kp["b2a"], kp["w2b"], kp["b2b"],
        kp["w3a"], kp["b3a"], kp["w3b"], kp["b3b"],
        kp["fc1w"], kp["fc1b"], kp["fc2w"], kp["fc2b"],
    )
    return pl.pallas_call(
        medium_cnn_kernel,
        out_shape=jax.ShapeDtypeStruct((B, kp["fc2b"].shape[-1]), jnp.float32),
        in_specs=[pl.BlockSpec(memory_space=pltpu.MemorySpace.VMEM) for _ in args],
        out_specs=pl.BlockSpec(memory_space=pltpu.MemorySpace.VMEM),
    )(*args)


# ------------------------------ parameter setup --------------------------------
def init_raw_params(key):
    """PyTorch-layout parameters: conv (Cout,Cin,3)+bias, BN stats, fc (out,in)+bias."""
    conv_cfg = [(1, 8), (8, 8), (8, 16), (16, 16), (16, 32), (32, 32)]
    raw = {"convs": []}
    for cin, cout in conv_cfg:
        key, kw, kb, kg, kbe, km, kv = jax.random.split(key, 7)
        bound = 1.0 / np.sqrt(cin * 3)
        raw["convs"].append({
            "w": jax.random.uniform(kw, (cout, cin, 3), jnp.float32, -bound, bound),
            "b": jax.random.uniform(kb, (cout,), jnp.float32, -bound, bound),
            "gamma": jax.random.uniform(kg, (cout,), jnp.float32, 0.5, 1.5),
            "beta": jax.random.uniform(kbe, (cout,), jnp.float32, -0.3, 0.3),
            "mean": 0.1 * jax.random.normal(km, (cout,), jnp.float32),
            "var": jax.random.uniform(kv, (cout,), jnp.float32, 0.5, 1.5),
        })
    key, k1, k2, k3, k4 = jax.random.split(key, 5)
    b1 = 1.0 / np.sqrt(640.0)
    b2 = 1.0 / np.sqrt(64.0)
    raw["fc1_w"] = jax.random.uniform(k1, (64, 640), jnp.float32, -b1, b1)
    raw["fc1_b"] = jax.random.uniform(k2, (64,), jnp.float32, -b1, b1)
    raw["fc2_w"] = jax.random.uniform(k3, (8, 64), jnp.float32, -b2, b2)
    raw["fc2_b"] = jax.random.uniform(k4, (8,), jnp.float32, -b2, b2)
    return raw


def fold_params(raw):
    """Fold eval-mode BatchNorm into conv weights/bias and permute for the kernel."""
    names = ["1a", "1b", "2a", "2b", "3a", "3b"]
    kp = {}
    for name, c in zip(names, raw["convs"]):
        scale = c["gamma"] / jnp.sqrt(c["var"] + BN_EPS)            # (Cout,)
        w_fold = c["w"] * scale[:, None, None]                      # (Cout, Cin, 3)
        b_fold = (c["b"] - c["mean"]) * scale + c["beta"]           # (Cout,)
        kp["w" + name] = jnp.transpose(w_fold, (2, 1, 0))           # (3, Cin, Cout)
        kp["b" + name] = b_fold.reshape(1, -1)
    # First conv: pad Cin 1 -> CIN_PAD with zero rows (matches zero-padded input).
    kp["w1a"] = jnp.pad(kp["w1a"], ((0, 0), (0, CIN_PAD - 1), (0, 0)))
    # fc1: PyTorch flattens (B, C=32, L=20) channel-major (index c*20 + l); permute the
    # weight to (position l, channel c, out) so the kernel contracts per position.
    kp["fc1w"] = jnp.transpose(raw["fc1_w"].reshape(64, 32, 20), (2, 1, 0))  # (20,32,64)
    kp["fc1b"] = raw["fc1_b"].reshape(1, -1)
    kp["fc2w"] = raw["fc2_w"].T                                     # (64, 8)
    kp["fc2b"] = raw["fc2_b"].reshape(1, -1)
    return kp


# ------------------------------ pure-JAX reference ------------------------------
def reference_forward(x_ncl, raw):
    """XLA mirror of PyTorch MediumCNN.forward (eval mode), NCL layout."""
    def conv_block(x, convs):
        for c in convs:
            y = jax.lax.conv_general_dilated(
                x, c["w"], window_strides=(1,), padding="SAME",
                dimension_numbers=("NCH", "OIH", "NCH"))
            y = y + c["b"][None, :, None]
            scale = c["gamma"] / jnp.sqrt(c["var"] + BN_EPS)
            y = (y - c["mean"][None, :, None]) * scale[None, :, None] + c["beta"][None, :, None]
            x = jnp.maximum(y, 0.0)
        Bx, C, Lx = x.shape
        return jnp.max(x.reshape(Bx, C, Lx // 2, 2), axis=-1)       # MaxPool1d(2, 2)

    x = conv_block(x_ncl, raw["convs"][0:2])
    x = conv_block(x, raw["convs"][2:4])
    x = conv_block(x, raw["convs"][4:6])
    flat = x.reshape(x.shape[0], -1)                                # channel-major flatten
    h = jnp.maximum(flat @ raw["fc1_w"].T + raw["fc1_b"], 0.0)
    # Dropout1d(0.2): identity in eval mode.
    return jnp.maximum(h @ raw["fc2_w"].T + raw["fc2_b"], 0.0)


# ----------------------------------- main ---------------------------------------
if __name__ == "__main__":
    # Linear(16*40 = 640) after three /2 pools of a 32-channel map => input length 160.
    B, L = 2, 160
    key = jax.random.PRNGKey(0)
    key, xkey = jax.random.split(key)
    x = jax.random.normal(xkey, (B, 1, L), jnp.float32)

    raw = init_raw_params(key)
    kp = fold_params(raw)

    out = jax.jit(medium_cnn_forward)(x, kp)
    out = jax.block_until_ready(out)

    ref = reference_forward(x, raw)
    np.testing.assert_allclose(np.asarray(out), np.asarray(ref), rtol=1e-4, atol=1e-4)

    print("KERNEL_OK")
</pallas_src>

<mosaic_0001>
module attributes {stable_mosaic.version = 11 : i64} {
  func.func @medium_cnn_kernel(%arg0: memref<2x160x8xf32, #tpu.memory_space<vmem>>, %arg1: memref<3x8x8xf32, #tpu.memory_space<vmem>>, %arg2: memref<1x8xf32, #tpu.memory_space<vmem>>, %arg3: memref<3x8x8xf32, #tpu.memory_space<vmem>>, %arg4: memref<1x8xf32, #tpu.memory_space<vmem>>, %arg5: memref<3x8x16xf32, #tpu.memory_space<vmem>>, %arg6: memref<1x16xf32, #tpu.memory_space<vmem>>, %arg7: memref<3x16x16xf32, #tpu.memory_space<vmem>>, %arg8: memref<1x16xf32, #tpu.memory_space<vmem>>, %arg9: memref<3x16x32xf32, #tpu.memory_space<vmem>>, %arg10: memref<1x32xf32, #tpu.memory_space<vmem>>, %arg11: memref<3x32x32xf32, #tpu.memory_space<vmem>>, %arg12: memref<1x32xf32, #tpu.memory_space<vmem>>, %arg13: memref<20x32x64xf32, #tpu.memory_space<vmem>>, %arg14: memref<1x64xf32, #tpu.memory_space<vmem>>, %arg15: memref<64x8xf32, #tpu.memory_space<vmem>>, %arg16: memref<1x8xf32, #tpu.memory_space<vmem>>, %arg17: memref<2x8xf32, #tpu.memory_space<vmem>>) attributes {dimension_semantics = [], scalar_prefetch = 0 : i64, scratch_operands = 0 : i64, tpu.core_type = #tpu.core_type<tc>} {
    %c0 = arith.constant 0 : index
    %c0_0 = arith.constant 0 : index
    %c0_1 = arith.constant 0 : index
    %0 = vector.load %arg0[%c0, %c0_0, %c0_1] : memref<2x160x8xf32, #tpu.memory_space<vmem>>, vector<2x160x8xf32>
    %cst = arith.constant 0.000000e+00 : f32
    %1 = vector.broadcast %cst : f32 to vector<2x1x8xf32>
    %2 = vector.extract_strided_slice %0 {offsets = [0, 0, 0], sizes = [2, 159, 8], strides = [1, 1, 1]} : vector<2x160x8xf32> to vector<2x159x8xf32>
    %3 = tpu.concatenate %1, %2 in 1 : vector<2x1x8xf32>, vector<2x159x8xf32> -> vector<2x160x8xf32>
    %4 = vector.shape_cast %3 : vector<2x160x8xf32> to vector<320x8xf32>
    %c0_2 = arith.constant 0 : index
    %c0_3 = arith.constant 0 : index
    %c0_4 = arith.constant 0 : index
    %5 = vector.load %arg1[%c0_2, %c0_3, %c0_4] : memref<3x8x8xf32, #tpu.memory_space<vmem>>, vector<1x8x8xf32>
    %6 = vector.shape_cast %5 : vector<1x8x8xf32> to vector<8x8xf32>
    %cst_5 = arith.constant dense<0.000000e+00> : vector<320x8xf32>
    %7 = tpu.matmul %4, %6, %cst_5 {dimension_numbers = #tpu.dot_dimension_numbers<[1], [0], [0], [1], [0, 0, 1, 1], [], []>} : vector<320x8xf32>, vector<8x8xf32>, vector<320x8xf32> -> vector<320x8xf32>
    %8 = vector.shape_cast %0 : vector<2x160x8xf32> to vector<320x8xf32>
    %c1 = arith.constant 1 : index
    %c0_6 = arith.constant 0 : index
    %c0_7 = arith.constant 0 : index
    %9 = vector.load %arg1[%c1, %c0_6, %c0_7] : memref<3x8x8xf32, #tpu.memory_space<vmem>>, vector<1x8x8xf32>
    %10 = vector.shape_cast %9 : vector<1x8x8xf32> to vector<8x8xf32>
    %cst_8 = arith.constant dense<0.000000e+00> : vector<320x8xf32>
    %11 = tpu.matmul %8, %10, %cst_8 {dimension_numbers = #tpu.dot_dimension_numbers<[1], [0], [0], [1], [0, 0, 1, 1], [], []>} : vector<320x8xf32>, vector<8x8xf32>, vector<320x8xf32> -> vector<320x8xf32>
    %12 = arith.addf %7, %11 : vector<320x8xf32>
    %cst_9 = arith.constant 0.000000e+00 : f32
    %13 = vector.broadcast %cst_9 : f32 to vector<2x1x8xf32>
    %14 = vector.extract_strided_slice %0 {offsets = [0, 1, 0], sizes = [2, 159, 8], strides = [1, 1, 1]} : vector<2x160x8xf32> to vector<2x159x8xf32>
    %15 = tpu.concatenate %14, %13 in 1 : vector<2x159x8xf32>, vector<2x1x8xf32> -> vector<2x160x8xf32>
    %16 = vector.shape_cast %15 : vector<2x160x8xf32> to vector<320x8xf32>
    %c2 = arith.constant 2 : index
    %c0_10 = arith.constant 0 : index
    %c0_11 = arith.constant 0 : index
    %17 = vector.load %arg1[%c2, %c0_10, %c0_11] : memref<3x8x8xf32, #tpu.memory_space<vmem>>, vector<1x8x8xf32>
    %18 = vector.shape_cast %17 : vector<1x8x8xf32> to vector<8x8xf32>
    %cst_12 = arith.constant dense<0.000000e+00> : vector<320x8xf32>
    %19 = tpu.matmul %16, %18, %cst_12 {dimension_numbers = #tpu.dot_dimension_numbers<[1], [0], [0], [1], [0, 0, 1, 1], [], []>} : vector<320x8xf32>, vector<8x8xf32>, vector<320x8xf32> -> vector<320x8xf32>
    %20 = arith.addf %12, %19 : vector<320x8xf32>
    %c0_13 = arith.constant 0 : index
    %c0_14 = arith.constant 0 : index
    %21 = vector.load %arg2[%c0_13, %c0_14] : memref<1x8xf32, #tpu.memory_space<vmem>>, vector<1x8xf32>
    %22 = vector.broadcast %21 : vector<1x8xf32> to vector<320x8xf32>
    %23 = arith.addf %20, %22 : vector<320x8xf32>
    %cst_15 = arith.constant 0.000000e+00 : f32
    %24 = vector.broadcast %cst_15 : f32 to vector<320x8xf32>
    %25 = arith.maximumf %23, %24 : vector<320x8xf32>
    %26 = vector.shape_cast %25 : vector<320x8xf32> to vector<2x160x8xf32>
    %cst_16 = arith.constant 0.000000e+00 : f32
    %27 = vector.broadcast %cst_16 : f32 to vector<2x1x8xf32>
    %28 = vector.extract_strided_slice %26 {offsets = [0, 0, 0], sizes = [2, 159, 8], strides = [1, 1, 1]} : vector<2x160x8xf32> to vector<2x159x8xf32>
    %29 = tpu.concatenate %27, %28 in 1 : vector<2x1x8xf32>, vector<2x159x8xf32> -> vector<2x160x8xf32>
    %30 = vector.shape_cast %29 : vector<2x160x8xf32> to vector<320x8xf32>
    %c0_17 = arith.constant 0 : index
    %c0_18 = arith.constant 0 : index
    %c0_19 = arith.constant 0 : index
    %31 = vector.load %arg3[%c0_17, %c0_18, %c0_19] : memref<3x8x8xf32, #tpu.memory_space<vmem>>, vector<1x8x8xf32>
    %32 = vector.shape_cast %31 : vector<1x8x8xf32> to vector<8x8xf32>
    %cst_20 = arith.constant dense<0.000000e+00> : vector<320x8xf32>
    %33 = tpu.matmul %30, %32, %cst_20 {dimension_numbers = #tpu.dot_dimension_numbers<[1], [0], [0], [1], [0, 0, 1, 1], [], []>} : vector<320x8xf32>, vector<8x8xf32>, vector<320x8xf32> -> vector<320x8xf32>
    %34 = vector.shape_cast %26 : vector<2x160x8xf32> to vector<320x8xf32>
    %c1_21 = arith.constant 1 : index
    %c0_22 = arith.constant 0 : index
    %c0_23 = arith.constant 0 : index
    %35 = vector.load %arg3[%c1_21, %c0_22, %c0_23] : memref<3x8x8xf32, #tpu.memory_space<vmem>>, vector<1x8x8xf32>
    %36 = vector.shape_cast %35 : vector<1x8x8xf32> to vector<8x8xf32>
    %cst_24 = arith.constant dense<0.000000e+00> : vector<320x8xf32>
    %37 = tpu.matmul %34, %36, %cst_24 {dimension_numbers = #tpu.dot_dimension_numbers<[1], [0], [0], [1], [0, 0, 1, 1], [], []>} : vector<320x8xf32>, vector<8x8xf32>, vector<320x8xf32> -> vector<320x8xf32>
    %38 = arith.addf %33, %37 : vector<320x8xf32>
    %cst_25 = arith.constant 0.000000e+00 : f32
    %39 = vector.broadcast %cst_25 : f32 to vector<2x1x8xf32>
    %40 = vector.extract_strided_slice %26 {offsets = [0, 1, 0], sizes = [2, 159, 8], strides = [1, 1, 1]} : vector<2x160x8xf32> to vector<2x159x8xf32>
    %41 = tpu.concatenate %40, %39 in 1 : vector<2x159x8xf32>, vector<2x1x8xf32> -> vector<2x160x8xf32>
    %42 = vector.shape_cast %41 : vector<2x160x8xf32> to vector<320x8xf32>
    %c2_26 = arith.constant 2 : index
    %c0_27 = arith.constant 0 : index
    %c0_28 = arith.constant 0 : index
    %43 = vector.load %arg3[%c2_26, %c0_27, %c0_28] : memref<3x8x8xf32, #tpu.memory_space<vmem>>, vector<1x8x8xf32>
    %44 = vector.shape_cast %43 : vector<1x8x8xf32> to vector<8x8xf32>
    %cst_29 = arith.constant dense<0.000000e+00> : vector<320x8xf32>
    %45 = tpu.matmul %42, %44, %cst_29 {dimension_numbers = #tpu.dot_dimension_numbers<[1], [0], [0], [1], [0, 0, 1, 1], [], []>} : vector<320x8xf32>, vector<8x8xf32>, vector<320x8xf32> -> vector<320x8xf32>
    %46 = arith.addf %38, %45 : vector<320x8xf32>
    %c0_30 = arith.constant 0 : index
    %c0_31 = arith.constant 0 : index
    %47 = vector.load %arg4[%c0_30, %c0_31] : memref<1x8xf32, #tpu.memory_space<vmem>>, vector<1x8xf32>
    %48 = vector.broadcast %47 : vector<1x8xf32> to vector<320x8xf32>
    %49 = arith.addf %46, %48 : vector<320x8xf32>
    %cst_32 = arith.constant 0.000000e+00 : f32
    %50 = vector.broadcast %cst_32 : f32 to vector<320x8xf32>
    %51 = arith.maximumf %49, %50 : vector<320x8xf32>
    %52 = vector.shape_cast %51 : vector<320x8xf32> to vector<2x160x8xf32>
    %cst_33 = arith.constant 0.000000e+00 : f32
    %53 = vector.broadcast %cst_33 : f32 to vector<2x1x8xf32>
    %54 = vector.extract_strided_slice %52 {offsets = [0, 1, 0], sizes = [2, 159, 8], strides = [1, 1, 1]} : vector<2x160x8xf32> to vector<2x159x8xf32>
    %55 = tpu.concatenate %54, %53 in 1 : vector<2x159x8xf32>, vector<2x1x8xf32> -> vector<2x160x8xf32>
    %56 = arith.maximumf %52, %55 : vector<2x160x8xf32>
    %cst_34 = arith.constant 0.000000e+00 : f32
    %57 = vector.broadcast %cst_34 : f32 to vector<2x2x8xf32>
    %58 = vector.extract_strided_slice %56 {offsets = [0, 0, 0], sizes = [2, 158, 8], strides = [1, 1, 1]} : vector<2x160x8xf32> to vector<2x158x8xf32>
    %59 = tpu.concatenate %57, %58 in 1 : vector<2x2x8xf32>, vector<2x158x8xf32> -> vector<2x160x8xf32>
    %60 = vector.shape_cast %59 : vector<2x160x8xf32> to vector<320x8xf32>
    %c0_35 = arith.constant 0 : index
    %c0_36 = arith.constant 0 : index
    %c0_37 = arith.constant 0 : index
    %61 = vector.load %arg5[%c0_35, %c0_36, %c0_37] : memref<3x8x16xf32, #tpu.memory_space<vmem>>, vector<1x8x16xf32>
    %62 = vector.shape_cast %61 : vector<1x8x16xf32> to vector<8x16xf32>
    %cst_38 = arith.constant dense<0.000000e+00> : vector<320x16xf32>
    %63 = tpu.matmul %60, %62, %cst_38 {dimension_numbers = #tpu.dot_dimension_numbers<[1], [0], [0], [1], [0, 0, 1, 1], [], []>} : vector<320x8xf32>, vector<8x16xf32>, vector<320x16xf32> -> vector<320x16xf32>
    %64 = vector.shape_cast %56 : vector<2x160x8xf32> to vector<320x8xf32>
    %c1_39 = arith.constant 1 : index
    %c0_40 = arith.constant 0 : index
    %c0_41 = arith.constant 0 : index
    %65 = vector.load %arg5[%c1_39, %c0_40, %c0_41] : memref<3x8x16xf32, #tpu.memory_space<vmem>>, vector<1x8x16xf32>
    %66 = vector.shape_cast %65 : vector<1x8x16xf32> to vector<8x16xf32>
    %cst_42 = arith.constant dense<0.000000e+00> : vector<320x16xf32>
    %67 = tpu.matmul %64, %66, %cst_42 {dimension_numbers = #tpu.dot_dimension_numbers<[1], [0], [0], [1], [0, 0, 1, 1], [], []>} : vector<320x8xf32>, vector<8x16xf32>, vector<320x16xf32> -> vector<320x16xf32>
    %68 = arith.addf %63, %67 : vector<320x16xf32>
    %cst_43 = arith.constant 0.000000e+00 : f32
    %69 = vector.broadcast %cst_43 : f32 to vector<2x2x8xf32>
    %70 = vector.extract_strided_slice %56 {offsets = [0, 2, 0], sizes = [2, 158, 8], strides = [1, 1, 1]} : vector<2x160x8xf32> to vector<2x158x8xf32>
    %71 = tpu.concatenate %70, %69 in 1 : vector<2x158x8xf32>, vector<2x2x8xf32> -> vector<2x160x8xf32>
    %72 = vector.shape_cast %71 : vector<2x160x8xf32> to vector<320x8xf32>
    %c2_44 = arith.constant 2 : index
    %c0_45 = arith.constant 0 : index
    %c0_46 = arith.constant 0 : index
    %73 = vector.load %arg5[%c2_44, %c0_45, %c0_46] : memref<3x8x16xf32, #tpu.memory_space<vmem>>, vector<1x8x16xf32>
    %74 = vector.shape_cast %73 : vector<1x8x16xf32> to vector<8x16xf32>
    %cst_47 = arith.constant dense<0.000000e+00> : vector<320x16xf32>
    %75 = tpu.matmul %72, %74, %cst_47 {dimension_numbers = #tpu.dot_dimension_numbers<[1], [0], [0], [1], [0, 0, 1, 1], [], []>} : vector<320x8xf32>, vector<8x16xf32>, vector<320x16xf32> -> vector<320x16xf32>
    %76 = arith.addf %68, %75 : vector<320x16xf32>
    %c0_48 = arith.constant 0 : index
    %c0_49 = arith.constant 0 : index
    %77 = vector.load %arg6[%c0_48, %c0_49] : memref<1x16xf32, #tpu.memory_space<vmem>>, vector<1x16xf32>
    %78 = vector.broadcast %77 : vector<1x16xf32> to vector<320x16xf32>
    %79 = arith.addf %76, %78 : vector<320x16xf32>
    %cst_50 = arith.constant 0.000000e+00 : f32
    %80 = vector.broadcast %cst_50 : f32 to vector<320x16xf32>
    %81 = arith.maximumf %79, %80 : vector<320x16xf32>
    %82 = vector.shape_cast %81 : vector<320x16xf32> to vector<2x160x16xf32>
    %cst_51 = arith.constant 0.000000e+00 : f32
    %83 = vector.broadcast %cst_51 : f32 to vector<2x2x16xf32>
    %84 = vector.extract_strided_slice %82 {offsets = [0, 0, 0], sizes = [2, 158, 16], strides = [1, 1, 1]} : vector<2x160x16xf32> to vector<2x158x16xf32>
    %85 = tpu.concatenate %83, %84 in 1 : vector<2x2x16xf32>, vector<2x158x16xf32> -> vector<2x160x16xf32>
    %86 = vector.shape_cast %85 : vector<2x160x16xf32> to vector<320x16xf32>
    %c0_52 = arith.constant 0 : index
    %c0_53 = arith.constant 0 : index
    %c0_54 = arith.constant 0 : index
    %87 = vector.load %arg7[%c0_52, %c0_53, %c0_54] : memref<3x16x16xf32, #tpu.memory_space<vmem>>, vector<1x16x16xf32>
    %88 = vector.shape_cast %87 : vector<1x16x16xf32> to vector<16x16xf32>
    %cst_55 = arith.constant dense<0.000000e+00> : vector<320x16xf32>
    %89 = tpu.matmul %86, %88, %cst_55 {dimension_numbers = #tpu.dot_dimension_numbers<[1], [0], [0], [1], [0, 0, 1, 1], [], []>} : vector<320x16xf32>, vector<16x16xf32>, vector<320x16xf32> -> vector<320x16xf32>
    %90 = vector.shape_cast %82 : vector<2x160x16xf32> to vector<320x16xf32>
    %c1_56 = arith.constant 1 : index
    %c0_57 = arith.constant 0 : index
    %c0_58 = arith.constant 0 : index
    %91 = vector.load %arg7[%c1_56, %c0_57, %c0_58] : memref<3x16x16xf32, #tpu.memory_space<vmem>>, vector<1x16x16xf32>
    %92 = vector.shape_cast %91 : vector<1x16x16xf32> to vector<16x16xf32>
    %cst_59 = arith.constant dense<0.000000e+00> : vector<320x16xf32>
    %93 = tpu.matmul %90, %92, %cst_59 {dimension_numbers = #tpu.dot_dimension_numbers<[1], [0], [0], [1], [0, 0, 1, 1], [], []>} : vector<320x16xf32>, vector<16x16xf32>, vector<320x16xf32> -> vector<320x16xf32>
    %94 = arith.addf %89, %93 : vector<320x16xf32>
    %cst_60 = arith.constant 0.000000e+00 : f32
    %95 = vector.broadcast %cst_60 : f32 to vector<2x2x16xf32>
    %96 = vector.extract_strided_slice %82 {offsets = [0, 2, 0], sizes = [2, 158, 16], strides = [1, 1, 1]} : vector<2x160x16xf32> to vector<2x158x16xf32>
    %97 = tpu.concatenate %96, %95 in 1 : vector<2x158x16xf32>, vector<2x2x16xf32> -> vector<2x160x16xf32>
    %98 = vector.shape_cast %97 : vector<2x160x16xf32> to vector<320x16xf32>
    %c2_61 = arith.constant 2 : index
    %c0_62 = arith.constant 0 : index
    %c0_63 = arith.constant 0 : index
    %99 = vector.load %arg7[%c2_61, %c0_62, %c0_63] : memref<3x16x16xf32, #tpu.memory_space<vmem>>, vector<1x16x16xf32>
    %100 = vector.shape_cast %99 : vector<1x16x16xf32> to vector<16x16xf32>
    %cst_64 = arith.constant dense<0.000000e+00> : vector<320x16xf32>
    %101 = tpu.matmul %98, %100, %cst_64 {dimension_numbers = #tpu.dot_dimension_numbers<[1], [0], [0], [1], [0, 0, 1, 1], [], []>} : vector<320x16xf32>, vector<16x16xf32>, vector<320x16xf32> -> vector<320x16xf32>
    %102 = arith.addf %94, %101 : vector<320x16xf32>
    %c0_65 = arith.constant 0 : index
    %c0_66 = arith.constant 0 : index
    %103 = vector.load %arg8[%c0_65, %c0_66] : memref<1x16xf32, #tpu.memory_space<vmem>>, vector<1x16xf32>
    %104 = vector.broadcast %103 : vector<1x16xf32> to vector<320x16xf32>
    %105 = arith.addf %102, %104 : vector<320x16xf32>
    %cst_67 = arith.constant 0.000000e+00 : f32
    %106 = vector.broadcast %cst_67 : f32 to vector<320x16xf32>
    %107 = arith.maximumf %105, %106 : vector<320x16xf32>
    %108 = vector.shape_cast %107 : vector<320x16xf32> to vector<2x160x16xf32>
    %cst_68 = arith.constant 0.000000e+00 : f32
    %109 = vector.broadcast %cst_68 : f32 to vector<2x2x16xf32>
    %110 = vector.extract_strided_slice %108 {offsets = [0, 2, 0], sizes = [2, 158, 16], strides = [1, 1, 1]} : vector<2x160x16xf32> to vector<2x158x16xf32>
    %111 = tpu.concatenate %110, %109 in 1 : vector<2x158x16xf32>, vector<2x2x16xf32> -> vector<2x160x16xf32>
    %112 = arith.maximumf %108, %111 : vector<2x160x16xf32>
    %cst_69 = arith.constant 0.000000e+00 : f32
    %113 = vector.broadcast %cst_69 : f32 to vector<2x4x16xf32>
    %114 = vector.extract_strided_slice %112 {offsets = [0, 0, 0], sizes = [2, 156, 16], strides = [1, 1, 1]} : vector<2x160x16xf32> to vector<2x156x16xf32>
    %115 = tpu.concatenate %113, %114 in 1 : vector<2x4x16xf32>, vector<2x156x16xf32> -> vector<2x160x16xf32>
    %116 = vector.shape_cast %115 : vector<2x160x16xf32> to vector<320x16xf32>
    %c0_70 = arith.constant 0 : index
    %c0_71 = arith.constant 0 : index
    %c0_72 = arith.constant 0 : index
    %117 = vector.load %arg9[%c0_70, %c0_71, %c0_72] : memref<3x16x32xf32, #tpu.memory_space<vmem>>, vector<1x16x32xf32>
    %118 = vector.shape_cast %117 : vector<1x16x32xf32> to vector<16x32xf32>
    %cst_73 = arith.constant dense<0.000000e+00> : vector<320x32xf32>
    %119 = tpu.matmul %116, %118, %cst_73 {dimension_numbers = #tpu.dot_dimension_numbers<[1], [0], [0], [1], [0, 0, 1, 1], [], []>} : vector<320x16xf32>, vector<16x32xf32>, vector<320x32xf32> -> vector<320x32xf32>
    %120 = vector.shape_cast %112 : vector<2x160x16xf32> to vector<320x16xf32>
    %c1_74 = arith.constant 1 : index
    %c0_75 = arith.constant 0 : index
    %c0_76 = arith.constant 0 : index
    %121 = vector.load %arg9[%c1_74, %c0_75, %c0_76] : memref<3x16x32xf32, #tpu.memory_space<vmem>>, vector<1x16x32xf32>
    %122 = vector.shape_cast %121 : vector<1x16x32xf32> to vector<16x32xf32>
    %cst_77 = arith.constant dense<0.000000e+00> : vector<320x32xf32>
    %123 = tpu.matmul %120, %122, %cst_77 {dimension_numbers = #tpu.dot_dimension_numbers<[1], [0], [0], [1], [0, 0, 1, 1], [], []>} : vector<320x16xf32>, vector<16x32xf32>, vector<320x32xf32> -> vector<320x32xf32>
    %124 = arith.addf %119, %123 : vector<320x32xf32>
    %cst_78 = arith.constant 0.000000e+00 : f32
    %125 = vector.broadcast %cst_78 : f32 to vector<2x4x16xf32>
    %126 = vector.extract_strided_slice %112 {offsets = [0, 4, 0], sizes = [2, 156, 16], strides = [1, 1, 1]} : vector<2x160x16xf32> to vector<2x156x16xf32>
    %127 = tpu.concatenate %126, %125 in 1 : vector<2x156x16xf32>, vector<2x4x16xf32> -> vector<2x160x16xf32>
    %128 = vector.shape_cast %127 : vector<2x160x16xf32> to vector<320x16xf32>
    %c2_79 = arith.constant 2 : index
    %c0_80 = arith.constant 0 : index
    %c0_81 = arith.constant 0 : index
    %129 = vector.load %arg9[%c2_79, %c0_80, %c0_81] : memref<3x16x32xf32, #tpu.memory_space<vmem>>, vector<1x16x32xf32>
    %130 = vector.shape_cast %129 : vector<1x16x32xf32> to vector<16x32xf32>
    %cst_82 = arith.constant dense<0.000000e+00> : vector<320x32xf32>
    %131 = tpu.matmul %128, %130, %cst_82 {dimension_numbers = #tpu.dot_dimension_numbers<[1], [0], [0], [1], [0, 0, 1, 1], [], []>} : vector<320x16xf32>, vector<16x32xf32>, vector<320x32xf32> -> vector<320x32xf32>
    %132 = arith.addf %124, %131 : vector<320x32xf32>
    %c0_83 = arith.constant 0 : index
    %c0_84 = arith.constant 0 : index
    %133 = vector.load %arg10[%c0_83, %c0_84] : memref<1x32xf32, #tpu.memory_space<vmem>>, vector<1x32xf32>
    %134 = vector.broadcast %133 : vector<1x32xf32> to vector<320x32xf32>
    %135 = arith.addf %132, %134 : vector<320x32xf32>
    %cst_85 = arith.constant 0.000000e+00 : f32
    %136 = vector.broadcast %cst_85 : f32 to vector<320x32xf32>
    %137 = arith.maximumf %135, %136 : vector<320x32xf32>
    %138 = vector.shape_cast %137 : vector<320x32xf32> to vector<2x160x32xf32>
    %cst_86 = arith.constant 0.000000e+00 : f32
    %139 = vector.broadcast %cst_86 : f32 to vector<2x4x32xf32>
    %140 = vector.extract_strided_slice %138 {offsets = [0, 0, 0], sizes = [2, 156, 32], strides = [1, 1, 1]} : vector<2x160x32xf32> to vector<2x156x32xf32>
    %141 = tpu.concatenate %139, %140 in 1 : vector<2x4x32xf32>, vector<2x156x32xf32> -> vector<2x160x32xf32>
    %142 = vector.shape_cast %141 : vector<2x160x32xf32> to vector<320x32xf32>
    %c0_87 = arith.constant 0 : index
    %c0_88 = arith.constant 0 : index
    %c0_89 = arith.constant 0 : index
    %143 = vector.load %arg11[%c0_87, %c0_88, %c0_89] : memref<3x32x32xf32, #tpu.memory_space<vmem>>, vector<1x32x32xf32>
    %144 = vector.shape_cast %143 : vector<1x32x32xf32> to vector<32x32xf32>
    %cst_90 = arith.constant dense<0.000000e+00> : vector<320x32xf32>
    %145 = tpu.matmul %142, %144, %cst_90 {dimension_numbers = #tpu.dot_dimension_numbers<[1], [0], [0], [1], [0, 0, 1, 1], [], []>} : vector<320x32xf32>, vector<32x32xf32>, vector<320x32xf32> -> vector<320x32xf32>
    %146 = vector.shape_cast %138 : vector<2x160x32xf32> to vector<320x32xf32>
    %c1_91 = arith.constant 1 : index
    %c0_92 = arith.constant 0 : index
    %c0_93 = arith.constant 0 : index
    %147 = vector.load %arg11[%c1_91, %c0_92, %c0_93] : memref<3x32x32xf32, #tpu.memory_space<vmem>>, vector<1x32x32xf32>
    %148 = vector.shape_cast %147 : vector<1x32x32xf32> to vector<32x32xf32>
    %cst_94 = arith.constant dense<0.000000e+00> : vector<320x32xf32>
    %149 = tpu.matmul %146, %148, %cst_94 {dimension_numbers = #tpu.dot_dimension_numbers<[1], [0], [0], [1], [0, 0, 1, 1], [], []>} : vector<320x32xf32>, vector<32x32xf32>, vector<320x32xf32> -> vector<320x32xf32>
    %150 = arith.addf %145, %149 : vector<320x32xf32>
    %cst_95 = arith.constant 0.000000e+00 : f32
    %151 = vector.broadcast %cst_95 : f32 to vector<2x4x32xf32>
    %152 = vector.extract_strided_slice %138 {offsets = [0, 4, 0], sizes = [2, 156, 32], strides = [1, 1, 1]} : vector<2x160x32xf32> to vector<2x156x32xf32>
    %153 = tpu.concatenate %152, %151 in 1 : vector<2x156x32xf32>, vector<2x4x32xf32> -> vector<2x160x32xf32>
    %154 = vector.shape_cast %153 : vector<2x160x32xf32> to vector<320x32xf32>
    %c2_96 = arith.constant 2 : index
    %c0_97 = arith.constant 0 : index
    %c0_98 = arith.constant 0 : index
    %155 = vector.load %arg11[%c2_96, %c0_97, %c0_98] : memref<3x32x32xf32, #tpu.memory_space<vmem>>, vector<1x32x32xf32>
    %156 = vector.shape_cast %155 : vector<1x32x32xf32> to vector<32x32xf32>
    %cst_99 = arith.constant dense<0.000000e+00> : vector<320x32xf32>
    %157 = tpu.matmul %154, %156, %cst_99 {dimension_numbers = #tpu.dot_dimension_numbers<[1], [0], [0], [1], [0, 0, 1, 1], [], []>} : vector<320x32xf32>, vector<32x32xf32>, vector<320x32xf32> -> vector<320x32xf32>
    %158 = arith.addf %150, %157 : vector<320x32xf32>
    %c0_100 = arith.constant 0 : index
    %c0_101 = arith.constant 0 : index
    %159 = vector.load %arg12[%c0_100, %c0_101] : memref<1x32xf32, #tpu.memory_space<vmem>>, vector<1x32xf32>
    %160 = vector.broadcast %159 : vector<1x32xf32> to vector<320x32xf32>
    %161 = arith.addf %158, %160 : vector<320x32xf32>
    %cst_102 = arith.constant 0.000000e+00 : f32
    %162 = vector.broadcast %cst_102 : f32 to vector<320x32xf32>
    %163 = arith.maximumf %161, %162 : vector<320x32xf32>
    %164 = vector.shape_cast %163 : vector<320x32xf32> to vector<2x160x32xf32>
    %cst_103 = arith.constant 0.000000e+00 : f32
    %165 = vector.broadcast %cst_103 : f32 to vector<2x4x32xf32>
    %166 = vector.extract_strided_slice %164 {offsets = [0, 4, 0], sizes = [2, 156, 32], strides = [1, 1, 1]} : vector<2x160x32xf32> to vector<2x156x32xf32>
    %167 = tpu.concatenate %166, %165 in 1 : vector<2x156x32xf32>, vector<2x4x32xf32> -> vector<2x160x32xf32>
    %168 = arith.maximumf %164, %167 : vector<2x160x32xf32>
    %169 = vector.shape_cast %168 : vector<2x160x32xf32> to vector<320x32xf32>
    %cst_104 = arith.constant 0.000000e+00 : f32
    %170 = vector.broadcast %cst_104 : f32 to vector<2x64xf32>
    %171 = vector.extract_strided_slice %169 {offsets = [0, 0], sizes = [1, 32], strides = [1, 1]} : vector<320x32xf32> to vector<1x32xf32>
    %172 = vector.extract_strided_slice %169 {offsets = [160, 0], sizes = [1, 32], strides = [1, 1]} : vector<320x32xf32> to vector<1x32xf32>
    %173 = tpu.concatenate %171, %172 in 0 : vector<1x32xf32>, vector<1x32xf32> -> vector<2x32xf32>
    %c0_105 = arith.constant 0 : index
    %c0_106 = arith.constant 0 : index
    %c0_107 = arith.constant 0 : index
    %174 = vector.load %arg13[%c0_105, %c0_106, %c0_107] : memref<20x32x64xf32, #tpu.memory_space<vmem>>, vector<1x32x64xf32>
    %175 = vector.shape_cast %174 : vector<1x32x64xf32> to vector<32x64xf32>
    %cst_108 = arith.constant dense<0.000000e+00> : vector<2x64xf32>
    %176 = tpu.matmul %173, %175, %cst_108 {dimension_numbers = #tpu.dot_dimension_numbers<[1], [0], [0], [1], [0, 0, 1, 1], [], []>} : vector<2x32xf32>, vector<32x64xf32>, vector<2x64xf32> -> vector<2x64xf32>
    %177 = arith.addf %170, %176 : vector<2x64xf32>
    %178 = vector.extract_strided_slice %169 {offsets = [8, 0], sizes = [1, 32], strides = [1, 1]} : vector<320x32xf32> to vector<1x32xf32>
    %179 = vector.extract_strided_slice %169 {offsets = [168, 0], sizes = [1, 32], strides = [1, 1]} : vector<320x32xf32> to vector<1x32xf32>
    %180 = tpu.concatenate %178, %179 in 0 : vector<1x32xf32>, vector<1x32xf32> -> vector<2x32xf32>
    %c1_109 = arith.constant 1 : index
    %c0_110 = arith.constant 0 : index
    %c0_111 = arith.constant 0 : index
    %181 = vector.load %arg13[%c1_109, %c0_110, %c0_111] : memref<20x32x64xf32, #tpu.memory_space<vmem>>, vector<1x32x64xf32>
    %182 = vector.shape_cast %181 : vector<1x32x64xf32> to vector<32x64xf32>
    %cst_112 = arith.constant dense<0.000000e+00> : vector<2x64xf32>
    %183 = tpu.matmul %180, %182, %cst_112 {dimension_numbers = #tpu.dot_dimension_numbers<[1], [0], [0], [1], [0, 0, 1, 1], [], []>} : vector<2x32xf32>, vector<32x64xf32>, vector<2x64xf32> -> vector<2x64xf32>
    %184 = arith.addf %177, %183 : vector<2x64xf32>
    %185 = vector.extract_strided_slice %169 {offsets = [16, 0], sizes = [1, 32], strides = [1, 1]} : vector<320x32xf32> to vector<1x32xf32>
    %186 = vector.extract_strided_slice %169 {offsets = [176, 0], sizes = [1, 32], strides = [1, 1]} : vector<320x32xf32> to vector<1x32xf32>
    %187 = tpu.concatenate %185, %186 in 0 : vector<1x32xf32>, vector<1x32xf32> -> vector<2x32xf32>
    %c2_113 = arith.constant 2 : index
    %c0_114 = arith.constant 0 : index
    %c0_115 = arith.constant 0 : index
    %188 = vector.load %arg13[%c2_113, %c0_114, %c0_115] : memref<20x32x64xf32, #tpu.memory_space<vmem>>, vector<1x32x64xf32>
    %189 = vector.shape_cast %188 : vector<1x32x64xf32> to vector<32x64xf32>
    %cst_116 = arith.constant dense<0.000000e+00> : vector<2x64xf32>
    %190 = tpu.matmul %187, %189, %cst_116 {dimension_numbers = #tpu.dot_dimension_numbers<[1], [0], [0], [1], [0, 0, 1, 1], [], []>} : vector<2x32xf32>, vector<32x64xf32>, vector<2x64xf32> -> vector<2x64xf32>
    %191 = arith.addf %184, %190 : vector<2x64xf32>
    %192 = vector.extract_strided_slice %169 {offsets = [24, 0], sizes = [1, 32], strides = [1, 1]} : vector<320x32xf32> to vector<1x32xf32>
    %193 = vector.extract_strided_slice %169 {offsets = [184, 0], sizes = [1, 32], strides = [1, 1]} : vector<320x32xf32> to vector<1x32xf32>
    %194 = tpu.concatenate %192, %193 in 0 : vector<1x32xf32>, vector<1x32xf32> -> vector<2x32xf32>
    %c3 = arith.constant 3 : index
    %c0_117 = arith.constant 0 : index
    %c0_118 = arith.constant 0 : index
    %195 = vector.load %arg13[%c3, %c0_117, %c0_118] : memref<20x32x64xf32, #tpu.memory_space<vmem>>, vector<1x32x64xf32>
    %196 = vector.shape_cast %195 : vector<1x32x64xf32> to vector<32x64xf32>
    %cst_119 = arith.constant dense<0.000000e+00> : vector<2x64xf32>
    %197 = tpu.matmul %194, %196, %cst_119 {dimension_numbers = #tpu.dot_dimension_numbers<[1], [0], [0], [1], [0, 0, 1, 1], [], []>} : vector<2x32xf32>, vector<32x64xf32>, vector<2x64xf32> -> vector<2x64xf32>
    %198 = arith.addf %191, %197 : vector<2x64xf32>
    %199 = vector.extract_strided_slice %169 {offsets = [32, 0], sizes = [1, 32], strides = [1, 1]} : vector<320x32xf32> to vector<1x32xf32>
    %200 = vector.extract_strided_slice %169 {offsets = [192, 0], sizes = [1, 32], strides = [1, 1]} : vector<320x32xf32> to vector<1x32xf32>
    %201 = tpu.concatenate %199, %200 in 0 : vector<1x32xf32>, vector<1x32xf32> -> vector<2x32xf32>
    %c4 = arith.constant 4 : index
    %c0_120 = arith.constant 0 : index
    %c0_121 = arith.constant 0 : index
    %202 = vector.load %arg13[%c4, %c0_120, %c0_121] : memref<20x32x64xf32, #tpu.memory_space<vmem>>, vector<1x32x64xf32>
    %203 = vector.shape_cast %202 : vector<1x32x64xf32> to vector<32x64xf32>
    %cst_122 = arith.constant dense<0.000000e+00> : vector<2x64xf32>
    %204 = tpu.matmul %201, %203, %cst_122 {dimension_numbers = #tpu.dot_dimension_numbers<[1], [0], [0], [1], [0, 0, 1, 1], [], []>} : vector<2x32xf32>, vector<32x64xf32>, vector<2x64xf32> -> vector<2x64xf32>
    %205 = arith.addf %198, %204 : vector<2x64xf32>
    %206 = vector.extract_strided_slice %169 {offsets = [40, 0], sizes = [1, 32], strides = [1, 1]} : vector<320x32xf32> to vector<1x32xf32>
    %207 = vector.extract_strided_slice %169 {offsets = [200, 0], sizes = [1, 32], strides = [1, 1]} : vector<320x32xf32> to vector<1x32xf32>
    %208 = tpu.concatenate %206, %207 in 0 : vector<1x32xf32>, vector<1x32xf32> -> vector<2x32xf32>
    %c5 = arith.constant 5 : index
    %c0_123 = arith.constant 0 : index
    %c0_124 = arith.constant 0 : index
    %209 = vector.load %arg13[%c5, %c0_123, %c0_124] : memref<20x32x64xf32, #tpu.memory_space<vmem>>, vector<1x32x64xf32>
    %210 = vector.shape_cast %209 : vector<1x32x64xf32> to vector<32x64xf32>
    %cst_125 = arith.constant dense<0.000000e+00> : vector<2x64xf32>
    %211 = tpu.matmul %208, %210, %cst_125 {dimension_numbers = #tpu.dot_dimension_numbers<[1], [0], [0], [1], [0, 0, 1, 1], [], []>} : vector<2x32xf32>, vector<32x64xf32>, vector<2x64xf32> -> vector<2x64xf32>
    %212 = arith.addf %205, %211 : vector<2x64xf32>
    %213 = vector.extract_strided_slice %169 {offsets = [48, 0], sizes = [1, 32], strides = [1, 1]} : vector<320x32xf32> to vector<1x32xf32>
    %214 = vector.extract_strided_slice %169 {offsets = [208, 0], sizes = [1, 32], strides = [1, 1]} : vector<320x32xf32> to vector<1x32xf32>
    %215 = tpu.concatenate %213, %214 in 0 : vector<1x32xf32>, vector<1x32xf32> -> vector<2x32xf32>
    %c6 = arith.constant 6 : index
    %c0_126 = arith.constant 0 : index
    %c0_127 = arith.constant 0 : index
    %216 = vector.load %arg13[%c6, %c0_126, %c0_127] : memref<20x32x64xf32, #tpu.memory_space<vmem>>, vector<1x32x64xf32>
    %217 = vector.shape_cast %216 : vector<1x32x64xf32> to vector<32x64xf32>
    %cst_128 = arith.constant dense<0.000000e+00> : vector<2x64xf32>
    %218 = tpu.matmul %215, %217, %cst_128 {dimension_numbers = #tpu.dot_dimension_numbers<[1], [0], [0], [1], [0, 0, 1, 1], [], []>} : vector<2x32xf32>, vector<32x64xf32>, vector<2x64xf32> -> vector<2x64xf32>
    %219 = arith.addf %212, %218 : vector<2x64xf32>
    %220 = vector.extract_strided_slice %169 {offsets = [56, 0], sizes = [1, 32], strides = [1, 1]} : vector<320x32xf32> to vector<1x32xf32>
    %221 = vector.extract_strided_slice %169 {offsets = [216, 0], sizes = [1, 32], strides = [1, 1]} : vector<320x32xf32> to vector<1x32xf32>
    %222 = tpu.concatenate %220, %221 in 0 : vector<1x32xf32>, vector<1x32xf32> -> vector<2x32xf32>
    %c7 = arith.constant 7 : index
    %c0_129 = arith.constant 0 : index
    %c0_130 = arith.constant 0 : index
    %223 = vector.load %arg13[%c7, %c0_129, %c0_130] : memref<20x32x64xf32, #tpu.memory_space<vmem>>, vector<1x32x64xf32>
    %224 = vector.shape_cast %223 : vector<1x32x64xf32> to vector<32x64xf32>
    %cst_131 = arith.constant dense<0.000000e+00> : vector<2x64xf32>
    %225 = tpu.matmul %222, %224, %cst_131 {dimension_numbers = #tpu.dot_dimension_numbers<[1], [0], [0], [1], [0, 0, 1, 1], [], []>} : vector<2x32xf32>, vector<32x64xf32>, vector<2x64xf32> -> vector<2x64xf32>
    %226 = arith.addf %219, %225 : vector<2x64xf32>
    %227 = vector.extract_strided_slice %169 {offsets = [64, 0], sizes = [1, 32], strides = [1, 1]} : vector<320x32xf32> to vector<1x32xf32>
    %228 = vector.extract_strided_slice %169 {offsets = [224, 0], sizes = [1, 32], strides = [1, 1]} : vector<320x32xf32> to vector<1x32xf32>
    %229 = tpu.concatenate %227, %228 in 0 : vector<1x32xf32>, vector<1x32xf32> -> vector<2x32xf32>
    %c8 = arith.constant 8 : index
    %c0_132 = arith.constant 0 : index
    %c0_133 = arith.constant 0 : index
    %230 = vector.load %arg13[%c8, %c0_132, %c0_133] : memref<20x32x64xf32, #tpu.memory_space<vmem>>, vector<1x32x64xf32>
    %231 = vector.shape_cast %230 : vector<1x32x64xf32> to vector<32x64xf32>
    %cst_134 = arith.constant dense<0.000000e+00> : vector<2x64xf32>
    %232 = tpu.matmul %229, %231, %cst_134 {dimension_numbers = #tpu.dot_dimension_numbers<[1], [0], [0], [1], [0, 0, 1, 1], [], []>} : vector<2x32xf32>, vector<32x64xf32>, vector<2x64xf32> -> vector<2x64xf32>
    %233 = arith.addf %226, %232 : vector<2x64xf32>
    %234 = vector.extract_strided_slice %169 {offsets = [72, 0], sizes = [1, 32], strides = [1, 1]} : vector<320x32xf32> to vector<1x32xf32>
    %235 = vector.extract_strided_slice %169 {offsets = [232, 0], sizes = [1, 32], strides = [1, 1]} : vector<320x32xf32> to vector<1x32xf32>
    %236 = tpu.concatenate %234, %235 in 0 : vector<1x32xf32>, vector<1x32xf32> -> vector<2x32xf32>
    %c9 = arith.constant 9 : index
    %c0_135 = arith.constant 0 : index
    %c0_136 = arith.constant 0 : index
    %237 = vector.load %arg13[%c9, %c0_135, %c0_136] : memref<20x32x64xf32, #tpu.memory_space<vmem>>, vector<1x32x64xf32>
    %238 = vector.shape_cast %237 : vector<1x32x64xf32> to vector<32x64xf32>
    %cst_137 = arith.constant dense<0.000000e+00> : vector<2x64xf32>
    %239 = tpu.matmul %236, %238, %cst_137 {dimension_numbers = #tpu.dot_dimension_numbers<[1], [0], [0], [1], [0, 0, 1, 1], [], []>} : vector<2x32xf32>, vector<32x64xf32>, vector<2x64xf32> -> vector<2x64xf32>
    %240 = arith.addf %233, %239 : vector<2x64xf32>
    %241 = vector.extract_strided_slice %169 {offsets = [80, 0], sizes = [1, 32], strides = [1, 1]} : vector<320x32xf32> to vector<1x32xf32>
    %242 = vector.extract_strided_slice %169 {offsets = [240, 0], sizes = [1, 32], strides = [1, 1]} : vector<320x32xf32> to vector<1x32xf32>
    %243 = tpu.concatenate %241, %242 in 0 : vector<1x32xf32>, vector<1x32xf32> -> vector<2x32xf32>
    %c10 = arith.constant 10 : index
    %c0_138 = arith.constant 0 : index
    %c0_139 = arith.constant 0 : index
    %244 = vector.load %arg13[%c10, %c0_138, %c0_139] : memref<20x32x64xf32, #tpu.memory_space<vmem>>, vector<1x32x64xf32>
    %245 = vector.shape_cast %244 : vector<1x32x64xf32> to vector<32x64xf32>
    %cst_140 = arith.constant dense<0.000000e+00> : vector<2x64xf32>
    %246 = tpu.matmul %243, %245, %cst_140 {dimension_numbers = #tpu.dot_dimension_numbers<[1], [0], [0], [1], [0, 0, 1, 1], [], []>} : vector<2x32xf32>, vector<32x64xf32>, vector<2x64xf32> -> vector<2x64xf32>
    %247 = arith.addf %240, %246 : vector<2x64xf32>
    %248 = vector.extract_strided_slice %169 {offsets = [88, 0], sizes = [1, 32], strides = [1, 1]} : vector<320x32xf32> to vector<1x32xf32>
    %249 = vector.extract_strided_slice %169 {offsets = [248, 0], sizes = [1, 32], strides = [1, 1]} : vector<320x32xf32> to vector<1x32xf32>
    %250 = tpu.concatenate %248, %249 in 0 : vector<1x32xf32>, vector<1x32xf32> -> vector<2x32xf32>
    %c11 = arith.constant 11 : index
    %c0_141 = arith.constant 0 : index
    %c0_142 = arith.constant 0 : index
    %251 = vector.load %arg13[%c11, %c0_141, %c0_142] : memref<20x32x64xf32, #tpu.memory_space<vmem>>, vector<1x32x64xf32>
    %252 = vector.shape_cast %251 : vector<1x32x64xf32> to vector<32x64xf32>
    %cst_143 = arith.constant dense<0.000000e+00> : vector<2x64xf32>
    %253 = tpu.matmul %250, %252, %cst_143 {dimension_numbers = #tpu.dot_dimension_numbers<[1], [0], [0], [1], [0, 0, 1, 1], [], []>} : vector<2x32xf32>, vector<32x64xf32>, vector<2x64xf32> -> vector<2x64xf32>
    %254 = arith.addf %247, %253 : vector<2x64xf32>
    %255 = vector.extract_strided_slice %169 {offsets = [96, 0], sizes = [1, 32], strides = [1, 1]} : vector<320x32xf32> to vector<1x32xf32>
    %256 = vector.extract_strided_slice %169 {offsets = [256, 0], sizes = [1, 32], strides = [1, 1]} : vector<320x32xf32> to vector<1x32xf32>
    %257 = tpu.concatenate %255, %256 in 0 : vector<1x32xf32>, vector<1x32xf32> -> vector<2x32xf32>
    %c12 = arith.constant 12 : index
    %c0_144 = arith.constant 0 : index
    %c0_145 = arith.constant 0 : index
    %258 = vector.load %arg13[%c12, %c0_144, %c0_145] : memref<20x32x64xf32, #tpu.memory_space<vmem>>, vector<1x32x64xf32>
    %259 = vector.shape_cast %258 : vector<1x32x64xf32> to vector<32x64xf32>
    %cst_146 = arith.constant dense<0.000000e+00> : vector<2x64xf32>
    %260 = tpu.matmul %257, %259, %cst_146 {dimension_numbers = #tpu.dot_dimension_numbers<[1], [0], [0], [1], [0, 0, 1, 1], [], []>} : vector<2x32xf32>, vector<32x64xf32>, vector<2x64xf32> -> vector<2x64xf32>
    %261 = arith.addf %254, %260 : vector<2x64xf32>
    %262 = vector.extract_strided_slice %169 {offsets = [104, 0], sizes = [1, 32], strides = [1, 1]} : vector<320x32xf32> to vector<1x32xf32>
    %263 = vector.extract_strided_slice %169 {offsets = [264, 0], sizes = [1, 32], strides = [1, 1]} : vector<320x32xf32> to vector<1x32xf32>
    %264 = tpu.concatenate %262, %263 in 0 : vector<1x32xf32>, vector<1x32xf32> -> vector<2x32xf32>
    %c13 = arith.constant 13 : index
    %c0_147 = arith.constant 0 : index
    %c0_148 = arith.constant 0 : index
    %265 = vector.load %arg13[%c13, %c0_147, %c0_148] : memref<20x32x64xf32, #tpu.memory_space<vmem>>, vector<1x32x64xf32>
    %266 = vector.shape_cast %265 : vector<1x32x64xf32> to vector<32x64xf32>
    %cst_149 = arith.constant dense<0.000000e+00> : vector<2x64xf32>
    %267 = tpu.matmul %264, %266, %cst_149 {dimension_numbers = #tpu.dot_dimension_numbers<[1], [0], [0], [1], [0, 0, 1, 1], [], []>} : vector<2x32xf32>, vector<32x64xf32>, vector<2x64xf32> -> vector<2x64xf32>
    %268 = arith.addf %261, %267 : vector<2x64xf32>
    %269 = vector.extract_strided_slice %169 {offsets = [112, 0], sizes = [1, 32], strides = [1, 1]} : vector<320x32xf32> to vector<1x32xf32>
    %270 = vector.extract_strided_slice %169 {offsets = [272, 0], sizes = [1, 32], strides = [1, 1]} : vector<320x32xf32> to vector<1x32xf32>
    %271 = tpu.concatenate %269, %270 in 0 : vector<1x32xf32>, vector<1x32xf32> -> vector<2x32xf32>
    %c14 = arith.constant 14 : index
    %c0_150 = arith.constant 0 : index
    %c0_151 = arith.constant 0 : index
    %272 = vector.load %arg13[%c14, %c0_150, %c0_151] : memref<20x32x64xf32, #tpu.memory_space<vmem>>, vector<1x32x64xf32>
    %273 = vector.shape_cast %272 : vector<1x32x64xf32> to vector<32x64xf32>
    %cst_152 = arith.constant dense<0.000000e+00> : vector<2x64xf32>
    %274 = tpu.matmul %271, %273, %cst_152 {dimension_numbers = #tpu.dot_dimension_numbers<[1], [0], [0], [1], [0, 0, 1, 1], [], []>} : vector<2x32xf32>, vector<32x64xf32>, vector<2x64xf32> -> vector<2x64xf32>
    %275 = arith.addf %268, %274 : vector<2x64xf32>
    %276 = vector.extract_strided_slice %169 {offsets = [120, 0], sizes = [1, 32], strides = [1, 1]} : vector<320x32xf32> to vector<1x32xf32>
    %277 = vector.extract_strided_slice %169 {offsets = [280, 0], sizes = [1, 32], strides = [1, 1]} : vector<320x32xf32> to vector<1x32xf32>
    %278 = tpu.concatenate %276, %277 in 0 : vector<1x32xf32>, vector<1x32xf32> -> vector<2x32xf32>
    %c15 = arith.constant 15 : index
    %c0_153 = arith.constant 0 : index
    %c0_154 = arith.constant 0 : index
    %279 = vector.load %arg13[%c15, %c0_153, %c0_154] : memref<20x32x64xf32, #tpu.memory_space<vmem>>, vector<1x32x64xf32>
    %280 = vector.shape_cast %279 : vector<1x32x64xf32> to vector<32x64xf32>
    %cst_155 = arith.constant dense<0.000000e+00> : vector<2x64xf32>
    %281 = tpu.matmul %278, %280, %cst_155 {dimension_numbers = #tpu.dot_dimension_numbers<[1], [0], [0], [1], [0, 0, 1, 1], [], []>} : vector<2x32xf32>, vector<32x64xf32>, vector<2x64xf32> -> vector<2x64xf32>
    %282 = arith.addf %275, %281 : vector<2x64xf32>
    %283 = vector.extract_strided_slice %169 {offsets = [128, 0], sizes = [1, 32], strides = [1, 1]} : vector<320x32xf32> to vector<1x32xf32>
    %284 = vector.extract_strided_slice %169 {offsets = [288, 0], sizes = [1, 32], strides = [1, 1]} : vector<320x32xf32> to vector<1x32xf32>
    %285 = tpu.concatenate %283, %284 in 0 : vector<1x32xf32>, vector<1x32xf32> -> vector<2x32xf32>
    %c16 = arith.constant 16 : index
    %c0_156 = arith.constant 0 : index
    %c0_157 = arith.constant 0 : index
    %286 = vector.load %arg13[%c16, %c0_156, %c0_157] : memref<20x32x64xf32, #tpu.memory_space<vmem>>, vector<1x32x64xf32>
    %287 = vector.shape_cast %286 : vector<1x32x64xf32> to vector<32x64xf32>
    %cst_158 = arith.constant dense<0.000000e+00> : vector<2x64xf32>
    %288 = tpu.matmul %285, %287, %cst_158 {dimension_numbers = #tpu.dot_dimension_numbers<[1], [0], [0], [1], [0, 0, 1, 1], [], []>} : vector<2x32xf32>, vector<32x64xf32>, vector<2x64xf32> -> vector<2x64xf32>
    %289 = arith.addf %282, %288 : vector<2x64xf32>
    %290 = vector.extract_strided_slice %169 {offsets = [136, 0], sizes = [1, 32], strides = [1, 1]} : vector<320x32xf32> to vector<1x32xf32>
    %291 = vector.extract_strided_slice %169 {offsets = [296, 0], sizes = [1, 32], strides = [1, 1]} : vector<320x32xf32> to vector<1x32xf32>
    %292 = tpu.concatenate %290, %291 in 0 : vector<1x32xf32>, vector<1x32xf32> -> vector<2x32xf32>
    %c17 = arith.constant 17 : index
    %c0_159 = arith.constant 0 : index
    %c0_160 = arith.constant 0 : index
    %293 = vector.load %arg13[%c17, %c0_159, %c0_160] : memref<20x32x64xf32, #tpu.memory_space<vmem>>, vector<1x32x64xf32>
    %294 = vector.shape_cast %293 : vector<1x32x64xf32> to vector<32x64xf32>
    %cst_161 = arith.constant dense<0.000000e+00> : vector<2x64xf32>
    %295 = tpu.matmul %292, %294, %cst_161 {dimension_numbers = #tpu.dot_dimension_numbers<[1], [0], [0], [1], [0, 0, 1, 1], [], []>} : vector<2x32xf32>, vector<32x64xf32>, vector<2x64xf32> -> vector<2x64xf32>
    %296 = arith.addf %289, %295 : vector<2x64xf32>
    %297 = vector.extract_strided_slice %169 {offsets = [144, 0], sizes = [1, 32], strides = [1, 1]} : vector<320x32xf32> to vector<1x32xf32>
    %298 = vector.extract_strided_slice %169 {offsets = [304, 0], sizes = [1, 32], strides = [1, 1]} : vector<320x32xf32> to vector<1x32xf32>
    %299 = tpu.concatenate %297, %298 in 0 : vector<1x32xf32>, vector<1x32xf32> -> vector<2x32xf32>
    %c18 = arith.constant 18 : index
    %c0_162 = arith.constant 0 : index
    %c0_163 = arith.constant 0 : index
    %300 = vector.load %arg13[%c18, %c0_162, %c0_163] : memref<20x32x64xf32, #tpu.memory_space<vmem>>, vector<1x32x64xf32>
    %301 = vector.shape_cast %300 : vector<1x32x64xf32> to vector<32x64xf32>
    %cst_164 = arith.constant dense<0.000000e+00> : vector<2x64xf32>
    %302 = tpu.matmul %299, %301, %cst_164 {dimension_numbers = #tpu.dot_dimension_numbers<[1], [0], [0], [1], [0, 0, 1, 1], [], []>} : vector<2x32xf32>, vector<32x64xf32>, vector<2x64xf32> -> vector<2x64xf32>
    %303 = arith.addf %296, %302 : vector<2x64xf32>
    %304 = vector.extract_strided_slice %169 {offsets = [152, 0], sizes = [1, 32], strides = [1, 1]} : vector<320x32xf32> to vector<1x32xf32>
    %305 = vector.extract_strided_slice %169 {offsets = [312, 0], sizes = [1, 32], strides = [1, 1]} : vector<320x32xf32> to vector<1x32xf32>
    %306 = tpu.concatenate %304, %305 in 0 : vector<1x32xf32>, vector<1x32xf32> -> vector<2x32xf32>
    %c19 = arith.constant 19 : index
    %c0_165 = arith.constant 0 : index
    %c0_166 = arith.constant 0 : index
    %307 = vector.load %arg13[%c19, %c0_165, %c0_166] : memref<20x32x64xf32, #tpu.memory_space<vmem>>, vector<1x32x64xf32>
    %308 = vector.shape_cast %307 : vector<1x32x64xf32> to vector<32x64xf32>
    %cst_167 = arith.constant dense<0.000000e+00> : vector<2x64xf32>
    %309 = tpu.matmul %306, %308, %cst_167 {dimension_numbers = #tpu.dot_dimension_numbers<[1], [0], [0], [1], [0, 0, 1, 1], [], []>} : vector<2x32xf32>, vector<32x64xf32>, vector<2x64xf32> -> vector<2x64xf32>
    %310 = arith.addf %303, %309 : vector<2x64xf32>
    %c0_168 = arith.constant 0 : index
    %c0_169 = arith.constant 0 : index
    %311 = vector.load %arg14[%c0_168, %c0_169] : memref<1x64xf32, #tpu.memory_space<vmem>>, vector<1x64xf32>
    %312 = vector.broadcast %311 : vector<1x64xf32> to vector<2x64xf32>
    %313 = arith.addf %310, %312 : vector<2x64xf32>
    %cst_170 = arith.constant 0.000000e+00 : f32
    %314 = vector.broadcast %cst_170 : f32 to vector<2x64xf32>
    %315 = arith.maximumf %313, %314 : vector<2x64xf32>
    %c0_171 = arith.constant 0 : index
    %c0_172 = arith.constant 0 : index
    %316 = vector.load %arg15[%c0_171, %c0_172] : memref<64x8xf32, #tpu.memory_space<vmem>>, vector<64x8xf32>
    %cst_173 = arith.constant dense<0.000000e+00> : vector<2x8xf32>
    %317 = tpu.matmul %315, %316, %cst_173 {dimension_numbers = #tpu.dot_dimension_numbers<[1], [0], [0], [1], [0, 0, 1, 1], [], []>} : vector<2x64xf32>, vector<64x8xf32>, vector<2x8xf32> -> vector<2x8xf32>
    %c0_174 = arith.constant 0 : index
    %c0_175 = arith.constant 0 : index
    %318 = vector.load %arg16[%c0_174, %c0_175] : memref<1x8xf32, #tpu.memory_space<vmem>>, vector<1x8xf32>
    %319 = vector.broadcast %318 : vector<1x8xf32> to vector<2x8xf32>
    %320 = arith.addf %317, %319 : vector<2x8xf32>
    %cst_176 = arith.constant 0.000000e+00 : f32
    %321 = vector.broadcast %cst_176 : f32 to vector<2x8xf32>
    %322 = arith.maximumf %320, %321 : vector<2x8xf32>
    %c0_177 = arith.constant 0 : index
    %c0_178 = arith.constant 0 : index
    %323 = vector.load %arg17[%c0_177, %c0_178] : memref<2x8xf32, #tpu.memory_space<vmem>>, vector<2x8xf32>
    tpu.vector_store %arg17[%c0_177, %c0_178], %322 {strides = array<i32>} : memref<2x8xf32, #tpu.memory_space<vmem>>, vector<2x8xf32>,
    return
  }
}

</mosaic_0001>

<bundles_post_ra>
// kernel: medium_cnn_forward.1
= control target key start
LH: loop header
LB: loop body
LE: loop exit
PB: predicated region body
PF: predicated region fallthrough
CT: control target
= control target key end

     0   :  { %s18546_s0 = inlined_call_operand.vmem [shape: f32[2,160,8], index: 0, kind: input, shape index: {}]   ;;  %s18547_s1 = inlined_call_operand.vmem [shape: f32[3,8,8], index: 1, kind: input, shape index: {}]   ;;  %s18548_s2 = inlined_call_operand.vmem [shape: f32[1,8], index: 2, kind: input, shape index: {}]   ;;  %s18549_s3 = inlined_call_operand.vmem [shape: f32[3,8,8], index: 3, kind: input, shape index: {}]   ;;  %s18550_s4 = inlined_call_operand.vmem [shape: f32[1,8], index: 4, kind: input, shape index: {}]   ;;  %s18551_s5 = inlined_call_operand.vmem [shape: f32[3,8,16], index: 5, kind: input, shape index: {}]   ;;  %s18552_s6 = inlined_call_operand.vmem [shape: f32[1,16], index: 6, kind: input, shape index: {}]   ;;  %s18553_s7 = inlined_call_operand.vmem [shape: f32[3,16,16], index: 7, kind: input, shape index: {}]   ;;  %s18554_s8 = inlined_call_operand.vmem [shape: f32[1,16], index: 8, kind: input, shape index: {}]   ;;  %s18555_s9 = inlined_call_operand.vmem [shape: f32[3,16,32], index: 9, kind: input, shape index: {}]   ;;  %s18556_s10 = inlined_call_operand.vmem [shape: f32[1,32], index: 10, kind: input, shape index: {}]   ;;  %s18557_s11 = inlined_call_operand.vmem [shape: f32[3,32,32], index: 11, kind: input, shape index: {}]   ;;  %s18558_s12 = inlined_call_operand.vmem [shape: f32[1,32], index: 12, kind: input, shape index: {}]   ;;  %s18559_s13 = inlined_call_operand.vmem [shape: f32[20,32,64], index: 13, kind: input, shape index: {}]   ;;  %s18560_s14 = inlined_call_operand.vmem [shape: f32[1,64], index: 14, kind: input, shape index: {}]   ;;  %s18561_s15 = inlined_call_operand.vmem [shape: f32[64,8], index: 15, kind: input, shape index: {}]   ;;  %s18562_s16 = inlined_call_operand.vmem [shape: f32[1,8], index: 16, kind: input, shape index: {}]   ;;  %s18563_s17 = inlined_call_operand.hbm [shape: f32[2,8], index: 17, kind: output, shape index: {}]  }
   0x1   :  { %18585 = sst [smem:[#allocation34_spill]] %s18546_s0 }
   0x2   :  { %18586 = sst [smem:[#allocation35_spill]] %s18547_s1 }
   0x3   :  { %18587 = sst [smem:[#allocation36_spill]] %s18558_s12 }
   0x4   :  { %s18588_s26 = sld [smem:[#allocation35_spill]]  ;;  %s18589_s12 = sld [smem:[#allocation34_spill]]  ;;  %vm223_vm0 = vcmask 64512   ;;  %vm137_vm1 = vcmask 1040384  }
   0xa   :  { %v10434_v0 = vld [vmem:[%s18588_s26 + $0x8] sm:$0xff]  ;;  %v14318_v1 = vld [vmem:[%s18589_s12] sm:$0xff]  ;;  %v14333_v4 = vld [vmem:[%s18589_s12 + $0x10] sm:$0xff] }
   0xb   :  { %v14323_v2 = vld [vmem:[%s18589_s12 + $0x8] sm:$0xff]  ;;  %12143 = vmatprep.subr.mxu0 %v10434_v0  ;;  %12145 = vmatprep.mubr.msk.f32.mxu0 %vm223_vm0, %v14318_v1  ;;  %v220_v3 = vld [vmem:[%s18588_s26] sm:$0xff]  ;;  %v14342_v5 = vld [vmem:[%s18589_s12 + $0x18] sm:$0xff]  ;;  %v18566_v7 = vrot.slane %v14318_v1, 7  ;;  %v141_v11 = vrot.slane %v14333_v4, 7 }
   0xc   :  { %12144 = vmatpush3.msra.mxu0 %v10434_v0  ;;  %13708 = vmatprep.subr.mxu1 %v10434_v0  ;;  %v14347_v6 = vld [vmem:[%s18589_s12 + $0x20] sm:$0xff]  ;;  %v139_v9 = vrot.slane %v14323_v2, 7  ;;  %v143_v13 = vrot.slane %v14342_v5, 7  ;;  %v14363_v14 = vld [vmem:[%s18589_s12 + $0x28] sm:$0xff]  ;;  %v14371_v18 = vld [vmem:[%s18589_s12 + $0x30] sm:$0xff] }
   0xd   :  { %12146 = vmatmul.mubr.msk.f32.vlgmr.msra.gmra.mrb[0].mxu0 %vm223_vm0, %v14323_v2  ;;  %12205 = vmatprep.subr.mxu0 %v220_v3  ;;  %v145_v16 = vrot.slane %v14347_v6, 7  ;;  %v147_v17 = vrot.slane %v14363_v14, 7  ;;  %v14376_v19 = vld [vmem:[%s18589_s12 + $0x38] sm:$0xff]  ;;  %v14381_v20 = vld [vmem:[%s18589_s12 + $0x40] sm:$0xff]  ;;  %v149_v21 = vrot.slane %v14371_v18, 7  ;;  %v14389_v24 = vld [vmem:[%s18589_s12 + $0x48] sm:$0xff] }
   0xe   :  { %12206 = vmatpush3.msra.mxu0 %v220_v3  ;;  %12148 = vmatprep.mubr.msk.f32.mxu0 %vm223_vm0, %v14333_v4  ;;  %v151_v22 = vrot.slane %v14376_v19, 7  ;;  %v153_v23 = vrot.slane %v14381_v20, 7  ;;  %v14394_v25 = vld [vmem:[%s18589_s12 + $0x50] sm:$0xff]  ;;  %v14399_v26 = vld [vmem:[%s18589_s12 + $0x58] sm:$0xff]  ;;  %v155_v27 = vrot.slane %v14389_v24, 7  ;;  %v14409_v30 = vld [vmem:[%s18589_s12 + $0x60] sm:$0xff]  ;;  %v14562_v34 = vsel %vm137_vm1, %v18566_v7, %v139_v9 }
   0xf   :  { %13709 = vmatpush3.msra.mxu1 %v10434_v0  ;;  %v157_v28 = vrot.slane %v14394_v25, 7  ;;  %v14414_v31 = vld [vmem:[%s18589_s12 + $0x68] sm:$0xff]  ;;  %v14419_v32 = vld [vmem:[%s18589_s12 + $0x70] sm:$0xff]  ;;  %v14429_v36 = vld [vmem:[%s18589_s12 + $0x78] sm:$0xff]  ;;  %v14570_v33 = vsel %vm137_vm1, %v139_v9, %v141_v11  ;;  %v14579_v35 = vsel %vm137_vm1, %v141_v11, %v143_v13  ;;  %v14586_v7 = vsel %vm137_vm1, %v143_v13, %v145_v16 }
  0x10   :  { %v14434_v37 = vld [vmem:[%s18589_s12 + $0x80] sm:$0xff]  ;;  %v14439_v38 = vld [vmem:[%s18589_s12 + $0x88] sm:$0xff]  ;;  %v14447_v42 = vld [vmem:[%s18589_s12 + $0x90] sm:$0xff]  ;;  %18590 = vst [vmem:[#allocation5_spill] sm:$0xff] %v14586_v7  ;;  %v14593_v9 = vsel %vm137_vm1, %v145_v16, %v147_v17  ;;  %v14600_v11 = vsel %vm137_vm1, %v147_v17, %v149_v21 }
  0x11   :  { %12149 = vmatmul.mubr.msk.f32.gmra.mrb[2].mxu0 %vm223_vm0, %v14342_v5  ;;  %v14452_v43 = vld [vmem:[%s18589_s12 + $0x98] sm:$0xff]  ;;  %v14457_v44 = vld [vmem:[%s18589_s12 + $0xa8] sm:$0xff]  ;;  %v14465_v48 = vld [vmem:[%s18589_s12 + $0xb0] sm:$0xff]  ;;  %18591 = vst [vmem:[#allocation6_spill] sm:$0xff] %v14593_v9 }
  0x12   :  { %12151 = vmatprep.mubr.msk.f32.mxu0 %vm223_vm0, %v14347_v6  ;;  %v14470_v49 = vld [vmem:[%s18589_s12 + $0xb8] sm:$0xff]  ;;  %v14475_v50 = vld [vmem:[%s18589_s12 + $0xc0] sm:$0xff]  ;;  %v180_v51 = vrot.slane %v14465_v48, 7  ;;  %v14485_v54 = vld [vmem:[%s18589_s12 + $0xc8] sm:$0xff]  ;;  %18592 = vst [vmem:[#allocation7_spill] sm:$0xff] %v14600_v11 }
  0x13   :  { %v182_v52 = vrot.slane %v14470_v49, 7  ;;  %v184_v53 = vrot.slane %v14475_v50, 7  ;;  %v14490_v55 = vld [vmem:[%s18589_s12 + $0xd0] sm:$0xff]  ;;  %v14495_v56 = vld [vmem:[%s18589_s12 + $0xd8] sm:$0xff]  ;;  %v186_v57 = vrot.slane %v14485_v54, 7  ;;  %v14505_v60 = vld [vmem:[%s18589_s12 + $0xe0] sm:$0xff] }
  0x14   :  { %v188_v58 = vrot.slane %v14490_v55, 7  ;;  %v190_v59 = vrot.slane %v14495_v56, 7  ;;  %v14510_v61 = vld [vmem:[%s18589_s12 + $0xe8] sm:$0xff]  ;;  %v14515_v62 = vld [vmem:[%s18589_s12 + $0xf0] sm:$0xff]  ;;  %v192_v63 = vrot.slane %v14505_v60, 7  ;;  %v14523_v15 = vld [vmem:[%s18589_s12 + $0xf8] sm:$0xff] }
  0x15   :  { %12152 = vmatmul.mubr.msk.f32.gmra.mrb[4].mxu0 %vm223_vm0, %v14363_v14  ;;  %v194_v0 = vrot.slane %v14510_v61, 7  ;;  %v196_v3 = vrot.slane %v14515_v62, 7  ;;  %v14528_v12 = vld [vmem:[%s18589_s12 + $0x100] sm:$0xff]  ;;  %v14533_v8 = vld [vmem:[%s18589_s12 + $0x108] sm:$0xff]  ;;  %v198_v10 = vrot.slane %v14523_v15, 7  ;;  %v14541_v45 = vld [vmem:[%s18589_s12 + $0x110] sm:$0xff] }
  0x16   :  { %12154 = vmatprep.mubr.msk.f32.mxu0 %vm223_vm0, %v14371_v18  ;;  %v200_v47 = vrot.slane %v14528_v12, 7  ;;  %v202_v46 = vrot.slane %v14533_v8, 7  ;;  %v14546_v41 = vld [vmem:[%s18589_s12 + $0x118] sm:$0xff]  ;;  %v14551_v40 = vld [vmem:[%s18588_s26 + $0x10] sm:$0xff]  ;;  %v204_v39 = vrot.slane %v14541_v45, 7  ;;  %v14605_v29 = vld [vmem:[%s18589_s12 + $0x120] sm:$0xff] }
  0x17   :  { %12267 = vmatprep.subr.mxu0 %v14551_v40  ;;  %18593 = vst [vmem:[#allocation8_spill] sm:$0xff] %v14605_v29 }
  0x19   :  { %12155 = vmatmul.mubr.msk.f32.gmra.mrb[6].mxu0 %vm223_vm0, %v14376_v19 }
  0x1a   :  { %12157 = vmatprep.mubr.msk.f32.mxu0 %vm223_vm0, %v14381_v20 }
  0x1d   :  { %12158 = vmatmul.mubr.msk.f32.gmra.mrb[8].mxu0 %vm223_vm0, %v14389_v24 }
  0x1e   :  { %12160 = vmatprep.mubr.msk.f32.mxu0 %vm223_vm0, %v14394_v25 }
  0x1f   :  { %22 = vsyncpa [#allocation3], 0  ;;  %v14612_v13 = vsel %vm137_vm1, %v149_v21, %v151_v22  ;;  %v14619_v16 = vsel %vm137_vm1, %v151_v22, %v153_v23  ;;  %v14626_v17 = vsel %vm137_vm1, %v153_v23, %v155_v27  ;;  %v14633_v21 = vsel %vm137_vm1, %v155_v27, %v157_v28  ;;  %12199 = vmatprep.mubr.msk.f32.mxu1 %vm223_vm0, %v14605_v29 }
  0x20   :  { %18594 = vst [vmem:[#allocation9_spill] sm:$0xff] %v14612_v13  ;;  %18595 = vst [vmem:[#allocation10_spill] sm:$0xff] %v14619_v16  ;;  %v14638_v13 = vld [vmem:[%s18589_s12 + $0x128] sm:$0xff]  ;;  %v18599_v22 = vrot.slane %v14399_v26, 7  ;;  %v18604_v16 = vrot.slane %v14414_v31, 7  ;;  %v18607_v9 = vrot.slane %v14419_v32, 7 }
  0x21   :  { %18596 = vst [vmem:[#allocation11_spill] sm:$0xff] %v14626_v17  ;;  %18597 = vst [vmem:[#allocation12_spill] sm:$0xff] %v14633_v21  ;;  %v18601_v17 = vrot.slane %v14409_v30, 7  ;;  %12200 = vmatmul.mubr.msk.f32.vlgmr.msra.gmra.mrb[0].mxu1 %vm223_vm0, %v14638_v13  ;;  %12161 = vmatmul.mubr.msk.f32.gmra.mrb[10].mxu0 %vm223_vm0, %v14399_v26  ;;  %vm916_vm2 = vcmask 1046528   ;;  %vm3090_vm3 = vcmask 1041408   ;;  %vm3868_vm4 = vcmask 1045504  }
  0x22   :  { %18598 = vst [vmem:[#allocation13_spill] sm:$0xff] %v14638_v13  ;;  %v14647_v23 = vsel %vm137_vm1, %v157_v28, %v18599_v22  ;;  %v18602_v27 = vmov %v18599_v22  ;;  %v18608_v7 = vmov %v18604_v16  ;;  %v18615_v13 = vrot.slane %v14439_v38, 7  ;;  %12163 = vmatprep.mubr.msk.f32.mxu0 %vm223_vm0, %v14409_v30 }
  0x23   :  { %18600 = vst [vmem:[#allocation14_spill] sm:$0xff] %v14647_v23  ;;  %v14654_v21 = vsel %vm137_vm1, %v18602_v27, %v18601_v17  ;;  %v18605_v11 = vmov %v18601_v17  ;;  %v14668_v28 = vsel %vm137_vm1, %v18608_v7, %v18607_v9  ;;  %v14677_v17 = vld [vmem:[%s18589_s12 + $0xa0] sm:$0xff]  ;;  %v18612_v7 = vrot.slane %v14434_v37, 7 }
  0x24   :  { %18603 = vst [vmem:[#allocation15_spill] sm:$0xff] %v14654_v21  ;;  %v14661_v29 = vsel %vm137_vm1, %v18605_v11, %v18604_v16  ;;  %18609 = vst [vmem:[#allocation17_spill] sm:$0xff] %v14668_v28  ;;  %v18610_v11 = vrot.slane %v14429_v36, 7  ;;  %v18611_v16 = vmov %v18607_v9  ;;  %v18618_v21 = vrot.slane %v14447_v42, 7 }
  0x25   :  { %18606 = vst [vmem:[#allocation16_spill] sm:$0xff] %v14661_v29  ;;  %v18616_v28 = vmov %v18612_v7  ;;  %v18619_v23 = vmov %v18615_v13  ;;  %12164 = vmatmul.mubr.msk.f32.gmra.mrb[12].mxu0 %vm223_vm0, %v14414_v31  ;;  %vm4554_vm5 = vcmask 130048   ;;  %vm6046_vm6 = vcmask 1043456  }
  0x26   :  { %v14684_v22 = vsel %vm137_vm1, %v18611_v16, %v18610_v11  ;;  %v18613_v9 = vmov %v18610_v11  ;;  %v14698_v29 = vsel %vm137_vm1, %v18616_v28, %v18615_v13  ;;  %v14705_v11 = vsel %vm137_vm1, %v18619_v23, %v18618_v21  ;;  %v14710_v16 = vld [vmem:[%s18589_s12 + $0x130] sm:$0xff]  ;;  %12166 = vmatprep.mubr.msk.f32.mxu0 %vm223_vm0, %v14419_v32 }
  0x27   :  { %v14691_v27 = vsel %vm137_vm1, %v18613_v9, %v18612_v7  ;;  %18617 = vst [vmem:[#allocation19_spill] sm:$0xff] %v14698_v29  ;;  %18620 = vst [vmem:[#allocation20_spill] sm:$0xff] %v14705_v11  ;;  %v18622_v7 = vrot.slane %v14452_v43, 7  ;;  %v18623_v13 = vmov %v18618_v21  ;;  %v18624_v21 = vrot.slane %v14457_v44, 7  ;;  %12202 = vmatprep.mubr.msk.f32.mxu1 %vm223_vm0, %v14710_v16 }
  0x28   :  { %18614 = vst [vmem:[#allocation18_spill] sm:$0xff] %v14691_v27  ;;  %18621 = vst [vmem:[#allocation21_spill] sm:$0xff] %v14710_v16  ;;  %v14728_v11 = vsel %vm137_vm1, %v180_v51, %v182_v52  ;;  %v14733_v29 = vsel %vm137_vm1, %v182_v52, %v184_v53  ;;  %v14736_v27 = vsel %vm137_vm1, %v184_v53, %v186_v57  ;;  %v18626_v9 = vrot.slane %v14457_v44, 7 }
  0x29   :  { %v14719_v28 = vsel %vm137_vm1, %v18623_v13, %v18622_v7  ;;  %v14725_v23 = vsel %vm137_vm1, %v18624_v21, %v180_v51  ;;  %v14739_v7 = vsel %vm137_vm1, %v186_v57, %v188_v58  ;;  %v14742_v13 = vsel %vm137_vm1, %v188_v58, %v190_v59  ;;  %v14747_v51 = vld [vmem:[%s18589_s12 + $0x138] sm:$0xff]  ;;  %12167 = vmatmul.mubr.msk.f32.gmra.mrb[14].mxu0 %vm223_vm0, %v14429_v36 }
  0x2a   :  { %18625 = vst [vmem:[#allocation22_spill] sm:$0xff] %v14747_v51  ;;  %v924_v21 = vrot.slane %v14347_v6, 1  ;;  %v18627_v52 = vrot.slane %v14677_v17, 7  ;;  %v14758_v57 = vsel %vm137_vm1, %v190_v59, %v192_v63  ;;  %v14761_v58 = vsel %vm137_vm1, %v192_v63, %v194_v0  ;;  %12203 = vmatmul.mubr.msk.f32.gmra.mrb[2].mxu1 %vm223_vm0, %v14747_v51  ;;  %12169 = vmatprep.mubr.msk.f32.mxu0 %vm223_vm0, %v14434_v37 }
  0x2b   :  { %v14768_v6 = vsel %vm137_vm1, %v194_v0, %v196_v3  ;;  %v14771_v16 = vsel %vm137_vm1, %v196_v3, %v198_v10  ;;  %v14777_v59 = vsel %vm137_vm1, %v200_v47, %v202_v46  ;;  %v926_v63 = vrot.slane %v14363_v14, 1 }
  0x2c   :  { %v14755_v53 = vsel %vm137_vm1, %v18627_v52, %v18626_v9  ;;  %v14774_v9 = vsel %vm137_vm1, %v198_v10, %v200_v47  ;;  %18628 = vst [vmem:[#allocation23_spill] sm:$0xff] %v14777_v59  ;;  %v928_v52 = vrot.slane %v14371_v18, 1  ;;  %v14784_v51 = vsel %vm137_vm1, %v202_v46, %v204_v39 }
  0x2d   :  { %18629 = vst [vmem:[#allocation24_spill] sm:$0xff] %v14784_v51  ;;  %v18630_v0 = vrot.slane %v14546_v41, 7  ;;  %v18632_v10 = vrot.slane %v14323_v2, 1  ;;  %v18633_v47 = vrot.slane %v14318_v1, 1  ;;  %v18634_v18 = vrot.slane %v14333_v4, 1  ;;  %12170 = vmatmul.mubr.msk.f32.gmra.mrb[16].mxu0 %vm223_vm0, %v14439_v38 }
  0x2e   :  { %v930_v51 = vrot.slane %v14376_v19, 1  ;;  %v932_v2 = vrot.slane %v14381_v20, 1  ;;  %v14824_v19 = vsel %vm916_vm2, %v924_v21, %v926_v63  ;;  %v934_v4 = vrot.slane %v14389_v24, 1  ;;  %12172 = vmatprep.mubr.msk.f32.mxu0 %vm223_vm0, %v14447_v42 }
  0x2f   :  { %v14789_v3 = vsel %vm137_vm1, %v204_v39, %v18630_v0  ;;  %v14796_v14 = vsel %vm916_vm2, %v18633_v47, %v18632_v10  ;;  %v18635_v59 = vmov %v18632_v10  ;;  %v18636_v39 = vrot.slane %v14342_v5, 1 }
  0x30   :  { %18631 = vst [vmem:[#allocation25_spill] sm:$0xff] %v14789_v3  ;;  %v14803_v46 = vsel %vm916_vm2, %v18635_v59, %v18634_v18  ;;  %v18637_v0 = vmov %v18634_v18  ;;  %v14827_v59 = vsel %vm916_vm2, %v926_v63, %v928_v52  ;;  %v14833_v5 = vsel %vm916_vm2, %v928_v52, %v930_v51 }
  0x31   :  { %v14813_v3 = vsel %vm916_vm2, %v18637_v0, %v18636_v39  ;;  %v18638_v10 = vmov %v18636_v39  ;;  %v936_v18 = vrot.slane %v14394_v25, 1  ;;  %v14839_v20 = vsel %vm916_vm2, %v930_v51, %v932_v2  ;;  %12173 = vmatmul.mubr.msk.f32.gmra.mrb[18].mxu0 %vm223_vm0, %v14452_v43 }
  0x32   :  { %v14818_v47 = vsel %vm916_vm2, %v18638_v10, %v924_v21  ;;  %v938_v21 = vrot.slane %v14399_v26, 1  ;;  %v14845_v24 = vsel %vm916_vm2, %v932_v2, %v934_v4  ;;  %v940_v63 = vrot.slane %v14409_v30, 1  ;;  %12175 = vmatprep.mubr.msk.f32.mxu0 %vm223_vm0, %v14677_v17 }
  0x33   :  { %v14851_v25 = vsel %vm916_vm2, %v934_v4, %v936_v18  ;;  %v942_v52 = vrot.slane %v14414_v31, 1  ;;  %v944_v51 = vrot.slane %v14419_v32, 1  ;;  %v946_v39 = vrot.slane %v14429_v36, 1 }
  0x34   :  { %v14857_v26 = vsel %vm916_vm2, %v936_v18, %v938_v21  ;;  %v14863_v30 = vsel %vm916_vm2, %v938_v21, %v940_v63  ;;  %v948_v0 = vrot.slane %v14434_v37, 1  ;;  %v950_v10 = vrot.slane %v14439_v38, 1 }
  0x35   :  { %12176 = vmatmul.mubr.msk.f32.gmra.mrb[20].mxu0 %vm223_vm0, %v14457_v44  ;;  %v14869_v31 = vsel %vm916_vm2, %v940_v63, %v942_v52  ;;  %v14875_v32 = vsel %vm916_vm2, %v942_v52, %v944_v51  ;;  %v14881_v36 = vsel %vm916_vm2, %v944_v51, %v946_v39  ;;  %v952_v2 = vrot.slane %v14447_v42, 1 }
  0x36   :  { %12178 = vmatprep.mubr.msk.f32.mxu0 %vm223_vm0, %v14465_v48  ;;  %v14887_v37 = vsel %vm916_vm2, %v946_v39, %v948_v0  ;;  %v954_v4 = vrot.slane %v14452_v43, 1  ;;  %v14893_v38 = vsel %vm916_vm2, %v948_v0, %v950_v10  ;;  %v956_v42 = vrot.slane %v14677_v17, 1 }
  0x37   :  { %v14898_v18 = vsel %vm916_vm2, %v950_v10, %v952_v2  ;;  %v957_v21 = vrot.slane %v14457_v44, 1  ;;  %v959_v52 = vrot.slane %v14465_v48, 1  ;;  %v961_v51 = vrot.slane %v14470_v49, 1 }
  0x38   :  { %v14907_v63 = vsel %vm916_vm2, %v952_v2, %v954_v4  ;;  %v963_v39 = vrot.slane %v14475_v50, 1  ;;  %v965_v48 = vrot.slane %v14485_v54, 1  ;;  %v967_v10 = vrot.slane %v14490_v55, 1 }
  0x39   :  { %12179 = vmatmul.mubr.msk.f32.gmra.mrb[22].mxu0 %vm223_vm0, %v14470_v49  ;;  %v14916_v44 = vsel %vm916_vm2, %v956_v42, %v957_v21  ;;  %v14922_v0 = vsel %vm916_vm2, %v957_v21, %v959_v52  ;;  %v14928_v49 = vsel %vm916_vm2, %v959_v52, %v961_v51  ;;  %v18639_v2 = vrot.slane %v14318_v1, 7 }
  0x3a   :  { %12181 = vmatprep.mubr.msk.f32.mxu0 %vm223_vm0, %v14475_v50  ;;  %v14934_v50 = vsel %vm916_vm2, %v961_v51, %v963_v39  ;;  %v14943_v21 = vsel %vm916_vm2, %v963_v39, %v965_v48  ;;  %v14948_v52 = vsel %vm916_vm2, %v965_v48, %v967_v10  ;;  %v973_v51 = vrot.slane %v14510_v61, 1  ;;  %v18640_v48 = vld [vmem:[#allocation5_spill] sm:$0xff] }
  0x3b   :  { %v218_v42 = vsel %vm137_vm1, 0.0, %v18639_v2  ;;  %v977_v39 = vrot.slane %v14523_v15, 1  ;;  %v985_v2 = vrot.slane %v14546_v41, 1  ;;  %vm7362_vm7 = vcmask 261120  }
  0x3c   :  { %vm14219_vm8 = vmmov 0   ;;  %vm10343_vm9 = vcmask 523264   ;;  %vm10418_vm10 = vcmask 58368  }
  0x3d   :  { %12182 = vmatmul.mubr.msk.f32.gmra.mrb[24].mxu0 %vm223_vm0, %v14485_v54  ;;  %v969_v54 = vrot.slane %v14495_v56, 1 }
  0x3e   :  { %12184 = vmatprep.mubr.msk.f32.mxu0 %vm223_vm0, %v14490_v55  ;;  %v971_v55 = vrot.slane %v14505_v60, 1 }
  0x3f   :  { %v14954_v1 = vsel %vm916_vm2, %v967_v10, %v969_v54  ;;  %v18642_v10 = vld [vmem:[#allocation7_spill] sm:$0xff] }
  0x41   :  { %12185 = vmatmul.mubr.msk.f32.gmra.mrb[26].mxu0 %vm223_vm0, %v14495_v56  ;;  %v975_v56 = vrot.slane %v14515_v62, 1 }
  0x42   :  { %12187 = vmatprep.mubr.msk.f32.mxu0 %vm223_vm0, %v14505_v60  ;;  %v14961_v60 = vsel %vm916_vm2, %v969_v54, %v971_v55  ;;  %v18644_v54 = vld [vmem:[#allocation10_spill] sm:$0xff] }
  0x45   :  { %12188 = vmatmul.mubr.msk.f32.gmra.mrb[28].mxu0 %vm223_vm0, %v14510_v61  ;;  %v979_v61 = vrot.slane %v14528_v12, 1 }
  0x46   :  { %12190 = vmatprep.mubr.msk.f32.mxu0 %vm223_vm0, %v14515_v62  ;;  %v18641_v62 = vld [vmem:[#allocation6_spill] sm:$0xff] }
  0x49   :  { %12191 = vmatmul.mubr.msk.f32.gmra.mrb[30].mxu0 %vm223_vm0, %v14523_v15  ;;  %v14979_v15 = vsel %vm916_vm2, %v975_v56, %v977_v39 }
  0x4a   :  { %12193 = vmatprep.mubr.msk.f32.mxu0 %vm223_vm0, %v14528_v12  ;;  %v14985_v12 = vsel %vm916_vm2, %v977_v39, %v979_v61  ;;  %v18647_v39 = vld [vmem:[#allocation14_spill] sm:$0xff] }
  0x4d   :  { %12194 = vmatmul.mubr.msk.f32.gmra.mrb[32].mxu0 %vm223_vm0, %v14533_v8 }
  0x4e   :  { %12196 = vmatprep.mubr.msk.f32.mxu0 %vm223_vm0, %v14541_v45 }
  0x51   :  { %12197 = vmatmul.mubr.msk.f32.gmra.mrb[34].mxu0 %vm223_vm0, %v14546_v41 }
  0x52   :  { %12207 = vmatprep.mubr.msk.f32.mxu0 %vm223_vm0, %v218_v42  ;;  %v18643_v42 = vld [vmem:[#allocation9_spill] sm:$0xff] }
  0x55   :  { %12208 = vmatmul.mubr.msk.f32.vlgmr.msra.gmra.mrb[0].mxu0 %vm223_vm0, %v14562_v34  ;;  %v14967_v34 = vsel %vm916_vm2, %v971_v55, %v973_v51 }
  0x56   :  { %12268 = vmatpush3.msra.mxu0 %v14551_v40  ;;  %12210 = vmatprep.mubr.msk.f32.mxu0 %vm223_vm0, %v14570_v33  ;;  %v14973_v40 = vsel %vm916_vm2, %v973_v51, %v975_v56  ;;  %v981_v33 = vrot.slane %v14533_v8, 1  ;;  %v18646_v56 = vld [vmem:[#allocation12_spill] sm:$0xff] }
  0x58   :  { %v14991_v8 = vsel %vm916_vm2, %v979_v61, %v981_v33  ;;  %v18648_v61 = vld [vmem:[#allocation15_spill] sm:$0xff] }
  0x59   :  { %12211 = vmatmul.mubr.msk.f32.gmra.mrb[2].mxu0 %vm223_vm0, %v14579_v35  ;;  %v983_v35 = vrot.slane %v14541_v45, 1  ;;  %v18645_v45 = vld [vmem:[#allocation11_spill] sm:$0xff] }
  0x5a   :  { %12213 = vmatprep.mubr.msk.f32.mxu0 %vm223_vm0, %v18640_v48  ;;  %v18649_v48 = vld [vmem:[#allocation16_spill] sm:$0xff] }
  0x5b   :  { %v14996_v55 = vsel %vm916_vm2, %v981_v33, %v983_v35  ;;  %v15003_v51 = vsel %vm916_vm2, %v983_v35, %v985_v2  ;;  %v18650_v33 = vld [vmem:[#allocation17_spill] sm:$0xff]  ;;  %v18652_v35 = vld [vmem:[#allocation19_spill] sm:$0xff] }
  0x5d   :  { %12214 = vmatmul.mubr.msk.f32.gmra.mrb[4].mxu0 %vm223_vm0, %v18641_v62  ;;  %v18651_v62 = vld [vmem:[#allocation18_spill] sm:$0xff] }
  0x5e   :  { %12216 = vmatprep.mubr.msk.f32.mxu0 %vm223_vm0, %v18642_v10  ;;  %v18653_v10 = vld [vmem:[#allocation20_spill] sm:$0xff] }
  0x61   :  { %12217 = vmatmul.mubr.msk.f32.gmra.mrb[6].mxu0 %vm223_vm0, %v18643_v42  ;;  %v18654_v42 = vrot.slane %v14677_v17, 7 }
  0x62   :  { %12219 = vmatprep.mubr.msk.f32.mxu0 %vm223_vm0, %v18644_v54 }
  0x63   :  { %v219_v54 = vsel %vm137_vm1, 0.0, %v18654_v42 }
  0x65   :  { %12220 = vmatmul.mubr.msk.f32.gmra.mrb[8].mxu0 %vm223_vm0, %v18645_v45 }
  0x66   :  { %12222 = vmatprep.mubr.msk.f32.mxu0 %vm223_vm0, %v18646_v56 }
  0x69   :  { %12223 = vmatmul.mubr.msk.f32.gmra.mrb[10].mxu0 %vm223_vm0, %v18647_v39 }
  0x6a   :  { %12225 = vmatprep.mubr.msk.f32.mxu0 %vm223_vm0, %v18648_v61 }
  0x6d   :  { %12226 = vmatmul.mubr.msk.f32.gmra.mrb[12].mxu0 %vm223_vm0, %v18649_v48 }
  0x6e   :  { %12228 = vmatprep.mubr.msk.f32.mxu0 %vm223_vm0, %v18650_v33 }
  0x71   :  { %12229 = vmatmul.mubr.msk.f32.gmra.mrb[14].mxu0 %vm223_vm0, %v14684_v22  ;;  %v18656_v22 = vld [vmem:[#allocation23_spill] sm:$0xff] }
  0x72   :  { %12231 = vmatprep.mubr.msk.f32.mxu0 %vm223_vm0, %v18651_v62 }
  0x75   :  { %12232 = vmatmul.mubr.msk.f32.gmra.mrb[16].mxu0 %vm223_vm0, %v18652_v35 }
  0x76   :  { %12234 = vmatprep.mubr.msk.f32.mxu0 %vm223_vm0, %v18653_v10 }
  0x79   :  { %12235 = vmatmul.mubr.msk.f32.gmra.mrb[18].mxu0 %vm223_vm0, %v14719_v28 }
  0x7a   :  { %12237 = vmatprep.mubr.msk.f32.mxu0 %vm223_vm0, %v219_v54 }
  0x7d   :  { %12238 = vmatmul.mubr.msk.f32.gmra.mrb[20].mxu0 %vm223_vm0, %v14755_v53 }
  0x7e   :  { %12240 = vmatprep.mubr.msk.f32.mxu0 %vm223_vm0, %v14725_v23  ;;  %v18659_v23 = vrot.slane %v14546_v41, 7 }
  0x81   :  { %12241 = vmatmul.mubr.msk.f32.gmra.mrb[22].mxu0 %vm223_vm0, %v14728_v11  ;;  %v18658_v11 = vld [vmem:[#allocation13_spill] sm:$0xff] }
  0x82   :  { %12243 = vmatprep.mubr.msk.f32.mxu0 %vm223_vm0, %v14733_v29  ;;  %v18655_v29 = vld [vmem:[#allocation8_spill] sm:$0xff]  ;;  %v210_v28 = vrot.slane %v18658_v11, 7 }
  0x83   :  { %v208_v17 = vrot.slane %v18655_v29, 7  ;;  %v987_v43 = vrot.slane %v18655_v29, 1 }
  0x85   :  { %12244 = vmatmul.mubr.msk.f32.gmra.mrb[24].mxu0 %vm223_vm0, %v14736_v27  ;;  %v18657_v27 = vld [vmem:[#allocation24_spill] sm:$0xff] }
  0x86   :  { %12246 = vmatprep.mubr.msk.f32.mxu0 %vm223_vm0, %v14739_v7  ;;  %v209_v7 = vsel %vm137_vm1, %v18659_v23, %v208_v17 }
  0x89   :  { %12247 = vmatmul.mubr.msk.f32.gmra.mrb[26].mxu0 %vm223_vm0, %v14742_v13  ;;  %v18660_v13 = vld [vmem:[#allocation21_spill] sm:$0xff] }
  0x8a   :  { %12249 = vmatprep.mubr.msk.f32.mxu0 %vm223_vm0, %v14758_v57  ;;  %v212_v53 = vrot.slane %v18660_v13, 7  ;;  %v211_v57 = vsel %vm137_vm1, %v208_v17, %v210_v28 }
  0x8d   :  { %12250 = vmatmul.mubr.msk.f32.gmra.mrb[28].mxu0 %vm223_vm0, %v14761_v58  ;;  %v18662_v58 = vld [vmem:[#allocation22_spill] sm:$0xff] }
  0x8e   :  { %12252 = vmatprep.mubr.msk.f32.mxu0 %vm223_vm0, %v14768_v6  ;;  %v214_v6 = vrot.slane %v18662_v58, 7 }
  0x90   :  { %v215_v45 = vsel %vm137_vm1, %v212_v53, %v214_v6 }
  0x91   :  { %12253 = vmatmul.mubr.msk.f32.gmra.mrb[30].mxu0 %vm223_vm0, %v14771_v16  ;;  %v18661_v16 = vld [vmem:[#allocation25_spill] sm:$0xff] }
  0x92   :  { %12255 = vmatprep.mubr.msk.f32.mxu0 %vm223_vm0, %v14774_v9  ;;  %v213_v9 = vsel %vm137_vm1, %v210_v28, %v212_v53 }
  0x95   :  { %12256 = vmatmul.mubr.msk.f32.gmra.mrb[32].mxu0 %vm223_vm0, %v18656_v22 }
  0x96   :  { %12258 = vmatprep.mubr.msk.f32.mxu0 %vm223_vm0, %v18657_v27 }
  0x99   :  { %12259 = vmatmul.mubr.msk.f32.gmra.mrb[34].mxu0 %vm223_vm0, %v18661_v16 }
  0x9a   :  { %12261 = vmatprep.mubr.msk.f32.mxu0 %vm223_vm0, %v209_v7 }
  0x9d   :  { %12262 = vmatmul.mubr.msk.f32.gmra.mrb[36].mxu0 %vm223_vm0, %v211_v57 }
  0x9e   :  { %12264 = vmatprep.mubr.msk.f32.mxu0 %vm223_vm0, %v213_v9 }
  0xa1   :  { %12265 = vmatmul.mubr.msk.f32.gmra.mrb[38].mxu0 %vm223_vm0, %v215_v45 }
  0xa2   :  { %12269 = vmatprep.mubr.msk.f32.mxu0 %vm223_vm0, %v14796_v14  ;;  %v989_v14 = vrot.slane %v18658_v11, 1 }
  0xa5   :  { %12270 = vmatmul.mubr.msk.f32.vlgmr.msra.gmra.mrb[0].mxu0 %vm223_vm0, %v14803_v46  ;;  %v988_v46 = vsel %vm916_vm2, %v985_v2, %v987_v43 }
  0xa6   :  { %12272 = vmatprep.mubr.msk.f32.mxu0 %vm223_vm0, %v14813_v3  ;;  %v997_v3 = vsel %vm916_vm2, %v954_v4, 0.0 }
  0xa9   :  { %12273 = vmatmul.mubr.msk.f32.gmra.mrb[2].mxu0 %vm223_vm0, %v14818_v47  ;;  %v991_v47 = vrot.slane %v18660_v13, 1 }
  0xaa   :  { %12275 = vmatprep.mubr.msk.f32.mxu0 %vm223_vm0, %v14824_v19  ;;  %v990_v19 = vsel %vm916_vm2, %v987_v43, %v989_v14 }
  0xad   :  { %12276 = vmatmul.mubr.msk.f32.gmra.mrb[4].mxu0 %vm223_vm0, %v14827_v59  ;;  %v993_v59 = vrot.slane %v18662_v58, 1 }
  0xae   :  { %12278 = vmatprep.mubr.msk.f32.mxu0 %vm223_vm0, %v14833_v5  ;;  %v992_v5 = vsel %vm916_vm2, %v989_v14, %v991_v47 }
  0xaf   :  { %v998_v41 = vsel %vm916_vm2, %v993_v59, 0.0 }
  0xb1   :  { %12279 = vmatmul.mubr.msk.f32.gmra.mrb[6].mxu0 %vm223_vm0, %v14839_v20  ;;  %v994_v20 = vsel %vm916_vm2, %v991_v47, %v993_v59 }
  0xb2   :  { %12281 = vmatprep.mubr.msk.f32.mxu0 %vm223_vm0, %v14845_v24  ;;  %v10557_v24 = vld [vmem:[%s18549_s3 + $0x8] sm:$0xff] }
  0xb3   :  { %12329 = vmatprep.subr.mxu1 %v10557_v24 }
  0xb4   :  { %12330 = vmatpush3.msra.mxu1 %v10557_v24 }
  0xb5   :  { %12282 = vmatmul.mubr.msk.f32.gmra.mrb[8].mxu0 %vm223_vm0, %v14851_v25  ;;  %v1597_v25 = vld [vmem:[%s18549_s3] sm:$0xff] }
  0xb6   :  { %12284 = vmatprep.mubr.msk.f32.mxu0 %vm223_vm0, %v14857_v26  ;;  %12391 = vmatprep.subr.mxu1 %v1597_v25 }
  0xb9   :  { %12285 = vmatmul.mubr.msk.f32.gmra.mrb[10].mxu0 %vm223_vm0, %v14863_v30 }
  0xba   :  { %12287 = vmatprep.mubr.msk.f32.mxu0 %vm223_vm0, %v14869_v31 }
  0xbd   :  { %12288 = vmatmul.mubr.msk.f32.gmra.mrb[12].mxu0 %vm223_vm0, %v14875_v32 }
  0xbe   :  { %12290 = vmatprep.mubr.msk.f32.mxu0 %vm223_vm0, %v14881_v36  ;;  %v15178_v36 = vld [vmem:[%s18548_s2] ss:$0 sm:$0xff] }
  0xc1   :  { %12291 = vmatmul.mubr.msk.f32.gmra.mrb[14].mxu0 %vm223_vm0, %v14887_v37 }
  0xc2   :  { %12293 = vmatprep.mubr.msk.f32.mxu0 %vm223_vm0, %v14893_v38 }
  0xc5   :  { %12294 = vmatmul.mubr.msk.f32.gmra.mrb[16].mxu0 %vm223_vm0, %v14898_v18 }
  0xc6   :  { %12296 = vmatprep.mubr.msk.f32.mxu0 %vm223_vm0, %v14907_v63 }
  0xc9   :  { %12297 = vmatmul.mubr.msk.f32.gmra.mrb[18].mxu0 %vm223_vm0, %v997_v3 }
  0xca   :  { %12299 = vmatprep.mubr.msk.f32.mxu0 %vm223_vm0, %v14916_v44 }
  0xcd   :  { %12300 = vmatmul.mubr.msk.f32.gmra.mrb[20].mxu0 %vm223_vm0, %v14922_v0 }
  0xce   :  { %12302 = vmatprep.mubr.msk.f32.mxu0 %vm223_vm0, %v14928_v49 }
  0xd1   :  { %12303 = vmatmul.mubr.msk.f32.gmra.mrb[22].mxu0 %vm223_vm0, %v14934_v50 }
  0xd2   :  { %12305 = vmatprep.mubr.msk.f32.mxu0 %vm223_vm0, %v14943_v21 }
  0xd5   :  { %12306 = vmatmul.mubr.msk.f32.gmra.mrb[24].mxu0 %vm223_vm0, %v14948_v52 }
  0xd6   :  { %12308 = vmatprep.mubr.msk.f32.mxu0 %vm223_vm0, %v14954_v1 }
  0xd9   :  { %12309 = vmatmul.mubr.msk.f32.gmra.mrb[26].mxu0 %vm223_vm0, %v14961_v60 }
  0xda   :  { %12311 = vmatprep.mubr.msk.f32.mxu0 %vm223_vm0, %v14967_v34 }
  0xdd   :  { %12312 = vmatmul.mubr.msk.f32.gmra.mrb[28].mxu0 %vm223_vm0, %v14973_v40  ;;  %v15193_v40 = vld [vmem:[%s18549_s3 + $0x10] sm:$0xff] }
  0xde   :  { %12314 = vmatprep.mubr.msk.f32.mxu0 %vm223_vm0, %v14979_v15 }
  0xe1   :  { %12315 = vmatmul.mubr.msk.f32.gmra.mrb[30].mxu0 %vm223_vm0, %v14985_v12 }
  0xe2   :  { %12317 = vmatprep.mubr.msk.f32.mxu0 %vm223_vm0, %v14991_v8 }
  0xe5   :  { %12318 = vmatmul.mubr.msk.f32.gmra.mrb[32].mxu0 %vm223_vm0, %v14996_v55 }
  0xe6   :  { %12320 = vmatprep.mubr.msk.f32.mxu0 %vm223_vm0, %v15003_v51 }
  0xe9   :  { %12321 = vmatmul.mubr.msk.f32.gmra.mrb[34].mxu0 %vm223_vm0, %v988_v46 }
  0xea   :  { %12323 = vmatprep.mubr.msk.f32.mxu0 %vm223_vm0, %v990_v19 }
  0xed   :  { %12324 = vmatmul.mubr.msk.f32.gmra.mrb[36].mxu0 %vm223_vm0, %v992_v5 }
  0xee   :  { %12326 = vmatprep.mubr.msk.f32.mxu0 %vm223_vm0, %v994_v20 }
  0xf1   :  { %12327 = vmatmul.mubr.msk.f32.gmra.mrb[38].mxu0 %vm223_vm0, %v998_v41 }
  0xf4   :  { %v15167_v26 = vpop.f32.mrb[0].mxu1 }
  0xf5   :  { %v15169_v30 = vpop.f32.mrb[1].mxu1 }
  0xfd   :  { %v15171_v31 = vpop.f32.mrb[2].mxu1 }
  0xfe   :  { %v15173_v32 = vpop.f32.mrb[3].mxu1 }
 0x178   :  { %v12271_v37 = vpop.f32.mrb[0].mxu0 }
 0x179   :  { %v1396_v4 = vadd.f32 %v12271_v37, %v15178_v36  ;;  %v1149_v38 = vpop.f32.mrb[1].mxu0 }
 0x17a   :  { %v1395_v18 = vadd.f32 %v15178_v36, %v1149_v38 }
 0x17b   :  { %v1436_v63 = vmax.f32 %v1396_v4, 0.0 }
 0x17c   :  { %v15182_v44 = vmax.f32 %v1395_v18, 0.0  ;;  %v12274_v0 = vpop.f32.mrb[2].mxu0 }
 0x17d   :  { %v1516_v49 = vrot.slane %v1436_v63, 7  ;;  %v2293_v50 = vrot.slane %v1436_v63, 1  ;;  %v1398_v21 = vadd.f32 %v12274_v0, %v15178_v36  ;;  %v1159_v52 = vpop.f32.mrb[3].mxu0 }
 0x17e   :  { %v2292_v1 = vrot.slane %v15182_v44, 1  ;;  %v1397_v60 = vadd.f32 %v15178_v36, %v1159_v52  ;;  %12331 = vmatprep.mubr.msk.f32.mxu1 %vm223_vm0, %v15182_v44  ;;  %v18576_v34 = vrot.slane %v15182_v44, 7 }
 0x17f   :  { %v1438_v15 = vmax.f32 %v1398_v21, 0.0  ;;  %12332 = vmatmul.mubr.msk.f32.vlgmr.msra.gmra.mrb[4].mxu1 %vm223_vm0, %v1436_v63 }
 0x180   :  { %v1437_v12 = vmax.f32 %v1397_v60, 0.0  ;;  %v12277_v2 = vpop.f32.mrb[4].mxu0  ;;  %12392 = vmatpush3.msra.mxu1 %v1597_v25  ;;  %v15199_v8 = vsel %vm137_vm1, %v18576_v34, %v1516_v49  ;;  %v15202_v55 = vsel %vm916_vm2, %v2292_v1, %v2293_v50 }
 0x181   :  { %v1520_v51 = vrot.slane %v1438_v15, 7  ;;  %v2297_v56 = vrot.slane %v1438_v15, 1  ;;  %v1400_v39 = vadd.f32 %v12277_v2, %v15178_v36  ;;  %v1169_v61 = vpop.f32.mrb[5].mxu0  ;;  %12453 = vmatprep.subr.mxu1 %v15193_v40 }
 0x182   :  { %v1518_v48 = vrot.slane %v1437_v12, 7  ;;  %v2295_v33 = vrot.slane %v1437_v12, 1  ;;  %v1399_v62 = vadd.f32 %v15178_v36, %v1169_v61  ;;  %12334 = vmatprep.mubr.msk.f32.mxu1 %vm223_vm0, %v1437_v12 }
 0x183   :  { %v1440_v35 = vmax.f32 %v1400_v39, 0.0  ;;  %12335 = vmatmul.mubr.msk.f32.gmra.mrb[6].mxu1 %vm223_vm0, %v1438_v15 }
 0x184   :  { %v1439_v10 = vmax.f32 %v1399_v62, 0.0  ;;  %v12280_v42 = vpop.f32.mrb[6].mxu0  ;;  %v15210_v54 = vsel %vm137_vm1, %v1516_v49, %v1518_v48  ;;  %v15213_v29 = vsel %vm137_vm1, %v1518_v48, %v1520_v51  ;;  %v15216_v17 = vsel %vm916_vm2, %v2293_v50, %v2295_v33 }
 0x185   :  { %v1524_v22 = vrot.slane %v1440_v35, 7  ;;  %v2301_v27 = vrot.slane %v1440_v35, 1  ;;  %v1402_v11 = vadd.f32 %v12280_v42, %v15178_v36  ;;  %v1179_v28 = vpop.f32.mrb[7].mxu0  ;;  %v15220_v23 = vsel %vm916_vm2, %v2295_v33, %v2297_v56 }
 0x186   :  { %v1522_v7 = vrot.slane %v1439_v10, 7  ;;  %v2299_v13 = vrot.slane %v1439_v10, 1  ;;  %v1401_v53 = vadd.f32 %v15178_v36, %v1179_v28  ;;  %12337 = vmatprep.mubr.msk.f32.mxu1 %vm223_vm0, %v1439_v10 }
 0x187   :  { %v1442_v16 = vmax.f32 %v1402_v11, 0.0  ;;  %12338 = vmatmul.mubr.msk.f32.gmra.mrb[8].mxu1 %vm223_vm0, %v1440_v35 }
 0x188   :  { %v1441_v57 = vmax.f32 %v1401_v53, 0.0  ;;  %v12283_v58 = vpop.f32.mrb[8].mxu0  ;;  %v15226_v6 = vsel %vm137_vm1, %v1520_v51, %v1522_v7  ;;  %v15229_v9 = vsel %vm137_vm1, %v1522_v7, %v1524_v22  ;;  %v15232_v45 = vsel %vm916_vm2, %v2297_v56, %v2299_v13 }
 0x189   :  { %v1528_v3 = vrot.slane %v1442_v16, 7  ;;  %v2305_v43 = vrot.slane %v1442_v16, 1  ;;  %v1404_v14 = vadd.f32 %v12283_v58, %v15178_v36  ;;  %v1189_v46 = vpop.f32.mrb[9].mxu0  ;;  %v15236_v47 = vsel %vm916_vm2, %v2299_v13, %v2301_v27 }
 0x18a   :  { %18663 = vst [vmem:[#allocation5_spill] sm:$0xff] %v15236_v47  ;;  %v1526_v19 = vrot.slane %v1441_v57, 7  ;;  %v2303_v59 = vrot.slane %v1441_v57, 1  ;;  %v1403_v5 = vadd.f32 %v15178_v36, %v1189_v46  ;;  %12340 = vmatprep.mubr.msk.f32.mxu1 %vm223_vm0, %v1441_v57 }
 0x18b   :  { %v1444_v20 = vmax.f32 %v1404_v14, 0.0  ;;  %12341 = vmatmul.mubr.msk.f32.gmra.mrb[10].mxu1 %vm223_vm0, %v1442_v16 }
 0x18c   :  { %v1443_v41 = vmax.f32 %v1403_v5, 0.0  ;;  %v12286_v24 = vpop.f32.mrb[10].mxu0  ;;  %v15242_v25 = vsel %vm137_vm1, %v1524_v22, %v1526_v19  ;;  %v15245_v37 = vsel %vm137_vm1, %v1526_v19, %v1528_v3  ;;  %v15248_v4 = vsel %vm916_vm2, %v2301_v27, %v2303_v59 }
 0x18d   :  { %18664 = vst [vmem:[#allocation6_spill] sm:$0xff] %v15248_v4  ;;  %v1532_v38 = vrot.slane %v1444_v20, 7  ;;  %v2309_v18 = vrot.slane %v1444_v20, 1  ;;  %v1406_v63 = vadd.f32 %v12286_v24, %v15178_v36  ;;  %v1199_v0 = vpop.f32.mrb[11].mxu0  ;;  %v15252_v49 = vsel %vm916_vm2, %v2303_v59, %v2305_v43 }
 0x18e   :  { %18665 = vst [vmem:[#allocation7_spill] sm:$0xff] %v15252_v49  ;;  %v1530_v50 = vrot.slane %v1443_v41, 7  ;;  %v2307_v21 = vrot.slane %v1443_v41, 1  ;;  %v1405_v52 = vadd.f32 %v15178_v36, %v1199_v0  ;;  %12343 = vmatprep.mubr.msk.f32.mxu1 %vm223_vm0, %v1443_v41 }
 0x18f   :  { %v1446_v1 = vmax.f32 %v1406_v63, 0.0  ;;  %12344 = vmatmul.mubr.msk.f32.gmra.mrb[12].mxu1 %vm223_vm0, %v1444_v20 }
 0x190   :  { %v1445_v60 = vmax.f32 %v1405_v52, 0.0  ;;  %v12289_v15 = vpop.f32.mrb[12].mxu0  ;;  %v15258_v12 = vsel %vm137_vm1, %v1528_v3, %v1530_v50  ;;  %v15261_v2 = vsel %vm137_vm1, %v1530_v50, %v1532_v38  ;;  %v15264_v51 = vsel %vm916_vm2, %v2305_v43, %v2307_v21 }
 0x191   :  { %18666 = vst [vmem:[#allocation9_spill] sm:$0xff] %v15264_v51  ;;  %v1536_v56 = vrot.slane %v1446_v1, 7  ;;  %v2313_v39 = vrot.slane %v1446_v1, 1  ;;  %v1408_v61 = vadd.f32 %v12289_v15, %v15178_v36  ;;  %v1209_v48 = vpop.f32.mrb[13].mxu0  ;;  %v15268_v33 = vsel %vm916_vm2, %v2307_v21, %v2309_v18 }
 0x192   :  { %18667 = vst [vmem:[#allocation10_spill] sm:$0xff] %v15268_v33  ;;  %v1534_v62 = vrot.slane %v1445_v60, 7  ;;  %v2311_v35 = vrot.slane %v1445_v60, 1  ;;  %v1407_v10 = vadd.f32 %v15178_v36, %v1209_v48  ;;  %12346 = vmatprep.mubr.msk.f32.mxu1 %vm223_vm0, %v1445_v60 }
 0x193   :  { %v1448_v42 = vmax.f32 %v1408_v61, 0.0  ;;  %12347 = vmatmul.mubr.msk.f32.gmra.mrb[14].mxu1 %vm223_vm0, %v1446_v1 }
 0x194   :  { %v1447_v22 = vmax.f32 %v1407_v10, 0.0  ;;  %v12292_v27 = vpop.f32.mrb[14].mxu0  ;;  %v15274_v11 = vsel %vm137_vm1, %v1532_v38, %v1534_v62  ;;  %v15277_v28 = vsel %vm137_vm1, %v1534_v62, %v1536_v56  ;;  %v15280_v7 = vsel %vm916_vm2, %v2309_v18, %v2311_v35 }
 0x195   :  { %18668 = vst [vmem:[#allocation11_spill] sm:$0xff] %v15280_v7  ;;  %v1540_v13 = vrot.slane %v1448_v42, 7  ;;  %v2317_v53 = vrot.slane %v1448_v42, 1  ;;  %v1410_v16 = vadd.f32 %v12292_v27, %v15178_v36  ;;  %v1219_v57 = vpop.f32.mrb[15].mxu0  ;;  %v15284_v58 = vsel %vm916_vm2, %v2311_v35, %v2313_v39 }
 0x196   :  { %18669 = vst [vmem:[#allocation12_spill] sm:$0xff] %v15284_v58  ;;  %v1538_v3 = vrot.slane %v1447_v22, 7  ;;  %v2315_v43 = vrot.slane %v1447_v22, 1  ;;  %v1409_v14 = vadd.f32 %v15178_v36, %v1219_v57  ;;  %12349 = vmatprep.mubr.msk.f32.mxu1 %vm223_vm0, %v1447_v22 }
 0x197   :  { %v1450_v46 = vmax.f32 %v1410_v16, 0.0  ;;  %12350 = vmatmul.mubr.msk.f32.gmra.mrb[16].mxu1 %vm223_vm0, %v1448_v42 }
 0x198   :  { %v1449_v19 = vmax.f32 %v1409_v14, 0.0  ;;  %v12295_v59 = vpop.f32.mrb[16].mxu0  ;;  %v15290_v5 = vsel %vm137_vm1, %v1536_v56, %v1538_v3  ;;  %v15293_v20 = vsel %vm137_vm1, %v1538_v3, %v1540_v13  ;;  %v15296_v41 = vsel %vm916_vm2, %v2313_v39, %v2315_v43 }
 0x199   :  { %18670 = vst [vmem:[#allocation14_spill] sm:$0xff] %v15296_v41  ;;  %v1544_v24 = vrot.slane %v1450_v46, 7  ;;  %v2321_v38 = vrot.slane %v1450_v46, 1  ;;  %v1412_v18 = vadd.f32 %v12295_v59, %v15178_v36  ;;  %v1229_v63 = vpop.f32.mrb[17].mxu0  ;;  %v15300_v0 = vsel %vm916_vm2, %v2315_v43, %v2317_v53 }
 0x19a   :  { %18671 = vst [vmem:[#allocation15_spill] sm:$0xff] %v15300_v0  ;;  %v1542_v50 = vrot.slane %v1449_v19, 7  ;;  %v2319_v21 = vrot.slane %v1449_v19, 1  ;;  %v1411_v52 = vadd.f32 %v15178_v36, %v1229_v63  ;;  %12352 = vmatprep.mubr.msk.f32.mxu1 %vm223_vm0, %v1449_v19 }
 0x19b   :  { %v1452_v1 = vmax.f32 %v1412_v18, 0.0  ;;  %12353 = vmatmul.mubr.msk.f32.gmra.mrb[18].mxu1 %vm223_vm0, %v1450_v46 }
 0x19c   :  { %v1451_v60 = vmax.f32 %v1411_v52, 0.0  ;;  %v12298_v15 = vpop.f32.mrb[18].mxu0  ;;  %v15306_v56 = vsel %vm137_vm1, %v1540_v13, %v1542_v50  ;;  %v15309_v39 = vsel %vm137_vm1, %v1542_v50, %v1544_v24  ;;  %v15312_v61 = vsel %vm916_vm2, %v2317_v53, %v2319_v21 }
 0x19d   :  { %18672 = vst [vmem:[#allocation16_spill] sm:$0xff] %v15312_v61  ;;  %v1548_v48 = vrot.slane %v1452_v1, 7  ;;  %v2325_v62 = vrot.slane %v1452_v1, 1  ;;  %v1414_v35 = vadd.f32 %v12298_v15, %v15178_v36  ;;  %v1239_v10 = vpop.f32.mrb[19].mxu0  ;;  %v15316_v42 = vsel %vm916_vm2, %v2319_v21, %v2321_v38 }
 0x19e   :  { %18673 = vst [vmem:[#allocation17_spill] sm:$0xff] %v15316_v42  ;;  %v1546_v22 = vrot.slane %v1451_v60, 7  ;;  %v2323_v27 = vrot.slane %v1451_v60, 1  ;;  %v1413_v16 = vadd.f32 %v15178_v36, %v1239_v10  ;;  %12355 = vmatprep.mubr.msk.f32.mxu1 %vm223_vm0, %v1451_v60 }
 0x19f   :  { %v15320_v13 = vmax.f32 %v1414_v35, 0.0  ;;  %12356 = vmatmul.mubr.msk.f32.gmra.mrb[20].mxu1 %vm223_vm0, %v1452_v1 }
 0x1a0   :  { %v1453_v53 = vmax.f32 %v1413_v16, 0.0  ;;  %v12301_v57 = vpop.f32.mrb[20].mxu0  ;;  %v15324_v3 = vsel %vm137_vm1, %v1544_v24, %v1546_v22  ;;  %v15327_v43 = vsel %vm137_vm1, %v1546_v22, %v1548_v48  ;;  %v15330_v14 = vsel %vm916_vm2, %v2321_v38, %v2323_v27 }
 0x1a1   :  { %18674 = vst [vmem:[#allocation18_spill] sm:$0xff] %v15320_v13  ;;  %18675 = vst [vmem:[#allocation19_spill] sm:$0xff] %v15330_v14  ;;  %v1552_v46 = vrot.slane %v15320_v13, 7  ;;  %v18575_v19 = vrot.slane %v15320_v13, 1  ;;  %v1416_v59 = vadd.f32 %v12301_v57, %v15178_v36  ;;  %v1249_v18 = vpop.f32.mrb[21].mxu0  ;;  %v15336_v63 = vsel %vm916_vm2, %v2323_v27, %v2325_v62 }
 0x1a2   :  { %18676 = vst [vmem:[#allocation20_spill] sm:$0xff] %v15336_v63  ;;  %v1550_v50 = vrot.slane %v1453_v53, 7  ;;  %v2327_v21 = vrot.slane %v1453_v53, 1  ;;  %v1415_v24 = vadd.f32 %v15178_v36, %v1249_v18  ;;  %12358 = vmatprep.mubr.msk.f32.mxu1 %vm223_vm0, %v1453_v53 }
 0x1a3   :  { %v1456_v52 = vmax.f32 %v1416_v59, 0.0  ;;  %12359 = vmatmul.mubr.msk.f32.gmra.mrb[22].mxu1 %vm223_vm0, %v15320_v13 }
 0x1a4   :  { %v15342_v38 = vmax.f32 %v1415_v24, 0.0  ;;  %v12304_v1 = vpop.f32.mrb[22].mxu0  ;;  %v15345_v60 = vsel %vm137_vm1, %v1548_v48, %v1550_v50  ;;  %v15348_v15 = vsel %vm137_vm1, %v1550_v50, %v1552_v46  ;;  %v15351_v35 = vsel %vm916_vm2, %v2325_v62, %v2327_v21 }
 0x1a5   :  { %18677 = vst [vmem:[#allocation8_spill] sm:$0xff] %v15351_v35  ;;  %v1555_v10 = vrot.slane %v1456_v52, 7  ;;  %v2332_v22 = vrot.slane %v1456_v52, 1  ;;  %v1418_v27 = vadd.f32 %v12304_v1, %v15178_v36  ;;  %v1259_v16 = vpop.f32.mrb[23].mxu0  ;;  %v15357_v53 = vsel %vm916_vm2, %v2327_v21, %v18575_v19 }
 0x1a6   :  { %18678 = vst [vmem:[#allocation23_spill] sm:$0xff] %v15357_v53  ;;  %v2331_v57 = vrot.slane %v15342_v38, 1  ;;  %v1417_v48 = vadd.f32 %v15178_v36, %v1259_v16  ;;  %12361 = vmatprep.mubr.msk.f32.mxu1 %vm223_vm0, %v15342_v38  ;;  %v18578_v62 = vrot.slane %v15342_v38, 7 }
 0x1a7   :  { %v1458_v46 = vmax.f32 %v1418_v27, 0.0  ;;  %12362 = vmatmul.mubr.msk.f32.gmra.mrb[24].mxu1 %vm223_vm0, %v1456_v52 }
 0x1a8   :  { %v1457_v59 = vmax.f32 %v1417_v48, 0.0  ;;  %v12307_v18 = vpop.f32.mrb[24].mxu0  ;;  %v15368_v50 = vsel %vm137_vm1, %v18578_v62, %v1555_v10  ;;  %v15371_v21 = vsel %vm916_vm2, %v2331_v57, %v2332_v22 }
 0x1a9   :  { %18679 = vst [vmem:[#allocation24_spill] sm:$0xff] %v15371_v21  ;;  %v1559_v24 = vrot.slane %v1458_v46, 7  ;;  %v2336_v1 = vrot.slane %v1458_v46, 1  ;;  %v1420_v16 = vadd.f32 %v12307_v18, %v15178_v36  ;;  %v1269_v19 = vpop.f32.mrb[25].mxu0 }
 0x1aa   :  { %v1557_v34 = vrot.slane %v1457_v59, 7  ;;  %v2334_v13 = vrot.slane %v1457_v59, 1  ;;  %v1419_v27 = vadd.f32 %v15178_v36, %v1269_v19  ;;  %12364 = vmatprep.mubr.msk.f32.mxu1 %vm223_vm0, %v1457_v59 }
 0x1ab   :  { %v1460_v52 = vmax.f32 %v1420_v16, 0.0  ;;  %12365 = vmatmul.mubr.msk.f32.gmra.mrb[26].mxu1 %vm223_vm0, %v1458_v46 }
 0x1ac   :  { %v1459_v48 = vmax.f32 %v1419_v27, 0.0  ;;  %v12310_v62 = vpop.f32.mrb[26].mxu0  ;;  %v15378_v53 = vsel %vm137_vm1, %v1555_v10, %v1557_v34  ;;  %v15381_v57 = vsel %vm137_vm1, %v1557_v34, %v1559_v24  ;;  %v15384_v18 = vsel %vm916_vm2, %v2332_v22, %v2334_v13 }
 0x1ad   :  { %18680 = vst [vmem:[#allocation13_spill] sm:$0xff] %v15384_v18  ;;  %v1563_v21 = vrot.slane %v1460_v52, 7  ;;  %v2340_v35 = vrot.slane %v1460_v52, 1  ;;  %v1422_v19 = vadd.f32 %v12310_v62, %v15178_v36  ;;  %v1279_v63 = vpop.f32.mrb[27].mxu0  ;;  %v15388_v59 = vsel %vm916_vm2, %v2334_v13, %v2336_v1 }
 0x1ae   :  { %18681 = vst [vmem:[#allocation21_spill] sm:$0xff] %v15388_v59  ;;  %v1561_v46 = vrot.slane %v1459_v48, 7  ;;  %v2338_v16 = vrot.slane %v1459_v48, 1  ;;  %v1421_v27 = vadd.f32 %v15178_v36, %v1279_v63  ;;  %12367 = vmatprep.mubr.msk.f32.mxu1 %vm223_vm0, %v1459_v48 }
 0x1af   :  { %v1462_v10 = vmax.f32 %v1422_v19, 0.0  ;;  %12368 = vmatmul.mubr.msk.f32.gmra.mrb[28].mxu1 %vm223_vm0, %v1460_v52 }
 0x1b0   :  { %v1461_v34 = vmax.f32 %v1421_v27, 0.0  ;;  %v12313_v22 = vpop.f32.mrb[28].mxu0  ;;  %v15394_v18 = vsel %vm137_vm1, %v1559_v24, %v1561_v46  ;;  %v15397_v62 = vsel %vm137_vm1, %v1561_v46, %v1563_v21  ;;  %v15400_v13 = vsel %vm916_vm2, %v2336_v1, %v2338_v16 }
 0x1b1   :  { %18682 = vst [vmem:[#allocation25_spill] sm:$0xff] %v15400_v13  ;;  %v1567_v59 = vrot.slane %v1462_v10, 7  ;;  %v2344_v14 = vrot.slane %v1462_v10, 1  ;;  %v1424_v63 = vadd.f32 %v12313_v22, %v15178_v36  ;;  %v1289_v42 = vpop.f32.mrb[29].mxu0  ;;  %v15404_v48 = vsel %vm916_vm2, %v2338_v16, %v2340_v35 }
 0x1b2   :  { %18683 = vst [vmem:[#allocation22_spill] sm:$0xff] %v15404_v48  ;;  %v1565_v52 = vrot.slane %v1461_v34, 7  ;;  %v2342_v19 = vrot.slane %v1461_v34, 1  ;;  %v1423_v27 = vadd.f32 %v15178_v36, %v1289_v42  ;;  %12370 = vmatprep.mubr.msk.f32.mxu1 %vm223_vm0, %v1461_v34 }
 0x1b3   :  { %v1464_v24 = vmax.f32 %v1424_v63, 0.0  ;;  %12371 = vmatmul.mubr.msk.f32.gmra.mrb[30].mxu1 %vm223_vm0, %v1462_v10 }
 0x1b4   :  { %v1463_v46 = vmax.f32 %v1423_v27, 0.0  ;;  %v12316_v1 = vpop.f32.mrb[30].mxu0  ;;  %v15410_v13 = vsel %vm137_vm1, %v1563_v21, %v1565_v52  ;;  %v15413_v22 = vsel %vm137_vm1, %v1565_v52, %v1567_v59  ;;  %v15416_v16 = vsel %vm916_vm2, %v2340_v35, %v2342_v19 }
 0x1b5   :  { %18684 = vst [vmem:[#allocation26_spill] sm:$0xff] %v15416_v16  ;;  %v1571_v48 = vrot.slane %v1464_v24, 7  ;;  %v2348_v61 = vrot.slane %v1464_v24, 1  ;;  %v1426_v42 = vadd.f32 %v12316_v1, %v15178_v36  ;;  %v1299_v0 = vpop.f32.mrb[31].mxu0  ;;  %v15420_v34 = vsel %vm916_vm2, %v2342_v19, %v2344_v14 }
 0x1b6   :  { %18685 = vst [vmem:[#allocation27_spill] sm:$0xff] %v15420_v34  ;;  %v1569_v10 = vrot.slane %v1463_v46, 7  ;;  %v2346_v63 = vrot.slane %v1463_v46, 1  ;;  %v1425_v27 = vadd.f32 %v15178_v36, %v1299_v0  ;;  %12373 = vmatprep.mubr.msk.f32.mxu1 %vm223_vm0, %v1463_v46 }
 0x1b7   :  { %v1466_v21 = vmax.f32 %v1426_v42, 0.0  ;;  %12374 = vmatmul.mubr.msk.f32.gmra.mrb[32].mxu1 %vm223_vm0, %v1464_v24 }
 0x1b8   :  { %v1465_v52 = vmax.f32 %v1425_v27, 0.0  ;;  %v12319_v35 = vpop.f32.mrb[32].mxu0  ;;  %v15426_v16 = vsel %vm137_vm1, %v1567_v59, %v1569_v10  ;;  %v15429_v1 = vsel %vm137_vm1, %v1569_v10, %v1571_v48  ;;  %v15432_v19 = vsel %vm916_vm2, %v2344_v14, %v2346_v63 }
 0x1b9   :  { %18686 = vst [vmem:[#allocation28_spill] sm:$0xff] %v15432_v19  ;;  %v1575_v34 = vrot.slane %v1466_v21, 7  ;;  %v2352_v41 = vrot.slane %v1466_v21, 1  ;;  %v1428_v0 = vadd.f32 %v12319_v35, %v15178_v36  ;;  %v1309_v58 = vpop.f32.mrb[33].mxu0  ;;  %v15436_v46 = vsel %vm916_vm2, %v2346_v63, %v2348_v61 }
 0x1ba   :  { %18687 = vst [vmem:[#allocation29_spill] sm:$0xff] %v15436_v46  ;;  %v1573_v24 = vrot.slane %v1465_v52, 7  ;;  %v2350_v42 = vrot.slane %v1465_v52, 1  ;;  %v1427_v27 = vadd.f32 %v15178_v36, %v1309_v58  ;;  %12376 = vmatprep.mubr.msk.f32.mxu1 %vm223_vm0, %v1465_v52 }
 0x1bb   :  { %v1468_v59 = vmax.f32 %v1428_v0, 0.0  ;;  %12377 = vmatmul.mubr.msk.f32.gmra.mrb[34].mxu1 %vm223_vm0, %v1466_v21 }
 0x1bc   :  { %v1467_v10 = vmax.f32 %v1427_v27, 0.0  ;;  %v12322_v14 = vpop.f32.mrb[34].mxu0  ;;  %v15442_v19 = vsel %vm137_vm1, %v1571_v48, %v1573_v24  ;;  %v15445_v35 = vsel %vm137_vm1, %v1573_v24, %v1575_v34  ;;  %v15448_v63 = vsel %vm916_vm2, %v2348_v61, %v2350_v42 }
 0x1bd   :  { %18688 = vst [vmem:[#allocation30_spill] sm:$0xff] %v15448_v63  ;;  %v1579_v46 = vrot.slane %v1468_v59, 7  ;;  %v2356_v7 = vrot.slane %v1468_v59, 1  ;;  %v1430_v58 = vadd.f32 %v12322_v14, %v15178_v36  ;;  %v1319_v33 = vpop.f32.mrb[35].mxu0  ;;  %v15452_v52 = vsel %vm916_vm2, %v2350_v42, %v2352_v41 }
 0x1be   :  { %18689 = vst [vmem:[#allocation31_spill] sm:$0xff] %v15452_v52  ;;  %v1577_v21 = vrot.slane %v1467_v10, 7  ;;  %v2354_v0 = vrot.slane %v1467_v10, 1  ;;  %v1429_v27 = vadd.f32 %v15178_v36, %v1319_v33  ;;  %12379 = vmatprep.mubr.msk.f32.mxu1 %vm223_vm0, %v1467_v10 }
 0x1bf   :  { %v1470_v48 = vmax.f32 %v1430_v58, 0.0  ;;  %12380 = vmatmul.mubr.msk.f32.gmra.mrb[36].mxu1 %vm223_vm0, %v1468_v59 }
 0x1c0   :  { %v1469_v24 = vmax.f32 %v1429_v27, 0.0  ;;  %v12325_v61 = vpop.f32.mrb[36].mxu0  ;;  %v15458_v63 = vsel %vm137_vm1, %v1575_v34, %v1577_v21  ;;  %v15461_v14 = vsel %vm137_vm1, %v1577_v21, %v1579_v46  ;;  %v15464_v42 = vsel %vm916_vm2, %v2352_v41, %v2354_v0 }
 0x1c1   :  { %18690 = vst [vmem:[#allocation32_spill] sm:$0xff] %v15464_v42  ;;  %v1583_v52 = vrot.slane %v1470_v48, 7  ;;  %v2360_v51 = vrot.slane %v1470_v48, 1  ;;  %v13710_v33 = vadd.f32 %v12325_v61, %v15167_v26  ;;  %v1329_v49 = vpop.f32.mrb[37].mxu0  ;;  %v15468_v10 = vsel %vm916_vm2, %v2354_v0, %v2356_v7 }
 0x1c2   :  { %18691 = vst [vmem:[#allocation33_spill] sm:$0xff] %v15468_v10  ;;  %v1581_v59 = vrot.slane %v1469_v24, 7  ;;  %v2358_v58 = vrot.slane %v1469_v24, 1  ;;  %v13711_v27 = vadd.f32 %v1329_v49, %v15169_v30  ;;  %12382 = vmatprep.mubr.msk.f32.mxu1 %vm223_vm0, %v1469_v24 }
 0x1c3   :  { %v1432_v34 = vadd.f32 %v13710_v33, %v15178_v36  ;;  %12383 = vmatmul.mubr.msk.f32.gmra.mrb[38].mxu1 %vm223_vm0, %v1470_v48 }
 0x1c4   :  { %v1431_v41 = vadd.f32 %v13711_v27, %v15178_v36  ;;  %v12328_v21 = vpop.f32.mrb[38].mxu0  ;;  %v15476_v42 = vsel %vm137_vm1, %v1579_v46, %v1581_v59  ;;  %v15479_v26 = vsel %vm137_vm1, %v1581_v59, %v1583_v52  ;;  %v15482_v0 = vsel %vm916_vm2, %v2356_v7, %v2358_v58 }
 0x1c5   :  { %v1472_v61 = vmax.f32 %v1432_v34, 0.0  ;;  %v13712_v30 = vadd.f32 %v12328_v21, %v15171_v31  ;;  %v1339_v49 = vpop.f32.mrb[39].mxu0  ;;  %v15486_v24 = vsel %vm916_vm2, %v2358_v58, %v2360_v51 }
 0x1c6   :  { %v1471_v48 = vmax.f32 %v1431_v41, 0.0  ;;  %v13713_v33 = vadd.f32 %v1339_v49, %v15173_v32 }
 0x1c7   :  { %v1587_v27 = vrot.slane %v1472_v61, 7  ;;  %v2364_v10 = vrot.slane %v1472_v61, 1  ;;  %v1434_v46 = vadd.f32 %v13712_v30, %v15178_v36 }
 0x1c8   :  { %v1585_v4 = vrot.slane %v1471_v48, 7  ;;  %v2362_v59 = vrot.slane %v1471_v48, 1  ;;  %v1433_v47 = vadd.f32 %v13713_v33, %v15178_v36  ;;  %12385 = vmatprep.mubr.msk.f32.mxu1 %vm223_vm0, %v1471_v48 }
 0x1c9   :  { %v15492_v7 = vmax.f32 %v1434_v46, 0.0  ;;  %12386 = vmatmul.mubr.msk.f32.gmra.mrb[40].mxu1 %vm223_vm0, %v1472_v61 }
 0x1ca   :  { %v1473_v31 = vmax.f32 %v1433_v47, 0.0  ;;  %v1586_v58 = vsel %vm137_vm1, %v1583_v52, %v1585_v4  ;;  %v1588_v34 = vsel %vm137_vm1, %v1585_v4, %v1587_v27  ;;  %v15498_v32 = vsel %vm916_vm2, %v2360_v51, %v2362_v59 }
 0x1cb   :  { %v1591_v41 = vrot.slane %v15492_v7, 7  ;;  %v2368_v21 = vrot.slane %v15492_v7, 1  ;;  %v15503_v36 = vsel %vm916_vm2, %v2362_v59, %v2364_v10  ;;  %v18692_v47 = vrot.slane %v15182_v44, 7  ;;  %v10680_v44 = vld [vmem:[%s18551_s5 + $0x8] sm:$0xff] }
 0x1cc   :  { %v1589_v30 = vrot.slane %v1473_v31, 7  ;;  %v2366_v49 = vrot.slane %v1473_v31, 1  ;;  %12388 = vmatprep.mubr.msk.f32.mxu1 %vm223_vm0, %v1473_v31  ;;  %12515 = vmatprep.subr.mxu0 %v10680_v44 }
 0x1cd   :  { %12389 = vmatmul.mubr.msk.f32.gmra.mrb[42].mxu1 %vm223_vm0, %v15492_v7  ;;  %v1595_v4 = vsel %vm137_vm1, 0.0, %v18692_v47  ;;  %12516 = vmatpush3.msra.mxu0 %v10680_v44 }
 0x1ce   :  { %12393 = vmatprep.mubr.msk.f32.mxu1 %vm223_vm0, %v1595_v4  ;;  %v1590_v51 = vsel %vm137_vm1, %v1587_v27, %v1589_v30  ;;  %v1592_v52 = vsel %vm137_vm1, %v1589_v30, %v1591_v41  ;;  %v15515_v61 = vsel %vm916_vm2, %v2364_v10, %v2366_v49  ;;  %v15520_v48 = vsel %vm916_vm2, %v2366_v49, %v2368_v21 }
 0x1d1   :  { %12394 = vmatmul.mubr.msk.f32.vlgmr.msra.gmra.mrb[4].mxu1 %vm223_vm0, %v15199_v8 }
 0x1d2   :  { %12396 = vmatprep.mubr.msk.f32.mxu1 %vm223_vm0, %v15210_v54  ;;  %12454 = vmatpush3.msra.mxu1 %v15193_v40  ;;  %v18693_v40 = vrot.slane %v15342_v38, 7  ;;  %v18694_v54 = vld [vmem:[#allocation5_spill] sm:$0xff] }
 0x1d3   :  { %v18713_v38 = vld [vmem:[#allocation21_spill] sm:$0xff] }
 0x1d4   :  { %v1596_v8 = vsel %vm137_vm1, 0.0, %v18693_v40 }
 0x1d5   :  { %12397 = vmatmul.mubr.msk.f32.gmra.mrb[6].mxu1 %vm223_vm0, %v15213_v29  ;;  %v18695_v29 = vld [vmem:[#allocation6_spill] sm:$0xff] }
 0x1d6   :  { %12399 = vmatprep.mubr.msk.f32.mxu1 %vm223_vm0, %v15226_v6  ;;  %v18696_v6 = vld [vmem:[#allocation7_spill] sm:$0xff] }
 0x1d9   :  { %12400 = vmatmul.mubr.msk.f32.gmra.mrb[8].mxu1 %vm223_vm0, %v15229_v9  ;;  %v18697_v9 = vld [vmem:[#allocation9_spill] sm:$0xff] }
 0x1da   :  { %12402 = vmatprep.mubr.msk.f32.mxu1 %vm223_vm0, %v15242_v25  ;;  %v18702_v25 = vld [vmem:[#allocation15_spill] sm:$0xff] }
 0x1dd   :  { %12403 = vmatmul.mubr.msk.f32.gmra.mrb[10].mxu1 %vm223_vm0, %v15245_v37  ;;  %v18703_v37 = vld [vmem:[#allocation16_spill] sm:$0xff] }
 0x1de   :  { %12405 = vmatprep.mubr.msk.f32.mxu1 %vm223_vm0, %v15258_v12  ;;  %v18704_v12 = vld [vmem:[#allocation17_spill] sm:$0xff] }
 0x1e1   :  { %12406 = vmatmul.mubr.msk.f32.gmra.mrb[12].mxu1 %vm223_vm0, %v15261_v2  ;;  %v18705_v2 = vld [vmem:[#allocation19_spill] sm:$0xff] }
 0x1e2   :  { %12408 = vmatprep.mubr.msk.f32.mxu1 %vm223_vm0, %v15274_v11  ;;  %v18706_v11 = vld [vmem:[#allocation20_spill] sm:$0xff] }
 0x1e5   :  { %12409 = vmatmul.mubr.msk.f32.gmra.mrb[14].mxu1 %vm223_vm0, %v15277_v28  ;;  %v18707_v28 = vld [vmem:[#allocation8_spill] sm:$0xff] }
 0x1e6   :  { %12411 = vmatprep.mubr.msk.f32.mxu1 %vm223_vm0, %v15290_v5  ;;  %v18708_v5 = vld [vmem:[#allocation23_spill] sm:$0xff] }
 0x1e9   :  { %12412 = vmatmul.mubr.msk.f32.gmra.mrb[16].mxu1 %vm223_vm0, %v15293_v20  ;;  %v18709_v20 = vld [vmem:[#allocation18_spill] sm:$0xff] }
 0x1ea   :  { %12414 = vmatprep.mubr.msk.f32.mxu1 %vm223_vm0, %v15306_v56  ;;  %v18710_v56 = vrot.slane %v18709_v20, 1 }
 0x1ed   :  { %12415 = vmatmul.mubr.msk.f32.gmra.mrb[18].mxu1 %vm223_vm0, %v15309_v39  ;;  %v2372_v39 = vsel %vm916_vm2, %v18710_v56, 0.0 }
 0x1ee   :  { %12417 = vmatprep.mubr.msk.f32.mxu1 %vm223_vm0, %v15324_v3  ;;  %v18711_v3 = vld [vmem:[#allocation24_spill] sm:$0xff] }
 0x1f1   :  { %12418 = vmatmul.mubr.msk.f32.gmra.mrb[20].mxu1 %vm223_vm0, %v15327_v43  ;;  %v18712_v43 = vld [vmem:[#allocation13_spill] sm:$0xff] }
 0x1f2   :  { %12420 = vmatprep.mubr.msk.f32.mxu1 %vm223_vm0, %v15345_v60  ;;  %v18714_v60 = vld [vmem:[#allocation25_spill] sm:$0xff] }
 0x1f5   :  { %12421 = vmatmul.mubr.msk.f32.gmra.mrb[22].mxu1 %vm223_vm0, %v15348_v15  ;;  %v18715_v15 = vld [vmem:[#allocation22_spill] sm:$0xff] }
 0x1f6   :  { %12423 = vmatprep.mubr.msk.f32.mxu1 %vm223_vm0, %v1596_v8 }
 0x1f9   :  { %12424 = vmatmul.mubr.msk.f32.gmra.mrb[24].mxu1 %vm223_vm0, %v15368_v50  ;;  %v18717_v50 = vld [vmem:[#allocation27_spill] sm:$0xff] }
 0x1fa   :  { %12426 = vmatprep.mubr.msk.f32.mxu1 %vm223_vm0, %v15378_v53  ;;  %v18716_v53 = vld [vmem:[#allocation26_spill] sm:$0xff] }
 0x1fd   :  { %12427 = vmatmul.mubr.msk.f32.gmra.mrb[26].mxu1 %vm223_vm0, %v15381_v57  ;;  %v18718_v57 = vld [vmem:[#allocation28_spill] sm:$0xff] }
 0x1fe   :  { %12429 = vmatprep.mubr.msk.f32.mxu1 %vm223_vm0, %v15394_v18  ;;  %v18719_v18 = vld [vmem:[#allocation29_spill] sm:$0xff] }
 0x201   :  { %12430 = vmatmul.mubr.msk.f32.gmra.mrb[28].mxu1 %vm223_vm0, %v15397_v62  ;;  %v18720_v62 = vld [vmem:[#allocation30_spill] sm:$0xff] }
 0x202   :  { %12432 = vmatprep.mubr.msk.f32.mxu1 %vm223_vm0, %v15410_v13  ;;  %v18721_v13 = vld [vmem:[#allocation31_spill] sm:$0xff] }
 0x205   :  { %12433 = vmatmul.mubr.msk.f32.gmra.mrb[30].mxu1 %vm223_vm0, %v15413_v22  ;;  %v18722_v22 = vld [vmem:[#allocation32_spill] sm:$0xff] }
 0x206   :  { %12435 = vmatprep.mubr.msk.f32.mxu1 %vm223_vm0, %v15426_v16  ;;  %v18723_v16 = vld [vmem:[#allocation33_spill] sm:$0xff] }
 0x209   :  { %12436 = vmatmul.mubr.msk.f32.gmra.mrb[32].mxu1 %vm223_vm0, %v15429_v1  ;;  %v2373_v1 = vsel %vm916_vm2, %v2368_v21, 0.0 }
 0x20a   :  { %12438 = vmatprep.mubr.msk.f32.mxu1 %vm223_vm0, %v15442_v19  ;;  %v3173_v19 = vld [vmem:[%s18551_s5] sm:$0xff] }
 0x20b   :  { %12577 = vmatprep.subr.mxu0 %v3173_v19 }
 0x20d   :  { %12439 = vmatmul.mubr.msk.f32.gmra.mrb[34].mxu1 %vm223_vm0, %v15445_v35  ;;  %v15692_v35 = vld [vmem:[%s18550_s4] ss:$0 sm:$0xff] }
 0x20e   :  { %12441 = vmatprep.mubr.msk.f32.mxu1 %vm223_vm0, %v15458_v63 }
 0x211   :  { %12442 = vmatmul.mubr.msk.f32.gmra.mrb[36].mxu1 %vm223_vm0, %v15461_v14 }
 0x212   :  { %12444 = vmatprep.mubr.msk.f32.mxu1 %vm223_vm0, %v15476_v42 }
 0x215   :  { %12445 = vmatmul.mubr.msk.f32.gmra.mrb[38].mxu1 %vm223_vm0, %v15479_v26 }
 0x216   :  { %12447 = vmatprep.mubr.msk.f32.mxu1 %vm223_vm0, %v1586_v58 }
 0x219   :  { %12448 = vmatmul.mubr.msk.f32.gmra.mrb[40].mxu1 %vm223_vm0, %v1588_v34 }
 0x21a   :  { %12450 = vmatprep.mubr.msk.f32.mxu1 %vm223_vm0, %v1590_v51 }
 0x21d   :  { %12451 = vmatmul.mubr.msk.f32.gmra.mrb[42].mxu1 %vm223_vm0, %v1592_v52 }
 0x21e   :  { %12455 = vmatprep.mubr.msk.f32.mxu1 %vm223_vm0, %v15202_v55  ;;  %v18698_v55 = vld [vmem:[#allocation10_spill] sm:$0xff] }
 0x221   :  { %12456 = vmatmul.mubr.msk.f32.vlgmr.msra.gmra.mrb[4].mxu1 %vm223_vm0, %v15216_v17  ;;  %v18699_v17 = vld [vmem:[#allocation11_spill] sm:$0xff] }
 0x222   :  { %12458 = vmatprep.mubr.msk.f32.mxu1 %vm223_vm0, %v15220_v23  ;;  %v18700_v23 = vld [vmem:[#allocation12_spill] sm:$0xff] }
 0x225   :  { %12459 = vmatmul.mubr.msk.f32.gmra.mrb[6].mxu1 %vm223_vm0, %v15232_v45  ;;  %v18701_v45 = vld [vmem:[#allocation14_spill] sm:$0xff] }
 0x226   :  { %12461 = vmatprep.mubr.msk.f32.mxu1 %vm223_vm0, %v18694_v54 }
 0x229   :  { %12462 = vmatmul.mubr.msk.f32.gmra.mrb[8].mxu1 %vm223_vm0, %v18695_v29 }
 0x22a   :  { %12464 = vmatprep.mubr.msk.f32.mxu1 %vm223_vm0, %v18696_v6 }
 0x22d   :  { %12465 = vmatmul.mubr.msk.f32.gmra.mrb[10].mxu1 %vm223_vm0, %v18697_v9 }
 0x22e   :  { %12467 = vmatprep.mubr.msk.f32.mxu1 %vm223_vm0, %v18698_v55 }
 0x231   :  { %12468 = vmatmul.mubr.msk.f32.gmra.mrb[12].mxu1 %vm223_vm0, %v18699_v17  ;;  %v15719_v17 = vld [vmem:[%s18551_s5 + $0x10] sm:$0xff] }
 0x232   :  { %12470 = vmatprep.mubr.msk.f32.mxu1 %vm223_vm0, %v18700_v23 }
 0x235   :  { %12471 = vmatmul.mubr.msk.f32.gmra.mrb[14].mxu1 %vm223_vm0, %v18701_v45 }
 0x236   :  { %12473 = vmatprep.mubr.msk.f32.mxu1 %vm223_vm0, %v18702_v25 }
 0x239   :  { %12474 = vmatmul.mubr.msk.f32.gmra.mrb[16].mxu1 %vm223_vm0, %v18703_v37 }
 0x23a   :  { %12476 = vmatprep.mubr.msk.f32.mxu1 %vm223_vm0, %v18704_v12 }
 0x23d   :  { %12477 = vmatmul.mubr.msk.f32.gmra.mrb[18].mxu1 %vm223_vm0, %v18705_v2 }
 0x23e   :  { %12479 = vmatprep.mubr.msk.f32.mxu1 %vm223_vm0, %v18706_v11 }
 0x241   :  { %12480 = vmatmul.mubr.msk.f32.gmra.mrb[20].mxu1 %vm223_vm0, %v18707_v28 }
 0x242   :  { %12482 = vmatprep.mubr.msk.f32.mxu1 %vm223_vm0, %v18708_v5 }
 0x245   :  { %12483 = vmatmul.mubr.msk.f32.gmra.mrb[22].mxu1 %vm223_vm0, %v2372_v39 }
 0x246   :  { %12485 = vmatprep.mubr.msk.f32.mxu1 %vm223_vm0, %v18711_v3 }
 0x249   :  { %12486 = vmatmul.mubr.msk.f32.gmra.mrb[24].mxu1 %vm223_vm0, %v18712_v43 }
 0x24a   :  { %12488 = vmatprep.mubr.msk.f32.mxu1 %vm223_vm0, %v18713_v38 }
 0x24d   :  { %12489 = vmatmul.mubr.msk.f32.gmra.mrb[26].mxu1 %vm223_vm0, %v18714_v60 }
 0x24e   :  { %12491 = vmatprep.mubr.msk.f32.mxu1 %vm223_vm0, %v18715_v15 }
 0x251   :  { %12492 = vmatmul.mubr.msk.f32.gmra.mrb[28].mxu1 %vm223_vm0, %v18716_v53 }
 0x252   :  { %12494 = vmatprep.mubr.msk.f32.mxu1 %vm223_vm0, %v18717_v50 }
 0x255   :  { %12495 = vmatmul.mubr.msk.f32.gmra.mrb[30].mxu1 %vm223_vm0, %v18718_v57 }
 0x256   :  { %12497 = vmatprep.mubr.msk.f32.mxu1 %vm223_vm0, %v18719_v18 }
 0x259   :  { %12498 = vmatmul.mubr.msk.f32.gmra.mrb[32].mxu1 %vm223_vm0, %v18720_v62 }
 0x25a   :  { %12500 = vmatprep.mubr.msk.f32.mxu1 %vm223_vm0, %v18721_v13 }
 0x25d   :  { %12501 = vmatmul.mubr.msk.f32.gmra.mrb[34].mxu1 %vm223_vm0, %v18722_v22 }
 0x25e   :  { %12503 = vmatprep.mubr.msk.f32.mxu1 %vm223_vm0, %v18723_v16 }
 0x261   :  { %12504 = vmatmul.mubr.msk.f32.gmra.mrb[36].mxu1 %vm223_vm0, %v15482_v0 }
 0x262   :  { %12506 = vmatprep.mubr.msk.f32.mxu1 %vm223_vm0, %v15486_v24 }
 0x265   :  { %12507 = vmatmul.mubr.msk.f32.gmra.mrb[38].mxu1 %vm223_vm0, %v15498_v32 }
 0x266   :  { %12509 = vmatprep.mubr.msk.f32.mxu1 %vm223_vm0, %v15503_v36 }
 0x269   :  { %12510 = vmatmul.mubr.msk.f32.gmra.mrb[40].mxu1 %vm223_vm0, %v15515_v61 }
 0x26a   :  { %12512 = vmatprep.mubr.msk.f32.mxu1 %vm223_vm0, %v15520_v48 }
 0x26d   :  { %12513 = vmatmul.mubr.msk.f32.gmra.mrb[42].mxu1 %vm223_vm0, %v2373_v1 }
 0x2f4   :  { %v12457_v63 = vpop.f32.mrb[4].mxu1 }
 0x2f5   :  { %v2771_v14 = vadd.f32 %v12457_v63, %v15692_v35  ;;  %v2524_v42 = vpop.f32.mrb[5].mxu1 }
 0x2f6   :  { %v2770_v10 = vadd.f32 %v15692_v35, %v2524_v42 }
 0x2f7   :  { %v2811_v26 = vmax.f32 %v2771_v14, 0.0 }
 0x2f8   :  { %v2810_v0 = vmax.f32 %v2770_v10, 0.0  ;;  %v12460_v24 = vpop.f32.mrb[6].mxu1 }
 0x2f9   :  { %v2891_v33 = vrot.slane %v2811_v26, 1  ;;  %v2773_v27 = vadd.f32 %v12460_v24, %v15692_v35  ;;  %v2534_v46 = vpop.f32.mrb[7].mxu1 }
 0x2fa   :  { %v2890_v59 = vrot.slane %v2810_v0, 1  ;;  %v2772_v7 = vadd.f32 %v15692_v35, %v2534_v46 }
 0x2fb   :  { %v2813_v31 = vmax.f32 %v2773_v27, 0.0 }
 0x2fc   :  { %v2892_v58 = vsel %vm916_vm2, %v2890_v59, %v2891_v33  ;;  %v2812_v34 = vmax.f32 %v2772_v7, 0.0  ;;  %v12463_v32 = vpop.f32.mrb[8].mxu1 }
 0x2fd   :  { %v15699_v41 = vmax.f32 %v2810_v0, %v2892_v58  ;;  %v2895_v21 = vrot.slane %v2813_v31, 1  ;;  %v2775_v36 = vadd.f32 %v12463_v32, %v15692_v35  ;;  %v2544_v30 = vpop.f32.mrb[9].mxu1 }
 0x2fe   :  { %v2893_v49 = vrot.slane %v2812_v34, 1  ;;  %v2774_v47 = vadd.f32 %v15692_v35, %v2544_v30 }
 0x2ff   :  { %v2815_v4 = vmax.f32 %v2775_v36, 0.0  ;;  %12517 = vmatprep.mubr.msk.f32.mxu0 %vm223_vm0, %v15699_v41  ;;  %v3869_v6 = vrot.slane %v15699_v41, 2  ;;  %v3091_v25 = vrot.slane %v15699_v41, 6 }
 0x300   :  { %v2894_v51 = vsel %vm916_vm2, %v2891_v33, %v2893_v49  ;;  %v2896_v52 = vsel %vm916_vm2, %v2893_v49, %v2895_v21  ;;  %v2814_v61 = vmax.f32 %v2774_v47, 0.0  ;;  %v12466_v48 = vpop.f32.mrb[10].mxu1 }
 0x301   :  { %v15707_v44 = vmax.f32 %v2811_v26, %v2894_v51  ;;  %v15709_v40 = vmax.f32 %v2812_v34, %v2896_v52  ;;  %v2899_v8 = vrot.slane %v2815_v4, 1  ;;  %v15712_v54 = vadd.f32 %v12466_v48, %v15692_v35  ;;  %v2554_v29 = vpop.f32.mrb[11].mxu1 }
 0x302   :  { %v2897_v9 = vrot.slane %v2814_v61, 1  ;;  %v2776_v55 = vadd.f32 %v15692_v35, %v2554_v29  ;;  %v15779_v7 = vsel %vm3090_vm3, 0.0, %v3091_v25 }
 0x303   :  { %v3094_v23 = vrot.slane %v15709_v40, 6  ;;  %v2817_v45 = vmax.f32 %v15712_v54, 0.0  ;;  %12518 = vmatmul.mubr.msk.f32.vlgmr.msra.gmra.mrb[40].mxu0 %vm223_vm0, %v15707_v44  ;;  %v3092_v37 = vrot.slane %v15707_v44, 6  ;;  %v3870_v5 = vrot.slane %v15707_v44, 2 }
 0x304   :  { %v2898_v12 = vsel %vm916_vm2, %v2895_v21, %v2897_v9  ;;  %v2900_v2 = vsel %vm916_vm2, %v2897_v9, %v2899_v8  ;;  %v2816_v11 = vmax.f32 %v2776_v55, 0.0  ;;  %v12469_v28 = vpop.f32.mrb[12].mxu1  ;;  %12520 = vmatprep.mubr.msk.f32.mxu0 %vm223_vm0, %v15709_v40  ;;  %12578 = vmatpush3.msra.mxu0 %v3173_v19  ;;  %v3872_v50 = vrot.slane %v15709_v40, 2 }
 0x305   :  { %v15732_v20 = vmax.f32 %v2814_v61, %v2900_v2  ;;  %v2903_v56 = vrot.slane %v2817_v45, 1  ;;  %v15735_v39 = vadd.f32 %v12469_v28, %v15692_v35  ;;  %v2564_v3 = vpop.f32.mrb[13].mxu1  ;;  %v15737_v43 = vmax.f32 %v2813_v31, %v2898_v12  ;;  %12639 = vmatprep.subr.mxu0 %v15719_v17 }
 0x306   :  { %v2901_v38 = vrot.slane %v2816_v11, 1  ;;  %v2778_v60 = vadd.f32 %v15692_v35, %v2564_v3  ;;  %v15742_v15 = vsel %vm3090_vm3, %v3091_v25, %v3092_v37  ;;  %v15745_v53 = vsel %vm3090_vm3, %v3092_v37, %v3094_v23 }
 0x307   :  { %v3098_v57 = vrot.slane %v15732_v20, 6  ;;  %v2819_v18 = vmax.f32 %v15735_v39, 0.0  ;;  %12521 = vmatmul.mubr.msk.f32.gmra.mrb[42].mxu0 %vm223_vm0, %v15737_v43  ;;  %v3096_v62 = vrot.slane %v15737_v43, 6  ;;  %v15758_v19 = vsel %vm3868_vm4, %v3869_v6, %v3870_v5 }
 0x308   :  { %v2902_v13 = vsel %vm916_vm2, %v2899_v8, %v2901_v38  ;;  %v2904_v22 = vsel %vm916_vm2, %v2901_v38, %v2903_v56  ;;  %v2818_v16 = vmax.f32 %v2778_v60, 0.0  ;;  %v12472_v1 = vpop.f32.mrb[14].mxu1  ;;  %12523 = vmatprep.mubr.msk.f32.mxu0 %vm223_vm0, %v15732_v20  ;;  %18724 = vst [vmem:[#allocation5_spill] sm:$0xff] %v15758_v19  ;;  %v15789_v21 = vsel %vm3868_vm4, %v3870_v5, %v3872_v50 }
 0x309   :  { %v15760_v63 = vmax.f32 %v2816_v11, %v2904_v22  ;;  %v2907_v14 = vrot.slane %v2819_v18, 1  ;;  %v15763_v42 = vadd.f32 %v12472_v1, %v15692_v35  ;;  %v2574_v10 = vpop.f32.mrb[15].mxu1  ;;  %v15765_v26 = vmax.f32 %v2815_v4, %v2902_v13  ;;  %18725 = vst [vmem:[#allocation6_spill] sm:$0xff] %v15789_v21 }
 0x30a   :  { %v2905_v0 = vrot.slane %v2818_v16, 1  ;;  %v2780_v24 = vadd.f32 %v15692_v35, %v2574_v10  ;;  %v15769_v33 = vsel %vm3090_vm3, %v3094_v23, %v3096_v62  ;;  %v15772_v27 = vsel %vm3090_vm3, %v3096_v62, %v3098_v57 }
 0x30b   :  { %v3102_v46 = vrot.slane %v15760_v63, 6  ;;  %v2821_v59 = vmax.f32 %v15763_v42, 0.0  ;;  %12524 = vmatmul.mubr.msk.f32.gmra.mrb[44].mxu0 %vm223_vm0, %v15765_v26  ;;  %v3100_v31 = vrot.slane %v15765_v26, 6  ;;  %v3876_v44 = vrot.slane %v15732_v20, 2 }
 0x30c   :  { %v2906_v58 = vsel %vm916_vm2, %v2903_v56, %v2905_v0  ;;  %v2908_v34 = vsel %vm916_vm2, %v2905_v0, %v2907_v14  ;;  %v2820_v32 = vmax.f32 %v2780_v24, 0.0  ;;  %v12475_v41 = vpop.f32.mrb[16].mxu1  ;;  %12526 = vmatprep.mubr.msk.f32.mxu0 %vm223_vm0, %v15760_v63  ;;  %v18579_v3 = vrot.slane %v15760_v63, 2 }
 0x30d   :  { %v15791_v36 = vmax.f32 %v2818_v16, %v2908_v34  ;;  %v2911_v30 = vrot.slane %v2821_v59, 1  ;;  %v15794_v49 = vadd.f32 %v12475_v41, %v15692_v35  ;;  %v2584_v47 = vpop.f32.mrb[17].mxu1  ;;  %v15796_v4 = vmax.f32 %v2817_v45, %v2906_v58 }
 0x30e   :  { %v2909_v51 = vrot.slane %v2820_v32, 1  ;;  %v2782_v52 = vadd.f32 %v15692_v35, %v2584_v47  ;;  %v15800_v61 = vsel %vm3090_vm3, %v3098_v57, %v3100_v31  ;;  %v15803_v48 = vsel %vm3090_vm3, %v3100_v31, %v3102_v46 }
 0x30f   :  { %v3106_v8 = vrot.slane %v15791_v36, 6  ;;  %v2823_v54 = vmax.f32 %v15794_v49, 0.0  ;;  %12527 = vmatmul.mubr.msk.f32.gmra.mrb[46].mxu0 %vm223_vm0, %v15796_v4  ;;  %v3104_v29 = vrot.slane %v15796_v4, 6  ;;  %v3874_v45 = vrot.slane %v15737_v43, 2 }
 0x310   :  { %v2910_v6 = vsel %vm916_vm2, %v2907_v14, %v2909_v51  ;;  %v2912_v9 = vsel %vm916_vm2, %v2909_v51, %v2911_v30  ;;  %v2822_v55 = vmax.f32 %v2782_v52, 0.0  ;;  %v12478_v23 = vpop.f32.mrb[18].mxu1  ;;  %12529 = vmatprep.mubr.msk.f32.mxu0 %vm223_vm0, %v15791_v36 }
 0x311   :  { %v15816_v25 = vmax.f32 %v2820_v32, %v2912_v9  ;;  %v2915_v37 = vrot.slane %v2823_v54, 1  ;;  %v15819_v12 = vadd.f32 %v12478_v23, %v15692_v35  ;;  %v2594_v2 = vpop.f32.mrb[19].mxu1  ;;  %v15821_v11 = vmax.f32 %v2819_v18, %v2910_v6 }
 0x312   :  { %v2913_v28 = vrot.slane %v2822_v55, 1  ;;  %v2784_v5 = vadd.f32 %v15692_v35, %v2594_v2  ;;  %v15825_v56 = vsel %vm3090_vm3, %v3102_v46, %v3104_v29  ;;  %v15828_v39 = vsel %vm3090_vm3, %v3104_v29, %v3106_v8 }
 0x313   :  { %v3110_v43 = vrot.slane %v15816_v25, 6  ;;  %v2825_v38 = vmax.f32 %v15819_v12, 0.0  ;;  %12530 = vmatmul.mubr.msk.f32.gmra.mrb[48].mxu0 %vm223_vm0, %v15821_v11  ;;  %v3108_v60 = vrot.slane %v15821_v11, 6  ;;  %v15843_v22 = vsel %vm3868_vm4, %v3872_v50, %v3874_v45 }
 0x314   :  { %v2914_v57 = vsel %vm916_vm2, %v2911_v30, %v2913_v28  ;;  %v2916_v18 = vsel %vm916_vm2, %v2913_v28, %v2915_v37  ;;  %v2824_v62 = vmax.f32 %v2784_v5, 0.0  ;;  %v12481_v13 = vpop.f32.mrb[20].mxu1  ;;  %12532 = vmatprep.mubr.msk.f32.mxu0 %vm223_vm0, %v15816_v25  ;;  %18726 = vst [vmem:[#allocation7_spill] sm:$0xff] %v15843_v22  ;;  %v15872_v49 = vsel %vm3868_vm4, %v3874_v45, %v3876_v44 }
 0x315   :  { %v15845_v16 = vmax.f32 %v2822_v55, %v2916_v18  ;;  %v2919_v1 = vrot.slane %v2825_v38, 1  ;;  %v15848_v14 = vadd.f32 %v12481_v13, %v15692_v35  ;;  %v2604_v42 = vpop.f32.mrb[21].mxu1  ;;  %v15850_v10 = vmax.f32 %v2821_v59, %v2914_v57  ;;  %18727 = vst [vmem:[#allocation9_spill] sm:$0xff] %v15872_v49 }
 0x316   :  { %v2917_v0 = vrot.slane %v2824_v62, 1  ;;  %v2786_v24 = vadd.f32 %v15692_v35, %v2604_v42  ;;  %v15854_v46 = vsel %vm3090_vm3, %v3106_v8, %v3108_v60  ;;  %v15857_v40 = vsel %vm3090_vm3, %v3108_v60, %v3110_v43 }
 0x317   :  { %v3114_v31 = vrot.slane %v15845_v16, 6  ;;  %v2827_v58 = vmax.f32 %v15848_v14, 0.0  ;;  %12533 = vmatmul.mubr.msk.f32.gmra.mrb[50].mxu0 %vm223_vm0, %v15850_v10  ;;  %v3112_v59 = vrot.slane %v15850_v10, 6 }
 0x318   :  { %v2918_v34 = vsel %vm916_vm2, %v2915_v37, %v2917_v0  ;;  %v2920_v32 = vsel %vm916_vm2, %v2917_v0, %v2919_v1  ;;  %v2826_v41 = vmax.f32 %v2786_v24, 0.0  ;;  %v12484_v30 = vpop.f32.mrb[22].mxu1  ;;  %12535 = vmatprep.mubr.msk.f32.mxu0 %vm223_vm0, %v15845_v16 }
 0x319   :  { %v15874_v47 = vmax.f32 %v2824_v62, %v2920_v32  ;;  %v2923_v51 = vrot.slane %v2827_v58, 1  ;;  %v2789_v52 = vadd.f32 %v12484_v30, %v15692_v35  ;;  %v2614_v8 = vpop.f32.mrb[23].mxu1  ;;  %v15877_v29 = vmax.f32 %v2823_v54, %v2918_v34 }
 0x31a   :  { %v2921_v6 = vrot.slane %v2826_v41, 1  ;;  %v2788_v9 = vadd.f32 %v15692_v35, %v2614_v8  ;;  %v15881_v55 = vsel %vm3090_vm3, %v3110_v43, %v3112_v59  ;;  %v15884_v23 = vsel %vm3090_vm3, %v3112_v59, %v3114_v31 }
 0x31b   :  { %v3118_v37 = vrot.slane %v15874_v47, 6  ;;  %v2829_v12 = vmax.f32 %v2789_v52, 0.0  ;;  %12536 = vmatmul.mubr.msk.f32.gmra.mrb[52].mxu0 %vm223_vm0, %v15877_v29  ;;  %v3116_v54 = vrot.slane %v15877_v29, 6 }
 0x31c   :  { %v2922_v28 = vsel %vm916_vm2, %v2919_v1, %v2921_v6  ;;  %v2924_v5 = vsel %vm916_vm2, %v2921_v6, %v2923_v51  ;;  %v2828_v43 = vmax.f32 %v2788_v9, 0.0  ;;  %v12487_v60 = vpop.f32.mrb[24].mxu1  ;;  %12538 = vmatprep.mubr.msk.f32.mxu0 %vm223_vm0, %v15874_v47 }
 0x31d   :  { %v15896_v57 = vmax.f32 %v2826_v41, %v2924_v5  ;;  %v2927_v18 = vrot.slane %v2829_v12, 1  ;;  %v15899_v62 = vadd.f32 %v12487_v60, %v15692_v35  ;;  %v2624_v13 = vpop.f32.mrb[25].mxu1  ;;  %v15901_v14 = vmax.f32 %v2825_v38, %v2922_v28 }
 0x31e   :  { %v2925_v42 = vrot.slane %v2828_v43, 1  ;;  %v2790_v0 = vadd.f32 %v15692_v35, %v2624_v13  ;;  %v15905_v1 = vsel %vm3090_vm3, %v3114_v31, %v3116_v54  ;;  %v15908_v24 = vsel %vm3090_vm3, %v3116_v54, %v3118_v37 }
 0x31f   :  { %v3008_v34 = vsel %vm916_vm2, %v2927_v18, 0.0  ;;  %v2831_v32 = vmax.f32 %v15899_v62, 0.0  ;;  %12539 = vmatmul.mubr.msk.f32.gmra.mrb[54].mxu0 %vm223_vm0, %v15901_v14  ;;  %v3878_v38 = vrot.slane %v15765_v26, 2  ;;  %v3122_v26 = vrot.slane %v15896_v57, 6 }
 0x320   :  { %v15916_v41 = vmax.f32 %v2829_v12, %v3008_v34  ;;  %v2926_v30 = vsel %vm916_vm2, %v2923_v51, %v2925_v42  ;;  %v2928_v31 = vsel %vm916_vm2, %v2925_v42, %v2927_v18  ;;  %v2830_v52 = vmax.f32 %v2790_v0, 0.0  ;;  %v12490_v8 = vpop.f32.mrb[26].mxu1  ;;  %12541 = vmatprep.mubr.msk.f32.mxu0 %vm223_vm0, %v15896_v57 }
 0x321   :  { %v15922_v6 = vmax.f32 %v2828_v43, %v2928_v31  ;;  %v2930_v9 = vrot.slane %v2831_v32, 1  ;;  %v15925_v54 = vadd.f32 %v12490_v8, %v15692_v35  ;;  %v2634_v28 = vpop.f32.mrb[27].mxu1  ;;  %v15927_v5 = vmax.f32 %v2827_v58, %v2926_v30 }
 0x322   :  { %18728 = vst [vmem:[#allocation10_spill] sm:$0xff] %v15916_v41  ;;  %v2929_v12 = vrot.slane %v2830_v52, 1  ;;  %v2792_v60 = vadd.f32 %v15692_v35, %v2634_v28  ;;  %v3128_v18 = vrot.slane %v15916_v41, 6  ;;  %v3120_v13 = vrot.slane %v15901_v14, 6 }
 0x323   :  { %v3126_v62 = vrot.slane %v15922_v6, 6  ;;  %v2833_v43 = vmax.f32 %v15925_v54, 0.0  ;;  %12542 = vmatmul.mubr.msk.f32.gmra.mrb[56].mxu0 %vm223_vm0, %v15927_v5  ;;  %v3124_v34 = vrot.slane %v15927_v5, 6  ;;  %v15945_v30 = vsel %vm3868_vm4, %v3876_v44, %v3878_v38 }
 0x324   :  { %v2931_v58 = vsel %vm916_vm2, %v2929_v12, %v2930_v9  ;;  %v2832_v42 = vmax.f32 %v2792_v60, 0.0  ;;  %v12493_v0 = vpop.f32.mrb[28].mxu1  ;;  %12544 = vmatprep.mubr.msk.f32.mxu0 %vm223_vm0, %v15922_v6  ;;  %18729 = vst [vmem:[#allocation11_spill] sm:$0xff] %v15945_v30  ;;  %v15953_v12 = vsel %vm3090_vm3, %v3118_v37, %v3120_v13  ;;  %v15957_v59 = vsel %vm3090_vm3, %v3120_v13, %v3122_v26 }
 0x325   :  { %v15947_v31 = vmax.f32 %v2830_v52, %v2931_v58  ;;  %v2934_v8 = vrot.slane %v2833_v43, 1  ;;  %v15950_v54 = vadd.f32 %v12493_v0, %v15692_v35  ;;  %v2644_v28 = vpop.f32.mrb[29].mxu1  ;;  %18730 = vst [vmem:[#allocation12_spill] sm:$0xff] %v15953_v12  ;;  %18731 = vst [vmem:[#allocation14_spill] sm:$0xff] %v15957_v59  ;;  %v15960_v20 = vsel %vm3090_vm3, %v3122_v26, %v3124_v34 }
 0x326   :  { %v2932_v60 = vrot.slane %v2832_v42, 1  ;;  %v2794_v51 = vadd.f32 %v15692_v35, %v2644_v28  ;;  %18732 = vst [vmem:[#allocation15_spill] sm:$0xff] %v15960_v20  ;;  %v15967_v58 = vsel %vm3090_vm3, %v3124_v34, %v3126_v62  ;;  %v15970_v37 = vsel %vm3090_vm3, %v3126_v62, %v3128_v18 }
 0x327   :  { %v2835_v52 = vmax.f32 %v15950_v54, 0.0  ;;  %12545 = vmatmul.mubr.msk.f32.gmra.mrb[58].mxu0 %vm223_vm0, %v15916_v41  ;;  %18733 = vst [vmem:[#allocation16_spill] sm:$0xff] %v15967_v58  ;;  %18734 = vst [vmem:[#allocation17_spill] sm:$0xff] %v15970_v37 }
 0x328   :  { %v2933_v13 = vsel %vm916_vm2, %v2930_v9, %v2932_v60  ;;  %v2935_v26 = vsel %vm916_vm2, %v2932_v60, %v2934_v8  ;;  %v2834_v28 = vmax.f32 %v2794_v51, 0.0  ;;  %v12496_v2 = vpop.f32.mrb[30].mxu1  ;;  %12547 = vmatprep.mubr.msk.f32.mxu0 %vm223_vm0, %v15947_v31  ;;  %v15989_v51 = vsel %vm3868_vm4, %v3878_v38, %v18579_v3 }
 0x329   :  { %v15977_v54 = vmax.f32 %v2832_v42, %v2935_v26  ;;  %v2938_v44 = vrot.slane %v2835_v52, 1  ;;  %v15980_v34 = vadd.f32 %v12496_v2, %v15692_v35  ;;  %v2654_v45 = vpop.f32.mrb[31].mxu1  ;;  %v15982_v18 = vmax.f32 %v2831_v32, %v2933_v13  ;;  %18735 = vst [vmem:[#allocation19_spill] sm:$0xff] %v15989_v51 }
 0x32a   :  { %v2936_v0 = vrot.slane %v2834_v28, 1  ;;  %v2796_v9 = vadd.f32 %v15692_v35, %v2654_v45  ;;  %v3882_v38 = vrot.slane %v15796_v4, 2 }
 0x32b   :  { %v3133_v42 = vrot.slane %v15977_v54, 6  ;;  %v2837_v60 = vmax.f32 %v15980_v34, 0.0  ;;  %12548 = vmatmul.mubr.msk.f32.gmra.mrb[60].mxu0 %vm223_vm0, %v15982_v18  ;;  %v3131_v32 = vrot.slane %v15982_v18, 6 }
 0x32c   :  { %v2937_v13 = vsel %vm916_vm2, %v2934_v8, %v2936_v0  ;;  %v2939_v45 = vsel %vm916_vm2, %v2936_v0, %v2938_v44  ;;  %v2836_v26 = vmax.f32 %v2796_v9, 0.0  ;;  %v12499_v62 = vpop.f32.mrb[32].mxu1  ;;  %12550 = vmatprep.mubr.msk.f32.mxu0 %vm223_vm0, %v15977_v54  ;;  %v18736_v0 = vrot.slane %v15947_v31, 6 }
 0x32d   :  { %v16002_v50 = vmax.f32 %v2834_v28, %v2939_v45  ;;  %v2942_v34 = vrot.slane %v2837_v60, 1  ;;  %v16005_v3 = vadd.f32 %v12499_v62, %v15692_v35  ;;  %v2664_v2 = vpop.f32.mrb[33].mxu1  ;;  %v16007_v51 = vmax.f32 %v2833_v43, %v2937_v13 }
 0x32e   :  { %v2940_v30 = vrot.slane %v2836_v26, 1  ;;  %v2798_v8 = vadd.f32 %v15692_v35, %v2664_v2  ;;  %v16013_v9 = vsel %vm3090_vm3, %v18736_v0, %v3131_v32  ;;  %v16016_v49 = vsel %vm3090_vm3, %v3131_v32, %v3133_v42 }
 0x32f   :  { %18737 = vst [vmem:[#allocation20_spill] sm:$0xff] %v16013_v9  ;;  %18738 = vst [vmem:[#allocation8_spill] sm:$0xff] %v16016_v49  ;;  %v3137_v28 = vrot.slane %v16002_v50, 6  ;;  %v2839_v62 = vmax.f32 %v16005_v3, 0.0  ;;  %12551 = vmatmul.mubr.msk.f32.gmra.mrb[62].mxu0 %vm223_vm0, %v16007_v51  ;;  %v3135_v43 = vrot.slane %v16007_v51, 6  ;;  %v18739_v32 = vrot.slane %v15760_v63, 2 }
 0x330   :  { %v2941_v2 = vsel %vm916_vm2, %v2938_v44, %v2940_v30  ;;  %v2943_v13 = vsel %vm916_vm2, %v2940_v30, %v2942_v34  ;;  %v2838_v45 = vmax.f32 %v2798_v8, 0.0  ;;  %v12502_v0 = vpop.f32.mrb[34].mxu1  ;;  %12553 = vmatprep.mubr.msk.f32.mxu0 %vm223_vm0, %v16002_v50 }
 0x331   :  { %v16031_v4 = vsel %vm3868_vm4, %v18739_v32, %v3882_v38  ;;  %v16033_v3 = vmax.f32 %v2836_v26, %v2943_v13  ;;  %v2946_v22 = vrot.slane %v2839_v62, 1  ;;  %v16036_v21 = vadd.f32 %v12502_v0, %v15692_v35  ;;  %v2674_v19 = vpop.f32.mrb[35].mxu1 }
 0x332   :  { %18740 = vst [vmem:[#allocation23_spill] sm:$0xff] %v16031_v4  ;;  %v16038_v44 = vmax.f32 %v2835_v52, %v2941_v2  ;;  %v2944_v30 = vrot.slane %v2838_v45, 1  ;;  %v2800_v8 = vadd.f32 %v15692_v35, %v2674_v19  ;;  %v16042_v49 = vsel %vm3090_vm3, %v3133_v42, %v3135_v43 }
 0x333   :  { %18741 = vst [vmem:[#allocation18_spill] sm:$0xff] %v16042_v49  ;;  %v16045_v63 = vsel %vm3090_vm3, %v3135_v43, %v3137_v28  ;;  %v3141_v26 = vrot.slane %v16033_v3, 6  ;;  %v2841_v13 = vmax.f32 %v16036_v21, 0.0  ;;  %v18743_v43 = vrot.slane %v15791_v36, 2 }
 0x334   :  { %18742 = vst [vmem:[#allocation24_spill] sm:$0xff] %v16045_v63  ;;  %12554 = vmatmul.mubr.msk.f32.gmra.mrb[64].mxu0 %vm223_vm0, %v16038_v44  ;;  %v3139_v52 = vrot.slane %v16038_v44, 6  ;;  %v2945_v2 = vsel %vm916_vm2, %v2942_v34, %v2944_v30  ;;  %v2947_v19 = vsel %vm916_vm2, %v2944_v30, %v2946_v22  ;;  %v2840_v42 = vmax.f32 %v2800_v8, 0.0  ;;  %v12505_v0 = vpop.f32.mrb[36].mxu1 }
 0x335   :  { %12556 = vmatprep.mubr.msk.f32.mxu0 %vm223_vm0, %v16033_v3  ;;  %v16060_v32 = vsel %vm3868_vm4, %v3882_v38, %v18743_v43  ;;  %v16062_v21 = vmax.f32 %v2838_v45, %v2947_v19  ;;  %v2950_v4 = vrot.slane %v2841_v13, 1  ;;  %v16065_v63 = vadd.f32 %v12505_v0, %v15692_v35  ;;  %v2684_v49 = vpop.f32.mrb[37].mxu1 }
 0x336   :  { %18744 = vst [vmem:[#allocation13_spill] sm:$0xff] %v16060_v32  ;;  %v16067_v34 = vmax.f32 %v2837_v60, %v2945_v2  ;;  %v2948_v30 = vrot.slane %v2840_v42, 1  ;;  %v2802_v8 = vadd.f32 %v15692_v35, %v2684_v49  ;;  %v16071_v9 = vsel %vm3090_vm3, %v3137_v28, %v3139_v52 }
 0x337   :  { %18745 = vst [vmem:[#allocation21_spill] sm:$0xff] %v16071_v9  ;;  %v16074_v37 = vsel %vm3090_vm3, %v3139_v52, %v3141_v26  ;;  %v3145_v45 = vrot.slane %v16062_v21, 6  ;;  %v2843_v19 = vmax.f32 %v16065_v63, 0.0  ;;  %v3886_v52 = vrot.slane %v15821_v11, 2 }
 0x338   :  { %18746 = vst [vmem:[#allocation25_spill] sm:$0xff] %v16074_v37  ;;  %12557 = vmatmul.mubr.msk.f32.gmra.mrb[66].mxu0 %vm223_vm0, %v16067_v34  ;;  %v3143_v60 = vrot.slane %v16067_v34, 6  ;;  %v2949_v2 = vsel %vm916_vm2, %v2946_v22, %v2948_v30  ;;  %v2951_v49 = vsel %vm916_vm2, %v2948_v30, %v2950_v4  ;;  %v2842_v28 = vmax.f32 %v2802_v8, 0.0  ;;  %v12508_v0 = vpop.f32.mrb[38].mxu1 }
 0x339   :  { %12559 = vmatprep.mubr.msk.f32.mxu0 %vm223_vm0, %v16062_v21  ;;  %v16087_v43 = vmax.f32 %v2840_v42, %v2951_v49  ;;  %v2954_v38 = vrot.slane %v2843_v19, 1  ;;  %v2805_v63 = vadd.f32 %v12508_v0, %v15692_v35  ;;  %v2694_v32 = vpop.f32.mrb[39].mxu1  ;;  %v16090_v37 = vmax.f32 %v2839_v62, %v2949_v2 }
 0x33a   :  { %v2952_v9 = vrot.slane %v2842_v28, 1  ;;  %v2804_v22 = vadd.f32 %v15692_v35, %v2694_v32  ;;  %v16094_v30 = vsel %vm3090_vm3, %v3141_v26, %v3143_v60  ;;  %v16097_v8 = vsel %vm3090_vm3, %v3143_v60, %v3145_v45 }
 0x33b   :  { %18747 = vst [vmem:[#allocation22_spill] sm:$0xff] %v16094_v30  ;;  %18748 = vst [vmem:[#allocation26_spill] sm:$0xff] %v16097_v8  ;;  %v3149_v11 = vrot.slane %v16087_v43, 6  ;;  %v2845_v42 = vmax.f32 %v2805_v63, 0.0  ;;  %v3147_v62 = vrot.slane %v16090_v37, 6  ;;  %v18749_v60 = vrot.slane %v15791_v36, 2 }
 0x33c   :  { %12560 = vmatmul.mubr.msk.f32.gmra.mrb[68].mxu0 %vm223_vm0, %v16090_v37  ;;  %v2953_v2 = vsel %vm916_vm2, %v2950_v4, %v2952_v9  ;;  %v2955_v32 = vsel %vm916_vm2, %v2952_v9, %v2954_v38  ;;  %v2844_v49 = vmax.f32 %v2804_v22, 0.0  ;;  %v12511_v26 = vpop.f32.mrb[40].mxu1 }
 0x33d   :  { %12562 = vmatprep.mubr.msk.f32.mxu0 %vm223_vm0, %v16087_v43  ;;  %v16111_v0 = vsel %vm3868_vm4, %v18749_v60, %v3886_v52  ;;  %v16113_v63 = vmax.f32 %v2842_v28, %v2955_v32  ;;  %v2958_v58 = vrot.slane %v2845_v42, 1  ;;  %v2807_v8 = vadd.f32 %v12511_v26, %v15692_v35  ;;  %v2704_v30 = vpop.f32.mrb[41].mxu1 }
 0x33e   :  { %18750 = vst [vmem:[#allocation27_spill] sm:$0xff] %v16111_v0  ;;  %v16116_v20 = vmax.f32 %v2841_v13, %v2953_v2  ;;  %v2956_v4 = vrot.slane %v2844_v49, 1  ;;  %v2806_v9 = vadd.f32 %v15692_v35, %v2704_v30  ;;  %v16120_v22 = vsel %vm3090_vm3, %v3145_v45, %v3147_v62 }
 0x33f   :  { %18751 = vst [vmem:[#allocation28_spill] sm:$0xff] %v16120_v22  ;;  %v16123_v59 = vsel %vm3090_vm3, %v3147_v62, %v3149_v11  ;;  %v3153_v28 = vrot.slane %v16113_v63, 6  ;;  %v2847_v32 = vmax.f32 %v2807_v8, 0.0  ;;  %v18753_v62 = vrot.slane %v15816_v25, 2 }
 0x340   :  { %18752 = vst [vmem:[#allocation29_spill] sm:$0xff] %v16123_v59  ;;  %12563 = vmatmul.mubr.msk.f32.gmra.mrb[70].mxu0 %vm223_vm0, %v16116_v20  ;;  %v3151_v13 = vrot.slane %v16116_v20, 6  ;;  %v2957_v2 = vsel %vm916_vm2, %v2954_v38, %v2956_v4  ;;  %v2959_v30 = vsel %vm916_vm2, %v2956_v4, %v2958_v58  ;;  %v2846_v26 = vmax.f32 %v2806_v9, 0.0  ;;  %v12514_v45 = vpop.f32.mrb[42].mxu1 }
 0x341   :  { %12565 = vmatprep.mubr.msk.f32.mxu0 %vm223_vm0, %v16113_v63  ;;  %v16137_v60 = vsel %vm3868_vm4, %v3886_v52, %v18753_v62  ;;  %v16139_v8 = vmax.f32 %v2844_v49, %v2959_v30  ;;  %v2962_v36 = vrot.slane %v2847_v32, 1  ;;  %v2809_v0 = vadd.f32 %v12514_v45, %v15692_v35  ;;  %v2714_v59 = vpop.f32.mrb[43].mxu1 }
 0x342   :  { %18754 = vst [vmem:[#allocation30_spill] sm:$0xff] %v16137_v60  ;;  %v16142_v22 = vmax.f32 %v2843_v19, %v2957_v2  ;;  %v2960_v38 = vrot.slane %v2846_v26, 1  ;;  %v2808_v4 = vadd.f32 %v15692_v35, %v2714_v59  ;;  %v16146_v9 = vsel %vm3090_vm3, %v3149_v11, %v3151_v13 }
 0x343   :  { %v16149_v12 = vsel %vm3090_vm3, %v3151_v13, %v3153_v28  ;;  %v3157_v49 = vrot.slane %v16139_v8, 6  ;;  %v2849_v30 = vmax.f32 %v2809_v0, 0.0  ;;  %v3890_v11 = vrot.slane %v15850_v10, 2 }
 0x344   :  { %12566 = vmatmul.mubr.msk.f32.gmra.mrb[72].mxu0 %vm223_vm0, %v16142_v22  ;;  %v3155_v19 = vrot.slane %v16142_v22, 6  ;;  %v2961_v2 = vsel %vm916_vm2, %v2958_v58, %v2960_v38  ;;  %v2963_v35 = vsel %vm916_vm2, %v2960_v38, %v2962_v36  ;;  %v2848_v59 = vmax.f32 %v2808_v4, 0.0 }
 0x345   :  { %12568 = vmatprep.mubr.msk.f32.mxu0 %vm223_vm0, %v16139_v8  ;;  %v16161_v13 = vmax.f32 %v2846_v26, %v2963_v35  ;;  %v2966_v45 = vrot.slane %v2849_v30, 1  ;;  %v16163_v62 = vmax.f32 %v2845_v42, %v2961_v2  ;;  %v18755_v58 = vrot.slane %v15816_v25, 2 }
 0x346   :  { %v16166_v0 = vsel %vm3090_vm3, %v3153_v28, %v3155_v19  ;;  %v2964_v52 = vrot.slane %v2848_v59, 1  ;;  %v16169_v60 = vsel %vm3090_vm3, %v3155_v19, %v3157_v49  ;;  %v18756_v4 = vrot.slane %v15845_v16, 2 }
 0x347   :  { %v16174_v38 = vsel %vm3868_vm4, %v18755_v58, %v3890_v11  ;;  %v3935_v42 = vrot.slane %v16139_v8, 2  ;;  %v3161_v26 = vrot.slane %v16161_v13, 6  ;;  %v3009_v28 = vsel %vm916_vm2, %v2966_v45, 0.0 }
 0x348   :  { %v16179_v10 = vsel %vm3868_vm4, %v3890_v11, %v18756_v4  ;;  %12569 = vmatmul.mubr.msk.f32.gmra.mrb[74].mxu0 %vm223_vm0, %v16163_v62  ;;  %v3159_v19 = vrot.slane %v16163_v62, 6  ;;  %v16187_v25 = vmax.f32 %v2849_v30, %v3009_v28  ;;  %v2965_v2 = vsel %vm916_vm2, %v2962_v36, %v2964_v52 }
 0x349   :  { %18757 = vst [vmem:[#allocation31_spill] sm:$0xff] %v16179_v10  ;;  %v2967_v35 = vsel %vm916_vm2, %v2964_v52, %v2966_v45  ;;  %12571 = vmatprep.mubr.msk.f32.mxu0 %vm223_vm0, %v16161_v13  ;;  %v3894_v8 = vrot.slane %v15877_v29, 2  ;;  %v3047_v58 = vmax.f32 %v2847_v32, %v2965_v2  ;;  %v3939_v30 = vrot.slane %v16161_v13, 2 }
 0x34a   :  { %v3048_v11 = vmax.f32 %v2848_v59, %v2967_v35  ;;  %v16195_v4 = vsel %vm3090_vm3, %v3157_v49, %v3159_v19  ;;  %v16198_v10 = vsel %vm3090_vm3, %v3159_v19, %v3161_v26  ;;  %v3167_v28 = vrot.slane %v16187_v25, 6 }
 0x34b   :  { %v18758_v36 = vrot.slane %v15845_v16, 2  ;;  %v18759_v45 = vrot.slane %v15874_v47, 2  ;;  %v3163_v59 = vrot.slane %v3047_v58, 6  ;;  %v3898_v13 = vrot.slane %v15901_v14, 2 }
 0x34c   :  { %v3165_v49 = vrot.slane %v3048_v11, 6  ;;  %12572 = vmatmul.mubr.msk.f32.gmra.mrb[76].mxu0 %vm223_vm0, %v3047_v58  ;;  %v3943_v19 = vrot.slane %v3048_v11, 2  ;;  %v3902_v16 = vrot.slane %v15927_v5, 2  ;;  %v18760_v2 = vrot.slane %v15916_v41, 2 }
 0x34d   :  { %v16205_v52 = vsel %vm3868_vm4, %v18758_v36, %v3894_v8  ;;  %v16210_v29 = vsel %vm3868_vm4, %v3894_v8, %v18759_v45  ;;  %12574 = vmatprep.mubr.msk.f32.mxu0 %vm223_vm0, %v3048_v11  ;;  %v18761_v35 = vrot.slane %v15922_v6, 2  ;;  %v3909_v36 = vrot.slane %v15982_v18, 2 }
 0x34e   :  { %v16226_v45 = vsel %vm3090_vm3, %v3161_v26, %v3163_v59  ;;  %v16229_v32 = vsel %vm3090_vm3, %v3163_v59, %v3165_v49  ;;  %v16232_v14 = vsel %vm3090_vm3, %v3165_v49, %v3167_v28  ;;  %v18762_v5 = vrot.slane %v15874_v47, 2 }
 0x34f   :  { %v16222_v8 = vsel %vm3868_vm4, %v18761_v35, %v18760_v2  ;;  %v18763_v41 = vrot.slane %v15896_v57, 2  ;;  %v18765_v59 = vmov %v18761_v35  ;;  %v18766_v47 = vrot.slane %v15947_v31, 2 }
 0x350   :  { %v16237_v11 = vsel %vm3868_vm4, %v18762_v5, %v3898_v13  ;;  %v16252_v28 = vsel %vm3868_vm4, %v3902_v16, %v18765_v59  ;;  %12575 = vmatmul.mubr.msk.f32.gmra.mrb[78].mxu0 %vm223_vm0, %v16187_v25  ;;  %v3917_v6 = vrot.slane %v16038_v44, 2  ;;  %v3925_v35 = vrot.slane %v16090_v37, 2 }
 0x351   :  { %v16242_v2 = vsel %vm3868_vm4, %v3898_v13, %v18763_v41  ;;  %v18764_v18 = vmov %v18763_v41  ;;  %v16257_v49 = vsel %vm3868_vm4, %v18766_v47, %v3909_v36  ;;  %v18767_v41 = vrot.slane %v15977_v54, 2  ;;  %12579 = vmatprep.mubr.msk.f32.mxu0 %vm223_vm0, %v15779_v7 }
 0x352   :  { %v16247_v26 = vsel %vm3868_vm4, %v18764_v18, %v3902_v16  ;;  %v3913_v13 = vrot.slane %v16007_v51, 2  ;;  %v3921_v16 = vrot.slane %v16067_v34, 2  ;;  %v3929_v5 = vrot.slane %v16116_v20, 2 }
 0x353   :  { %v16264_v57 = vsel %vm3868_vm4, %v3909_v36, %v18767_v41  ;;  %v3933_v18 = vrot.slane %v16142_v22, 2  ;;  %v3937_v59 = vrot.slane %v16163_v62, 2  ;;  %v18768_v36 = vmov %v18767_v41 }
 0x354   :  { %v16278_v47 = vsel %vm3868_vm4, %v18768_v36, %v3913_v13  ;;  %v18769_v51 = vrot.slane %v16002_v50, 2  ;;  %v18771_v20 = vrot.slane %v16033_v3, 2  ;;  %v18773_v62 = vrot.slane %v16062_v21, 2  ;;  %12580 = vmatmul.mubr.msk.f32.vlgmr.msra.gmra.mrb[40].mxu0 %vm223_vm0, %v15742_v15 }
 0x355   :  { %v18775_v36 = vrot.slane %v16087_v43, 2  ;;  %12582 = vmatprep.mubr.msk.f32.mxu0 %vm223_vm0, %v15745_v53  ;;  %12640 = vmatpush3.msra.mxu0 %v15719_v17  ;;  %v16339_v15 = vsel %vm3868_vm4, %v3935_v42, %v3937_v59  ;;  %v16342_v43 = vsel %vm3868_vm4, %v3937_v59, %v3939_v30  ;;  %v18780_v17 = vld [vmem:[#allocation12_spill] sm:$0xff]  ;;  %v10803_v53 = vld [vmem:[%s18553_s7 + $0x10] sm:$0xff]  ;;  %v18795_v59 = vld [vmem:[#allocation29_spill] sm:$0xff] }
 0x356   :  { %v16283_v44 = vsel %vm3868_vm4, %v3913_v13, %v18769_v51  ;;  %v18770_v7 = vmov %v18769_v51  ;;  %v16293_v34 = vsel %vm3868_vm4, %v3917_v6, %v18771_v20  ;;  %v18772_v54 = vmov %v18771_v20 }
 0x357   :  { %v16288_v37 = vsel %vm3868_vm4, %v18770_v7, %v3917_v6  ;;  %v16298_v22 = vsel %vm3868_vm4, %v18772_v54, %v3921_v16  ;;  %v16303_v41 = vsel %vm3868_vm4, %v3921_v16, %v18773_v62  ;;  %v18774_v50 = vmov %v18773_v62 }
 0x358   :  { %v16308_v13 = vsel %vm3868_vm4, %v18774_v50, %v3925_v35  ;;  %v16313_v6 = vsel %vm3868_vm4, %v3925_v35, %v18775_v36  ;;  %v18776_v3 = vmov %v18775_v36  ;;  %v18777_v16 = vrot.slane %v16113_v63, 2  ;;  %12583 = vmatmul.mubr.msk.f32.gmra.mrb[42].mxu0 %vm223_vm0, %v15769_v33  ;;  %v10804_v33 = vld [vmem:[%s18553_s7 + $0x18] sm:$0xff]  ;;  %v18805_v50 = vld [vmem:[#allocation30_spill] sm:$0xff] }
 0x359   :  { %v16320_v51 = vsel %vm3868_vm4, %v18776_v3, %v3929_v5  ;;  %v16333_v35 = vsel %vm3868_vm4, %v3933_v18, %v3935_v42  ;;  %v18779_v63 = vrot.slane %v16187_v25, 2  ;;  %12585 = vmatprep.mubr.msk.f32.mxu0 %vm223_vm0, %v15772_v27  ;;  %v18781_v27 = vld [vmem:[#allocation14_spill] sm:$0xff]  ;;  %v18790_v42 = vld [vmem:[#allocation21_spill] sm:$0xff]  ;;  %v18806_v36 = vld [vmem:[#allocation31_spill] sm:$0xff] }
 0x35a   :  { %v16325_v21 = vsel %vm3868_vm4, %v3929_v5, %v18777_v16  ;;  %v18778_v7 = vmov %v18777_v16  ;;  %v3941_v5 = vrot.slane %v3047_v58, 2  ;;  %v18792_v58 = vld [vmem:[#allocation22_spill] sm:$0xff] }
 0x35b   :  { %v16330_v20 = vsel %vm3868_vm4, %v18778_v7, %v3933_v18  ;;  %v16347_v54 = vsel %vm3868_vm4, %v3943_v19, %v18779_v63 }
 0x35c   :  { %v16350_v18 = vsel %vm3868_vm4, %v3939_v30, %v3941_v5  ;;  %v16353_v62 = vsel %vm3868_vm4, %v3941_v5, %v3943_v19  ;;  %12586 = vmatmul.mubr.msk.f32.gmra.mrb[44].mxu0 %vm223_vm0, %v15800_v61  ;;  %v13528_v61 = vpack.c.bf16 %v10804_v33, %v10803_v53  ;;  %v18793_v30 = vld [vmem:[#allocation26_spill] sm:$0xff]  ;;  %v18794_v19 = vld [vmem:[#allocation28_spill] sm:$0xff] }
 0x35d   :  { %12588 = vmatprep.mubr.msk.f32.mxu0 %vm223_vm0, %v15803_v48  ;;  %v18782_v48 = vld [vmem:[#allocation15_spill] sm:$0xff] }
 0x35e   :  { %13529 = vmatprep.subr.bf16.mxu1 %v13528_v61 }
 0x35f   :  { %13531 = vmatpush3.bf16.msra.mxu1 %v13528_v61 }
 0x360   :  { %12589 = vmatmul.mubr.msk.f32.gmra.mrb[46].mxu0 %vm223_vm0, %v15825_v56  ;;  %v18783_v56 = vld [vmem:[#allocation16_spill] sm:$0xff] }
 0x361   :  { %12591 = vmatprep.mubr.msk.f32.mxu0 %vm223_vm0, %v15828_v39  ;;  %v18784_v39 = vld [vmem:[#allocation17_spill] sm:$0xff] }
 0x364   :  { %12592 = vmatmul.mubr.msk.f32.gmra.mrb[48].mxu0 %vm223_vm0, %v15854_v46  ;;  %v18785_v46 = vrot.slane %v15947_v31, 6  ;;  %v18791_v31 = vld [vmem:[#allocation25_spill] sm:$0xff] }
 0x365   :  { %12594 = vmatprep.mubr.msk.f32.mxu0 %vm223_vm0, %v15857_v40 }
 0x366   :  { %v3172_v40 = vsel %vm3090_vm3, 0.0, %v18785_v46 }
 0x368   :  { %12595 = vmatmul.mubr.msk.f32.gmra.mrb[50].mxu0 %vm223_vm0, %v15881_v55  ;;  %v18786_v55 = vld [vmem:[#allocation20_spill] sm:$0xff] }
 0x369   :  { %12597 = vmatprep.mubr.msk.f32.mxu0 %vm223_vm0, %v15884_v23  ;;  %v18787_v23 = vld [vmem:[#allocation8_spill] sm:$0xff] }
 0x36c   :  { %12598 = vmatmul.mubr.msk.f32.gmra.mrb[52].mxu0 %vm223_vm0, %v15905_v1  ;;  %v18788_v1 = vld [vmem:[#allocation18_spill] sm:$0xff] }
 0x36d   :  { %12600 = vmatprep.mubr.msk.f32.mxu0 %vm223_vm0, %v15908_v24  ;;  %v18789_v24 = vld [vmem:[#allocation24_spill] sm:$0xff] }
 0x370   :  { %12601 = vmatmul.mubr.msk.f32.gmra.mrb[54].mxu0 %vm223_vm0, %v18780_v17 }
 0x371   :  { %12603 = vmatprep.mubr.msk.f32.mxu0 %vm223_vm0, %v18781_v27 }
 0x374   :  { %12604 = vmatmul.mubr.msk.f32.gmra.mrb[56].mxu0 %vm223_vm0, %v18782_v48 }
 0x375   :  { %12606 = vmatprep.mubr.msk.f32.mxu0 %vm223_vm0, %v18783_v56 }
 0x378   :  { %12607 = vmatmul.mubr.msk.f32.gmra.mrb[58].mxu0 %vm223_vm0, %v18784_v39 }
 0x379   :  { %12609 = vmatprep.mubr.msk.f32.mxu0 %vm223_vm0, %v3172_v40 }
 0x37c   :  { %12610 = vmatmul.mubr.msk.f32.gmra.mrb[60].mxu0 %vm223_vm0, %v18786_v55 }
 0x37d   :  { %12612 = vmatprep.mubr.msk.f32.mxu0 %vm223_vm0, %v18787_v23 }
 0x380   :  { %12613 = vmatmul.mubr.msk.f32.gmra.mrb[62].mxu0 %vm223_vm0, %v18788_v1 }
 0x381   :  { %12615 = vmatprep.mubr.msk.f32.mxu0 %vm223_vm0, %v18789_v24 }
 0x384   :  { %12616 = vmatmul.mubr.msk.f32.gmra.mrb[64].mxu0 %vm223_vm0, %v18790_v42 }
 0x385   :  { %12618 = vmatprep.mubr.msk.f32.mxu0 %vm223_vm0, %v18791_v31 }
 0x388   :  { %12619 = vmatmul.mubr.msk.f32.gmra.mrb[66].mxu0 %vm223_vm0, %v18792_v58 }
 0x389   :  { %12621 = vmatprep.mubr.msk.f32.mxu0 %vm223_vm0, %v18793_v30 }
 0x38c   :  { %12622 = vmatmul.mubr.msk.f32.gmra.mrb[68].mxu0 %vm223_vm0, %v18794_v19 }
 0x38d   :  { %12624 = vmatprep.mubr.msk.f32.mxu0 %vm223_vm0, %v18795_v59 }
 0x390   :  { %12625 = vmatmul.mubr.msk.f32.gmra.mrb[70].mxu0 %vm223_vm0, %v16146_v9  ;;  %v18797_v9 = vld [vmem:[#allocation6_spill] sm:$0xff] }
 0x391   :  { %12627 = vmatprep.mubr.msk.f32.mxu0 %vm223_vm0, %v16149_v12  ;;  %v18796_v12 = vld [vmem:[#allocation5_spill] sm:$0xff] }
 0x394   :  { %12628 = vmatmul.mubr.msk.f32.gmra.mrb[72].mxu0 %vm223_vm0, %v16166_v0  ;;  %v18799_v0 = vld [vmem:[#allocation9_spill] sm:$0xff] }
 0x395   :  { %12630 = vmatprep.mubr.msk.f32.mxu0 %vm223_vm0, %v16169_v60  ;;  %v18798_v60 = vld [vmem:[#allocation7_spill] sm:$0xff] }
 0x398   :  { %12631 = vmatmul.mubr.msk.f32.gmra.mrb[74].mxu0 %vm223_vm0, %v16195_v4  ;;  %v18801_v4 = vld [vmem:[#allocation19_spill] sm:$0xff] }
 0x399   :  { %12633 = vmatprep.mubr.msk.f32.mxu0 %vm223_vm0, %v16198_v10  ;;  %v18800_v10 = vld [vmem:[#allocation11_spill] sm:$0xff] }
 0x39c   :  { %12634 = vmatmul.mubr.msk.f32.gmra.mrb[76].mxu0 %vm223_vm0, %v16226_v45  ;;  %v18803_v45 = vld [vmem:[#allocation13_spill] sm:$0xff] }
 0x39d   :  { %12636 = vmatprep.mubr.msk.f32.mxu0 %vm223_vm0, %v16229_v32  ;;  %v18802_v32 = vld [vmem:[#allocation23_spill] sm:$0xff] }
 0x3a0   :  { %12637 = vmatmul.mubr.msk.f32.gmra.mrb[78].mxu0 %vm223_vm0, %v16232_v14  ;;  %v18804_v14 = vld [vmem:[#allocation27_spill] sm:$0xff] }
 0x3a1   :  { %12641 = vmatprep.mubr.msk.f32.mxu0 %vm223_vm0, %v18796_v12 }
 0x3a4   :  { %12642 = vmatmul.mubr.msk.f32.vlgmr.msra.gmra.mrb[40].mxu0 %vm223_vm0, %v18797_v9 }
 0x3a5   :  { %12644 = vmatprep.mubr.msk.f32.mxu0 %vm223_vm0, %v18798_v60 }
 0x3a8   :  { %12645 = vmatmul.mubr.msk.f32.gmra.mrb[42].mxu0 %vm223_vm0, %v18799_v0 }
 0x3a9   :  { %12647 = vmatprep.mubr.msk.f32.mxu0 %vm223_vm0, %v18800_v10 }
 0x3ac   :  { %12648 = vmatmul.mubr.msk.f32.gmra.mrb[44].mxu0 %vm223_vm0, %v18801_v4 }
 0x3ad   :  { %12650 = vmatprep.mubr.msk.f32.mxu0 %vm223_vm0, %v18802_v32 }
 0x3b0   :  { %12651 = vmatmul.mubr.msk.f32.gmra.mrb[46].mxu0 %vm223_vm0, %v18803_v45 }
 0x3b1   :  { %12653 = vmatprep.mubr.msk.f32.mxu0 %vm223_vm0, %v18804_v14 }
 0x3b4   :  { %12654 = vmatmul.mubr.msk.f32.gmra.mrb[48].mxu0 %vm223_vm0, %v18805_v50 }
 0x3b5   :  { %12656 = vmatprep.mubr.msk.f32.mxu0 %vm223_vm0, %v16174_v38  ;;  %v18807_v38 = vld [vmem:[#allocation10_spill] sm:$0xff] }
 0x3b8   :  { %12657 = vmatmul.mubr.msk.f32.gmra.mrb[50].mxu0 %vm223_vm0, %v18806_v36 }
 0x3b9   :  { %12659 = vmatprep.mubr.msk.f32.mxu0 %vm223_vm0, %v16205_v52  ;;  %v18808_v52 = vrot.slane %v18807_v38, 2 }
 0x3bb   :  { %v3949_v3 = vsel %vm3868_vm4, %v18808_v52, 0.0 }
 0x3bc   :  { %12660 = vmatmul.mubr.msk.f32.gmra.mrb[52].mxu0 %vm223_vm0, %v16210_v29  ;;  %v18809_v29 = vmov %v18779_v63 }
 0x3bd   :  { %12662 = vmatprep.mubr.msk.f32.mxu0 %vm223_vm0, %v16237_v11  ;;  %v4549_v11 = vld [vmem:[%s18553_s7] sm:$0xff] }
 0x3c0   :  { %12663 = vmatmul.mubr.msk.f32.gmra.mrb[54].mxu0 %vm223_vm0, %v16242_v2  ;;  %v4550_v2 = vld [vmem:[%s18553_s7 + $0x8] sm:$0xff] }
 0x3c1   :  { %12665 = vmatprep.mubr.msk.f32.mxu0 %vm223_vm0, %v16247_v26  ;;  %v13532_v26 = vpack.c.bf16 %v4550_v2, %v4549_v11 }
 0x3c3   :  { %13533 = vmatprep.subr.bf16.mxu1 %v13532_v26 }
 0x3c4   :  { %12666 = vmatmul.mubr.msk.f32.gmra.mrb[56].mxu0 %vm223_vm0, %v16252_v28  ;;  %v16530_v28 = vld [vmem:[%s18552_s6] ss:$0 sm:$0xff] }
 0x3c5   :  { %12668 = vmatprep.mubr.msk.f32.mxu0 %vm223_vm0, %v16222_v8  ;;  %v3950_v8 = vsel %vm3868_vm4, %v18809_v29, 0.0 }
 0x3c8   :  { %12669 = vmatmul.mubr.msk.f32.gmra.mrb[58].mxu0 %vm223_vm0, %v3949_v3 }
 0x3c9   :  { %12671 = vmatprep.mubr.msk.f32.mxu0 %vm223_vm0, %v16257_v49 }
 0x3cc   :  { %12672 = vmatmul.mubr.msk.f32.gmra.mrb[60].mxu0 %vm223_vm0, %v16264_v57 }
 0x3cd   :  { %12674 = vmatprep.mubr.msk.f32.mxu0 %vm223_vm0, %v16278_v47 }
 0x3d0   :  { %12675 = vmatmul.mubr.msk.f32.gmra.mrb[62].mxu0 %vm223_vm0, %v16283_v44  ;;  %v10885_v44 = vld [vmem:[%s18553_s7 + $0x20] sm:$0xff] }
 0x3d1   :  { %12677 = vmatprep.mubr.msk.f32.mxu0 %vm223_vm0, %v16288_v37  ;;  %v10886_v37 = vld [vmem:[%s18553_s7 + $0x28] sm:$0xff] }
 0x3d4   :  { %12678 = vmatmul.mubr.msk.f32.gmra.mrb[64].mxu0 %vm223_vm0, %v16293_v34 }
 0x3d5   :  { %12680 = vmatprep.mubr.msk.f32.mxu0 %vm223_vm0, %v16298_v22 }
 0x3d8   :  { %12681 = vmatmul.mubr.msk.f32.gmra.mrb[66].mxu0 %vm223_vm0, %v16303_v41 }
 0x3d9   :  { %12683 = vmatprep.mubr.msk.f32.mxu0 %vm223_vm0, %v16308_v13 }
 0x3dc   :  { %12684 = vmatmul.mubr.msk.f32.gmra.mrb[68].mxu0 %vm223_vm0, %v16313_v6 }
 0x3dd   :  { %12686 = vmatprep.mubr.msk.f32.mxu0 %vm223_vm0, %v16320_v51 }
 0x3e0   :  { %12687 = vmatmul.mubr.msk.f32.gmra.mrb[70].mxu0 %vm223_vm0, %v16325_v21  ;;  %v16543_v21 = vpack.c.bf16 %v10886_v37, %v10885_v44 }
 0x3e1   :  { %12689 = vmatprep.mubr.msk.f32.mxu0 %vm223_vm0, %v16330_v20 }
 0x3e4   :  { %12690 = vmatmul.mubr.msk.f32.gmra.mrb[72].mxu0 %vm223_vm0, %v16333_v35 }
 0x3e5   :  { %12692 = vmatprep.mubr.msk.f32.mxu0 %vm223_vm0, %v16339_v15 }
 0x3e8   :  { %12693 = vmatmul.mubr.msk.f32.gmra.mrb[74].mxu0 %vm223_vm0, %v16342_v43 }
 0x3e9   :  { %12695 = vmatprep.mubr.msk.f32.mxu0 %vm223_vm0, %v16350_v18 }
 0x3ec   :  { %12696 = vmatmul.mubr.msk.f32.gmra.mrb[76].mxu0 %vm223_vm0, %v16353_v62 }
 0x3ed   :  { %12698 = vmatprep.mubr.msk.f32.mxu0 %vm223_vm0, %v16347_v54 }
 0x3f0   :  { %12699 = vmatmul.mubr.msk.f32.gmra.mrb[78].mxu0 %vm223_vm0, %v3950_v8 }
 0x477   :  { %v12643_v25 = vpop.f32.mrb[40].mxu0 }
 0x478   :  { %v4348_v49 = vadd.f32 %v12643_v25, %v16530_v28  ;;  %v4101_v57 = vpop.f32.mrb[41].mxu0 }
 0x479   :  { %v4347_v47 = vadd.f32 %v16530_v28, %v4101_v57 }
 0x47a   :  { %v4388_v34 = vmax.f32 %v4348_v49, 0.0 }
 0x47b   :  { %v16540_v22 = vmax.f32 %v4347_v47, 0.0  ;;  %v12646_v41 = vpop.f32.mrb[42].mxu0 }
 0x47c   :  { %v4468_v13 = vrot.slane %v4388_v34, 6  ;;  %v5248_v6 = vrot.slane %v4388_v34, 2  ;;  %v4350_v51 = vadd.f32 %v12646_v41, %v16530_v28  ;;  %v4111_v16 = vpop.f32.mrb[43].mxu0 }
 0x47d   :  { %v5247_v7 = vrot.slane %v16540_v22, 2  ;;  %v4349_v20 = vadd.f32 %v16530_v28, %v4111_v16  ;;  %12705 = vmatprep.mubr.msk.f32.mxu1 %vm4554_vm5, %v16540_v22  ;;  %v18583_v35 = vrot.slane %v16540_v22, 6 }
 0x47e   :  { %v4390_v15 = vmax.f32 %v4350_v51, 0.0  ;;  %12706 = vmatmul.mubr.msk.f32.vlgmr.msra.gmra.mrb[44].mxu1 %vm4554_vm5, %v4388_v34 }
 0x47f   :  { %v4389_v43 = vmax.f32 %v4349_v20, 0.0  ;;  %v12649_v5 = vpop.f32.mrb[44].mxu0  ;;  %13535 = vmatpush3.bf16.msra.mxu1 %v13532_v26  ;;  %v16554_v63 = vsel %vm3090_vm3, %v18583_v35, %v4468_v13  ;;  %v16557_v54 = vsel %vm3868_vm4, %v5247_v7, %v5248_v6 }
 0x480   :  { %v4472_v18 = vrot.slane %v4390_v15, 6  ;;  %v5252_v62 = vrot.slane %v4390_v15, 2  ;;  %v4352_v17 = vadd.f32 %v12649_v5, %v16530_v28  ;;  %v4121_v53 = vpop.f32.mrb[45].mxu0  ;;  %13537 = vmatprep.subr.bf16.mxu1 %v16543_v21 }
 0x481   :  { %v4470_v33 = vrot.slane %v4389_v43, 6  ;;  %v5250_v27 = vrot.slane %v4389_v43, 2  ;;  %v4351_v61 = vadd.f32 %v16530_v28, %v4121_v53  ;;  %12708 = vmatprep.mubr.msk.f32.mxu1 %vm4554_vm5, %v4389_v43 }
 0x482   :  { %v4392_v48 = vmax.f32 %v4352_v17, 0.0  ;;  %12709 = vmatmul.mubr.msk.f32.gmra.mrb[46].mxu1 %vm4554_vm5, %v4390_v15 }
 0x483   :  { %v4391_v56 = vmax.f32 %v4351_v61, 0.0  ;;  %v12652_v39 = vpop.f32.mrb[46].mxu0  ;;  %v16565_v46 = vsel %vm3090_vm3, %v4468_v13, %v4470_v33  ;;  %v16568_v40 = vsel %vm3090_vm3, %v4470_v33, %v4472_v18  ;;  %v16571_v55 = vsel %vm3868_vm4, %v5248_v6, %v5250_v27 }
 0x484   :  { %v4476_v23 = vrot.slane %v4392_v48, 6  ;;  %v5256_v1 = vrot.slane %v4392_v48, 2  ;;  %v4354_v24 = vadd.f32 %v12652_v39, %v16530_v28  ;;  %v4131_v42 = vpop.f32.mrb[47].mxu0  ;;  %v16575_v31 = vsel %vm3868_vm4, %v5250_v27, %v5252_v62 }
 0x485   :  { %v4474_v58 = vrot.slane %v4391_v56, 6  ;;  %v5254_v30 = vrot.slane %v4391_v56, 2  ;;  %v4353_v19 = vadd.f32 %v16530_v28, %v4131_v42  ;;  %12711 = vmatprep.mubr.msk.f32.mxu1 %vm4554_vm5, %v4391_v56 }
 0x486   :  { %v4394_v59 = vmax.f32 %v4354_v24, 0.0  ;;  %12712 = vmatmul.mubr.msk.f32.gmra.mrb[48].mxu1 %vm4554_vm5, %v4392_v48 }
 0x487   :  { %v4393_v12 = vmax.f32 %v4353_v19, 0.0  ;;  %v12655_v9 = vpop.f32.mrb[48].mxu0  ;;  %v16581_v60 = vsel %vm3090_vm3, %v4472_v18, %v4474_v58  ;;  %v16584_v0 = vsel %vm3090_vm3, %v4474_v58, %v4476_v23  ;;  %v16587_v10 = vsel %vm3868_vm4, %v5252_v62, %v5254_v30 }
 0x488   :  { %v4480_v4 = vrot.slane %v4394_v59, 6  ;;  %v5260_v32 = vrot.slane %v4394_v59, 2  ;;  %v4356_v45 = vadd.f32 %v12655_v9, %v16530_v28  ;;  %v4141_v14 = vpop.f32.mrb[49].mxu0  ;;  %v16591_v50 = vsel %vm3868_vm4, %v5254_v30, %v5256_v1 }
 0x489   :  { %v4478_v36 = vrot.slane %v4393_v12, 6  ;;  %v5258_v38 = vrot.slane %v4393_v12, 2  ;;  %v4355_v52 = vadd.f32 %v16530_v28, %v4141_v14  ;;  %12714 = vmatprep.mubr.msk.f32.mxu1 %vm4554_vm5, %v4393_v12 }
 0x48a   :  { %v4396_v3 = vmax.f32 %v4356_v45, 0.0  ;;  %12715 = vmatmul.mubr.msk.f32.gmra.mrb[50].mxu1 %vm4554_vm5, %v4394_v59 }
 0x48b   :  { %v4395_v29 = vmax.f32 %v4355_v52, 0.0  ;;  %v12658_v8 = vpop.f32.mrb[50].mxu0  ;;  %v16597_v11 = vsel %vm3090_vm3, %v4476_v23, %v4478_v36  ;;  %v16600_v2 = vsel %vm3090_vm3, %v4478_v36, %v4480_v4  ;;  %v16603_v26 = vsel %vm3868_vm4, %v5256_v1, %v5258_v38 }
 0x48c   :  { %v4484_v25 = vrot.slane %v4396_v3, 6  ;;  %v5264_v49 = vrot.slane %v4396_v3, 2  ;;  %v4358_v57 = vadd.f32 %v12658_v8, %v16530_v28  ;;  %v4151_v47 = vpop.f32.mrb[51].mxu0  ;;  %v16607_v44 = vsel %vm3868_vm4, %v5258_v38, %v5260_v32 }
 0x48d   :  { %v4482_v37 = vrot.slane %v4395_v29, 6  ;;  %v5262_v34 = vrot.slane %v4395_v29, 2  ;;  %v4357_v41 = vadd.f32 %v16530_v28, %v4151_v47  ;;  %12717 = vmatprep.mubr.msk.f32.mxu1 %vm4554_vm5, %v4395_v29 }
 0x48e   :  { %v4398_v13 = vmax.f32 %v4358_v57, 0.0  ;;  %12718 = vmatmul.mubr.msk.f32.gmra.mrb[52].mxu1 %vm4554_vm5, %v4396_v3 }
 0x48f   :  { %v4397_v6 = vmax.f32 %v4357_v41, 0.0  ;;  %v12661_v51 = vpop.f32.mrb[52].mxu0  ;;  %v16613_v16 = vsel %vm3090_vm3, %v4480_v4, %v4482_v37  ;;  %v16616_v7 = vsel %vm3090_vm3, %v4482_v37, %v4484_v25  ;;  %v16619_v20 = vsel %vm3868_vm4, %v5260_v32, %v5262_v34 }
 0x490   :  { %v4488_v15 = vrot.slane %v4398_v13, 6  ;;  %v5268_v43 = vrot.slane %v4398_v13, 2  ;;  %v4360_v5 = vadd.f32 %v12661_v51, %v16530_v28  ;;  %v4161_v18 = vpop.f32.mrb[53].mxu0  ;;  %v16623_v62 = vsel %vm3868_vm4, %v5262_v34, %v5264_v49 }
 0x491   :  { %18810 = vst [vmem:[#allocation32_spill] sm:$0xff] %v16623_v62  ;;  %v4486_v17 = vrot.slane %v4397_v6, 6  ;;  %v5266_v53 = vrot.slane %v4397_v6, 2  ;;  %v4359_v33 = vadd.f32 %v16530_v28, %v4161_v18  ;;  %12720 = vmatprep.mubr.msk.f32.mxu1 %vm4554_vm5, %v4397_v6 }
 0x492   :  { %v4400_v27 = vmax.f32 %v4360_v5, 0.0  ;;  %12721 = vmatmul.mubr.msk.f32.gmra.mrb[54].mxu1 %vm4554_vm5, %v4398_v13 }
 0x493   :  { %v4399_v61 = vmax.f32 %v4359_v33, 0.0  ;;  %v12664_v48 = vpop.f32.mrb[54].mxu0  ;;  %v16629_v56 = vsel %vm3090_vm3, %v4484_v25, %v4486_v17  ;;  %v16632_v39 = vsel %vm3090_vm3, %v4486_v17, %v4488_v15  ;;  %v16635_v23 = vsel %vm3868_vm4, %v5264_v49, %v5266_v53 }
 0x494   :  { %18811 = vst [vmem:[#allocation33_spill] sm:$0xff] %v16635_v23  ;;  %v4492_v1 = vrot.slane %v4400_v27, 6  ;;  %v5272_v24 = vrot.slane %v4400_v27, 2  ;;  %v4362_v42 = vadd.f32 %v12664_v48, %v16530_v28  ;;  %v4171_v58 = vpop.f32.mrb[55].mxu0  ;;  %v16639_v30 = vsel %vm3868_vm4, %v5266_v53, %v5268_v43 }
 0x495   :  { %18812 = vst [vmem:[#allocation12_spill] sm:$0xff] %v16639_v30  ;;  %v4490_v19 = vrot.slane %v4399_v61, 6  ;;  %v5270_v59 = vrot.slane %v4399_v61, 2  ;;  %v4361_v12 = vadd.f32 %v16530_v28, %v4171_v58  ;;  %12723 = vmatprep.mubr.msk.f32.mxu1 %vm4554_vm5, %v4399_v61 }
 0x496   :  { %v4402_v9 = vmax.f32 %v4362_v42, 0.0  ;;  %12724 = vmatmul.mubr.msk.f32.gmra.mrb[56].mxu1 %vm4554_vm5, %v4400_v27 }
 0x497   :  { %v4401_v4 = vmax.f32 %v4361_v12, 0.0  ;;  %v12667_v32 = vpop.f32.mrb[56].mxu0  ;;  %v16645_v45 = vsel %vm3090_vm3, %v4488_v15, %v4490_v19  ;;  %v16648_v14 = vsel %vm3090_vm3, %v4490_v19, %v4492_v1  ;;  %v16651_v36 = vsel %vm3868_vm4, %v5268_v43, %v5270_v59 }
 0x498   :  { %18813 = vst [vmem:[#allocation14_spill] sm:$0xff] %v16651_v36  ;;  %v4496_v38 = vrot.slane %v4402_v9, 6  ;;  %v5276_v52 = vrot.slane %v4402_v9, 2  ;;  %v4364_v3 = vadd.f32 %v12667_v32, %v16530_v28  ;;  %v4181_v29 = vpop.f32.mrb[57].mxu0  ;;  %v16655_v8 = vsel %vm3868_vm4, %v5270_v59, %v5272_v24 }
 0x499   :  { %18814 = vst [vmem:[#allocation15_spill] sm:$0xff] %v16655_v8  ;;  %v4494_v25 = vrot.slane %v4401_v4, 6  ;;  %v5274_v49 = vrot.slane %v4401_v4, 2  ;;  %v4363_v57 = vadd.f32 %v16530_v28, %v4181_v29  ;;  %12726 = vmatprep.mubr.msk.f32.mxu1 %vm4554_vm5, %v4401_v4 }
 0x49a   :  { %v4404_v47 = vmax.f32 %v4364_v3, 0.0  ;;  %12727 = vmatmul.mubr.msk.f32.gmra.mrb[58].mxu1 %vm4554_vm5, %v4402_v9 }
 0x49b   :  { %v4403_v37 = vmax.f32 %v4363_v57, 0.0  ;;  %v12670_v34 = vpop.f32.mrb[58].mxu0  ;;  %v16661_v41 = vsel %vm3090_vm3, %v4492_v1, %v4494_v25  ;;  %v16664_v13 = vsel %vm3090_vm3, %v4494_v25, %v4496_v38  ;;  %v16667_v6 = vsel %vm3868_vm4, %v5272_v24, %v5274_v49 }
 0x49c   :  { %18815 = vst [vmem:[#allocation16_spill] sm:$0xff] %v16667_v6  ;;  %v4500_v51 = vrot.slane %v4404_v47, 6  ;;  %v5280_v15 = vrot.slane %v4404_v47, 2  ;;  %v4366_v43 = vadd.f32 %v12670_v34, %v16530_v28  ;;  %v4191_v5 = vpop.f32.mrb[59].mxu0  ;;  %v16671_v18 = vsel %vm3868_vm4, %v5274_v49, %v5276_v52 }
 0x49d   :  { %18816 = vst [vmem:[#allocation17_spill] sm:$0xff] %v16671_v18  ;;  %v4498_v17 = vrot.slane %v4403_v37, 6  ;;  %v5278_v53 = vrot.slane %v4403_v37, 2  ;;  %v4365_v33 = vadd.f32 %v16530_v28, %v4191_v5  ;;  %12729 = vmatprep.mubr.msk.f32.mxu1 %vm4554_vm5, %v4403_v37 }
 0x49e   :  { %v16675_v27 = vmax.f32 %v4366_v43, 0.0  ;;  %12730 = vmatmul.mubr.msk.f32.gmra.mrb[60].mxu1 %vm4554_vm5, %v4404_v47 }
 0x49f   :  { %v4405_v61 = vmax.f32 %v4365_v33, 0.0  ;;  %v12673_v48 = vpop.f32.mrb[60].mxu0  ;;  %v16679_v1 = vsel %vm3090_vm3, %v4496_v38, %v4498_v17  ;;  %v16682_v24 = vsel %vm3090_vm3, %v4498_v17, %v4500_v51  ;;  %v16685_v42 = vsel %vm3868_vm4, %v5276_v52, %v5278_v53 }
 0x4a0   :  { %18817 = vst [vmem:[#allocation20_spill] sm:$0xff] %v16675_v27  ;;  %18818 = vst [vmem:[#allocation8_spill] sm:$0xff] %v16685_v42  ;;  %v4504_v58 = vrot.slane %v16675_v27, 6  ;;  %v18581_v19 = vrot.slane %v16675_v27, 2  ;;  %v4368_v59 = vadd.f32 %v12673_v48, %v16530_v28  ;;  %v4201_v12 = vpop.f32.mrb[61].mxu0  ;;  %v16691_v9 = vsel %vm3868_vm4, %v5278_v53, %v5280_v15 }
 0x4a1   :  { %18819 = vst [vmem:[#allocation18_spill] sm:$0xff] %v16691_v9  ;;  %v4502_v4 = vrot.slane %v4405_v61, 6  ;;  %v5282_v32 = vrot.slane %v4405_v61, 2  ;;  %v4367_v38 = vadd.f32 %v16530_v28, %v4201_v12  ;;  %12732 = vmatprep.mubr.msk.f32.mxu1 %vm4554_vm5, %v4405_v61 }
 0x4a2   :  { %v4408_v3 = vmax.f32 %v4368_v59, 0.0  ;;  %12733 = vmatmul.mubr.msk.f32.gmra.mrb[62].mxu1 %vm4554_vm5, %v16675_v27 }
 0x4a3   :  { %v16697_v52 = vmax.f32 %v4367_v38, 0.0  ;;  %v12676_v29 = vpop.f32.mrb[62].mxu0  ;;  %v16700_v25 = vsel %vm3090_vm3, %v4500_v51, %v4502_v4  ;;  %v16703_v49 = vsel %vm3090_vm3, %v4502_v4, %v4504_v58  ;;  %v16706_v57 = vsel %vm3868_vm4, %v5280_v15, %v5282_v32 }
 0x4a4   :  { %18820 = vst [vmem:[#allocation24_spill] sm:$0xff] %v16706_v57  ;;  %v4507_v47 = vrot.slane %v4408_v3, 6  ;;  %v5287_v37 = vrot.slane %v4408_v3, 2  ;;  %v4370_v34 = vadd.f32 %v12676_v29, %v16530_v28  ;;  %v4211_v43 = vpop.f32.mrb[63].mxu0  ;;  %v16712_v5 = vsel %vm3868_vm4, %v5282_v32, %v18581_v19 }
 0x4a5   :  { %18821 = vst [vmem:[#allocation21_spill] sm:$0xff] %v16712_v5  ;;  %v5286_v17 = vrot.slane %v16697_v52, 2  ;;  %v4369_v51 = vadd.f32 %v16530_v28, %v4211_v43  ;;  %12735 = vmatprep.mubr.msk.f32.mxu1 %vm4554_vm5, %v16697_v52  ;;  %v18582_v15 = vrot.slane %v16697_v52, 6 }
 0x4a6   :  { %v4410_v53 = vmax.f32 %v4370_v34, 0.0  ;;  %12736 = vmatmul.mubr.msk.f32.gmra.mrb[64].mxu1 %vm4554_vm5, %v4408_v3 }
 0x4a7   :  { %v4409_v33 = vmax.f32 %v4369_v51, 0.0  ;;  %v12679_v61 = vpop.f32.mrb[64].mxu0  ;;  %v16723_v48 = vsel %vm3090_vm3, %v18582_v15, %v4507_v47  ;;  %v16726_v58 = vsel %vm3868_vm4, %v5286_v17, %v5287_v37 }
 0x4a8   :  { %18822 = vst [vmem:[#allocation25_spill] sm:$0xff] %v16726_v58  ;;  %v4511_v59 = vrot.slane %v4410_v53, 6  ;;  %v5291_v12 = vrot.slane %v4410_v53, 2  ;;  %v4372_v4 = vadd.f32 %v12679_v61, %v16530_v28  ;;  %v4221_v32 = vpop.f32.mrb[65].mxu0 }
 0x4a9   :  { %v4509_v38 = vrot.slane %v4409_v33, 6  ;;  %v5289_v29 = vrot.slane %v4409_v33, 2  ;;  %v4371_v34 = vadd.f32 %v16530_v28, %v4221_v32  ;;  %12738 = vmatprep.mubr.msk.f32.mxu1 %vm4554_vm5, %v4409_v33 }
 0x4aa   :  { %v4412_v3 = vmax.f32 %v4372_v4, 0.0  ;;  %12739 = vmatmul.mubr.msk.f32.gmra.mrb[66].mxu1 %vm4554_vm5, %v4410_v53 }
 0x4ab   :  { %v4411_v43 = vmax.f32 %v4371_v34, 0.0  ;;  %v12682_v51 = vpop.f32.mrb[66].mxu0  ;;  %v16733_v19 = vsel %vm3090_vm3, %v4507_v47, %v4509_v38  ;;  %v16736_v17 = vsel %vm3090_vm3, %v4509_v38, %v4511_v59  ;;  %v16739_v61 = vsel %vm3868_vm4, %v5287_v37, %v5289_v29 }
 0x4ac   :  { %18823 = vst [vmem:[#allocation22_spill] sm:$0xff] %v16739_v61  ;;  %v4515_v15 = vrot.slane %v4412_v3, 6  ;;  %v5295_v35 = vrot.slane %v4412_v3, 2  ;;  %v4374_v32 = vadd.f32 %v12682_v51, %v16530_v28  ;;  %v4231_v58 = vpop.f32.mrb[67].mxu0  ;;  %v16743_v33 = vsel %vm3868_vm4, %v5289_v29, %v5291_v12 }
 0x4ad   :  { %18824 = vst [vmem:[#allocation26_spill] sm:$0xff] %v16743_v33  ;;  %v4513_v53 = vrot.slane %v4411_v43, 6  ;;  %v5293_v4 = vrot.slane %v4411_v43, 2  ;;  %v4373_v34 = vadd.f32 %v16530_v28, %v4231_v58  ;;  %12741 = vmatprep.mubr.msk.f32.mxu1 %vm4554_vm5, %v4411_v43 }
 0x4ae   :  { %v4414_v47 = vmax.f32 %v4374_v32, 0.0  ;;  %12742 = vmatmul.mubr.msk.f32.gmra.mrb[68].mxu1 %vm4554_vm5, %v4412_v3 }
 0x4af   :  { %v4413_v38 = vmax.f32 %v4373_v34, 0.0  ;;  %v12685_v37 = vpop.f32.mrb[68].mxu0  ;;  %v16749_v61 = vsel %vm3090_vm3, %v4511_v59, %v4513_v53  ;;  %v16752_v51 = vsel %vm3090_vm3, %v4513_v53, %v4515_v15  ;;  %v16755_v29 = vsel %vm3868_vm4, %v5291_v12, %v5293_v4 }
 0x4b0   :  { %18825 = vst [vmem:[#allocation28_spill] sm:$0xff] %v16755_v29  ;;  %v4519_v33 = vrot.slane %v4414_v47, 6  ;;  %v5299_v27 = vrot.slane %v4414_v47, 2  ;;  %v4376_v58 = vadd.f32 %v12685_v37, %v16530_v28  ;;  %v4241_v5 = vpop.f32.mrb[69].mxu0  ;;  %v16759_v43 = vsel %vm3868_vm4, %v5293_v4, %v5295_v35 }
 0x4b1   :  { %18826 = vst [vmem:[#allocation29_spill] sm:$0xff] %v16759_v43  ;;  %v4517_v3 = vrot.slane %v4413_v38, 6  ;;  %v5297_v32 = vrot.slane %v4413_v38, 2  ;;  %v4375_v34 = vadd.f32 %v16530_v28, %v4241_v5  ;;  %12744 = vmatprep.mubr.msk.f32.mxu1 %vm4554_vm5, %v4413_v38 }
 0x4b2   :  { %v4416_v59 = vmax.f32 %v4376_v58, 0.0  ;;  %12745 = vmatmul.mubr.msk.f32.gmra.mrb[70].mxu1 %vm4554_vm5, %v4414_v47 }
 0x4b3   :  { %v4415_v53 = vmax.f32 %v4375_v34, 0.0  ;;  %v12688_v12 = vpop.f32.mrb[70].mxu0  ;;  %v16765_v29 = vsel %vm3090_vm3, %v4515_v15, %v4517_v3  ;;  %v16768_v37 = vsel %vm3090_vm3, %v4517_v3, %v4519_v33  ;;  %v16771_v4 = vsel %vm3868_vm4, %v5295_v35, %v5297_v32 }
 0x4b4   :  { %18827 = vst [vmem:[#allocation5_spill] sm:$0xff] %v16771_v4  ;;  %v4523_v43 = vrot.slane %v4416_v59, 6  ;;  %v5303_v57 = vrot.slane %v4416_v59, 2  ;;  %v4378_v5 = vadd.f32 %v12688_v12, %v16530_v28  ;;  %v4251_v9 = vpop.f32.mrb[71].mxu0  ;;  %v16775_v38 = vsel %vm3868_vm4, %v5297_v32, %v5299_v27 }
 0x4b5   :  { %18828 = vst [vmem:[#allocation6_spill] sm:$0xff] %v16775_v38  ;;  %v4521_v47 = vrot.slane %v4415_v53, 6  ;;  %v5301_v58 = vrot.slane %v4415_v53, 2  ;;  %v4377_v34 = vadd.f32 %v16530_v28, %v4251_v9  ;;  %12747 = vmatprep.mubr.msk.f32.mxu1 %vm4554_vm5, %v4415_v53 }
 0x4b6   :  { %v4418_v15 = vmax.f32 %v4378_v5, 0.0  ;;  %12748 = vmatmul.mubr.msk.f32.gmra.mrb[72].mxu1 %vm4554_vm5, %v4416_v59 }
 0x4b7   :  { %v4417_v3 = vmax.f32 %v4377_v34, 0.0  ;;  %v12691_v35 = vpop.f32.mrb[72].mxu0  ;;  %v16781_v4 = vsel %vm3090_vm3, %v4519_v33, %v4521_v47  ;;  %v16784_v12 = vsel %vm3090_vm3, %v4521_v47, %v4523_v43  ;;  %v16787_v32 = vsel %vm3868_vm4, %v5299_v27, %v5301_v58 }
 0x4b8   :  { %18829 = vst [vmem:[#allocation7_spill] sm:$0xff] %v16787_v32  ;;  %v4527_v38 = vrot.slane %v4418_v15, 6  ;;  %v5307_v42 = vrot.slane %v4418_v15, 2  ;;  %v4380_v9 = vadd.f32 %v12691_v35, %v16530_v28  ;;  %v4261_v18 = vpop.f32.mrb[73].mxu0  ;;  %v16791_v53 = vsel %vm3868_vm4, %v5301_v58, %v5303_v57 }
 0x4b9   :  { %18830 = vst [vmem:[#allocation9_spill] sm:$0xff] %v16791_v53  ;;  %v4525_v59 = vrot.slane %v4417_v3, 6  ;;  %v5305_v5 = vrot.slane %v4417_v3, 2  ;;  %v4379_v34 = vadd.f32 %v16530_v28, %v4261_v18  ;;  %12750 = vmatprep.mubr.msk.f32.mxu1 %vm4554_vm5, %v4417_v3 }
 0x4ba   :  { %v4420_v33 = vmax.f32 %v4380_v9, 0.0  ;;  %12751 = vmatmul.mubr.msk.f32.gmra.mrb[74].mxu1 %vm4554_vm5, %v4418_v15 }
 0x4bb   :  { %v4419_v47 = vmax.f32 %v4379_v34, 0.0  ;;  %v12694_v27 = vpop.f32.mrb[74].mxu0  ;;  %v16797_v32 = vsel %vm3090_vm3, %v4523_v43, %v4525_v59  ;;  %v16800_v35 = vsel %vm3090_vm3, %v4525_v59, %v4527_v38  ;;  %v16803_v58 = vsel %vm3868_vm4, %v5303_v57, %v5305_v5 }
 0x4bc   :  { %18831 = vst [vmem:[#allocation11_spill] sm:$0xff] %v16803_v58  ;;  %v4531_v53 = vrot.slane %v4420_v33, 6  ;;  %v5311_v6 = vrot.slane %v4420_v33, 2  ;;  %v4382_v18 = vadd.f32 %v12694_v27, %v16530_v28  ;;  %v4271_v8 = vpop.f32.mrb[75].mxu0  ;;  %v16807_v3 = vsel %vm3868_vm4, %v5305_v5, %v5307_v42 }
 0x4bd   :  { %18832 = vst [vmem:[#allocation19_spill] sm:$0xff] %v16807_v3  ;;  %v4529_v15 = vrot.slane %v4419_v47, 6  ;;  %v5309_v9 = vrot.slane %v4419_v47, 2  ;;  %v4381_v34 = vadd.f32 %v16530_v28, %v4271_v8  ;;  %12753 = vmatprep.mubr.msk.f32.mxu1 %vm4554_vm5, %v4419_v47 }
 0x4be   :  { %v4422_v43 = vmax.f32 %v4382_v18, 0.0  ;;  %12754 = vmatmul.mubr.msk.f32.gmra.mrb[76].mxu1 %vm4554_vm5, %v4420_v33 }
 0x4bf   :  { %v4421_v59 = vmax.f32 %v4381_v34, 0.0  ;;  %v12697_v57 = vpop.f32.mrb[76].mxu0  ;;  %v16813_v58 = vsel %vm3090_vm3, %v4527_v38, %v4529_v15  ;;  %v16816_v27 = vsel %vm3090_vm3, %v4529_v15, %v4531_v53  ;;  %v16819_v5 = vsel %vm3868_vm4, %v5307_v42, %v5309_v9 }
 0x4c0   :  { %18833 = vst [vmem:[#allocation23_spill] sm:$0xff] %v16819_v5  ;;  %v4535_v3 = vrot.slane %v4422_v43, 6  ;;  %v5315_v36 = vrot.slane %v4422_v43, 2  ;;  %v4384_v8 = vadd.f32 %v12697_v57, %v16530_v28  ;;  %v4281_v30 = vpop.f32.mrb[77].mxu0  ;;  %v16823_v47 = vsel %vm3868_vm4, %v5309_v9, %v5311_v6 }
 0x4c1   :  { %18834 = vst [vmem:[#allocation13_spill] sm:$0xff] %v16823_v47  ;;  %v4533_v33 = vrot.slane %v4421_v59, 6  ;;  %v5313_v18 = vrot.slane %v4421_v59, 2  ;;  %v4383_v34 = vadd.f32 %v16530_v28, %v4281_v30  ;;  %12756 = vmatprep.mubr.msk.f32.mxu1 %vm4554_vm5, %v4421_v59 }
 0x4c2   :  { %v4424_v38 = vmax.f32 %v4384_v8, 0.0  ;;  %12757 = vmatmul.mubr.msk.f32.gmra.mrb[78].mxu1 %vm4554_vm5, %v4422_v43 }
 0x4c3   :  { %v4423_v15 = vmax.f32 %v4383_v34, 0.0  ;;  %v12700_v42 = vpop.f32.mrb[78].mxu0  ;;  %v16829_v5 = vsel %vm3090_vm3, %v4531_v53, %v4533_v33  ;;  %v16832_v57 = vsel %vm3090_vm3, %v4533_v33, %v4535_v3  ;;  %v16835_v9 = vsel %vm3868_vm4, %v5311_v6, %v5313_v18 }
 0x4c4   :  { %18835 = vst [vmem:[#allocation27_spill] sm:$0xff] %v16835_v9  ;;  %v4539_v47 = vrot.slane %v4424_v38, 6  ;;  %v5319_v23 = vrot.slane %v4424_v38, 2  ;;  %v4386_v30 = vadd.f32 %v12700_v42, %v16530_v28  ;;  %v4291_v62 = vpop.f32.mrb[79].mxu0  ;;  %v16839_v59 = vsel %vm3868_vm4, %v5313_v18, %v5315_v36 }
 0x4c5   :  { %18836 = vst [vmem:[#allocation30_spill] sm:$0xff] %v16839_v59  ;;  %v4537_v43 = vrot.slane %v4423_v15, 6  ;;  %v5317_v8 = vrot.slane %v4423_v15, 2  ;;  %v4385_v34 = vadd.f32 %v16530_v28, %v4291_v62  ;;  %12759 = vmatprep.mubr.msk.f32.mxu1 %vm4554_vm5, %v4423_v15 }
 0x4c6   :  { %v16843_v53 = vmax.f32 %v4386_v30, 0.0  ;;  %12760 = vmatmul.mubr.msk.f32.gmra.mrb[80].mxu1 %vm4554_vm5, %v4424_v38 }
 0x4c7   :  { %v4425_v6 = vmax.f32 %v4385_v34, 0.0  ;;  %v4538_v33 = vsel %vm3090_vm3, %v4535_v3, %v4537_v43  ;;  %v4540_v9 = vsel %vm3090_vm3, %v4537_v43, %v4539_v47  ;;  %v16849_v42 = vsel %vm3868_vm4, %v5315_v36, %v5317_v8 }
 0x4c8   :  { %v4543_v18 = vrot.slane %v16843_v53, 6  ;;  %v5323_v59 = vrot.slane %v16843_v53, 2  ;;  %v16854_v28 = vsel %vm3868_vm4, %v5317_v8, %v5319_v23  ;;  %v18837_v3 = vrot.slane %v16540_v22, 6  ;;  %v10928_v22 = vld [vmem:[%s18555_s9 + $0x10] sm:$0xff] }
 0x4c9   :  { %v4541_v62 = vrot.slane %v4425_v6, 6  ;;  %v5321_v15 = vrot.slane %v4425_v6, 2  ;;  %12762 = vmatprep.mubr.msk.f32.mxu1 %vm4554_vm5, %v4425_v6 }
 0x4ca   :  { %12763 = vmatmul.mubr.msk.f32.gmra.mrb[82].mxu1 %vm4554_vm5, %v16843_v53  ;;  %v4547_v38 = vsel %vm3090_vm3, 0.0, %v18837_v3 }
 0x4cb   :  { %12769 = vmatprep.mubr.msk.f32.mxu1 %vm4554_vm5, %v4547_v38  ;;  %v4542_v36 = vsel %vm3090_vm3, %v4539_v47, %v4541_v62  ;;  %v4544_v30 = vsel %vm3090_vm3, %v4541_v62, %v4543_v18  ;;  %v16866_v43 = vsel %vm3868_vm4, %v5319_v23, %v5321_v15  ;;  %v16871_v8 = vsel %vm3868_vm4, %v5321_v15, %v5323_v59  ;;  %v18854_v23 = vld [vmem:[#allocation26_spill] sm:$0xff]  ;;  %v11010_v38 = vld [vmem:[%s18555_s9 + $0x20] sm:$0xff] }
 0x4ce   :  { %12770 = vmatmul.mubr.msk.f32.vlgmr.msra.gmra.mrb[44].mxu1 %vm4554_vm5, %v16554_v63 }
 0x4cf   :  { %12772 = vmatprep.mubr.msk.f32.mxu1 %vm4554_vm5, %v16565_v46  ;;  %13539 = vmatpush3.bf16.msra.mxu1 %v16543_v21  ;;  %v10929_v21 = vld [vmem:[%s18555_s9 + $0x18] sm:$0xff]  ;;  %v18838_v46 = vrot.slane %v16697_v52, 6 }
 0x4d0   :  { %v13540_v63 = vpack.c.bf16 %v10929_v21, %v10928_v22  ;;  %v18862_v52 = vld [vmem:[#allocation19_spill] sm:$0xff] }
 0x4d2   :  { %12773 = vmatmul.mubr.msk.f32.gmra.mrb[46].mxu1 %vm4554_vm5, %v16568_v40  ;;  %13541 = vmatprep.subr.bf16.mxu0 %v13540_v63  ;;  %v4548_v40 = vsel %vm3090_vm3, 0.0, %v18838_v46 }
 0x4d3   :  { %12775 = vmatprep.mubr.msk.f32.mxu1 %vm4554_vm5, %v16581_v60  ;;  %13543 = vmatpush3.bf16.msra.mxu0 %v13540_v63  ;;  %v18842_v60 = vld [vmem:[#allocation14_spill] sm:$0xff] }
 0x4d6   :  { %12776 = vmatmul.mubr.msk.f32.gmra.mrb[48].mxu1 %vm4554_vm5, %v16584_v0  ;;  %v18843_v0 = vld [vmem:[#allocation15_spill] sm:$0xff] }
 0x4d7   :  { %12778 = vmatprep.mubr.msk.f32.mxu1 %vm4554_vm5, %v16597_v11  ;;  %v18846_v11 = vld [vmem:[#allocation8_spill] sm:$0xff] }
 0x4da   :  { %12779 = vmatmul.mubr.msk.f32.gmra.mrb[50].mxu1 %vm4554_vm5, %v16600_v2  ;;  %v18847_v2 = vld [vmem:[#allocation18_spill] sm:$0xff] }
 0x4db   :  { %12781 = vmatprep.mubr.msk.f32.mxu1 %vm4554_vm5, %v16613_v16  ;;  %v18850_v16 = vld [vmem:[#allocation20_spill] sm:$0xff] }
 0x4de   :  { %12782 = vmatmul.mubr.msk.f32.gmra.mrb[52].mxu1 %vm4554_vm5, %v16616_v7  ;;  %v18851_v7 = vrot.slane %v18850_v16, 2 }
 0x4df   :  { %12784 = vmatprep.mubr.msk.f32.mxu1 %vm4554_vm5, %v16629_v56  ;;  %v18852_v56 = vld [vmem:[#allocation25_spill] sm:$0xff] }
 0x4e2   :  { %12785 = vmatmul.mubr.msk.f32.gmra.mrb[54].mxu1 %vm4554_vm5, %v16632_v39  ;;  %v18853_v39 = vld [vmem:[#allocation22_spill] sm:$0xff] }
 0x4e3   :  { %12787 = vmatprep.mubr.msk.f32.mxu1 %vm4554_vm5, %v16645_v45  ;;  %v18855_v45 = vld [vmem:[#allocation28_spill] sm:$0xff] }
 0x4e6   :  { %12788 = vmatmul.mubr.msk.f32.gmra.mrb[56].mxu1 %vm4554_vm5, %v16648_v14  ;;  %v18856_v14 = vld [vmem:[#allocation29_spill] sm:$0xff] }
 0x4e7   :  { %12790 = vmatprep.mubr.msk.f32.mxu1 %vm4554_vm5, %v16661_v41  ;;  %v18857_v41 = vld [vmem:[#allocation5_spill] sm:$0xff] }
 0x4ea   :  { %12791 = vmatmul.mubr.msk.f32.gmra.mrb[58].mxu1 %vm4554_vm5, %v16664_v13  ;;  %v18858_v13 = vld [vmem:[#allocation6_spill] sm:$0xff] }
 0x4eb   :  { %12793 = vmatprep.mubr.msk.f32.mxu1 %vm4554_vm5, %v16679_v1  ;;  %v18859_v1 = vld [vmem:[#allocation7_spill] sm:$0xff] }
 0x4ee   :  { %12794 = vmatmul.mubr.msk.f32.gmra.mrb[60].mxu1 %vm4554_vm5, %v16682_v24  ;;  %v18860_v24 = vld [vmem:[#allocation9_spill] sm:$0xff] }
 0x4ef   :  { %12796 = vmatprep.mubr.msk.f32.mxu1 %vm4554_vm5, %v16700_v25  ;;  %v18863_v25 = vld [vmem:[#allocation23_spill] sm:$0xff] }
 0x4f2   :  { %12797 = vmatmul.mubr.msk.f32.gmra.mrb[62].mxu1 %vm4554_vm5, %v16703_v49  ;;  %v18864_v49 = vld [vmem:[#allocation13_spill] sm:$0xff] }
 0x4f3   :  { %12799 = vmatprep.mubr.msk.f32.mxu1 %vm4554_vm5, %v4548_v40 }
 0x4f6   :  { %12800 = vmatmul.mubr.msk.f32.gmra.mrb[64].mxu1 %vm4554_vm5, %v16723_v48  ;;  %v18865_v48 = vld [vmem:[#allocation27_spill] sm:$0xff] }
 0x4f7   :  { %12802 = vmatprep.mubr.msk.f32.mxu1 %vm4554_vm5, %v16733_v19  ;;  %v18861_v19 = vld [vmem:[#allocation11_spill] sm:$0xff] }
 0x4fa   :  { %12803 = vmatmul.mubr.msk.f32.gmra.mrb[66].mxu1 %vm4554_vm5, %v16736_v17  ;;  %v18866_v17 = vld [vmem:[#allocation30_spill] sm:$0xff] }
 0x4fb   :  { %12805 = vmatprep.mubr.msk.f32.mxu1 %vm4554_vm5, %v16749_v61  ;;  %v5328_v61 = vsel %vm3868_vm4, %v5323_v59, 0.0 }
 0x4fe   :  { %12806 = vmatmul.mubr.msk.f32.gmra.mrb[68].mxu1 %vm4554_vm5, %v16752_v51  ;;  %v6129_v51 = vld [vmem:[%s18555_s9] sm:$0xff] }
 0x4ff   :  { %12808 = vmatprep.mubr.msk.f32.mxu1 %vm4554_vm5, %v16765_v29  ;;  %v6130_v29 = vld [vmem:[%s18555_s9 + $0x8] sm:$0xff] }
 0x502   :  { %12809 = vmatmul.mubr.msk.f32.gmra.mrb[70].mxu1 %vm4554_vm5, %v16768_v37  ;;  %v13544_v37 = vpack.c.bf16 %v6130_v29, %v6129_v51 }
 0x503   :  { %12811 = vmatprep.mubr.msk.f32.mxu1 %vm4554_vm5, %v16781_v4  ;;  %v17049_v4 = vld [vmem:[%s18554_s8] ss:$0 sm:$0xff] }
 0x504   :  { %13545 = vmatprep.subr.bf16.mxu0 %v13544_v37 }
 0x506   :  { %12812 = vmatmul.mubr.msk.f32.gmra.mrb[72].mxu1 %vm4554_vm5, %v16784_v12 }
 0x507   :  { %12814 = vmatprep.mubr.msk.f32.mxu1 %vm4554_vm5, %v16797_v32 }
 0x50a   :  { %12815 = vmatmul.mubr.msk.f32.gmra.mrb[74].mxu1 %vm4554_vm5, %v16800_v35 }
 0x50b   :  { %12817 = vmatprep.mubr.msk.f32.mxu1 %vm4554_vm5, %v16813_v58 }
 0x50e   :  { %12818 = vmatmul.mubr.msk.f32.gmra.mrb[76].mxu1 %vm4554_vm5, %v16816_v27 }
 0x50f   :  { %12820 = vmatprep.mubr.msk.f32.mxu1 %vm4554_vm5, %v16829_v5 }
 0x512   :  { %12821 = vmatmul.mubr.msk.f32.gmra.mrb[78].mxu1 %vm4554_vm5, %v16832_v57 }
 0x513   :  { %12823 = vmatprep.mubr.msk.f32.mxu1 %vm4554_vm5, %v4538_v33 }
 0x516   :  { %12824 = vmatmul.mubr.msk.f32.gmra.mrb[80].mxu1 %vm4554_vm5, %v4540_v9 }
 0x517   :  { %12826 = vmatprep.mubr.msk.f32.mxu1 %vm4554_vm5, %v4542_v36  ;;  %v11011_v36 = vld [vmem:[%s18555_s9 + $0x28] sm:$0xff]  ;;  %s14221_s9 = smov [#allocation2]  }
 0x518   :  { %v17070_v40 = vpack.c.bf16 %v11011_v36, %v11010_v38 }
 0x51a   :  { %12827 = vmatmul.mubr.msk.f32.gmra.mrb[82].mxu1 %vm4554_vm5, %v4544_v30 }
 0x51b   :  { %12833 = vmatprep.mubr.msk.f32.mxu1 %vm4554_vm5, %v16557_v54  ;;  %v18839_v54 = vld [vmem:[#allocation32_spill] sm:$0xff] }
 0x51e   :  { %12834 = vmatmul.mubr.msk.f32.vlgmr.msra.gmra.mrb[44].mxu1 %vm4554_vm5, %v16571_v55  ;;  %v18840_v55 = vld [vmem:[#allocation33_spill] sm:$0xff] }
 0x51f   :  { %12836 = vmatprep.mubr.msk.f32.mxu1 %vm4554_vm5, %v16575_v31  ;;  %v18841_v31 = vld [vmem:[#allocation12_spill] sm:$0xff] }
 0x522   :  { %12837 = vmatmul.mubr.msk.f32.gmra.mrb[46].mxu1 %vm4554_vm5, %v16587_v10  ;;  %v18844_v10 = vld [vmem:[#allocation16_spill] sm:$0xff] }
 0x523   :  { %12839 = vmatprep.mubr.msk.f32.mxu1 %vm4554_vm5, %v16591_v50  ;;  %v18845_v50 = vld [vmem:[#allocation17_spill] sm:$0xff] }
 0x526   :  { %12840 = vmatmul.mubr.msk.f32.gmra.mrb[48].mxu1 %vm4554_vm5, %v16603_v26  ;;  %v18848_v26 = vld [vmem:[#allocation24_spill] sm:$0xff] }
 0x527   :  { %12842 = vmatprep.mubr.msk.f32.mxu1 %vm4554_vm5, %v16607_v44  ;;  %v18849_v44 = vld [vmem:[#allocation21_spill] sm:$0xff] }
 0x52a   :  { %12843 = vmatmul.mubr.msk.f32.gmra.mrb[50].mxu1 %vm4554_vm5, %v16619_v20  ;;  %v5327_v20 = vsel %vm3868_vm4, %v18851_v7, 0.0 }
 0x52b   :  { %12845 = vmatprep.mubr.msk.f32.mxu1 %vm4554_vm5, %v18839_v54 }
 0x52e   :  { %12846 = vmatmul.mubr.msk.f32.gmra.mrb[52].mxu1 %vm4554_vm5, %v18840_v55 }
 0x52f   :  { %12848 = vmatprep.mubr.msk.f32.mxu1 %vm4554_vm5, %v18841_v31 }
 0x532   :  { %12849 = vmatmul.mubr.msk.f32.gmra.mrb[54].mxu1 %vm4554_vm5, %v18842_v60 }
 0x533   :  { %12851 = vmatprep.mubr.msk.f32.mxu1 %vm4554_vm5, %v18843_v0 }
 0x536   :  { %12852 = vmatmul.mubr.msk.f32.gmra.mrb[56].mxu1 %vm4554_vm5, %v18844_v10 }
 0x537   :  { %12854 = vmatprep.mubr.msk.f32.mxu1 %vm4554_vm5, %v18845_v50 }
 0x53a   :  { %12855 = vmatmul.mubr.msk.f32.gmra.mrb[58].mxu1 %vm4554_vm5, %v18846_v11 }
 0x53b   :  { %12857 = vmatprep.mubr.msk.f32.mxu1 %vm4554_vm5, %v18847_v2 }
 0x53e   :  { %12858 = vmatmul.mubr.msk.f32.gmra.mrb[60].mxu1 %vm4554_vm5, %v18848_v26 }
 0x53f   :  { %12860 = vmatprep.mubr.msk.f32.mxu1 %vm4554_vm5, %v18849_v44 }
 0x542   :  { %12861 = vmatmul.mubr.msk.f32.gmra.mrb[62].mxu1 %vm4554_vm5, %v5327_v20 }
 0x543   :  { %12863 = vmatprep.mubr.msk.f32.mxu1 %vm4554_vm5, %v18852_v56 }
 0x546   :  { %12864 = vmatmul.mubr.msk.f32.gmra.mrb[64].mxu1 %vm4554_vm5, %v18853_v39 }
 0x547   :  { %12866 = vmatprep.mubr.msk.f32.mxu1 %vm4554_vm5, %v18854_v23 }
 0x54a   :  { %12867 = vmatmul.mubr.msk.f32.gmra.mrb[66].mxu1 %vm4554_vm5, %v18855_v45 }
 0x54b   :  { %12869 = vmatprep.mubr.msk.f32.mxu1 %vm4554_vm5, %v18856_v14 }
 0x54e   :  { %12870 = vmatmul.mubr.msk.f32.gmra.mrb[68].mxu1 %vm4554_vm5, %v18857_v41 }
 0x54f   :  { %12872 = vmatprep.mubr.msk.f32.mxu1 %vm4554_vm5, %v18858_v13 }
 0x552   :  { %12873 = vmatmul.mubr.msk.f32.gmra.mrb[70].mxu1 %vm4554_vm5, %v18859_v1 }
 0x553   :  { %12875 = vmatprep.mubr.msk.f32.mxu1 %vm4554_vm5, %v18860_v24 }
 0x556   :  { %12876 = vmatmul.mubr.msk.f32.gmra.mrb[72].mxu1 %vm4554_vm5, %v18861_v19 }
 0x557   :  { %12878 = vmatprep.mubr.msk.f32.mxu1 %vm4554_vm5, %v18862_v52 }
 0x55a   :  { %12879 = vmatmul.mubr.msk.f32.gmra.mrb[74].mxu1 %vm4554_vm5, %v18863_v25 }
 0x55b   :  { %12881 = vmatprep.mubr.msk.f32.mxu1 %vm4554_vm5, %v18864_v49 }
 0x55e   :  { %12882 = vmatmul.mubr.msk.f32.gmra.mrb[76].mxu1 %vm4554_vm5, %v18865_v48 }
 0x55f   :  { %12884 = vmatprep.mubr.msk.f32.mxu1 %vm4554_vm5, %v18866_v17 }
 0x562   :  { %12885 = vmatmul.mubr.msk.f32.gmra.mrb[78].mxu1 %vm4554_vm5, %v16849_v42 }
 0x563   :  { %12887 = vmatprep.mubr.msk.f32.mxu1 %vm4554_vm5, %v16854_v28 }
 0x566   :  { %12888 = vmatmul.mubr.msk.f32.gmra.mrb[80].mxu1 %vm4554_vm5, %v16866_v43 }
 0x567   :  { %12890 = vmatprep.mubr.msk.f32.mxu1 %vm4554_vm5, %v16871_v8 }
 0x56a   :  { %12891 = vmatmul.mubr.msk.f32.gmra.mrb[82].mxu1 %vm4554_vm5, %v5328_v61 }
 0x5f1   :  { %v12835_v12 = vpop.f32.mrb[44].mxu1 }
 0x5f2   :  { %v5727_v32 = vadd.f32 %v12835_v12, %v17049_v4  ;;  %v5480_v35 = vpop.f32.mrb[45].mxu1 }
 0x5f3   :  { %v5726_v58 = vadd.f32 %v17049_v4, %v5480_v35 }
 0x5f4   :  { %v5767_v27 = vmax.f32 %v5727_v32, 0.0 }
 0x5f5   :  { %v5766_v5 = vmax.f32 %v5726_v58, 0.0  ;;  %v12838_v47 = vpop.f32.mrb[46].mxu1 }
 0x5f6   :  { %v5847_v57 = vrot.slane %v5767_v27, 2  ;;  %v5729_v9 = vadd.f32 %v12838_v47, %v17049_v4  ;;  %v5490_v59 = vpop.f32.mrb[47].mxu1 }
 0x5f7   :  { %v5846_v34 = vrot.slane %v5766_v5, 2  ;;  %v5728_v53 = vadd.f32 %v17049_v4, %v5490_v59 }
 0x5f8   :  { %v5769_v6 = vmax.f32 %v5729_v9, 0.0 }
 0x5f9   :  { %v5848_v33 = vsel %vm3868_vm4, %v5846_v34, %v5847_v57  ;;  %v5768_v42 = vmax.f32 %v5728_v53, 0.0  ;;  %v12841_v18 = vpop.f32.mrb[48].mxu1 }
 0x5fa   :  { %v17056_v28 = vmax.f32 %v5766_v5, %v5848_v33  ;;  %v5851_v62 = vrot.slane %v5769_v6, 2  ;;  %v5731_v15 = vadd.f32 %v12841_v18, %v17049_v4  ;;  %v5500_v3 = vpop.f32.mrb[49].mxu1 }
 0x5fb   :  { %v5849_v30 = vrot.slane %v5768_v42, 2  ;;  %v5730_v43 = vadd.f32 %v17049_v4, %v5500_v3 }
 0x5fc   :  { %v5771_v8 = vmax.f32 %v5731_v15, 0.0  ;;  %12897 = vmatprep.mubr.msk.f32.mxu0 %vm4554_vm5, %v17056_v28  ;;  %v6047_v44 = vrot.slane %v17056_v28, 4  ;;  %v11053_v28 = vld [vmem:[%s18557_s11 + $0x20] sm:$0xff] }
 0x5fd   :  { %v5850_v22 = vsel %vm3868_vm4, %v5847_v57, %v5849_v30  ;;  %v5852_v21 = vsel %vm3868_vm4, %v5849_v30, %v5851_v62  ;;  %v5770_v63 = vmax.f32 %v5730_v43, 0.0  ;;  %v12844_v46 = vpop.f32.mrb[50].mxu1 }
 0x5fe   :  { %v5967_v54 = vmax.f32 %v5767_v27, %v5850_v22  ;;  %v5968_v55 = vmax.f32 %v5768_v42, %v5852_v21  ;;  %v5855_v31 = vrot.slane %v5771_v8, 2  ;;  %v5733_v60 = vadd.f32 %v12844_v46, %v17049_v4  ;;  %v5510_v0 = vpop.f32.mrb[51].mxu1 }
 0x5ff   :  { %v5853_v10 = vrot.slane %v5770_v63, 2  ;;  %v5732_v50 = vadd.f32 %v17049_v4, %v5510_v0 }
 0x600   :  { %v6048_v11 = vrot.slane %v5967_v54, 4  ;;  %v6050_v2 = vrot.slane %v5968_v55, 4  ;;  %v5773_v26 = vmax.f32 %v5733_v60, 0.0  ;;  %12898 = vmatmul.mubr.msk.f32.vlgmr.msra.gmra.mrb[80].mxu0 %vm4554_vm5, %v5967_v54 }
 0x601   :  { %v5854_v16 = vsel %vm3868_vm4, %v5851_v62, %v5853_v10  ;;  %v5856_v7 = vsel %vm3868_vm4, %v5853_v10, %v5855_v31  ;;  %v5772_v20 = vmax.f32 %v5732_v50, 0.0  ;;  %v12847_v56 = vpop.f32.mrb[52].mxu1  ;;  %12900 = vmatprep.mubr.msk.f32.mxu0 %vm4554_vm5, %v5968_v55  ;;  %13547 = vmatpush3.bf16.msra.mxu0 %v13544_v37 }
 0x602   :  { %v5970_v39 = vmax.f32 %v5770_v63, %v5856_v7  ;;  %v5859_v23 = vrot.slane %v5773_v26, 2  ;;  %v5735_v45 = vadd.f32 %v12847_v56, %v17049_v4  ;;  %v5520_v14 = vpop.f32.mrb[53].mxu1  ;;  %v5969_v41 = vmax.f32 %v5769_v6, %v5854_v16  ;;  %13549 = vmatprep.subr.bf16.mxu0 %v17070_v40 }
 0x603   :  { %v5857_v13 = vrot.slane %v5772_v20, 2  ;;  %v5734_v1 = vadd.f32 %v17049_v4, %v5520_v14  ;;  %v17085_v24 = vsel %vm6046_vm6, %v6047_v44, %v6048_v11  ;;  %v17088_v19 = vsel %vm6046_vm6, %v6048_v11, %v6050_v2 }
 0x604   :  { %v6054_v52 = vrot.slane %v5970_v39, 4  ;;  %v5775_v25 = vmax.f32 %v5735_v45, 0.0  ;;  %12901 = vmatmul.mubr.msk.f32.gmra.mrb[82].mxu0 %vm4554_vm5, %v5969_v41  ;;  %v6052_v49 = vrot.slane %v5969_v41, 4 }
 0x605   :  { %v5858_v48 = vsel %vm3868_vm4, %v5855_v31, %v5857_v13  ;;  %v5860_v17 = vsel %vm3868_vm4, %v5857_v13, %v5859_v23  ;;  %v5774_v61 = vmax.f32 %v5734_v1, 0.0  ;;  %v12850_v51 = vpop.f32.mrb[54].mxu1  ;;  %12903 = vmatprep.mubr.msk.f32.mxu0 %vm4554_vm5, %v5970_v39 }
 0x606   :  { %v5972_v29 = vmax.f32 %v5772_v20, %v5860_v17  ;;  %v5863_v37 = vrot.slane %v5775_v25, 2  ;;  %v5737_v12 = vadd.f32 %v12850_v51, %v17049_v4  ;;  %v5530_v32 = vpop.f32.mrb[55].mxu1  ;;  %v5971_v35 = vmax.f32 %v5771_v8, %v5858_v48 }
 0x607   :  { %v5861_v58 = vrot.slane %v5774_v61, 2  ;;  %v5736_v27 = vadd.f32 %v17049_v4, %v5530_v32  ;;  %v17097_v5 = vsel %vm6046_vm6, %v6050_v2, %v6052_v49  ;;  %v17100_v47 = vsel %vm6046_vm6, %v6052_v49, %v6054_v52 }
 0x608   :  { %v6058_v57 = vrot.slane %v5972_v29, 4  ;;  %v5777_v9 = vmax.f32 %v5737_v12, 0.0  ;;  %12904 = vmatmul.mubr.msk.f32.gmra.mrb[84].mxu0 %vm4554_vm5, %v5971_v35  ;;  %v6056_v59 = vrot.slane %v5971_v35, 4 }
 0x609   :  { %v5862_v34 = vsel %vm3868_vm4, %v5859_v23, %v5861_v58  ;;  %v5864_v53 = vsel %vm3868_vm4, %v5861_v58, %v5863_v37  ;;  %v5776_v6 = vmax.f32 %v5736_v27, 0.0  ;;  %v12853_v33 = vpop.f32.mrb[56].mxu1  ;;  %12906 = vmatprep.mubr.msk.f32.mxu0 %vm4554_vm5, %v5972_v29 }
 0x60a   :  { %v5974_v42 = vmax.f32 %v5774_v61, %v5864_v53  ;;  %v5867_v18 = vrot.slane %v5777_v9, 2  ;;  %v5739_v62 = vadd.f32 %v12853_v33, %v17049_v4  ;;  %v5540_v15 = vpop.f32.mrb[57].mxu1  ;;  %v5973_v3 = vmax.f32 %v5773_v26, %v5862_v34 }
 0x60b   :  { %v5865_v38 = vrot.slane %v5776_v6, 2  ;;  %v5738_v36 = vadd.f32 %v17049_v4, %v5540_v15  ;;  %v17109_v30 = vsel %vm6046_vm6, %v6054_v52, %v6056_v59  ;;  %v17112_v43 = vsel %vm6046_vm6, %v6056_v59, %v6058_v57 }
 0x60c   :  { %v6062_v8 = vrot.slane %v5974_v42, 4  ;;  %v5779_v22 = vmax.f32 %v5739_v62, 0.0  ;;  %12907 = vmatmul.mubr.msk.f32.gmra.mrb[86].mxu0 %vm4554_vm5, %v5973_v3  ;;  %v6060_v21 = vrot.slane %v5973_v3, 4 }
 0x60d   :  { %v5866_v63 = vsel %vm3868_vm4, %v5863_v37, %v5865_v38  ;;  %v5868_v46 = vsel %vm3868_vm4, %v5865_v38, %v5867_v18  ;;  %v5778_v54 = vmax.f32 %v5738_v36, 0.0  ;;  %v12856_v55 = vpop.f32.mrb[58].mxu1  ;;  %12909 = vmatprep.mubr.msk.f32.mxu0 %vm4554_vm5, %v5974_v42 }
 0x60e   :  { %v5976_v31 = vmax.f32 %v5776_v6, %v5868_v46  ;;  %v5871_v60 = vrot.slane %v5779_v22, 2  ;;  %v5741_v0 = vadd.f32 %v12856_v55, %v17049_v4  ;;  %v5550_v10 = vpop.f32.mrb[59].mxu1  ;;  %v5975_v50 = vmax.f32 %v5775_v25, %v5866_v63 }
 0x60f   :  { %v5869_v11 = vrot.slane %v5778_v54, 2  ;;  %v5740_v2 = vadd.f32 %v17049_v4, %v5550_v10  ;;  %v17121_v26 = vsel %vm6046_vm6, %v6058_v57, %v6060_v21  ;;  %v17124_v16 = vsel %vm6046_vm6, %v6060_v21, %v6062_v8 }
 0x610   :  { %v6066_v7 = vrot.slane %v5976_v31, 4  ;;  %v5781_v20 = vmax.f32 %v5741_v0, 0.0  ;;  %12910 = vmatmul.mubr.msk.f32.gmra.mrb[88].mxu0 %vm4554_vm5, %v5975_v50  ;;  %v6064_v56 = vrot.slane %v5975_v50, 4 }
 0x611   :  { %v5870_v39 = vsel %vm3868_vm4, %v5867_v18, %v5869_v11  ;;  %v5872_v23 = vsel %vm3868_vm4, %v5869_v11, %v5871_v60  ;;  %v5780_v45 = vmax.f32 %v5740_v2, 0.0  ;;  %v12859_v14 = vpop.f32.mrb[60].mxu1  ;;  %12912 = vmatprep.mubr.msk.f32.mxu0 %vm4554_vm5, %v5976_v31 }
 0x612   :  { %v5978_v41 = vmax.f32 %v5778_v54, %v5872_v23  ;;  %v5875_v13 = vrot.slane %v5781_v20, 2  ;;  %v5743_v1 = vadd.f32 %v12859_v14, %v17049_v4  ;;  %v5560_v52 = vpop.f32.mrb[61].mxu1  ;;  %v5977_v25 = vmax.f32 %v5777_v9, %v5870_v39 }
 0x613   :  { %v5873_v49 = vrot.slane %v5780_v45, 2  ;;  %v5742_v48 = vadd.f32 %v17049_v4, %v5560_v52  ;;  %v17133_v17 = vsel %vm6046_vm6, %v6062_v8, %v6064_v56  ;;  %v17136_v61 = vsel %vm6046_vm6, %v6064_v56, %v6066_v7 }
 0x614   :  { %v6070_v51 = vrot.slane %v5978_v41, 4  ;;  %v5783_v29 = vmax.f32 %v5743_v1, 0.0  ;;  %12913 = vmatmul.mubr.msk.f32.gmra.mrb[90].mxu0 %vm4554_vm5, %v5977_v25  ;;  %v6068_v37 = vrot.slane %v5977_v25, 4 }
 0x615   :  { %v5874_v12 = vsel %vm3868_vm4, %v5871_v60, %v5873_v49  ;;  %v5876_v32 = vsel %vm3868_vm4, %v5873_v49, %v5875_v13  ;;  %v5782_v35 = vmax.f32 %v5742_v48, 0.0  ;;  %v12862_v58 = vpop.f32.mrb[62].mxu1  ;;  %12915 = vmatprep.mubr.msk.f32.mxu0 %vm4554_vm5, %v5978_v41 }
 0x616   :  { %v5980_v27 = vmax.f32 %v5780_v45, %v5876_v32  ;;  %v5879_v57 = vrot.slane %v5783_v29, 2  ;;  %v5745_v9 = vadd.f32 %v12862_v58, %v17049_v4  ;;  %v5570_v59 = vpop.f32.mrb[63].mxu1  ;;  %v5979_v34 = vmax.f32 %v5779_v22, %v5874_v12 }
 0x617   :  { %v5877_v53 = vrot.slane %v5782_v35, 2  ;;  %v5744_v6 = vadd.f32 %v17049_v4, %v5570_v59  ;;  %v17145_v33 = vsel %vm6046_vm6, %v6066_v7, %v6068_v37  ;;  %v17148_v42 = vsel %vm6046_vm6, %v6068_v37, %v6070_v51 }
 0x618   :  { %v6074_v18 = vrot.slane %v5980_v27, 4  ;;  %v5785_v62 = vmax.f32 %v5745_v9, 0.0  ;;  %12916 = vmatmul.mubr.msk.f32.gmra.mrb[92].mxu0 %vm4554_vm5, %v5979_v34  ;;  %v6072_v15 = vrot.slane %v5979_v34, 4 }
 0x619   :  { %v5878_v3 = vsel %vm3868_vm4, %v5875_v13, %v5877_v53  ;;  %v5880_v38 = vsel %vm3868_vm4, %v5877_v53, %v5879_v57  ;;  %v5784_v36 = vmax.f32 %v5744_v6, 0.0  ;;  %v12865_v8 = vpop.f32.mrb[64].mxu1  ;;  %12918 = vmatprep.mubr.msk.f32.mxu0 %vm4554_vm5, %v5980_v27 }
 0x61a   :  { %v5982_v22 = vmax.f32 %v5782_v35, %v5880_v38  ;;  %v5883_v21 = vrot.slane %v5785_v62, 2  ;;  %v5747_v63 = vadd.f32 %v12865_v8, %v17049_v4  ;;  %v5580_v46 = vpop.f32.mrb[65].mxu1  ;;  %v5981_v54 = vmax.f32 %v5781_v20, %v5878_v3 }
 0x61b   :  { %v5881_v55 = vrot.slane %v5784_v36, 2  ;;  %v5746_v31 = vadd.f32 %v17049_v4, %v5580_v46  ;;  %v17157_v60 = vsel %vm6046_vm6, %v6070_v51, %v6072_v15  ;;  %v17160_v0 = vsel %vm6046_vm6, %v6072_v15, %v6074_v18 }
 0x61c   :  { %v6078_v10 = vrot.slane %v5982_v22, 4  ;;  %v5964_v50 = vsel %vm3868_vm4, %v5883_v21, 0.0  ;;  %v5787_v11 = vmax.f32 %v5747_v63, 0.0  ;;  %12919 = vmatmul.mubr.msk.f32.gmra.mrb[94].mxu0 %vm4554_vm5, %v5981_v54  ;;  %v6076_v2 = vrot.slane %v5981_v54, 4 }
 0x61d   :  { %v17164_v7 = vmax.f32 %v5785_v62, %v5964_v50  ;;  %v5882_v20 = vsel %vm3868_vm4, %v5879_v57, %v5881_v55  ;;  %v5884_v56 = vsel %vm3868_vm4, %v5881_v55, %v5883_v21  ;;  %v5786_v39 = vmax.f32 %v5746_v31, 0.0  ;;  %v12868_v23 = vpop.f32.mrb[66].mxu1  ;;  %12921 = vmatprep.mubr.msk.f32.mxu0 %vm4554_vm5, %v5982_v22 }
 0x61e   :  { %v5984_v45 = vmax.f32 %v5784_v36, %v5884_v56  ;;  %v5886_v14 = vrot.slane %v5787_v11, 2  ;;  %v5749_v41 = vadd.f32 %v12868_v23, %v17049_v4  ;;  %v5590_v13 = vpop.f32.mrb[67].mxu1  ;;  %v5983_v1 = vmax.f32 %v5783_v29, %v5882_v20 }
 0x61f   :  { %v6084_v52 = vrot.slane %v17164_v7, 4  ;;  %v5885_v25 = vrot.slane %v5786_v39, 2  ;;  %v5748_v49 = vadd.f32 %v17049_v4, %v5590_v13  ;;  %v17173_v48 = vsel %vm6046_vm6, %v6074_v18, %v6076_v2 }
 0x620   :  { %v6082_v51 = vrot.slane %v5984_v45, 4  ;;  %v5789_v37 = vmax.f32 %v5749_v41, 0.0  ;;  %12922 = vmatmul.mubr.msk.f32.gmra.mrb[96].mxu0 %vm4554_vm5, %v5983_v1  ;;  %v17177_v12 = vsel %vm6046_vm6, %v6076_v2, %v6078_v10  ;;  %v6080_v32 = vrot.slane %v5983_v1, 4 }
 0x621   :  { %v5887_v35 = vsel %vm3868_vm4, %v5885_v25, %v5886_v14  ;;  %v5788_v58 = vmax.f32 %v5748_v49, 0.0  ;;  %v12871_v29 = vpop.f32.mrb[68].mxu1  ;;  %12924 = vmatprep.mubr.msk.f32.mxu0 %vm4554_vm5, %v5984_v45 }
 0x622   :  { %v17181_v27 = vmax.f32 %v5786_v39, %v5887_v35  ;;  %v5890_v57 = vrot.slane %v5789_v37, 2  ;;  %v5751_v9 = vadd.f32 %v12871_v29, %v17049_v4  ;;  %v5600_v59 = vpop.f32.mrb[69].mxu1  ;;  %v17185_v34 = vsel %vm6046_vm6, %v6078_v10, %v6080_v32 }
 0x623   :  { %v5888_v53 = vrot.slane %v5788_v58, 2  ;;  %v5750_v6 = vadd.f32 %v17049_v4, %v5600_v59  ;;  %v17189_v18 = vsel %vm6046_vm6, %v6080_v32, %v6082_v51  ;;  %v17194_v62 = vsel %vm6046_vm6, %v6082_v51, %v6084_v52 }
 0x624   :  { %v5791_v15 = vmax.f32 %v5751_v9, 0.0  ;;  %12925 = vmatmul.mubr.msk.f32.gmra.mrb[98].mxu0 %vm4554_vm5, %v17164_v7  ;;  %v6086_v20 = vrot.slane %v17181_v27, 4 }
 0x625   :  { %v5889_v3 = vsel %vm3868_vm4, %v5886_v14, %v5888_v53  ;;  %v5891_v38 = vsel %vm3868_vm4, %v5888_v53, %v5890_v57  ;;  %v5790_v36 = vmax.f32 %v5750_v6, 0.0  ;;  %v12874_v8 = vpop.f32.mrb[70].mxu1  ;;  %12927 = vmatprep.mubr.msk.f32.mxu0 %vm4554_vm5, %v17181_v27 }
 0x626   :  { %v5988_v22 = vmax.f32 %v5788_v58, %v5891_v38  ;;  %v5894_v21 = vrot.slane %v5791_v15, 2  ;;  %v5753_v63 = vadd.f32 %v12874_v8, %v17049_v4  ;;  %v5610_v46 = vpop.f32.mrb[71].mxu1  ;;  %v5987_v54 = vmax.f32 %v5787_v11, %v5889_v3 }
 0x627   :  { %v5892_v55 = vrot.slane %v5790_v36, 2  ;;  %v5752_v31 = vadd.f32 %v17049_v4, %v5610_v46 }
 0x628   :  { %v6089_v10 = vrot.slane %v5988_v22, 4  ;;  %v5793_v50 = vmax.f32 %v5753_v63, 0.0  ;;  %12928 = vmatmul.mubr.msk.f32.gmra.mrb[100].mxu0 %vm4554_vm5, %v5987_v54  ;;  %v6087_v2 = vrot.slane %v5987_v54, 4 }
 0x629   :  { %v5893_v56 = vsel %vm3868_vm4, %v5890_v57, %v5892_v55  ;;  %v5895_v39 = vsel %vm3868_vm4, %v5892_v55, %v5894_v21  ;;  %v5792_v23 = vmax.f32 %v5752_v31, 0.0  ;;  %v12877_v45 = vpop.f32.mrb[72].mxu1  ;;  %12930 = vmatprep.mubr.msk.f32.mxu0 %vm4554_vm5, %v5988_v22 }
 0x62a   :  { %v5990_v14 = vmax.f32 %v5790_v36, %v5895_v39  ;;  %v5898_v11 = vrot.slane %v5793_v50, 2  ;;  %v5755_v41 = vadd.f32 %v12877_v45, %v17049_v4  ;;  %v5620_v13 = vpop.f32.mrb[73].mxu1  ;;  %v5989_v1 = vmax.f32 %v5789_v37, %v5893_v56 }
 0x62b   :  { %v5896_v25 = vrot.slane %v5792_v23, 2  ;;  %v5754_v49 = vadd.f32 %v17049_v4, %v5620_v13  ;;  %v17214_v51 = vsel %vm6046_vm6, %v6086_v20, %v6087_v2  ;;  %v17217_v32 = vsel %vm6046_vm6, %v6087_v2, %v6089_v10 }
 0x62c   :  { %v6093_v35 = vrot.slane %v5990_v14, 4  ;;  %v5795_v58 = vmax.f32 %v5755_v41, 0.0  ;;  %12931 = vmatmul.mubr.msk.f32.gmra.mrb[102].mxu0 %vm4554_vm5, %v5989_v1  ;;  %v6091_v29 = vrot.slane %v5989_v1, 4 }
 0x62d   :  { %v5897_v57 = vsel %vm3868_vm4, %v5894_v21, %v5896_v25  ;;  %v5899_v37 = vsel %vm3868_vm4, %v5896_v25, %v5898_v11  ;;  %v5794_v9 = vmax.f32 %v5754_v49, 0.0  ;;  %v12880_v59 = vpop.f32.mrb[74].mxu1  ;;  %12933 = vmatprep.mubr.msk.f32.mxu0 %vm4554_vm5, %v5990_v14 }
 0x62e   :  { %v5992_v53 = vmax.f32 %v5792_v23, %v5899_v37  ;;  %v5902_v6 = vrot.slane %v5795_v58, 2  ;;  %v5757_v3 = vadd.f32 %v12880_v59, %v17049_v4  ;;  %v5630_v38 = vpop.f32.mrb[75].mxu1  ;;  %v5991_v36 = vmax.f32 %v5791_v15, %v5897_v57 }
 0x62f   :  { %v5900_v8 = vrot.slane %v5794_v9, 2  ;;  %v5756_v22 = vadd.f32 %v17049_v4, %v5630_v38  ;;  %v17226_v63 = vsel %vm6046_vm6, %v6089_v10, %v6091_v29  ;;  %v17229_v21 = vsel %vm6046_vm6, %v6091_v29, %v6093_v35 }
 0x630   :  { %v6097_v46 = vrot.slane %v5992_v53, 4  ;;  %v5797_v54 = vmax.f32 %v5757_v3, 0.0  ;;  %12934 = vmatmul.mubr.msk.f32.gmra.mrb[104].mxu0 %vm4554_vm5, %v5991_v36  ;;  %v6095_v55 = vrot.slane %v5991_v36, 4 }
 0x631   :  { %v5901_v31 = vsel %vm3868_vm4, %v5898_v11, %v5900_v8  ;;  %v5903_v2 = vsel %vm3868_vm4, %v5900_v8, %v5902_v6  ;;  %v5796_v56 = vmax.f32 %v5756_v22, 0.0  ;;  %v12883_v15 = vpop.f32.mrb[76].mxu1  ;;  %12936 = vmatprep.mubr.msk.f32.mxu0 %vm4554_vm5, %v5992_v53 }
 0x632   :  { %v5994_v39 = vmax.f32 %v5794_v9, %v5903_v2  ;;  %v5906_v23 = vrot.slane %v5797_v54, 2  ;;  %v5759_v10 = vadd.f32 %v12883_v15, %v17049_v4  ;;  %v5640_v45 = vpop.f32.mrb[77].mxu1  ;;  %v5993_v14 = vmax.f32 %v5793_v50, %v5901_v31 }
 0x633   :  { %v5904_v41 = vrot.slane %v5796_v56, 2  ;;  %v5758_v13 = vadd.f32 %v17049_v4, %v5640_v45  ;;  %v17238_v1 = vsel %vm6046_vm6, %v6093_v35, %v6095_v55  ;;  %v17241_v11 = vsel %vm6046_vm6, %v6095_v55, %v6097_v46 }
 0x634   :  { %v6101_v25 = vrot.slane %v5994_v39, 4  ;;  %v5799_v49 = vmax.f32 %v5759_v10, 0.0  ;;  %12937 = vmatmul.mubr.msk.f32.gmra.mrb[106].mxu0 %vm4554_vm5, %v5993_v14  ;;  %v6099_v29 = vrot.slane %v5993_v14, 4 }
 0x635   :  { %v5905_v57 = vsel %vm3868_vm4, %v5902_v6, %v5904_v41  ;;  %v5907_v37 = vsel %vm3868_vm4, %v5904_v41, %v5906_v23  ;;  %v5798_v9 = vmax.f32 %v5758_v13, 0.0  ;;  %v12886_v50 = vpop.f32.mrb[78].mxu1  ;;  %12939 = vmatprep.mubr.msk.f32.mxu0 %vm4554_vm5, %v5994_v39 }
 0x636   :  { %v5996_v59 = vmax.f32 %v5796_v56, %v5907_v37  ;;  %v5910_v53 = vrot.slane %v5799_v49, 2  ;;  %v5761_v35 = vadd.f32 %v12886_v50, %v17049_v4  ;;  %v5650_v3 = vpop.f32.mrb[79].mxu1  ;;  %v5995_v38 = vmax.f32 %v5795_v58, %v5905_v57 }
 0x637   :  { %v5908_v36 = vrot.slane %v5798_v9, 2  ;;  %v5760_v8 = vadd.f32 %v17049_v4, %v5650_v3  ;;  %v17250_v22 = vsel %vm6046_vm6, %v6097_v46, %v6099_v29  ;;  %v17253_v6 = vsel %vm6046_vm6, %v6099_v29, %v6101_v25 }
 0x638   :  { %v6105_v55 = vrot.slane %v5996_v59, 4  ;;  %v5801_v31 = vmax.f32 %v5761_v35, 0.0  ;;  %12940 = vmatmul.mubr.msk.f32.gmra.mrb[108].mxu0 %vm4554_vm5, %v5995_v38  ;;  %v6103_v2 = vrot.slane %v5995_v38, 4 }
 0x639   :  { %v5909_v56 = vsel %vm3868_vm4, %v5906_v23, %v5908_v36  ;;  %v5911_v15 = vsel %vm3868_vm4, %v5908_v36, %v5910_v53  ;;  %v5800_v39 = vmax.f32 %v5760_v8, 0.0  ;;  %v12889_v58 = vpop.f32.mrb[80].mxu1  ;;  %12942 = vmatprep.mubr.msk.f32.mxu0 %vm4554_vm5, %v5996_v59 }
 0x63a   :  { %v5998_v10 = vmax.f32 %v5798_v9, %v5911_v15  ;;  %v5914_v45 = vrot.slane %v5801_v31, 2  ;;  %v5763_v46 = vadd.f32 %v12889_v58, %v17049_v4  ;;  %v5660_v14 = vpop.f32.mrb[81].mxu1  ;;  %v5997_v41 = vmax.f32 %v5797_v54, %v5909_v56 }
 0x63b   :  { %v5912_v13 = vrot.slane %v5800_v39, 2  ;;  %v5762_v29 = vadd.f32 %v17049_v4, %v5660_v14  ;;  %v17262_v57 = vsel %vm6046_vm6, %v6101_v25, %v6103_v2  ;;  %v17265_v23 = vsel %vm6046_vm6, %v6103_v2, %v6105_v55 }
 0x63c   :  { %v6109_v37 = vrot.slane %v5998_v10, 4  ;;  %v5803_v50 = vmax.f32 %v5763_v46, 0.0  ;;  %12943 = vmatmul.mubr.msk.f32.gmra.mrb[110].mxu0 %vm4554_vm5, %v5997_v41  ;;  %v6107_v59 = vrot.slane %v5997_v41, 4 }
 0x63d   :  { %v5913_v9 = vsel %vm3868_vm4, %v5910_v53, %v5912_v13  ;;  %v5915_v35 = vsel %vm3868_vm4, %v5912_v13, %v5914_v45  ;;  %v5802_v3 = vmax.f32 %v5762_v29, 0.0  ;;  %v12892_v54 = vpop.f32.mrb[82].mxu1  ;;  %12945 = vmatprep.mubr.msk.f32.mxu0 %vm4554_vm5, %v5998_v10 }
 0x63e   :  { %v6000_v38 = vmax.f32 %v5800_v39, %v5915_v35  ;;  %v5918_v36 = vrot.slane %v5803_v50, 2  ;;  %v5765_v25 = vadd.f32 %v12892_v54, %v17049_v4  ;;  %v5670_v8 = vpop.f32.mrb[83].mxu1  ;;  %v5999_v2 = vmax.f32 %v5799_v49, %v5913_v9 }
 0x63f   :  { %v5916_v56 = vrot.slane %v5802_v3, 2  ;;  %v5764_v15 = vadd.f32 %v17049_v4, %v5670_v8  ;;  %v17274_v58 = vsel %vm6046_vm6, %v6105_v55, %v6107_v59  ;;  %v17277_v53 = vsel %vm6046_vm6, %v6107_v59, %v6109_v37 }
 0x640   :  { %v6113_v46 = vrot.slane %v6000_v38, 4  ;;  %v5805_v14 = vmax.f32 %v5765_v25, 0.0  ;;  %12946 = vmatmul.mubr.msk.f32.gmra.mrb[112].mxu0 %vm4554_vm5, %v5999_v2  ;;  %v6111_v10 = vrot.slane %v5999_v2, 4 }
 0x641   :  { %v5917_v39 = vsel %vm3868_vm4, %v5914_v45, %v5916_v56  ;;  %v5919_v41 = vsel %vm3868_vm4, %v5916_v56, %v5918_v36  ;;  %v5804_v13 = vmax.f32 %v5764_v15, 0.0  ;;  %12948 = vmatprep.mubr.msk.f32.mxu0 %vm4554_vm5, %v6000_v38 }
 0x642   :  { %v6002_v49 = vmax.f32 %v5802_v3, %v5919_v41  ;;  %v5922_v4 = vrot.slane %v5805_v14, 2  ;;  %v6001_v29 = vmax.f32 %v5801_v31, %v5917_v39  ;;  %v17284_v55 = vsel %vm6046_vm6, %v6109_v37, %v6111_v10  ;;  %v11056_v41 = vld [vmem:[%s18557_s11 + $0x38] sm:$0xff] }
 0x643   :  { %v5920_v59 = vrot.slane %v5804_v13, 2  ;;  %v17287_v9 = vsel %vm6046_vm6, %v6111_v10, %v6113_v46 }
 0x644   :  { %v6117_v35 = vrot.slane %v6002_v49, 4  ;;  %v5965_v54 = vsel %vm3868_vm4, %v5922_v4, 0.0  ;;  %12949 = vmatmul.mubr.msk.f32.gmra.mrb[114].mxu0 %vm4554_vm5, %v6001_v29  ;;  %v6115_v45 = vrot.slane %v6001_v29, 4 }
 0x645   :  { %v17291_v25 = vmax.f32 %v5805_v14, %v5965_v54  ;;  %v5921_v38 = vsel %vm3868_vm4, %v5918_v36, %v5920_v59  ;;  %v5923_v3 = vsel %vm3868_vm4, %v5920_v59, %v5922_v4  ;;  %12951 = vmatprep.mubr.msk.f32.mxu0 %vm4554_vm5, %v6002_v49  ;;  %v6128_v49 = vsel %vm6046_vm6, 0.0, %v6086_v20  ;;  %v11138_v20 = vld [vmem:[%s18557_s11 + $0x48] sm:$0xff] }
 0x646   :  { %v6004_v31 = vmax.f32 %v5804_v13, %v5923_v3  ;;  %v6003_v37 = vmax.f32 %v5803_v50, %v5921_v38  ;;  %v17297_v8 = vsel %vm6046_vm6, %v6113_v46, %v6115_v45  ;;  %v17300_v2 = vsel %vm6046_vm6, %v6115_v45, %v6117_v35 }
 0x647   :  { %v6123_v56 = vrot.slane %v17291_v25, 4  ;;  %v6127_v46 = vsel %vm6046_vm6, 0.0, %v6047_v44  ;;  %v11055_v44 = vld [vmem:[%s18557_s11 + $0x30] sm:$0xff] }
 0x648   :  { %v6121_v15 = vrot.slane %v6004_v31, 4  ;;  %12952 = vmatmul.mubr.msk.f32.gmra.mrb[116].mxu0 %vm4554_vm5, %v6003_v37  ;;  %v6119_v14 = vrot.slane %v6003_v37, 4  ;;  %v13556_v13 = vpack.c.bf16 %v11056_v41, %v11055_v44 }
 0x649   :  { %12954 = vmatprep.mubr.msk.f32.mxu0 %vm4554_vm5, %v6004_v31 }
 0x64a   :  { %v17306_v36 = vsel %vm6046_vm6, %v6117_v35, %v6119_v14  ;;  %v17309_v10 = vsel %vm6046_vm6, %v6119_v14, %v6121_v15  ;;  %v17314_v50 = vsel %vm6046_vm6, %v6121_v15, %v6123_v56 }
 0x64c   :  { %12955 = vmatmul.mubr.msk.f32.gmra.mrb[118].mxu0 %vm4554_vm5, %v17291_v25 }
 0x64d   :  { %12961 = vmatprep.mubr.msk.f32.mxu0 %vm4554_vm5, %v6127_v46 }
 0x650   :  { %12962 = vmatmul.mubr.msk.f32.vlgmr.msra.gmra.mrb[80].mxu0 %vm4554_vm5, %v17085_v24 }
 0x651   :  { %12964 = vmatprep.mubr.msk.f32.mxu0 %vm4554_vm5, %v17088_v19  ;;  %13551 = vmatpush3.bf16.msra.mxu0 %v17070_v40  ;;  %v11054_v40 = vld [vmem:[%s18557_s11 + $0x28] sm:$0xff] }
 0x652   :  { %v13552_v39 = vpack.c.bf16 %v11054_v40, %v11053_v28 }
 0x654   :  { %12965 = vmatmul.mubr.msk.f32.gmra.mrb[82].mxu0 %vm4554_vm5, %v17097_v5  ;;  %13553 = vmatprep.subr.bf16.mxu1 %v13552_v39 }
 0x655   :  { %12967 = vmatprep.mubr.msk.f32.mxu0 %vm4554_vm5, %v17100_v47  ;;  %13555 = vmatpush3.bf16.msra.mxu1 %v13552_v39 }
 0x656   :  { %13557 = vmatprep.subr.bf16.mxu1 %v13556_v13 }
 0x658   :  { %12968 = vmatmul.mubr.msk.f32.gmra.mrb[84].mxu0 %vm4554_vm5, %v17109_v30 }
 0x659   :  { %12970 = vmatprep.mubr.msk.f32.mxu0 %vm4554_vm5, %v17112_v43  ;;  %13559 = vmatpush3.bf16.msra.mxu1 %v13556_v13 }
 0x65c   :  { %12971 = vmatmul.mubr.msk.f32.gmra.mrb[86].mxu0 %vm4554_vm5, %v17121_v26 }
 0x65d   :  { %12973 = vmatprep.mubr.msk.f32.mxu0 %vm4554_vm5, %v17124_v16 }
 0x660   :  { %12974 = vmatmul.mubr.msk.f32.gmra.mrb[88].mxu0 %vm4554_vm5, %v17133_v17 }
 0x661   :  { %12976 = vmatprep.mubr.msk.f32.mxu0 %vm4554_vm5, %v17136_v61 }
 0x664   :  { %12977 = vmatmul.mubr.msk.f32.gmra.mrb[90].mxu0 %vm4554_vm5, %v17145_v33 }
 0x665   :  { %12979 = vmatprep.mubr.msk.f32.mxu0 %vm4554_vm5, %v17148_v42 }
 0x668   :  { %12980 = vmatmul.mubr.msk.f32.gmra.mrb[92].mxu0 %vm4554_vm5, %v17157_v60 }
 0x669   :  { %12982 = vmatprep.mubr.msk.f32.mxu0 %vm4554_vm5, %v17160_v0 }
 0x66c   :  { %12983 = vmatmul.mubr.msk.f32.gmra.mrb[94].mxu0 %vm4554_vm5, %v17173_v48 }
 0x66d   :  { %12985 = vmatprep.mubr.msk.f32.mxu0 %vm4554_vm5, %v17177_v12 }
 0x670   :  { %12986 = vmatmul.mubr.msk.f32.gmra.mrb[96].mxu0 %vm4554_vm5, %v17185_v34 }
 0x671   :  { %12988 = vmatprep.mubr.msk.f32.mxu0 %vm4554_vm5, %v17189_v18 }
 0x674   :  { %12989 = vmatmul.mubr.msk.f32.gmra.mrb[98].mxu0 %vm4554_vm5, %v17194_v62 }
 0x675   :  { %12991 = vmatprep.mubr.msk.f32.mxu0 %vm4554_vm5, %v6128_v49 }
 0x678   :  { %12992 = vmatmul.mubr.msk.f32.gmra.mrb[100].mxu0 %vm4554_vm5, %v17214_v51 }
 0x679   :  { %12994 = vmatprep.mubr.msk.f32.mxu0 %vm4554_vm5, %v17217_v32 }
 0x67c   :  { %12995 = vmatmul.mubr.msk.f32.gmra.mrb[102].mxu0 %vm4554_vm5, %v17226_v63 }
 0x67d   :  { %12997 = vmatprep.mubr.msk.f32.mxu0 %vm4554_vm5, %v17229_v21 }
 0x680   :  { %12998 = vmatmul.mubr.msk.f32.gmra.mrb[104].mxu0 %vm4554_vm5, %v17238_v1 }
 0x681   :  { %13000 = vmatprep.mubr.msk.f32.mxu0 %vm4554_vm5, %v17241_v11 }
 0x684   :  { %13001 = vmatmul.mubr.msk.f32.gmra.mrb[106].mxu0 %vm4554_vm5, %v17250_v22 }
 0x685   :  { %13003 = vmatprep.mubr.msk.f32.mxu0 %vm4554_vm5, %v17253_v6 }
 0x688   :  { %13004 = vmatmul.mubr.msk.f32.gmra.mrb[108].mxu0 %vm4554_vm5, %v17262_v57 }
 0x689   :  { %13006 = vmatprep.mubr.msk.f32.mxu0 %vm4554_vm5, %v17265_v23 }
 0x68c   :  { %13007 = vmatmul.mubr.msk.f32.gmra.mrb[110].mxu0 %vm4554_vm5, %v17274_v58 }
 0x68d   :  { %13009 = vmatprep.mubr.msk.f32.mxu0 %vm4554_vm5, %v17277_v53 }
 0x690   :  { %13010 = vmatmul.mubr.msk.f32.gmra.mrb[112].mxu0 %vm4554_vm5, %v17284_v55 }
 0x691   :  { %13012 = vmatprep.mubr.msk.f32.mxu0 %vm4554_vm5, %v17287_v9 }
 0x694   :  { %13013 = vmatmul.mubr.msk.f32.gmra.mrb[114].mxu0 %vm4554_vm5, %v17297_v8 }
 0x695   :  { %13015 = vmatprep.mubr.msk.f32.mxu0 %vm4554_vm5, %v17300_v2 }
 0x698   :  { %13016 = vmatmul.mubr.msk.f32.gmra.mrb[116].mxu0 %vm4554_vm5, %v17306_v36 }
 0x699   :  { %13018 = vmatprep.mubr.msk.f32.mxu0 %vm4554_vm5, %v17309_v10 }
 0x69c   :  { %13019 = vmatmul.mubr.msk.f32.gmra.mrb[118].mxu0 %vm4554_vm5, %v17314_v50 }
 0x69d   :  { %13025 = vmatprep.mubr.msk.f32.mxu0 %vm4554_vm5, %v17085_v24  ;;  %v6828_v24 = vsel %vm6046_vm6, %v6084_v52, 0.0 }
 0x6a0   :  { %13026 = vmatmul.mubr.msk.f32.vlgmr.msra.gmra.mrb[80].mxu0 %vm4554_vm5, %v17088_v19  ;;  %v6829_v19 = vsel %vm6046_vm6, %v6123_v56, 0.0 }
 0x6a1   :  { %13028 = vmatprep.mubr.msk.f32.mxu0 %vm4554_vm5, %v17097_v5  ;;  %v7353_v5 = vld [vmem:[%s18557_s11] sm:$0xff] }
 0x6a4   :  { %13029 = vmatmul.mubr.msk.f32.gmra.mrb[82].mxu0 %vm4554_vm5, %v17100_v47  ;;  %v7354_v47 = vld [vmem:[%s18557_s11 + $0x8] sm:$0xff] }
 0x6a5   :  { %13031 = vmatprep.mubr.msk.f32.mxu0 %vm4554_vm5, %v17109_v30  ;;  %v13560_v30 = vpack.c.bf16 %v7354_v47, %v7353_v5 }
 0x6a7   :  { %13561 = vmatprep.subr.bf16.mxu1 %v13560_v30 }
 0x6a8   :  { %13032 = vmatmul.mubr.msk.f32.gmra.mrb[84].mxu0 %vm4554_vm5, %v17112_v43  ;;  %v17508_v43 = vld [vmem:[%s18556_s10] ss:$0 sm:$0xff]  ;;  %s18867_s10 = sld [smem:[#allocation36_spill]] }
 0x6a9   :  { %13034 = vmatprep.mubr.msk.f32.mxu0 %vm4554_vm5, %v17121_v26 }
 0x6ac   :  { %13035 = vmatmul.mubr.msk.f32.gmra.mrb[86].mxu0 %vm4554_vm5, %v17124_v16 }
 0x6ad   :  { %13037 = vmatprep.mubr.msk.f32.mxu0 %vm4554_vm5, %v17133_v17 }
 0x6b0   :  { %13038 = vmatmul.mubr.msk.f32.gmra.mrb[88].mxu0 %vm4554_vm5, %v17136_v61 }
 0x6b1   :  { %13040 = vmatprep.mubr.msk.f32.mxu0 %vm4554_vm5, %v17145_v33  ;;  %v7355_v33 = vld [vmem:[%s18557_s11 + $0x10] sm:$0xff] }
 0x6b4   :  { %13041 = vmatmul.mubr.msk.f32.gmra.mrb[90].mxu0 %vm4554_vm5, %v17148_v42  ;;  %v7356_v42 = vld [vmem:[%s18557_s11 + $0x18] sm:$0xff] }
 0x6b5   :  { %13043 = vmatprep.mubr.msk.f32.mxu0 %vm4554_vm5, %v17157_v60  ;;  %v13564_v27 = vpack.c.bf16 %v7356_v42, %v7355_v33 }
 0x6b8   :  { %13044 = vmatmul.mubr.msk.f32.gmra.mrb[92].mxu0 %vm4554_vm5, %v17160_v0 }
 0x6b9   :  { %13046 = vmatprep.mubr.msk.f32.mxu0 %vm4554_vm5, %v17173_v48 }
 0x6bc   :  { %13047 = vmatmul.mubr.msk.f32.gmra.mrb[94].mxu0 %vm4554_vm5, %v17177_v12 }
 0x6bd   :  { %13049 = vmatprep.mubr.msk.f32.mxu0 %vm4554_vm5, %v17185_v34 }
 0x6c0   :  { %13050 = vmatmul.mubr.msk.f32.gmra.mrb[96].mxu0 %vm4554_vm5, %v17189_v18 }
 0x6c1   :  { %13052 = vmatprep.mubr.msk.f32.mxu0 %vm4554_vm5, %v17194_v62  ;;  %v11137_v62 = vld [vmem:[%s18557_s11 + $0x40] sm:$0xff] }
 0x6c4   :  { %13053 = vmatmul.mubr.msk.f32.gmra.mrb[98].mxu0 %vm4554_vm5, %v6828_v24 }
 0x6c5   :  { %13055 = vmatprep.mubr.msk.f32.mxu0 %vm4554_vm5, %v17214_v51 }
 0x6c8   :  { %13056 = vmatmul.mubr.msk.f32.gmra.mrb[100].mxu0 %vm4554_vm5, %v17217_v32 }
 0x6c9   :  { %13058 = vmatprep.mubr.msk.f32.mxu0 %vm4554_vm5, %v17226_v63 }
 0x6cc   :  { %13059 = vmatmul.mubr.msk.f32.gmra.mrb[102].mxu0 %vm4554_vm5, %v17229_v21 }
 0x6cd   :  { %13061 = vmatprep.mubr.msk.f32.mxu0 %vm4554_vm5, %v17238_v1 }
 0x6d0   :  { %13062 = vmatmul.mubr.msk.f32.gmra.mrb[104].mxu0 %vm4554_vm5, %v17241_v11 }
 0x6d1   :  { %13064 = vmatprep.mubr.msk.f32.mxu0 %vm4554_vm5, %v17250_v22 }
 0x6d4   :  { %13065 = vmatmul.mubr.msk.f32.gmra.mrb[106].mxu0 %vm4554_vm5, %v17253_v6  ;;  %v17535_v6 = vpack.c.bf16 %v11138_v20, %v11137_v62 }
 0x6d5   :  { %13067 = vmatprep.mubr.msk.f32.mxu0 %vm4554_vm5, %v17262_v57 }
 0x6d8   :  { %13068 = vmatmul.mubr.msk.f32.gmra.mrb[108].mxu0 %vm4554_vm5, %v17265_v23 }
 0x6d9   :  { %13070 = vmatprep.mubr.msk.f32.mxu0 %vm4554_vm5, %v17274_v58 }
 0x6dc   :  { %13071 = vmatmul.mubr.msk.f32.gmra.mrb[110].mxu0 %vm4554_vm5, %v17277_v53 }
 0x6dd   :  { %13073 = vmatprep.mubr.msk.f32.mxu0 %vm4554_vm5, %v17284_v55 }
 0x6e0   :  { %13074 = vmatmul.mubr.msk.f32.gmra.mrb[112].mxu0 %vm4554_vm5, %v17287_v9 }
 0x6e1   :  { %13076 = vmatprep.mubr.msk.f32.mxu0 %vm4554_vm5, %v17297_v8 }
 0x6e4   :  { %13077 = vmatmul.mubr.msk.f32.gmra.mrb[114].mxu0 %vm4554_vm5, %v17300_v2 }
 0x6e5   :  { %13079 = vmatprep.mubr.msk.f32.mxu0 %vm4554_vm5, %v17306_v36 }
 0x6e8   :  { %13080 = vmatmul.mubr.msk.f32.gmra.mrb[116].mxu0 %vm4554_vm5, %v17309_v10 }
 0x6e9   :  { %13082 = vmatprep.mubr.msk.f32.mxu0 %vm4554_vm5, %v17314_v50 }
 0x6ec   :  { %13083 = vmatmul.mubr.msk.f32.gmra.mrb[118].mxu0 %vm4554_vm5, %v6829_v19 }
 0x773   :  { %v13027_v26 = vpop.f32.mrb[80].mxu0 }
 0x774   :  { %v7152_v16 = vadd.f32 %v13027_v26, %v17508_v43  ;;  %v6905_v17 = vpop.f32.mrb[81].mxu0 }
 0x775   :  { %v7151_v61 = vadd.f32 %v17508_v43, %v6905_v17 }
 0x776   :  { %v7192_v60 = vmax.f32 %v7152_v16, 0.0 }
 0x777   :  { %v7191_v0 = vmax.f32 %v7151_v61, 0.0  ;;  %v13030_v7 = vpop.f32.mrb[82].mxu0 }
 0x778   :  { %v7272_v52 = vrot.slane %v7192_v60, 4  ;;  %v7154_v48 = vadd.f32 %v13030_v7, %v17508_v43  ;;  %v6915_v12 = vpop.f32.mrb[83].mxu0 }
 0x779   :  { %v17519_v34 = vrot.slane %v7191_v0, 4  ;;  %v7153_v18 = vadd.f32 %v17508_v43, %v6915_v12  ;;  %13093 = vmatprep.mubr.msk.f32.mxu1 %vm7362_vm7, %v7191_v0 }
 0x77a   :  { %v7194_v51 = vmax.f32 %v7154_v48, 0.0  ;;  %13094 = vmatmul.mubr.msk.f32.vlgmr.msra.gmra.mrb[84].mxu1 %vm7362_vm7, %v7192_v60 }
 0x77b   :  { %v17532_v32 = vsel %vm6046_vm6, %v17519_v34, %v7272_v52  ;;  %v7193_v63 = vmax.f32 %v7153_v18, 0.0  ;;  %v13033_v21 = vpop.f32.mrb[84].mxu0  ;;  %13563 = vmatpush3.bf16.msra.mxu1 %v13560_v30 }
 0x77c   :  { %v7276_v1 = vrot.slane %v7194_v51, 4  ;;  %v7156_v11 = vadd.f32 %v13033_v21, %v17508_v43  ;;  %v6925_v22 = vpop.f32.mrb[85].mxu0  ;;  %13565 = vmatprep.subr.bf16.mxu1 %v13564_v27 }
 0x77d   :  { %v7274_v57 = vrot.slane %v7193_v63, 4  ;;  %v7155_v23 = vadd.f32 %v17508_v43, %v6925_v22  ;;  %13096 = vmatprep.mubr.msk.f32.mxu1 %vm7362_vm7, %v7193_v63 }
 0x77e   :  { %v7196_v58 = vmax.f32 %v7156_v11, 0.0  ;;  %13097 = vmatmul.mubr.msk.f32.gmra.mrb[86].mxu1 %vm7362_vm7, %v7194_v51 }
 0x77f   :  { %v7195_v53 = vmax.f32 %v7155_v23, 0.0  ;;  %v13036_v4 = vpop.f32.mrb[86].mxu0  ;;  %13567 = vmatpush3.bf16.msra.mxu1 %v13564_v27  ;;  %v17541_v29 = vsel %vm6046_vm6, %v7272_v52, %v7274_v57  ;;  %v17544_v55 = vsel %vm6046_vm6, %v7274_v57, %v7276_v1 }
 0x780   :  { %v7280_v59 = vrot.slane %v7196_v58, 4  ;;  %v7158_v9 = vadd.f32 %v13036_v4, %v17508_v43  ;;  %v6935_v35 = vpop.f32.mrb[87].mxu0  ;;  %13569 = vmatprep.subr.bf16.mxu1 %v17535_v6 }
 0x781   :  { %v7278_v54 = vrot.slane %v7195_v53, 4  ;;  %v7157_v45 = vadd.f32 %v17508_v43, %v6935_v35  ;;  %13099 = vmatprep.mubr.msk.f32.mxu1 %vm7362_vm7, %v7195_v53 }
 0x782   :  { %v7198_v25 = vmax.f32 %v7158_v9, 0.0  ;;  %13100 = vmatmul.mubr.msk.f32.gmra.mrb[88].mxu1 %vm7362_vm7, %v7196_v58 }
 0x783   :  { %v7197_v38 = vmax.f32 %v7157_v45, 0.0  ;;  %v13039_v3 = vpop.f32.mrb[88].mxu0  ;;  %v17552_v31 = vsel %vm6046_vm6, %v7276_v1, %v7278_v54  ;;  %v17555_v37 = vsel %vm6046_vm6, %v7278_v54, %v7280_v59 }
 0x784   :  { %v7284_v8 = vrot.slane %v7198_v25, 4  ;;  %v7160_v2 = vadd.f32 %v13039_v3, %v17508_v43  ;;  %v6945_v56 = vpop.f32.mrb[89].mxu0 }
 0x785   :  { %v7282_v15 = vrot.slane %v7197_v38, 4  ;;  %v7159_v14 = vadd.f32 %v17508_v43, %v6945_v56  ;;  %13102 = vmatprep.mubr.msk.f32.mxu1 %vm7362_vm7, %v7197_v38 }
 0x786   :  { %v7200_v36 = vmax.f32 %v7160_v2, 0.0  ;;  %13103 = vmatmul.mubr.msk.f32.gmra.mrb[90].mxu1 %vm7362_vm7, %v7198_v25 }
 0x787   :  { %v7199_v10 = vmax.f32 %v7159_v14, 0.0  ;;  %v13042_v50 = vpop.f32.mrb[90].mxu0  ;;  %v17562_v46 = vsel %vm6046_vm6, %v7280_v59, %v7282_v15  ;;  %v17565_v28 = vsel %vm6046_vm6, %v7282_v15, %v7284_v8 }
 0x788   :  { %v7288_v40 = vrot.slane %v7200_v36, 4  ;;  %v7162_v44 = vadd.f32 %v13042_v50, %v17508_v43  ;;  %v6955_v39 = vpop.f32.mrb[91].mxu0 }
 0x789   :  { %v7286_v41 = vrot.slane %v7199_v10, 4  ;;  %v7161_v13 = vadd.f32 %v17508_v43, %v6955_v39  ;;  %13105 = vmatprep.mubr.msk.f32.mxu1 %vm7362_vm7, %v7199_v10 }
 0x78a   :  { %v7202_v49 = vmax.f32 %v7162_v44, 0.0  ;;  %13106 = vmatmul.mubr.msk.f32.gmra.mrb[92].mxu1 %vm7362_vm7, %v7200_v36 }
 0x78b   :  { %v7201_v24 = vmax.f32 %v7161_v13, 0.0  ;;  %v13045_v19 = vpop.f32.mrb[92].mxu0  ;;  %v17572_v5 = vsel %vm6046_vm6, %v7284_v8, %v7286_v41  ;;  %v17575_v47 = vsel %vm6046_vm6, %v7286_v41, %v7288_v40 }
 0x78c   :  { %v7292_v30 = vrot.slane %v7202_v49, 4  ;;  %v7164_v26 = vadd.f32 %v13045_v19, %v17508_v43  ;;  %v6965_v16 = vpop.f32.mrb[93].mxu0 }
 0x78d   :  { %v7290_v17 = vrot.slane %v7201_v24, 4  ;;  %v7163_v61 = vadd.f32 %v17508_v43, %v6965_v16  ;;  %13108 = vmatprep.mubr.msk.f32.mxu1 %vm7362_vm7, %v7201_v24 }
 0x78e   :  { %v7204_v33 = vmax.f32 %v7164_v26, 0.0  ;;  %13109 = vmatmul.mubr.msk.f32.gmra.mrb[94].mxu1 %vm7362_vm7, %v7202_v49 }
 0x78f   :  { %v7203_v42 = vmax.f32 %v7163_v61, 0.0  ;;  %v13048_v60 = vpop.f32.mrb[94].mxu0  ;;  %v17582_v0 = vsel %vm6046_vm6, %v7288_v40, %v7290_v17  ;;  %v17585_v7 = vsel %vm6046_vm6, %v7290_v17, %v7292_v30 }
 0x790   :  { %v7296_v52 = vrot.slane %v7204_v33, 4  ;;  %v7166_v48 = vadd.f32 %v13048_v60, %v17508_v43  ;;  %v6975_v12 = vpop.f32.mrb[95].mxu0 }
 0x791   :  { %v7294_v27 = vrot.slane %v7203_v42, 4  ;;  %v7165_v18 = vadd.f32 %v17508_v43, %v6975_v12  ;;  %13111 = vmatprep.mubr.msk.f32.mxu1 %vm7362_vm7, %v7203_v42 }
 0x792   :  { %v7206_v62 = vmax.f32 %v7166_v48, 0.0  ;;  %13112 = vmatmul.mubr.msk.f32.gmra.mrb[96].mxu1 %vm7362_vm7, %v7204_v33 }
 0x793   :  { %v7205_v20 = vmax.f32 %v7165_v18, 0.0  ;;  %v13051_v51 = vpop.f32.mrb[96].mxu0  ;;  %v17592_v63 = vsel %vm6046_vm6, %v7292_v30, %v7294_v27  ;;  %v17595_v21 = vsel %vm6046_vm6, %v7294_v27, %v7296_v52 }
 0x794   :  { %v7300_v1 = vrot.slane %v7206_v62, 4  ;;  %v7168_v11 = vadd.f32 %v13051_v51, %v17508_v43  ;;  %v6985_v22 = vpop.f32.mrb[97].mxu0 }
 0x795   :  { %v7298_v57 = vrot.slane %v7205_v20, 4  ;;  %v7167_v23 = vadd.f32 %v17508_v43, %v6985_v22  ;;  %13114 = vmatprep.mubr.msk.f32.mxu1 %vm7362_vm7, %v7205_v20 }
 0x796   :  { %v7208_v58 = vmax.f32 %v7168_v11, 0.0  ;;  %13115 = vmatmul.mubr.msk.f32.gmra.mrb[98].mxu1 %vm7362_vm7, %v7206_v62 }
 0x797   :  { %v7207_v53 = vmax.f32 %v7167_v23, 0.0  ;;  %v13054_v4 = vpop.f32.mrb[98].mxu0  ;;  %v17602_v59 = vsel %vm6046_vm6, %v7296_v52, %v7298_v57  ;;  %v17605_v9 = vsel %vm6046_vm6, %v7298_v57, %v7300_v1 }
 0x798   :  { %v7304_v35 = vrot.slane %v7208_v58, 4  ;;  %v7170_v54 = vadd.f32 %v13054_v4, %v17508_v43  ;;  %v6995_v45 = vpop.f32.mrb[99].mxu0 }
 0x799   :  { %v7302_v25 = vrot.slane %v7207_v53, 4  ;;  %v7169_v38 = vadd.f32 %v17508_v43, %v6995_v45  ;;  %13117 = vmatprep.mubr.msk.f32.mxu1 %vm7362_vm7, %v7207_v53 }
 0x79a   :  { %v7210_v3 = vmax.f32 %v7170_v54, 0.0  ;;  %13118 = vmatmul.mubr.msk.f32.gmra.mrb[100].mxu1 %vm7362_vm7, %v7208_v58 }
 0x79b   :  { %v7209_v8 = vmax.f32 %v7169_v38, 0.0  ;;  %v13057_v2 = vpop.f32.mrb[100].mxu0  ;;  %v17612_v56 = vsel %vm6046_vm6, %v7300_v1, %v7302_v25  ;;  %v17615_v15 = vsel %vm6046_vm6, %v7302_v25, %v7304_v35 }
 0x79c   :  { %v17617_v14 = vrot.slane %v7210_v3, 4  ;;  %v7172_v36 = vadd.f32 %v13057_v2, %v17508_v43  ;;  %v7005_v10 = vpop.f32.mrb[101].mxu0 }
 0x79d   :  { %v7306_v50 = vrot.slane %v7209_v8, 4  ;;  %v7171_v40 = vadd.f32 %v17508_v43, %v7005_v10  ;;  %13120 = vmatprep.mubr.msk.f32.mxu1 %vm7362_vm7, %v7209_v8 }
 0x79e   :  { %v7212_v44 = vmax.f32 %v7172_v36, 0.0  ;;  %13121 = vmatmul.mubr.msk.f32.gmra.mrb[102].mxu1 %vm7362_vm7, %v7210_v3 }
 0x79f   :  { %v7211_v39 = vmax.f32 %v7171_v40, 0.0  ;;  %v13060_v41 = vpop.f32.mrb[102].mxu0  ;;  %v17624_v13 = vsel %vm6046_vm6, %v7304_v35, %v7306_v50  ;;  %v17628_v49 = vsel %vm6046_vm6, %v7306_v50, %v17617_v14 }
 0x7a0   :  { %v7311_v24 = vrot.slane %v7212_v44, 4  ;;  %v7174_v19 = vadd.f32 %v13060_v41, %v17508_v43  ;;  %v7015_v30 = vpop.f32.mrb[103].mxu0 }
 0x7a1   :  { %v17631_v26 = vrot.slane %v7211_v39, 4  ;;  %v7173_v16 = vadd.f32 %v17508_v43, %v7015_v30  ;;  %13123 = vmatprep.mubr.msk.f32.mxu1 %vm7362_vm7, %v7211_v39 }
 0x7a2   :  { %v7214_v17 = vmax.f32 %v7174_v19, 0.0  ;;  %13124 = vmatmul.mubr.msk.f32.gmra.mrb[104].mxu1 %vm7362_vm7, %v7212_v44 }
 0x7a3   :  { %v7213_v61 = vmax.f32 %v7173_v16, 0.0  ;;  %v13063_v33 = vpop.f32.mrb[104].mxu0  ;;  %v17638_v42 = vsel %vm6046_vm6, %v17631_v26, %v7311_v24 }
 0x7a4   :  { %v7315_v60 = vrot.slane %v7214_v17, 4  ;;  %v7176_v52 = vadd.f32 %v13063_v33, %v17508_v43  ;;  %v7025_v48 = vpop.f32.mrb[105].mxu0 }
 0x7a5   :  { %v7313_v12 = vrot.slane %v7213_v61, 4  ;;  %v7175_v27 = vadd.f32 %v17508_v43, %v7025_v48  ;;  %13126 = vmatprep.mubr.msk.f32.mxu1 %vm7362_vm7, %v7213_v61 }
 0x7a6   :  { %v7216_v18 = vmax.f32 %v7176_v52, 0.0  ;;  %13127 = vmatmul.mubr.msk.f32.gmra.mrb[106].mxu1 %vm7362_vm7, %v7214_v17 }
 0x7a7   :  { %v7215_v62 = vmax.f32 %v7175_v27, 0.0  ;;  %v13066_v20 = vpop.f32.mrb[106].mxu0  ;;  %v17645_v51 = vsel %vm6046_vm6, %v7311_v24, %v7313_v12  ;;  %v17648_v1 = vsel %vm6046_vm6, %v7313_v12, %v7315_v60 }
 0x7a8   :  { %v7319_v11 = vrot.slane %v7216_v18, 4  ;;  %v7178_v22 = vadd.f32 %v13066_v20, %v17508_v43  ;;  %v7035_v57 = vpop.f32.mrb[107].mxu0 }
 0x7a9   :  { %v7317_v23 = vrot.slane %v7215_v62, 4  ;;  %v7177_v58 = vadd.f32 %v17508_v43, %v7035_v57  ;;  %13129 = vmatprep.mubr.msk.f32.mxu1 %vm7362_vm7, %v7215_v62 }
 0x7aa   :  { %v7218_v53 = vmax.f32 %v7178_v22, 0.0  ;;  %13130 = vmatmul.mubr.msk.f32.gmra.mrb[108].mxu1 %vm7362_vm7, %v7216_v18 }
 0x7ab   :  { %v7217_v4 = vmax.f32 %v7177_v58, 0.0  ;;  %v13069_v35 = vpop.f32.mrb[108].mxu0  ;;  %v17655_v54 = vsel %vm6046_vm6, %v7315_v60, %v7317_v23  ;;  %v17658_v45 = vsel %vm6046_vm6, %v7317_v23, %v7319_v11 }
 0x7ac   :  { %v7323_v25 = vrot.slane %v7218_v53, 4  ;;  %v7180_v38 = vadd.f32 %v13069_v35, %v17508_v43  ;;  %v7045_v3 = vpop.f32.mrb[109].mxu0 }
 0x7ad   :  { %v7321_v8 = vrot.slane %v7217_v4, 4  ;;  %v7179_v2 = vadd.f32 %v17508_v43, %v7045_v3  ;;  %13132 = vmatprep.mubr.msk.f32.mxu1 %vm7362_vm7, %v7217_v4 }
 0x7ae   :  { %v7220_v36 = vmax.f32 %v7180_v38, 0.0  ;;  %13133 = vmatmul.mubr.msk.f32.gmra.mrb[110].mxu1 %vm7362_vm7, %v7218_v53 }
 0x7af   :  { %v7219_v10 = vmax.f32 %v7179_v2, 0.0  ;;  %v13072_v50 = vpop.f32.mrb[110].mxu0  ;;  %v17665_v40 = vsel %vm6046_vm6, %v7319_v11, %v7321_v8  ;;  %v17668_v44 = vsel %vm6046_vm6, %v7321_v8, %v7323_v25 }
 0x7b0   :  { %v7327_v39 = vrot.slane %v7220_v36, 4  ;;  %v7182_v41 = vadd.f32 %v13072_v50, %v17508_v43  ;;  %v7055_v24 = vpop.f32.mrb[111].mxu0 }
 0x7b1   :  { %v7325_v19 = vrot.slane %v7219_v10, 4  ;;  %v7181_v30 = vadd.f32 %v17508_v43, %v7055_v24  ;;  %13135 = vmatprep.mubr.msk.f32.mxu1 %vm7362_vm7, %v7219_v10 }
 0x7b2   :  { %v7222_v16 = vmax.f32 %v7182_v41, 0.0  ;;  %13136 = vmatmul.mubr.msk.f32.gmra.mrb[112].mxu1 %vm7362_vm7, %v7220_v36 }
 0x7b3   :  { %v7221_v17 = vmax.f32 %v7181_v30, 0.0  ;;  %v13075_v61 = vpop.f32.mrb[112].mxu0  ;;  %v17675_v33 = vsel %vm6046_vm6, %v7323_v25, %v7325_v19  ;;  %v17678_v60 = vsel %vm6046_vm6, %v7325_v19, %v7327_v39 }
 0x7b4   :  { %v7331_v52 = vrot.slane %v7222_v16, 4  ;;  %v7184_v48 = vadd.f32 %v13075_v61, %v17508_v43  ;;  %v7065_v12 = vpop.f32.mrb[113].mxu0 }
 0x7b5   :  { %v7329_v27 = vrot.slane %v7221_v17, 4  ;;  %v7183_v18 = vadd.f32 %v17508_v43, %v7065_v12  ;;  %13138 = vmatprep.mubr.msk.f32.mxu1 %vm7362_vm7, %v7221_v17 }
 0x7b6   :  { %v7224_v62 = vmax.f32 %v7184_v48, 0.0  ;;  %13139 = vmatmul.mubr.msk.f32.gmra.mrb[114].mxu1 %vm7362_vm7, %v7222_v16 }
 0x7b7   :  { %v7223_v20 = vmax.f32 %v7183_v18, 0.0  ;;  %v13078_v11 = vpop.f32.mrb[114].mxu0  ;;  %v17685_v22 = vsel %vm6046_vm6, %v7327_v39, %v7329_v27  ;;  %v17688_v57 = vsel %vm6046_vm6, %v7329_v27, %v7331_v52 }
 0x7b8   :  { %v7335_v23 = vrot.slane %v7224_v62, 4  ;;  %v7186_v58 = vadd.f32 %v13078_v11, %v17508_v43  ;;  %v7075_v53 = vpop.f32.mrb[115].mxu0 }
 0x7b9   :  { %v7333_v4 = vrot.slane %v7223_v20, 4  ;;  %v7185_v35 = vadd.f32 %v17508_v43, %v7075_v53  ;;  %13141 = vmatprep.mubr.msk.f32.mxu1 %vm7362_vm7, %v7223_v20  ;;  %v11140_v53 = vld [vmem:[%s18557_s11 + $0x58] sm:$0xff] }
 0x7ba   :  { %v7226_v25 = vmax.f32 %v7186_v58, 0.0  ;;  %13142 = vmatmul.mubr.msk.f32.gmra.mrb[116].mxu1 %vm7362_vm7, %v7224_v62 }
 0x7bb   :  { %v7225_v38 = vmax.f32 %v7185_v35, 0.0  ;;  %v13081_v3 = vpop.f32.mrb[116].mxu0  ;;  %v17695_v8 = vsel %vm6046_vm6, %v7331_v52, %v7333_v4  ;;  %v17698_v2 = vsel %vm6046_vm6, %v7333_v4, %v7335_v23  ;;  %v7351_v4 = vsel %vm6046_vm6, 0.0, %v17519_v34  ;;  %v11182_v34 = vld [vmem:[%s18559_s13 + $0x20] sm:$0xff] }
 0x7bc   :  { %v7339_v36 = vrot.slane %v7226_v25, 4  ;;  %v7188_v10 = vadd.f32 %v13081_v3, %v17508_v43  ;;  %v7085_v50 = vpop.f32.mrb[117].mxu0  ;;  %v14218_v3 = vmov 0.0|0.0  }
 0x7bd   :  { %v7337_v39 = vrot.slane %v7225_v38, 4  ;;  %v7187_v41 = vadd.f32 %v17508_v43, %v7085_v50  ;;  %13144 = vmatprep.mubr.msk.f32.mxu1 %vm7362_vm7, %v7225_v38  ;;  %13576 = vmatprep.subr.bf16.mxu0 %v14218_v3  ;;  %v8667_v50 = vld [vmem:[%s18559_s13 + $0x8] sm:$0xff] }
 0x7be   :  { %v7228_v24 = vmax.f32 %v7188_v10, 0.0  ;;  %13145 = vmatmul.mubr.msk.f32.gmra.mrb[118].mxu1 %vm7362_vm7, %v7226_v25  ;;  %v7352_v10 = vsel %vm6046_vm6, 0.0, %v17631_v26  ;;  %v8666_v26 = vld [vmem:[%s18559_s13] sm:$0xff] }
 0x7bf   :  { %v7227_v19 = vmax.f32 %v7187_v41, 0.0  ;;  %v13084_v30 = vpop.f32.mrb[118].mxu0  ;;  %v17705_v16 = vsel %vm6046_vm6, %v7335_v23, %v7337_v39  ;;  %v17708_v17 = vsel %vm6046_vm6, %v7337_v39, %v7339_v36  ;;  %v13583_v39 = vpack.c.bf16 %v8667_v50, %v8666_v26 }
 0x7c0   :  { %v7343_v61 = vrot.slane %v7228_v24, 4  ;;  %v7190_v52 = vadd.f32 %v13084_v30, %v17508_v43  ;;  %v7095_v48 = vpop.f32.mrb[119].mxu0 }
 0x7c1   :  { %v7341_v12 = vrot.slane %v7227_v19, 4  ;;  %v7189_v27 = vadd.f32 %v17508_v43, %v7095_v48  ;;  %13147 = vmatprep.mubr.msk.f32.mxu1 %vm7362_vm7, %v7227_v19  ;;  %v11139_v43 = vld [vmem:[%s18557_s11 + $0x50] sm:$0xff]  ;;  %s10426_s11 = sshll.u32 %s14221_s9, 4  ;;  %s10427_s11 = int_to_ptr.vmem [resolvable:$true] %s10426_s11 }
 0x7c2   :  { %v7230_v18 = vmax.f32 %v7190_v52, 0.0  ;;  %13148 = vmatmul.mubr.msk.f32.gmra.mrb[120].mxu1 %vm7362_vm7, %v7228_v24  ;;  %v13572_v38 = vpack.c.bf16 %v11140_v53, %v11139_v43  ;;  %s14194_s25 = scalar_lea.vmem %s10427_s11, 32  ;;  %p14199_p1 = scmp.lt.s32.totalorder %s10427_s11, %s10427_s11 }
 0x7c3   :  { %v7229_v62 = vmax.f32 %v7189_v27, 0.0  ;;  %v17715_v20 = vsel %vm6046_vm6, %v7339_v36, %v7341_v12  ;;  %v17718_v11 = vsel %vm6046_vm6, %v7341_v12, %v7343_v61  ;;  %p14195_p0 = scmp.ne.s32.totalorder %s10427_s11, %s14194_s25  ;;  %p14200_p2 = scmp.lt.s32.totalorder %s14194_s25, %s14194_s25 }
 0x7c4   :  { %v17720_v23 = vrot.slane %v7230_v18, 4 }
 0x7c5   :  { %v7345_v58 = vrot.slane %v7229_v62, 4  ;;  %13150 = vmatprep.mubr.msk.f32.mxu1 %vm7362_vm7, %v7229_v62  ;;  %p14201_p3 = por %p14200_p2, %p14199_p1 }
 0x7c6   :  { %13151 = vmatmul.mubr.msk.f32.gmra.mrb[122].mxu1 %vm7362_vm7, %v7230_v18 }
 0x7c7   :  { %13161 = vmatprep.mubr.msk.f32.mxu1 %vm7362_vm7, %v7351_v4  ;;  %v17734_v35 = vsel %vm6046_vm6, %v7343_v61, %v7345_v58  ;;  %v17738_v25 = vsel %vm6046_vm6, %v7345_v58, %v17720_v23  ;;  %p14202_p4 = pnand %p14201_p3, %p14195_p0 }
 0x7ca   :  { %13162 = vmatmul.mubr.msk.f32.vlgmr.msra.gmra.mrb[84].mxu1 %vm7362_vm7, %v17532_v32 }
 0x7cb   :  { %13164 = vmatprep.mubr.msk.f32.mxu1 %vm7362_vm7, %v17541_v29  ;;  %13571 = vmatpush3.bf16.msra.mxu1 %v17535_v6  ;;  %v11183_v6 = vld [vmem:[%s18559_s13 + $0x28] sm:$0xff] }
 0x7cc   :  { %13573 = vmatprep.subr.bf16.mxu1 %v13572_v38  ;;  %v13577_v36 = vpack.c.bf16 %v11183_v6, %v11182_v34 }
 0x7ce   :  { %13165 = vmatmul.mubr.msk.f32.gmra.mrb[86].mxu1 %vm7362_vm7, %v17544_v55  ;;  %13578 = vmatpush3.bf16.msra.mxu0 %v13577_v36 }
 0x7cf   :  { %13167 = vmatprep.mubr.msk.f32.mxu1 %vm7362_vm7, %v17552_v31  ;;  %13575 = vmatpush3.bf16.msra.mxu1 %v13572_v38 }
 0x7d0   :  { %13582 = vmatprep.subr.bf16.mxu1 %v14218_v3  ;;  %13579 = vmatprep.subr.bf16.mxu0 %v14218_v3 }
 0x7d2   :  { %13168 = vmatmul.mubr.msk.f32.gmra.mrb[88].mxu1 %vm7362_vm7, %v17555_v37 }
 0x7d3   :  { %13170 = vmatprep.mubr.msk.f32.mxu1 %vm7362_vm7, %v17562_v46 }
 0x7d6   :  { %13171 = vmatmul.mubr.msk.f32.gmra.mrb[90].mxu1 %vm7362_vm7, %v17565_v28 }
 0x7d7   :  { %13173 = vmatprep.mubr.msk.f32.mxu1 %vm7362_vm7, %v17572_v5 }
 0x7da   :  { %13174 = vmatmul.mubr.msk.f32.gmra.mrb[92].mxu1 %vm7362_vm7, %v17575_v47 }
 0x7db   :  { %13176 = vmatprep.mubr.msk.f32.mxu1 %vm7362_vm7, %v17582_v0 }
 0x7de   :  { %13177 = vmatmul.mubr.msk.f32.gmra.mrb[94].mxu1 %vm7362_vm7, %v17585_v7 }
 0x7df   :  { %13179 = vmatprep.mubr.msk.f32.mxu1 %vm7362_vm7, %v17592_v63 }
 0x7e2   :  { %13180 = vmatmul.mubr.msk.f32.gmra.mrb[96].mxu1 %vm7362_vm7, %v17595_v21 }
 0x7e3   :  { %13182 = vmatprep.mubr.msk.f32.mxu1 %vm7362_vm7, %v17602_v59 }
 0x7e6   :  { %13183 = vmatmul.mubr.msk.f32.gmra.mrb[98].mxu1 %vm7362_vm7, %v17605_v9 }
 0x7e7   :  { %13185 = vmatprep.mubr.msk.f32.mxu1 %vm7362_vm7, %v17612_v56 }
 0x7ea   :  { %13186 = vmatmul.mubr.msk.f32.gmra.mrb[100].mxu1 %vm7362_vm7, %v17615_v15 }
 0x7eb   :  { %13188 = vmatprep.mubr.msk.f32.mxu1 %vm7362_vm7, %v17624_v13 }
 0x7ee   :  { %13189 = vmatmul.mubr.msk.f32.gmra.mrb[102].mxu1 %vm7362_vm7, %v17628_v49 }
 0x7ef   :  { %13191 = vmatprep.mubr.msk.f32.mxu1 %vm7362_vm7, %v7352_v10 }
 0x7f2   :  { %13192 = vmatmul.mubr.msk.f32.gmra.mrb[104].mxu1 %vm7362_vm7, %v17638_v42 }
 0x7f3   :  { %13194 = vmatprep.mubr.msk.f32.mxu1 %vm7362_vm7, %v17645_v51 }
 0x7f6   :  { %13195 = vmatmul.mubr.msk.f32.gmra.mrb[106].mxu1 %vm7362_vm7, %v17648_v1 }
 0x7f7   :  { %13197 = vmatprep.mubr.msk.f32.mxu1 %vm7362_vm7, %v17655_v54 }
 0x7fa   :  { %13198 = vmatmul.mubr.msk.f32.gmra.mrb[108].mxu1 %vm7362_vm7, %v17658_v45 }
 0x7fb   :  { %13200 = vmatprep.mubr.msk.f32.mxu1 %vm7362_vm7, %v17665_v40 }
 0x7fe   :  { %13201 = vmatmul.mubr.msk.f32.gmra.mrb[110].mxu1 %vm7362_vm7, %v17668_v44 }
 0x7ff   :  { %13203 = vmatprep.mubr.msk.f32.mxu1 %vm7362_vm7, %v17675_v33 }
 0x802   :  { %13204 = vmatmul.mubr.msk.f32.gmra.mrb[112].mxu1 %vm7362_vm7, %v17678_v60 }
 0x803   :  { %13206 = vmatprep.mubr.msk.f32.mxu1 %vm7362_vm7, %v17685_v22 }
 0x806   :  { %13207 = vmatmul.mubr.msk.f32.gmra.mrb[114].mxu1 %vm7362_vm7, %v17688_v57 }
 0x807   :  { %13209 = vmatprep.mubr.msk.f32.mxu1 %vm7362_vm7, %v17695_v8 }
 0x80a   :  { %13210 = vmatmul.mubr.msk.f32.gmra.mrb[116].mxu1 %vm7362_vm7, %v17698_v2 }
 0x80b   :  { %13212 = vmatprep.mubr.msk.f32.mxu1 %vm7362_vm7, %v17705_v16 }
 0x80e   :  { %13213 = vmatmul.mubr.msk.f32.gmra.mrb[118].mxu1 %vm7362_vm7, %v17708_v17 }
 0x80f   :  { %13215 = vmatprep.mubr.msk.f32.mxu1 %vm7362_vm7, %v17715_v20 }
 0x812   :  { %13216 = vmatmul.mubr.msk.f32.gmra.mrb[120].mxu1 %vm7362_vm7, %v17718_v11 }
 0x813   :  { %13218 = vmatprep.mubr.msk.f32.mxu1 %vm7362_vm7, %v17734_v35 }
 0x816   :  { %13219 = vmatmul.mubr.msk.f32.gmra.mrb[122].mxu1 %vm7362_vm7, %v17738_v25 }
 0x817   :  { %13229 = vmatprep.mubr.msk.f32.mxu1 %vm7362_vm7, %v17532_v32  ;;  %v8057_v32 = vsel %vm6046_vm6, %v17617_v14, 0.0 }
 0x81a   :  { %13230 = vmatmul.mubr.msk.f32.vlgmr.msra.gmra.mrb[84].mxu1 %vm7362_vm7, %v17541_v29  ;;  %v8058_v29 = vsel %vm6046_vm6, %v17720_v23, 0.0 }
 0x81b   :  { %13232 = vmatprep.mubr.msk.f32.mxu1 %vm7362_vm7, %v17544_v55  ;;  %13584 = vmatpush3.bf16.msra.mxu1 %v13583_v39  ;;  %v11184_v55 = vld [vmem:[%s18559_s13 + $0x30] sm:$0xff] }
 0x81c   :  { %13585 = vmatprep.subr.bf16.mxu1 %v14218_v3 }
 0x81e   :  { %13233 = vmatmul.mubr.msk.f32.gmra.mrb[86].mxu1 %vm7362_vm7, %v17552_v31  ;;  %v11185_v31 = vld [vmem:[%s18559_s13 + $0x38] sm:$0xff] }
 0x81f   :  { %13235 = vmatprep.mubr.msk.f32.mxu1 %vm7362_vm7, %v17555_v37  ;;  %v13580_v37 = vpack.c.bf16 %v11185_v31, %v11184_v55 }
 0x821   :  { %13581 = vmatpush3.bf16.msra.mxu0 %v13580_v37 }
 0x822   :  { %13236 = vmatmul.mubr.msk.f32.gmra.mrb[88].mxu1 %vm7362_vm7, %v17562_v46  ;;  %v8668_v46 = vld [vmem:[%s18559_s13 + $0x10] sm:$0xff]  ;;  %13588 = vmatprep.subr.bf16.mxu0 %v14218_v3 }
 0x823   :  { %13238 = vmatprep.mubr.msk.f32.mxu1 %vm7362_vm7, %v17565_v28  ;;  %v8669_v28 = vld [vmem:[%s18559_s13 + $0x18] sm:$0xff] }
 0x826   :  { %13239 = vmatmul.mubr.msk.f32.gmra.mrb[90].mxu1 %vm7362_vm7, %v17572_v5  ;;  %v13586_v5 = vpack.c.bf16 %v8669_v28, %v8668_v46 }
 0x827   :  { %13241 = vmatprep.mubr.msk.f32.mxu1 %vm7362_vm7, %v17575_v47  ;;  %v14220_v47 = vmov 0.0  }
 0x828   :  { %13587 = vmatpush3.bf16.msra.mxu1 %v13586_v5  ;;  %13297 = vmatprep.mubr.msk.f32.mxu0 %vm14219_vm8, %v14220_v47 }
 0x829   :  { %13594 = vmatprep.subr.bf16.mxu1 %v14218_v3 }
 0x82a   :  { %13242 = vmatmul.mubr.msk.f32.gmra.mrb[92].mxu1 %vm7362_vm7, %v17582_v0  ;;  %v17939_v0 = vld [vmem:[%s18867_s10] ss:$0 sm:$0xff] }
 0x82b   :  { %13244 = vmatprep.mubr.msk.f32.mxu1 %vm7362_vm7, %v17585_v7 }
 0x82e   :  { %13245 = vmatmul.mubr.msk.f32.gmra.mrb[94].mxu1 %vm7362_vm7, %v17592_v63 }
 0x82f   :  { %13247 = vmatprep.mubr.msk.f32.mxu1 %vm7362_vm7, %v17595_v21 }
 0x832   :  { %13248 = vmatmul.mubr.msk.f32.gmra.mrb[96].mxu1 %vm7362_vm7, %v17602_v59 }
 0x833   :  { %13250 = vmatprep.mubr.msk.f32.mxu1 %vm7362_vm7, %v17605_v9 }
 0x836   :  { %13251 = vmatmul.mubr.msk.f32.gmra.mrb[98].mxu1 %vm7362_vm7, %v17612_v56 }
 0x837   :  { %13253 = vmatprep.mubr.msk.f32.mxu1 %vm7362_vm7, %v17615_v15 }
 0x83a   :  { %13254 = vmatmul.mubr.msk.f32.gmra.mrb[100].mxu1 %vm7362_vm7, %v17624_v13 }
 0x83b   :  { %13256 = vmatprep.mubr.msk.f32.mxu1 %vm7362_vm7, %v17628_v49 }
 0x83e   :  { %13257 = vmatmul.mubr.msk.f32.gmra.mrb[102].mxu1 %vm7362_vm7, %v8057_v32 }
 0x83f   :  { %13259 = vmatprep.mubr.msk.f32.mxu1 %vm7362_vm7, %v17638_v42 }
 0x842   :  { %13260 = vmatmul.mubr.msk.f32.gmra.mrb[104].mxu1 %vm7362_vm7, %v17645_v51 }
 0x843   :  { %13262 = vmatprep.mubr.msk.f32.mxu1 %vm7362_vm7, %v17648_v1 }
 0x846   :  { %13263 = vmatmul.mubr.msk.f32.gmra.mrb[106].mxu1 %vm7362_vm7, %v17655_v54 }
 0x847   :  { %13265 = vmatprep.mubr.msk.f32.mxu1 %vm7362_vm7, %v17658_v45 }
 0x84a   :  { %13266 = vmatmul.mubr.msk.f32.gmra.mrb[108].mxu1 %vm7362_vm7, %v17665_v40 }
 0x84b   :  { %13268 = vmatprep.mubr.msk.f32.mxu1 %vm7362_vm7, %v17668_v44 }
 0x84e   :  { %13269 = vmatmul.mubr.msk.f32.gmra.mrb[110].mxu1 %vm7362_vm7, %v17675_v33 }
 0x84f   :  { %13271 = vmatprep.mubr.msk.f32.mxu1 %vm7362_vm7, %v17678_v60 }
 0x852   :  { %13272 = vmatmul.mubr.msk.f32.gmra.mrb[112].mxu1 %vm7362_vm7, %v17685_v22 }
 0x853   :  { %13274 = vmatprep.mubr.msk.f32.mxu1 %vm7362_vm7, %v17688_v57 }
 0x856   :  { %13275 = vmatmul.mubr.msk.f32.gmra.mrb[114].mxu1 %vm7362_vm7, %v17695_v8 }
 0x857   :  { %13277 = vmatprep.mubr.msk.f32.mxu1 %vm7362_vm7, %v17698_v2 }
 0x85a   :  { %13278 = vmatmul.mubr.msk.f32.gmra.mrb[116].mxu1 %vm7362_vm7, %v17705_v16 }
 0x85b   :  { %13280 = vmatprep.mubr.msk.f32.mxu1 %vm7362_vm7, %v17708_v17 }
 0x85e   :  { %13281 = vmatmul.mubr.msk.f32.gmra.mrb[118].mxu1 %vm7362_vm7, %v17715_v20 }
 0x85f   :  { %13283 = vmatprep.mubr.msk.f32.mxu1 %vm7362_vm7, %v17718_v11 }
 0x862   :  { %13284 = vmatmul.mubr.msk.f32.gmra.mrb[120].mxu1 %vm7362_vm7, %v17734_v35 }
 0x863   :  { %13286 = vmatprep.mubr.msk.f32.mxu1 %vm7362_vm7, %v17738_v25 }
 0x866   :  { %13287 = vmatmul.mubr.msk.f32.gmra.mrb[122].mxu1 %vm7362_vm7, %v8058_v29 }
 0x867   :  { %13308 = vmatprep.mubr.msk.f32.mxu1 %vm14219_vm8, %v14220_v47 }
 0x8ed   :  { %v13231_v7 = vpop.f32.mrb[84].mxu1 }
 0x8ee   :  { %v8383_v63 = vadd.f32 %v13231_v7, %v17939_v0  ;;  %v8136_v21 = vpop.f32.mrb[85].mxu1 }
 0x8ef   :  { %v8382_v59 = vadd.f32 %v17939_v0, %v8136_v21 }
 0x8f0   :  { %v8423_v9 = vmax.f32 %v8383_v63, 0.0 }
 0x8f1   :  { %v8422_v56 = vmax.f32 %v8382_v59, 0.0  ;;  %v13234_v15 = vpop.f32.mrb[86].mxu1 }
 0x8f2   :  { %v8503_v14 = vrot.slane %v8423_v9, 4  ;;  %v8385_v13 = vadd.f32 %v13234_v15, %v17939_v0  ;;  %v8146_v49 = vpop.f32.mrb[87].mxu1 }
 0x8f3   :  { %v8502_v42 = vrot.slane %v8422_v56, 4  ;;  %v8384_v51 = vadd.f32 %v17939_v0, %v8146_v49 }
 0x8f4   :  { %v8425_v1 = vmax.f32 %v8385_v13, 0.0 }
 0x8f5   :  { %v8504_v54 = vsel %vm6046_vm6, %v8502_v42, %v8503_v14  ;;  %v8424_v45 = vmax.f32 %v8384_v51, 0.0  ;;  %v13237_v40 = vpop.f32.mrb[88].mxu1 }
 0x8f6   :  { %v17946_v44 = vmax.f32 %v8422_v56, %v8504_v54  ;;  %v8507_v33 = vrot.slane %v8425_v1, 4  ;;  %v8387_v60 = vadd.f32 %v13237_v40, %v17939_v0  ;;  %v8156_v22 = vpop.f32.mrb[89].mxu1 }
 0x8f7   :  { %v8505_v57 = vrot.slane %v8424_v45, 4  ;;  %v8386_v8 = vadd.f32 %v17939_v0, %v8156_v22 }
 0x8f8   :  { %v8427_v2 = vmax.f32 %v8387_v60, 0.0 }
 0x8f9   :  { %v8506_v41 = vsel %vm6046_vm6, %v8503_v14, %v8505_v57  ;;  %v8508_v24 = vsel %vm6046_vm6, %v8505_v57, %v8507_v33  ;;  %v8426_v19 = vmax.f32 %v8386_v8, 0.0  ;;  %v13240_v30 = vpop.f32.mrb[90].mxu1 }
 0x8fa   :  { %v17952_v16 = vmax.f32 %v8423_v9, %v8506_v41  ;;  %v17954_v17 = vmax.f32 %v8424_v45, %v8508_v24  ;;  %v8511_v61 = vrot.slane %v8427_v2, 4  ;;  %v8389_v52 = vadd.f32 %v13240_v30, %v17939_v0  ;;  %v8166_v48 = vpop.f32.mrb[91].mxu1 }
 0x8fb   :  { %v8509_v12 = vrot.slane %v8426_v19, 4  ;;  %v8388_v27 = vadd.f32 %v17939_v0, %v8166_v48 }
 0x8fc   :  { %v8429_v18 = vmax.f32 %v8389_v52, 0.0 }
 0x8fd   :  { %v8510_v62 = vsel %vm6046_vm6, %v8507_v33, %v8509_v12  ;;  %v8512_v20 = vsel %vm6046_vm6, %v8509_v12, %v8511_v61  ;;  %v8428_v11 = vmax.f32 %v8388_v27, 0.0  ;;  %v13243_v23 = vpop.f32.mrb[92].mxu1 }
 0x8fe   :  { %v17960_v58 = vmax.f32 %v8425_v1, %v8510_v62  ;;  %v17962_v43 = vmax.f32 %v8426_v19, %v8512_v20  ;;  %v8515_v53 = vrot.slane %v8429_v18, 4  ;;  %v8391_v4 = vadd.f32 %v13243_v23, %v17939_v0  ;;  %v8176_v35 = vpop.f32.mrb[93].mxu1 }
 0x8ff   :  { %v8513_v25 = vrot.slane %v8428_v11, 4  ;;  %v8390_v38 = vadd.f32 %v17939_v0, %v8176_v35 }
 0x900   :  { %v8431_v34 = vmax.f32 %v8391_v4, 0.0 }
 0x901   :  { %v8514_v6 = vsel %vm6046_vm6, %v8511_v61, %v8513_v25  ;;  %v8516_v36 = vsel %vm6046_vm6, %v8513_v25, %v8515_v53  ;;  %v8430_v10 = vmax.f32 %v8390_v38, 0.0  ;;  %v13246_v26 = vpop.f32.mrb[94].mxu1 }
 0x902   :  { %v17968_v50 = vmax.f32 %v8427_v2, %v8514_v6  ;;  %v17970_v39 = vmax.f32 %v8428_v11, %v8516_v36  ;;  %v8519_v32 = vrot.slane %v8431_v34, 4  ;;  %v8393_v29 = vadd.f32 %v13246_v26, %v17939_v0  ;;  %v8186_v55 = vpop.f32.mrb[95].mxu1 }
 0x903   :  { %v8517_v31 = vrot.slane %v8430_v10, 4  ;;  %v8392_v37 = vadd.f32 %v17939_v0, %v8186_v55 }
 0x904   :  { %v8433_v46 = vmax.f32 %v8393_v29, 0.0 }
 0x905   :  { %v8518_v28 = vsel %vm6046_vm6, %v8515_v53, %v8517_v31  ;;  %v8520_v5 = vsel %vm6046_vm6, %v8517_v31, %v8519_v32  ;;  %v8432_v7 = vmax.f32 %v8392_v37, 0.0  ;;  %v13249_v63 = vpop.f32.mrb[96].mxu1 }
 0x906   :  { %v17976_v21 = vmax.f32 %v8429_v18, %v8518_v28  ;;  %v17978_v59 = vmax.f32 %v8430_v10, %v8520_v5  ;;  %v8523_v9 = vrot.slane %v8433_v46, 4  ;;  %v8395_v56 = vadd.f32 %v13249_v63, %v17939_v0  ;;  %v8196_v15 = vpop.f32.mrb[97].mxu1 }
 0x907   :  { %v8521_v14 = vrot.slane %v8432_v7, 4  ;;  %v8394_v13 = vadd.f32 %v17939_v0, %v8196_v15 }
 0x908   :  { %v8435_v49 = vmax.f32 %v8395_v56, 0.0 }
 0x909   :  { %v8522_v42 = vsel %vm6046_vm6, %v8519_v32, %v8521_v14  ;;  %v8524_v51 = vsel %vm6046_vm6, %v8521_v14, %v8523_v9  ;;  %v8434_v1 = vmax.f32 %v8394_v13, 0.0  ;;  %v13252_v54 = vpop.f32.mrb[98].mxu1 }
 0x90a   :  { %v17984_v45 = vmax.f32 %v8431_v34, %v8522_v42  ;;  %v17986_v40 = vmax.f32 %v8432_v7, %v8524_v51  ;;  %v8527_v33 = vrot.slane %v8435_v49, 4  ;;  %v8397_v60 = vadd.f32 %v13252_v54, %v17939_v0  ;;  %v8206_v22 = vpop.f32.mrb[99].mxu1 }
 0x90b   :  { %v8525_v57 = vrot.slane %v8434_v1, 4  ;;  %v8396_v8 = vadd.f32 %v17939_v0, %v8206_v22 }
 0x90c   :  { %v8437_v2 = vmax.f32 %v8397_v60, 0.0 }
 0x90d   :  { %v8526_v41 = vsel %vm6046_vm6, %v8523_v9, %v8525_v57  ;;  %v8528_v24 = vsel %vm6046_vm6, %v8525_v57, %v8527_v33  ;;  %v8436_v19 = vmax.f32 %v8396_v8, 0.0  ;;  %v13255_v30 = vpop.f32.mrb[100].mxu1 }
 0x90e   :  { %v17992_v61 = vmax.f32 %v8433_v46, %v8526_v41  ;;  %v17994_v52 = vmax.f32 %v8434_v1, %v8528_v24  ;;  %v8531_v48 = vrot.slane %v8437_v2, 4  ;;  %v8399_v12 = vadd.f32 %v13255_v30, %v17939_v0  ;;  %v8216_v27 = vpop.f32.mrb[101].mxu1  ;;  %v11193_v24 = vld [vmem:[%s18559_s13 + $0x60] sm:$0xff] }
 0x90f   :  { %v8529_v18 = vrot.slane %v8436_v19, 4  ;;  %v8398_v62 = vadd.f32 %v17939_v0, %v8216_v27 }
 0x910   :  { %v8439_v20 = vmax.f32 %v8399_v12, 0.0 }
 0x911   :  { %v8530_v11 = vsel %vm6046_vm6, %v8527_v33, %v8529_v18  ;;  %v8532_v23 = vsel %vm6046_vm6, %v8529_v18, %v8531_v48  ;;  %v8438_v53 = vmax.f32 %v8398_v62, 0.0  ;;  %v13258_v4 = vpop.f32.mrb[102].mxu1 }
 0x912   :  { %v18000_v35 = vmax.f32 %v8435_v49, %v8530_v11  ;;  %v18002_v25 = vmax.f32 %v8436_v19, %v8532_v23  ;;  %v8535_v38 = vrot.slane %v8439_v20, 4  ;;  %v18005_v34 = vadd.f32 %v13258_v4, %v17939_v0  ;;  %v8226_v6 = vpop.f32.mrb[103].mxu1  ;;  %v11194_v19 = vld [vmem:[%s18559_s13 + $0x68] sm:$0xff] }
 0x913   :  { %v8533_v36 = vrot.slane %v8438_v53, 4  ;;  %v8400_v10 = vadd.f32 %v17939_v0, %v8226_v6  ;;  %v13595_v23 = vpack.c.bf16 %v11194_v19, %v11193_v24 }
 0x914   :  { %v8441_v26 = vmax.f32 %v18005_v34, 0.0  ;;  %v11231_v34 = vld [vmem:[%s18559_s13 + $0x158] sm:$0xff] }
 0x915   :  { %v8534_v32 = vsel %vm6046_vm6, %v8531_v48, %v8533_v36  ;;  %v8536_v29 = vsel %vm6046_vm6, %v8533_v36, %v8535_v38  ;;  %v8440_v55 = vmax.f32 %v8400_v10, 0.0  ;;  %v13261_v31 = vpop.f32.mrb[104].mxu1  ;;  %v11189_v10 = vld [vmem:[%s18559_s13 + $0x48] sm:$0xff] }
 0x916   :  { %v18011_v37 = vmax.f32 %v8437_v2, %v8534_v32  ;;  %v18013_v46 = vmax.f32 %v8438_v53, %v8536_v29  ;;  %v18017_v28 = vrot.slane %v8441_v26, 4  ;;  %v8403_v5 = vadd.f32 %v13261_v31, %v17939_v0  ;;  %v8236_v7 = vpop.f32.mrb[105].mxu1  ;;  %v11188_v53 = vld [vmem:[%s18559_s13 + $0x40] sm:$0xff]  ;;  %v11195_v32 = vld [vmem:[%s18559_s13 + $0x70] sm:$0xff]  ;;  %v11196_v29 = vld [vmem:[%s18559_s13 + $0x78] sm:$0xff] }
 0x917   :  { %v8537_v63 = vrot.slane %v8440_v55, 4  ;;  %v8402_v9 = vadd.f32 %v17939_v0, %v8236_v7 }
 0x918   :  { %v8443_v56 = vmax.f32 %v8403_v5, 0.0 }
 0x919   :  { %v8538_v15 = vsel %vm6046_vm6, %v8535_v38, %v8537_v63  ;;  %v8540_v14 = vsel %vm6046_vm6, %v8537_v63, %v18017_v28  ;;  %v8442_v13 = vmax.f32 %v8402_v9, 0.0  ;;  %v13264_v49 = vpop.f32.mrb[106].mxu1 }
 0x91a   :  { %v18024_v42 = vmax.f32 %v8439_v20, %v8538_v15  ;;  %v18026_v51 = vmax.f32 %v8440_v55, %v8540_v14  ;;  %v8542_v1 = vrot.slane %v8443_v56, 4  ;;  %v8405_v54 = vadd.f32 %v13264_v49, %v17939_v0  ;;  %v8246_v33 = vpop.f32.mrb[107].mxu1 }
 0x91b   :  { %v8541_v60 = vrot.slane %v8442_v13, 4  ;;  %v8404_v22 = vadd.f32 %v17939_v0, %v8246_v33 }
 0x91c   :  { %v8445_v57 = vmax.f32 %v8405_v54, 0.0  ;;  %v13598_v54 = vpack.c.bf16 %v11196_v29, %v11195_v32  ;;  %v11199_v29 = vld [vmem:[%s18559_s13 + $0x88] sm:$0xff] }
 0x91d   :  { %v8543_v8 = vsel %vm6046_vm6, %v8541_v60, %v8542_v1  ;;  %v8444_v2 = vmax.f32 %v8404_v22, 0.0  ;;  %v13267_v41 = vpop.f32.mrb[108].mxu1 }
 0x91e   :  { %v8642_v30 = vmax.f32 %v8442_v13, %v8543_v8  ;;  %v8546_v48 = vrot.slane %v8445_v57, 4  ;;  %v18038_v12 = vadd.f32 %v13267_v41, %v17939_v0  ;;  %v8256_v27 = vpop.f32.mrb[109].mxu1  ;;  %v11190_v8 = vld [vmem:[%s18559_s13 + $0x50] sm:$0xff] }
 0x91f   :  { %v8544_v18 = vrot.slane %v8444_v2, 4  ;;  %v8406_v62 = vadd.f32 %v17939_v0, %v8256_v27  ;;  %v11204_v27 = vld [vmem:[%s18559_s13 + $0xa8] sm:$0xff] }
 0x920   :  { %v8663_v20 = vrot.slane %v8642_v30, 7  ;;  %v8447_v11 = vmax.f32 %v18038_v12, 0.0  ;;  %v11203_v12 = vld [vmem:[%s18559_s13 + $0xa0] sm:$0xff] }
 0x921   :  { %v8545_v4 = vsel %vm6046_vm6, %v8542_v1, %v8544_v18  ;;  %v8547_v38 = vsel %vm6046_vm6, %v8544_v18, %v8546_v48  ;;  %v8446_v6 = vmax.f32 %v8406_v62, 0.0  ;;  %v13270_v36 = vpop.f32.mrb[110].mxu1  ;;  %v13589_v1 = vpack.c.bf16 %v11189_v10, %v11188_v53 }
 0x922   :  { %v8665_v55 = vsel %vm137_vm1, %v17946_v44, %v8663_v20  ;;  %v8643_v31 = vmax.f32 %v8443_v56, %v8545_v4  ;;  %v8644_v5 = vmax.f32 %v8444_v2, %v8547_v38  ;;  %v8550_v7 = vrot.slane %v8447_v11, 4  ;;  %v8266_v63 = vpop.f32.mrb[111].mxu1  ;;  %v11191_v2 = vld [vmem:[%s18559_s13 + $0x58] sm:$0xff] }
 0x923   :  { %v8548_v9 = vrot.slane %v8446_v6, 4  ;;  %v18059_v15 = vadd.f32 %v13270_v36, %v17939_v0  ;;  %v8408_v14 = vadd.f32 %v17939_v0, %v8266_v63  ;;  %13309 = vmatmul.mubr.msk.f32.vlgmr.msra.gmra.mrb[124].mxu1 %vm7362_vm7, %v8665_v55  ;;  %v13592_v4 = vpack.c.bf16 %v11191_v2, %v11190_v8 }
 0x924   :  { %v8671_v13 = vrot.slane %v8643_v31, 7  ;;  %v8826_v49 = vrot.slane %v8644_v5, 7  ;;  %13596 = vmatpush3.bf16.msra.mxu1 %v13595_v23  ;;  %13330 = vmatprep.mubr.msk.f32.mxu1 %vm14219_vm8, %v14220_v47  ;;  %v13607_v32 = vpack.c.bf16 %v11204_v27, %v11203_v12 }
 0x925   :  { %v8549_v44 = vsel %vm6046_vm6, %v8546_v48, %v8548_v9  ;;  %v8551_v56 = vsel %vm6046_vm6, %v8548_v9, %v8550_v7  ;;  %v8449_v33 = vmax.f32 %v18059_v15, 0.0  ;;  %v8448_v60 = vmax.f32 %v8408_v14, 0.0  ;;  %v13273_v22 = vpop.f32.mrb[112].mxu1  ;;  %13597 = vmatprep.subr.bf16.mxu1 %v14218_v3  ;;  %v11205_v9 = vld [vmem:[%s18559_s13 + $0xb0] sm:$0xff]  ;;  %v11206_v15 = vld [vmem:[%s18559_s13 + $0xb8] sm:$0xff] }
 0x926   :  { %v8645_v41 = vmax.f32 %v8445_v57, %v8549_v44  ;;  %v8646_v24 = vmax.f32 %v8446_v6, %v8551_v56  ;;  %v18076_v19 = vadd.f32 %v13273_v22, %v17939_v0  ;;  %v8276_v30 = vpop.f32.mrb[113].mxu1  ;;  %v8673_v48 = vsel %vm137_vm1, %v17952_v16, %v8671_v13 }
 0x927   :  { %v8554_v18 = vrot.slane %v8449_v33, 4  ;;  %v8552_v62 = vrot.slane %v8448_v60, 4  ;;  %v8410_v57 = vadd.f32 %v17939_v0, %v8276_v30  ;;  %13298 = vmatmul.mubr.msk.f32.vlgmr.msra.gmra.mrb[120].mxu0 %vm7362_vm7, %v8673_v48  ;;  %v8828_v20 = vsel %vm137_vm1, %v17954_v17, %v8826_v49  ;;  %v11198_v17 = vld [vmem:[%s18559_s13 + $0x80] sm:$0xff] }
 0x928   :  { %v8909_v23 = vrot.slane %v8645_v41, 7  ;;  %v8992_v53 = vrot.slane %v8646_v24, 7  ;;  %v8451_v16 = vmax.f32 %v18076_v19, 0.0  ;;  %13590 = vmatpush3.bf16.msra.mxu0 %v13589_v1  ;;  %13599 = vmatpush3.bf16.msra.mxu1 %v13598_v54  ;;  %v13601_v56 = vpack.c.bf16 %v11199_v29, %v11198_v17  ;;  %v11201_v41 = vld [vmem:[%s18559_s13 + $0x98] sm:$0xff]  ;;  %v11208_v17 = vld [vmem:[%s18559_s13 + $0xc0] sm:$0xff]  ;;  %v11209_v29 = vld [vmem:[%s18559_s13 + $0xc8] sm:$0xff] }
 0x929   :  { %v8553_v38 = vsel %vm6046_vm6, %v8550_v7, %v8552_v62  ;;  %v8555_v6 = vsel %vm6046_vm6, %v8552_v62, %v8554_v18  ;;  %v8450_v36 = vmax.f32 %v8410_v57, 0.0  ;;  %v13276_v10 = vpop.f32.mrb[114].mxu1  ;;  %13591 = vmatprep.subr.bf16.mxu0 %v14218_v3  ;;  %13606 = vmatprep.subr.bf16.mxu1 %v14218_v3 }
 0x92a   :  { %v8647_v55 = vmax.f32 %v8447_v11, %v8553_v38  ;;  %v8648_v31 = vmax.f32 %v8448_v60, %v8555_v6  ;;  %v8558_v5 = vrot.slane %v8451_v16, 4  ;;  %v18104_v7 = vadd.f32 %v13276_v10, %v17939_v0  ;;  %v8286_v63 = vpop.f32.mrb[115].mxu1  ;;  %13319 = vmatprep.mubr.msk.f32.mxu0 %vm14219_vm8, %v14220_v47 }
 0x92b   :  { %v8556_v11 = vrot.slane %v8450_v36, 4  ;;  %v8412_v14 = vadd.f32 %v17939_v0, %v8286_v63  ;;  %v8911_v13 = vsel %vm137_vm1, %v17960_v58, %v8909_v23  ;;  %v18119_v49 = vsel %vm137_vm1, %v17962_v43, %v8992_v53  ;;  %v11200_v43 = vld [vmem:[%s18559_s13 + $0x90] sm:$0xff] }
 0x92c   :  { %v9075_v1 = vrot.slane %v8647_v55, 7  ;;  %v9158_v54 = vrot.slane %v8648_v31, 7  ;;  %v8453_v44 = vmax.f32 %v18104_v7, 0.0  ;;  %13593 = vmatpush3.bf16.msra.mxu0 %v13592_v4  ;;  %13331 = vmatmul.mubr.msk.f32.vlgmr.msra.gmra.mrb[126].mxu1 %vm7362_vm7, %v8911_v13  ;;  %v13610_v58 = vpack.c.bf16 %v11206_v15, %v11205_v9  ;;  %v11215_v15 = vld [vmem:[%s18559_s13 + $0xf0] sm:$0xff]  ;;  %v11224_v7 = vld [vmem:[%s18559_s13 + $0x128] sm:$0xff] }
 0x92d   :  { %v8557_v60 = vsel %vm6046_vm6, %v8554_v18, %v8556_v11  ;;  %v8559_v22 = vsel %vm6046_vm6, %v8556_v11, %v8558_v5  ;;  %v8452_v8 = vmax.f32 %v8412_v14, 0.0  ;;  %13608 = vmatpush3.bf16.msra.mxu1 %v13607_v32  ;;  %v13279_v2 = vpop.f32.mrb[116].mxu1  ;;  %13600 = vmatprep.subr.bf16.mxu0 %v14218_v3  ;;  %v11213_v18 = vld [vmem:[%s18559_s13 + $0xe0] sm:$0xff]  ;;  %v11216_v11 = vld [vmem:[%s18559_s13 + $0xf8] sm:$0xff] }
 0x92e   :  { %v8649_v24 = vmax.f32 %v8449_v33, %v8557_v60  ;;  %v8650_v30 = vmax.f32 %v8450_v36, %v8559_v22  ;;  %v8562_v48 = vrot.slane %v8453_v44, 4  ;;  %v18135_v12 = vadd.f32 %v13279_v2, %v17939_v0  ;;  %v8296_v27 = vpop.f32.mrb[117].mxu1  ;;  %13609 = vmatprep.subr.bf16.mxu1 %v14218_v3  ;;  %13352 = vmatprep.mubr.msk.f32.mxu1 %vm14219_vm8, %v14220_v47  ;;  %v11214_v33 = vld [vmem:[%s18559_s13 + $0xe8] sm:$0xff] }
 0x92f   :  { %v8560_v62 = vrot.slane %v8452_v8, 4  ;;  %v8414_v57 = vadd.f32 %v17939_v0, %v8296_v27  ;;  %13320 = vmatmul.mubr.msk.f32.vlgmr.msra.gmra.mrb[122].mxu0 %vm7362_vm7, %v8828_v20  ;;  %v9077_v23 = vsel %vm137_vm1, %v17968_v50, %v9075_v1  ;;  %v18152_v53 = vsel %vm137_vm1, %v17970_v39, %v9158_v54 }
 0x930   :  { %v9241_v4 = vrot.slane %v8649_v24, 7  ;;  %v9324_v38 = vrot.slane %v8650_v30, 7  ;;  %v8455_v6 = vmax.f32 %v18135_v12, 0.0  ;;  %13602 = vmatpush3.bf16.msra.mxu0 %v13601_v56  ;;  %v13604_v36 = vpack.c.bf16 %v11201_v41, %v11200_v43  ;;  %13341 = vmatprep.mubr.msk.f32.mxu0 %vm14219_vm8, %v14220_v47  ;;  %v11211_v43 = vld [vmem:[%s18559_s13 + $0xd8] sm:$0xff] }
 0x931   :  { %v8561_v10 = vsel %vm6046_vm6, %v8558_v5, %v8560_v62  ;;  %v8563_v20 = vsel %vm6046_vm6, %v8560_v62, %v8562_v48  ;;  %v8454_v32 = vmax.f32 %v8414_v57, 0.0  ;;  %13611 = vmatpush3.bf16.msra.mxu1 %v13610_v58  ;;  %v13282_v50 = vpop.f32.mrb[118].mxu1  ;;  %13603 = vmatprep.subr.bf16.mxu0 %v14218_v3  ;;  %v13619_v39 = vpack.c.bf16 %v11214_v33, %v11213_v18  ;;  %v11223_v18 = vld [vmem:[%s18559_s13 + $0x120] sm:$0xff] }
 0x932   :  { %v8651_v55 = vmax.f32 %v8451_v16, %v8561_v10  ;;  %v8652_v31 = vmax.f32 %v8452_v8, %v8563_v20  ;;  %v8566_v5 = vrot.slane %v8455_v6, 4  ;;  %v18171_v63 = vadd.f32 %v13282_v50, %v17939_v0  ;;  %v8306_v9 = vpop.f32.mrb[119].mxu1  ;;  %13618 = vmatprep.subr.bf16.mxu1 %v14218_v3  ;;  %v11219_v50 = vld [vmem:[%s18559_s13 + $0x108] sm:$0xff] }
 0x933   :  { %v8564_v19 = vrot.slane %v8454_v32, 4  ;;  %v8416_v16 = vadd.f32 %v17939_v0, %v8306_v9  ;;  %v9243_v14 = vsel %vm137_vm1, %v17976_v21, %v9241_v4  ;;  %v18185_v13 = vsel %vm137_vm1, %v17978_v59, %v9324_v38  ;;  %v11210_v59 = vld [vmem:[%s18559_s13 + $0xd0] sm:$0xff]  ;;  %v11226_v9 = vld [vmem:[%s18559_s13 + $0x138] sm:$0xff] }
 0x934   :  { %v9407_v1 = vrot.slane %v8651_v55, 7  ;;  %v9490_v54 = vrot.slane %v8652_v31, 7  ;;  %v8457_v56 = vmax.f32 %v18171_v63, 0.0  ;;  %13353 = vmatmul.mubr.msk.f32.vlgmr.msra.gmra.mrb[128].mxu1 %vm7362_vm7, %v9077_v23  ;;  %13605 = vmatpush3.bf16.msra.mxu0 %v13604_v36  ;;  %v13613_v60 = vpack.c.bf16 %v11209_v29, %v11208_v17 }
 0x935   :  { %v8565_v22 = vsel %vm6046_vm6, %v8562_v48, %v8564_v19  ;;  %v8567_v8 = vsel %vm6046_vm6, %v8564_v19, %v8566_v5  ;;  %v8456_v2 = vmax.f32 %v8416_v16, 0.0  ;;  %13620 = vmatpush3.bf16.msra.mxu1 %v13619_v39  ;;  %v13285_v58 = vpop.f32.mrb[120].mxu1  ;;  %13612 = vmatprep.subr.bf16.mxu0 %v14218_v3  ;;  %v13622_v21 = vpack.c.bf16 %v11216_v11, %v11215_v15 }
 0x936   :  { %v8653_v41 = vmax.f32 %v8453_v44, %v8565_v22  ;;  %v8654_v24 = vmax.f32 %v8454_v32, %v8567_v8  ;;  %v8570_v30 = vrot.slane %v8457_v56, 4  ;;  %v18203_v48 = vadd.f32 %v13285_v58, %v17939_v0  ;;  %v8316_v27 = vpop.f32.mrb[121].mxu1  ;;  %13621 = vmatprep.subr.bf16.mxu1 %v14218_v3  ;;  %13374 = vmatprep.mubr.msk.f32.mxu1 %vm14219_vm8, %v14220_v47  ;;  %v11218_v32 = vld [vmem:[%s18559_s13 + $0x100] sm:$0xff] }
 0x937   :  { %v8568_v44 = vrot.slane %v8456_v2, 4  ;;  %v8418_v33 = vadd.f32 %v17939_v0, %v8316_v27  ;;  %13342 = vmatmul.mubr.msk.f32.vlgmr.msra.gmra.mrb[124].mxu0 %vm7362_vm7, %v18119_v49  ;;  %v18219_v62 = vsel %vm137_vm1, %v17984_v45, %v9407_v1  ;;  %v18223_v57 = vsel %vm137_vm1, %v17986_v40, %v9490_v54 }
 0x938   :  { %v9573_v23 = vrot.slane %v8653_v41, 7  ;;  %v9656_v4 = vrot.slane %v8654_v24, 7  ;;  %v8459_v38 = vmax.f32 %v18203_v48, 0.0  ;;  %13614 = vmatpush3.bf16.msra.mxu0 %v13613_v60  ;;  %v13616_v36 = vpack.c.bf16 %v11211_v43, %v11210_v59  ;;  %13363 = vmatprep.mubr.msk.f32.mxu0 %vm14219_vm8, %v14220_v47 }
 0x939   :  { %v8569_v10 = vsel %vm6046_vm6, %v8566_v5, %v8568_v44  ;;  %v8571_v49 = vsel %vm6046_vm6, %v8568_v44, %v8570_v30  ;;  %v8458_v20 = vmax.f32 %v8418_v33, 0.0  ;;  %13623 = vmatpush3.bf16.msra.mxu1 %v13622_v21  ;;  %v13288_v45 = vpop.f32.mrb[122].mxu1  ;;  %13615 = vmatprep.subr.bf16.mxu0 %v14218_v3  ;;  %v13631_v40 = vpack.c.bf16 %v11224_v7, %v11223_v18  ;;  %v11225_v5 = vld [vmem:[%s18559_s13 + $0x130] sm:$0xff] }
 0x93a   :  { %v8655_v39 = vmax.f32 %v8455_v6, %v8569_v10  ;;  %v8656_v17 = vmax.f32 %v8456_v2, %v8571_v49  ;;  %v8574_v29 = vrot.slane %v8459_v38, 4  ;;  %v8421_v55 = vadd.f32 %v13288_v45, %v17939_v0  ;;  %v8326_v31 = vpop.f32.mrb[123].mxu1  ;;  %13630 = vmatprep.subr.bf16.mxu1 %v14218_v3  ;;  %v11220_v6 = vld [vmem:[%s18559_s13 + $0x110] sm:$0xff] }
 0x93b   :  { %v8572_v15 = vrot.slane %v8458_v20, 4  ;;  %v8420_v12 = vadd.f32 %v17939_v0, %v8326_v31  ;;  %v18255_v11 = vsel %vm137_vm1, %v17992_v61, %v9573_v23  ;;  %v18259_v19 = vsel %vm137_vm1, %v17994_v52, %v9656_v4  ;;  %v11221_v0 = vld [vmem:[%s18559_s13 + $0x118] sm:$0xff]  ;;  %v11233_v61 = vld [vmem:[%s18559_s13 + $0x160] sm:$0xff]  ;;  %v11234_v52 = vld [vmem:[%s18559_s13 + $0x168] sm:$0xff] }
 0x93c   :  { %v9739_v16 = vrot.slane %v8655_v39, 7  ;;  %v9822_v1 = vrot.slane %v8656_v17, 7  ;;  %v8461_v54 = vmax.f32 %v8421_v55, 0.0  ;;  %13375 = vmatmul.mubr.msk.f32.vlgmr.msra.gmra.mrb[130].mxu1 %vm7362_vm7, %v9243_v14  ;;  %13617 = vmatpush3.bf16.msra.mxu0 %v13616_v36  ;;  %v13625_v60 = vpack.c.bf16 %v11219_v50, %v11218_v32  ;;  %v11235_v4 = vld [vmem:[%s18559_s13 + $0x170] sm:$0xff]  ;;  %v11236_v36 = vld [vmem:[%s18559_s13 + $0x178] sm:$0xff]  ;;  %v11244_v32 = vld [vmem:[%s18559_s13 + $0x1a8] sm:$0xff] }
 0x93d   :  { %v8573_v22 = vsel %vm6046_vm6, %v8570_v30, %v8572_v15  ;;  %v8575_v8 = vsel %vm6046_vm6, %v8572_v15, %v8574_v29  ;;  %v8460_v2 = vmax.f32 %v8420_v12, 0.0  ;;  %13632 = vmatpush3.bf16.msra.mxu1 %v13631_v40  ;;  %13624 = vmatprep.subr.bf16.mxu0 %v14218_v3  ;;  %v13634_v14 = vpack.c.bf16 %v11226_v9, %v11225_v5  ;;  %v11246_v55 = vld [vmem:[%s18559_s13 + $0x1b8] sm:$0xff]  ;;  %v11240_v9 = vld [vmem:[%s18559_s13 + $0x190] sm:$0xff]  ;;  %v11253_v12 = vld [vmem:[%s18559_s13 + $0x1e0] sm:$0xff] }
 0x93e   :  { %v8657_v58 = vmax.f32 %v8457_v56, %v8573_v22  ;;  %v8658_v21 = vmax.f32 %v8458_v20, %v8575_v8  ;;  %v8578_v59 = vrot.slane %v8461_v54, 4  ;;  %13633 = vmatprep.subr.bf16.mxu1 %v14218_v3  ;;  %13396 = vmatprep.mubr.msk.f32.mxu1 %vm14219_vm8, %v14220_v47  ;;  %v18281_v43 = vsel %vm137_vm1, %v18000_v35, %v9739_v16  ;;  %v11241_v15 = vld [vmem:[%s18559_s13 + $0x198] sm:$0xff]  ;;  %v11263_v8 = vld [vmem:[%s18559_s13 + $0x220] sm:$0xff] }
 0x93f   :  { %v8576_v41 = vrot.slane %v8460_v2, 4  ;;  %13364 = vmatmul.mubr.msk.f32.vlgmr.msra.gmra.mrb[126].mxu0 %vm7362_vm7, %v18152_v53  ;;  %v13628_v24 = vpack.c.bf16 %v11221_v0, %v11220_v6  ;;  %v13643_v30 = vpack.c.bf16 %v11234_v52, %v11233_v61  ;;  %v18287_v63 = vsel %vm137_vm1, %v18002_v25, %v9822_v1  ;;  %v11228_v25 = vld [vmem:[%s18559_s13 + $0x140] sm:$0xff]  ;;  %v11254_v6 = vld [vmem:[%s18559_s13 + $0x1e8] sm:$0xff]  ;;  %v11250_v52 = vld [vmem:[%s18559_s13 + $0x1d0] sm:$0xff] }
 0x940   :  { %v8620_v56 = vsel %vm6046_vm6, %v18017_v28, 0.0  ;;  %v9905_v27 = vrot.slane %v8657_v58, 7  ;;  %v9988_v18 = vrot.slane %v8658_v21, 7  ;;  %v8621_v7 = vsel %vm6046_vm6, %v8578_v59, 0.0  ;;  %13626 = vmatpush3.bf16.msra.mxu0 %v13625_v60  ;;  %13385 = vmatprep.mubr.msk.f32.mxu0 %vm14219_vm8, %v14220_v47  ;;  %v11229_v28 = vld [vmem:[%s18559_s13 + $0x148] sm:$0xff]  ;;  %v11248_v1 = vld [vmem:[%s18559_s13 + $0x1c0] sm:$0xff] }
 0x941   :  { %v8661_v35 = vmax.f32 %v8461_v54, %v8621_v7  ;;  %v8577_v53 = vsel %vm6046_vm6, %v8574_v29, %v8576_v41  ;;  %v8579_v44 = vsel %vm6046_vm6, %v8576_v41, %v8578_v59  ;;  %13635 = vmatpush3.bf16.msra.mxu1 %v13634_v14  ;;  %13627 = vmatprep.subr.bf16.mxu0 %v14218_v3  ;;  %v11249_v54 = vld [vmem:[%s18559_s13 + $0x1c8] sm:$0xff]  ;;  %v11256_v60 = vld [vmem:[%s18559_s13 + $0x1f8] sm:$0xff]  ;;  %v11258_v21 = vld [vmem:[%s18559_s13 + $0x200] sm:$0xff] }
 0x942   :  { %v8659_v33 = vmax.f32 %v8459_v38, %v8577_v53  ;;  %v8660_v23 = vmax.f32 %v8460_v2, %v8579_v44  ;;  %13642 = vmatprep.subr.bf16.mxu1 %v14218_v3  ;;  %v18314_v10 = vsel %vm137_vm1, %v18011_v37, %v9905_v27  ;;  %v18318_v49 = vsel %vm137_vm1, %v18013_v46, %v9988_v18  ;;  %v11230_v46 = vld [vmem:[%s18559_s13 + $0x150] sm:$0xff]  ;;  %v11251_v22 = vld [vmem:[%s18559_s13 + $0x1d8] sm:$0xff]  ;;  %v11264_v2 = vld [vmem:[%s18559_s13 + $0x228] sm:$0xff] }
 0x943   :  { %v8641_v48 = vmax.f32 %v8441_v26, %v8620_v56  ;;  %v10237_v38 = vrot.slane %v8661_v35, 7  ;;  %v13637_v40 = vpack.c.bf16 %v11229_v28, %v11228_v25  ;;  %v13646_v37 = vpack.c.bf16 %v11236_v36, %v11235_v4  ;;  %v11259_v59 = vld [vmem:[%s18559_s13 + $0x208] sm:$0xff]  ;;  %v11261_v56 = vld [vmem:[%s18559_s13 + $0x218] sm:$0xff]  ;;  %v11273_v27 = vld [vmem:[%s18559_s13 + $0x260] sm:$0xff] }
 0x944   :  { %v10071_v20 = vrot.slane %v8659_v33, 7  ;;  %v10154_v45 = vrot.slane %v8660_v23, 7  ;;  %13397 = vmatmul.mubr.msk.f32.vlgmr.msra.gmra.mrb[132].mxu1 %vm7362_vm7, %v18219_v62  ;;  %13629 = vmatpush3.bf16.msra.mxu0 %v13628_v24  ;;  %v11243_v62 = vld [vmem:[%s18559_s13 + $0x1a0] sm:$0xff]  ;;  %v13640_v17 = vpack.c.bf16 %v11231_v34, %v11230_v46  ;;  %v13667_v16 = vpack.c.bf16 %v11254_v6, %v11253_v12  ;;  %v11274_v18 = vld [vmem:[%s18559_s13 + $0x268] sm:$0xff]  ;;  %v11276_v25 = vld [vmem:[%s18559_s13 + $0x278] sm:$0xff] }
 0x945   :  { %13644 = vmatpush3.bf16.msra.mxu1 %v13643_v30  ;;  %13636 = vmatprep.subr.bf16.mxu0 %v14218_v3  ;;  %v18332_v26 = vsel %vm137_vm1, %v8641_v48, %v10237_v38  ;;  %v13655_v29 = vpack.c.bf16 %v11244_v32, %v11243_v62  ;;  %v13661_v0 = vpack.c.bf16 %v11249_v54, %v11248_v1  ;;  %v11260_v30 = vld [vmem:[%s18559_s13 + $0x210] sm:$0xff]  ;;  %v11268_v53 = vld [vmem:[%s18559_s13 + $0x240] sm:$0xff]  ;;  %v11269_v44 = vld [vmem:[%s18559_s13 + $0x248] sm:$0xff] }
 0x946   :  { %13645 = vmatprep.subr.bf16.mxu1 %v14218_v3  ;;  %13418 = vmatprep.mubr.msk.f32.mxu1 %vm14219_vm8, %v14220_v47  ;;  %v18345_v50 = vsel %vm137_vm1, %v18024_v42, %v10071_v20  ;;  %v18349_v39 = vsel %vm137_vm1, %v18026_v51, %v10154_v45  ;;  %v11238_v42 = vld [vmem:[%s18559_s13 + $0x180] sm:$0xff]  ;;  %v11239_v51 = vld [vmem:[%s18559_s13 + $0x188] sm:$0xff]  ;;  %v13664_v14 = vpack.c.bf16 %v11251_v22, %v11250_v52  ;;  %v11270_v23 = vld [vmem:[%s18559_s13 + $0x250] sm:$0xff] }
 0x947   :  { %13386 = vmatmul.mubr.msk.f32.vlgmr.msra.gmra.mrb[128].mxu0 %vm7362_vm7, %v18185_v13  ;;  %v11245_v13 = vld [vmem:[%s18559_s13 + $0x1b0] sm:$0xff]  ;;  %v13649_v31 = vpack.c.bf16 %v11239_v51, %v11238_v42  ;;  %v13679_v58 = vpack.c.bf16 %v11264_v2, %v11263_v8  ;;  %v13673_v41 = vpack.c.bf16 %v11259_v59, %v11258_v21  ;;  %v13676_v7 = vpack.c.bf16 %v11261_v56, %v11260_v30  ;;  %v11271_v4 = vld [vmem:[%s18559_s13 + $0x258] sm:$0xff]  ;;  %v10332_v45 = vld [vmem:[%s18561_s15 + $0x20] sm:$0xff] }
 0x948   :  { %13638 = vmatpush3.bf16.msra.mxu0 %v13637_v40  ;;  %13407 = vmatprep.mubr.msk.f32.mxu0 %vm14219_vm8, %v14220_v47  ;;  %v13658_v5 = vpack.c.bf16 %v11246_v55, %v11245_v13  ;;  %v13691_v35 = vpack.c.bf16 %v11274_v18, %v11273_v27  ;;  %v13685_v28 = vpack.c.bf16 %v11269_v44, %v11268_v53  ;;  %v10330_v38 = vld [vmem:[%s18561_s15 + $0x10] sm:$0xff]  ;;  %v10333_v40 = vld [vmem:[%s18561_s15 + $0x28] sm:$0xff]  ;;  %v10335_v34 = vld [vmem:[%s18561_s15 + $0x38] sm:$0xff] }
 0x949   :  { %13647 = vmatpush3.bf16.msra.mxu1 %v13646_v37  ;;  %13639 = vmatprep.subr.bf16.mxu0 %v14218_v3  ;;  %v13688_v36 = vpack.c.bf16 %v11271_v4, %v11270_v23  ;;  %v10334_v37 = vld [vmem:[%s18561_s15 + $0x30] sm:$0xff]  ;;  %v13703_v46 = vpack.c.bf16 %v10333_v40, %v10332_v45  ;;  %v11278_v45 = vld [vmem:[%s18560_s14] ss:$0 sm:$0xff] }
 0x94a   :  { %13654 = vmatprep.subr.bf16.mxu1 %v14218_v3 }
 0x94c   :  { %13419 = vmatmul.mubr.msk.f32.vlgmr.msra.gmra.mrb[134].mxu1 %vm7362_vm7, %v18255_v11  ;;  %13641 = vmatpush3.bf16.msra.mxu0 %v13640_v17  ;;  %v13652_v11 = vpack.c.bf16 %v11241_v15, %v11240_v9 }
 0x94d   :  { %13656 = vmatpush3.bf16.msra.mxu1 %v13655_v29  ;;  %13648 = vmatprep.subr.bf16.mxu0 %v14218_v3 }
 0x94e   :  { %13657 = vmatprep.subr.bf16.mxu1 %v14218_v3  ;;  %13440 = vmatprep.mubr.msk.f32.mxu1 %vm14219_vm8, %v14220_v47 }
 0x94f   :  { %13408 = vmatmul.mubr.msk.f32.vlgmr.msra.gmra.mrb[130].mxu0 %vm7362_vm7, %v18223_v57  ;;  %v11255_v57 = vld [vmem:[%s18559_s13 + $0x1f0] sm:$0xff] }
 0x950   :  { %13650 = vmatpush3.bf16.msra.mxu0 %v13649_v31  ;;  %13429 = vmatprep.mubr.msk.f32.mxu0 %vm14219_vm8, %v14220_v47  ;;  %v13670_v61 = vpack.c.bf16 %v11256_v60, %v11255_v57 }
 0x951   :  { %13659 = vmatpush3.bf16.msra.mxu1 %v13658_v5  ;;  %13651 = vmatprep.subr.bf16.mxu0 %v14218_v3 }
 0x952   :  { %13666 = vmatprep.subr.bf16.mxu1 %v14218_v3 }
 0x954   :  { %13441 = vmatmul.mubr.msk.f32.vlgmr.msra.gmra.mrb[136].mxu1 %vm7362_vm7, %v18281_v43  ;;  %13653 = vmatpush3.bf16.msra.mxu0 %v13652_v11  ;;  %v11266_v43 = vld [vmem:[%s18559_s13 + $0x238] sm:$0xff] }
 0x955   :  { %13668 = vmatpush3.bf16.msra.mxu1 %v13667_v16  ;;  %13660 = vmatprep.subr.bf16.mxu0 %v14218_v3 }
 0x956   :  { %13669 = vmatprep.subr.bf16.mxu1 %v14218_v3  ;;  %13462 = vmatprep.mubr.msk.f32.mxu1 %vm14219_vm8, %v14220_v47 }
 0x957   :  { %13430 = vmatmul.mubr.msk.f32.vlgmr.msra.gmra.mrb[132].mxu0 %vm7362_vm7, %v18259_v19  ;;  %v11265_v19 = vld [vmem:[%s18559_s13 + $0x230] sm:$0xff] }
 0x958   :  { %13662 = vmatpush3.bf16.msra.mxu0 %v13661_v0  ;;  %13451 = vmatprep.mubr.msk.f32.mxu0 %vm14219_vm8, %v14220_v47  ;;  %v13682_v24 = vpack.c.bf16 %v11266_v43, %v11265_v19 }
 0x959   :  { %13671 = vmatpush3.bf16.msra.mxu1 %v13670_v61  ;;  %13663 = vmatprep.subr.bf16.mxu0 %v14218_v3 }
 0x95a   :  { %13678 = vmatprep.subr.bf16.mxu1 %v14218_v3 }
 0x95c   :  { %13463 = vmatmul.mubr.msk.f32.vlgmr.msra.gmra.mrb[138].mxu1 %vm7362_vm7, %v18314_v10  ;;  %13665 = vmatpush3.bf16.msra.mxu0 %v13664_v14  ;;  %v10328_v10 = vld [vmem:[%s18561_s15] sm:$0xff] }
 0x95d   :  { %13680 = vmatpush3.bf16.msra.mxu1 %v13679_v58  ;;  %13672 = vmatprep.subr.bf16.mxu0 %v14218_v3 }
 0x95e   :  { %13681 = vmatprep.subr.bf16.mxu1 %v14218_v3  ;;  %13484 = vmatprep.mubr.msk.f32.mxu1 %vm14219_vm8, %v14220_v47 }
 0x95f   :  { %13452 = vmatmul.mubr.msk.f32.vlgmr.msra.gmra.mrb[134].mxu0 %vm7362_vm7, %v18287_v63  ;;  %v11275_v63 = vld [vmem:[%s18559_s13 + $0x270] sm:$0xff] }
 0x960   :  { %13674 = vmatpush3.bf16.msra.mxu0 %v13673_v41  ;;  %13473 = vmatprep.mubr.msk.f32.mxu0 %vm14219_vm8, %v14220_v47  ;;  %v13694_v33 = vpack.c.bf16 %v11276_v25, %v11275_v63 }
 0x961   :  { %13683 = vmatpush3.bf16.msra.mxu1 %v13682_v24  ;;  %13675 = vmatprep.subr.bf16.mxu0 %v14218_v3 }
 0x962   :  { %13690 = vmatprep.subr.bf16.mxu1 %v14218_v3 }
 0x964   :  { %13485 = vmatmul.mubr.msk.f32.vlgmr.msra.gmra.mrb[140].mxu1 %vm7362_vm7, %v18345_v50  ;;  %13677 = vmatpush3.bf16.msra.mxu0 %v13676_v7 }
 0x965   :  { %13692 = vmatpush3.bf16.msra.mxu1 %v13691_v35  ;;  %13684 = vmatprep.subr.bf16.mxu0 %v14218_v3 }
 0x966   :  { %13693 = vmatprep.subr.bf16.mxu1 %v14218_v3  ;;  %13506 = vmatprep.mubr.msk.f32.mxu1 %vm14219_vm8, %v14220_v47 }
 0x967   :  { %13474 = vmatmul.mubr.msk.f32.vlgmr.msra.gmra.mrb[136].mxu0 %vm7362_vm7, %v18318_v49  ;;  %v10329_v49 = vld [vmem:[%s18561_s15 + $0x8] sm:$0xff] }
 0x968   :  { %13686 = vmatpush3.bf16.msra.mxu0 %v13685_v28  ;;  %13495 = vmatprep.mubr.msk.f32.mxu0 %vm14219_vm8, %v14220_v47  ;;  %v13697_v48 = vpack.c.bf16 %v10329_v49, %v10328_v10 }
 0x969   :  { %13695 = vmatpush3.bf16.msra.mxu1 %v13694_v33  ;;  %13687 = vmatprep.subr.bf16.mxu0 %v14218_v3 }
 0x96c   :  { %13507 = vmatmul.mubr.msk.f32.vlgmr.msra.gmra.mrb[142].mxu1 %vm7362_vm7, %v18332_v26  ;;  %13689 = vmatpush3.bf16.msra.mxu0 %v13688_v36  ;;  %v13706_v26 = vpack.c.bf16 %v10335_v34, %v10334_v37  ;;  %v11279_v34 = vld [vmem:[%s18562_s16] ss:$0 sm:$0xff] }
 0x96d   :  { %13696 = vmatprep.subr.bf16.mxu0 %v14218_v3 }
 0x96f   :  { %13496 = vmatmul.mubr.msk.f32.vlgmr.msra.gmra.mrb[138].mxu0 %vm7362_vm7, %v18349_v39 }
 0x970   :  { %13525 = vmatprep.mubr.msk.f32.mxu0 %vm14219_vm8, %v14220_v47  ;;  %13698 = vmatpush3.bf16.msra.mxu0 %v13697_v48  ;;  %v10331_v47 = vld [vmem:[%s18561_s15 + $0x18] sm:$0xff] }
 0x971   :  { %13699 = vmatprep.subr.bf16.mxu0 %v14218_v3  ;;  %v13700_v20 = vpack.c.bf16 %v10331_v47, %v10330_v38 }
 0x974   :  { %13701 = vmatpush3.bf16.msra.mxu0 %v13700_v20 }
 0x975   :  { %13702 = vmatprep.subr.bf16.mxu0 %v14218_v3 }
 0x978   :  { %13704 = vmatpush3.bf16.msra.mxu0 %v13703_v46 }
 0x979   :  { %13705 = vmatprep.subr.bf16.mxu0 %v14218_v3 }
 0x97c   :  { %13707 = vmatpush3.bf16.msra.mxu0 %v13706_v26 }
 0x9f6   :  { %v8821_v62 = vpop.f32.mrb[124].mxu1 }
 0x9f7   :  { %v13310_v32 = vpop.f32.mrb[125].mxu1 }
 0x9fa   :  { %v8748_v50 = vpop.f32.mrb[120].mxu0 }
 0x9fb   :  { %v8822_v39 = vadd.f32 %v8821_v62, %v8748_v50  ;;  %v13299_v17 = vpop.f32.mrb[121].mxu0 }
 0x9ff   :  { %v8986_v29 = vpop.f32.mrb[126].mxu1 }
 0xa00   :  { %v13332_v42 = vpop.f32.mrb[127].mxu1 }
 0xa02   :  { %v8903_v51 = vpop.f32.mrb[122].mxu0 }
 0xa03   :  { %v8907_v13 = vadd.f32 %v8903_v51, %v8822_v39  ;;  %v13321_v55 = vpop.f32.mrb[123].mxu0 }
 0xa05   :  { %v8990_v31 = vadd.f32 %v8986_v29, %v8907_v13 }
 0xa07   :  { %v9152_v5 = vpop.f32.mrb[128].mxu1 }
 0xa08   :  { %v13354_v9 = vpop.f32.mrb[129].mxu1 }
 0xa0a   :  { %v9069_v15 = vpop.f32.mrb[124].mxu0 }
 0xa0b   :  { %v9073_v12 = vadd.f32 %v9069_v15, %v8990_v31  ;;  %v13343_v6 = vpop.f32.mrb[125].mxu0 }
 0xa0d   :  { %v9156_v11 = vadd.f32 %v9152_v5, %v9073_v12 }
 0xa0f   :  { %v9318_v16 = vpop.f32.mrb[130].mxu1 }
 0xa10   :  { %v13376_v3 = vpop.f32.mrb[131].mxu1 }
 0xa12   :  { %v9235_v1 = vpop.f32.mrb[126].mxu0 }
 0xa13   :  { %v9239_v54 = vadd.f32 %v9235_v1, %v9156_v11  ;;  %v13365_v57 = vpop.f32.mrb[127].mxu0 }
 0xa15   :  { %v9322_v60 = vadd.f32 %v9318_v16, %v9239_v54 }
 0xa17   :  { %v9484_v0 = vpop.f32.mrb[132].mxu1 }
 0xa18   :  { %v13398_v61 = vpop.f32.mrb[133].mxu1 }
 0xa1a   :  { %v9401_v52 = vpop.f32.mrb[128].mxu0 }
 0xa1b   :  { %v9405_v22 = vadd.f32 %v9401_v52, %v9322_v60  ;;  %v13387_v8 = vpop.f32.mrb[129].mxu0 }
 0xa1d   :  { %v9488_v2 = vadd.f32 %v9484_v0, %v9405_v22 }
 0xa1f   :  { %v9650_v14 = vpop.f32.mrb[134].mxu1 }
 0xa20   :  { %v13420_v58 = vpop.f32.mrb[135].mxu1 }
 0xa22   :  { %v9567_v21 = vpop.f32.mrb[130].mxu0 }
 0xa23   :  { %v9571_v59 = vadd.f32 %v9567_v21, %v9488_v2  ;;  %v13409_v19 = vpop.f32.mrb[131].mxu0 }
 0xa25   :  { %v9654_v43 = vadd.f32 %v9650_v14, %v9571_v59 }
 0xa27   :  { %v9816_v41 = vpop.f32.mrb[136].mxu1 }
 0xa28   :  { %v13442_v24 = vpop.f32.mrb[137].mxu1 }
 0xa2a   :  { %v9733_v30 = vpop.f32.mrb[132].mxu0 }
 0xa2b   :  { %v9737_v56 = vadd.f32 %v9733_v30, %v9654_v43  ;;  %v13431_v27 = vpop.f32.mrb[133].mxu0 }
 0xa2d   :  { %v9820_v18 = vadd.f32 %v9816_v41, %v9737_v56 }
 0xa2f   :  { %v9982_v7 = vpop.f32.mrb[138].mxu1 }
 0xa30   :  { %v13464_v35 = vpop.f32.mrb[139].mxu1 }
 0xa32   :  { %v9899_v53 = vpop.f32.mrb[134].mxu0 }
 0xa33   :  { %v9903_v44 = vadd.f32 %v9899_v53, %v9820_v18  ;;  %v13453_v63 = vpop.f32.mrb[135].mxu0 }
 0xa35   :  { %v9986_v25 = vadd.f32 %v9982_v7, %v9903_v44 }
 0xa37   :  { %v10148_v28 = vpop.f32.mrb[140].mxu1 }
 0xa38   :  { %v13486_v33 = vpop.f32.mrb[141].mxu1 }
 0xa3a   :  { %v10065_v23 = vpop.f32.mrb[136].mxu0 }
 0xa3b   :  { %v10069_v4 = vadd.f32 %v10065_v23, %v9986_v25  ;;  %v13475_v36 = vpop.f32.mrb[137].mxu0 }
 0xa3d   :  { %v10152_v10 = vadd.f32 %v10148_v28, %v10069_v4 }
 0xa3f   :  { %v10314_v49 = vpop.f32.mrb[142].mxu1 }
 0xa40   :  { %v13508_v48 = vpop.f32.mrb[143].mxu1 }
 0xa42   :  { %v10231_v38 = vpop.f32.mrb[138].mxu0 }
 0xa43   :  { %v10235_v47 = vadd.f32 %v10231_v38, %v10152_v10  ;;  %v13497_v20 = vpop.f32.mrb[139].mxu0 }
 0xa45   :  { %v10318_v40 = vadd.f32 %v10314_v49, %v10235_v47 }
 0xa47   :  { %v10326_v37 = vadd.f32 %v11278_v45, %v10318_v40 }
 0xa49   :  { %v10327_v46 = vmax.f32 %v10326_v37, 0.0 }
 0xa4b   :  { %13526 = vmatmul.mubr.msk.f32.vlgmr.msra.gmra.mrb[140].mxu0 %vm10343_vm9, %v10327_v46 }
 0xb1e   :  { %v10413_v26 = vpop.f32.mrb[140].mxu0 }
 0xb1f   :  { %v10414_v62 = vadd.f32 %v11279_v34, %v10413_v26  ;;  %v13527_v32 = vpop.f32.mrb[141].mxu0 }
 0xb21   :  { %v10417_v50 = vmax.f32 %v10414_v62, 0.0 }
 0xb23   :  { %10419 = vst.msk [vmem:[#allocation2] sm:$0x3] %vm10418_vm10, %v10417_v50 }
 0xb24   :  { %14205 = shalt.err (!%p14202_p4)
}
 0xb25   :  { %s14206_s16 = scalar_lea.hbm %s18563_s17, 32 }
 0xb26   :  { %p14207_p5 = scmp.ne.s32.totalorder %s18563_s17, %s14206_s16  ;;  %p14210_p6 = scmp.lt.u32.totalorder %s14206_s16, %s18563_s17 }
 0xb28   :  { %p14212_p7 = pnand %p14210_p6, %p14207_p5 }
 0xb2a   :  { %14215 = shalt.err (!%p14212_p7)
}
 0xb2b   :  { %10429 = dma.vmem_to_hbm [thread:$0]  %s10427_s11, 32, %s18563_s17, [#allocation3]  }
 0xb2c   :  { %14216 = dma.done.wait [#allocation3], 32  }
 0xb2d   :  { %14217 = vsyncadd [#allocation3], 4294967264 }
 0xb2e   :  { %10433 = vsyncpa [#allocation3], 1 }

</bundles_post_ra>
